<compile_context>
chip_gen: v6e
topology: v6e:2x2x1
jax: 0.10.0
libtpu: 0.0.40
codegen_flags: <defaults>
</compile_context>

<pallas_src>
import jax
import jax.numpy as jnp
from jax.experimental import pallas as pl
from jax.experimental.pallas import tpu as pltpu

INPUT_SIZE = 354
F_PAD = 384            # 354 -> 3*128 (clean MXU K cadence)
HIDDEN_SIZE = 128
NUM_CLASSES = 6
OUT_PAD = 128          # 6 -> 128 lane-dense output store
FC1_SIZE = 64
BN_EPS = 1e-5


def _round_up(x, m):
    return (x + m - 1) // m * m


# ---------------------------------------------------------------------------
# Fused kernel
# ---------------------------------------------------------------------------
def lstm_model_kernel(
    x_ref,                                  # (T, TB, F_PAD) bf16, time-major tile
    wih0_ref, whh0_ref, b0_ref,             # layer 0: (F_PAD,4H) bf16, (H,4H) bf16, (1,4H) f32
    wcat1_ref, b1_ref,                      # layer 1: ([Wih1;Whh1]) (2H,4H) bf16, (1,4H) f32
    wa1_ref, ba1_ref, wa2_ref,              # attention: (H,H) bf16, (1,H) f32, (1,H) f32
    wf1_ref, bf1_ref,                       # fc1: (H,64) bf16, (1,64) f32
    wf2_ref, bf2_ref,                       # fc2 (BN folded): (64,OUT_PAD) bf16, (1,OUT_PAD) f32
    o_ref,                                  # (TB, OUT_PAD) f32
    gx_ref,                                 # scratch (T, TB, 4H) f32: layer-0 input projections
    h2_ref,                                 # scratch (T, TB, H) bf16: layer-1 hidden states
):
    f32 = jnp.float32
    bf16 = jnp.bfloat16
    T, TB, _ = x_ref.shape
    H = HIDDEN_SIZE

    # ---- layer-0 input projections: one big MXU stream (M = T*TB) -----------
    x_flat = x_ref[...].reshape(T * TB, F_PAD)                      # bf16, layout-free reshape
    gx = jnp.dot(x_flat, wih0_ref[...], preferred_element_type=f32) + b0_ref[...]
    gx_ref[...] = gx.reshape(T, TB, 4 * H)

    # Gate columns are permuted host-side to [i, f, o, g]: one sigmoid slab + one tanh.
    def gates_to_hc(gates, c):
        sig = 0.5 * (jnp.tanh(0.5 * gates[:, :3 * H]) + 1.0)        # i, f, o together
        i = sig[:, 0:H]
        f = sig[:, H:2 * H]
        o = sig[:, 2 * H:3 * H]
        g = jnp.tanh(gates[:, 3 * H:])
        c_new = f * c + i * g
        h_new = o * jnp.tanh(c_new)
        return h_new, c_new

    whh0 = whh0_ref[...]
    wcat1 = wcat1_ref[...]
    b1 = b1_ref[...]

    # ---- skewed two-layer recurrence (independent dots per wave) ------------
    h0 = jnp.zeros((TB, H), f32)
    c0 = jnp.zeros((TB, H), f32)
    h1 = jnp.zeros((TB, H), f32)
    c1 = jnp.zeros((TB, H), f32)
    h0_out = None                                                   # layer-0 output, bf16
    for s in range(T + 1):
        if s >= 1:
            # Layer-1 step s-1: merged input+recurrent projection, K = 2H = 256.
            hcat = jnp.concatenate([h0_out, h1.astype(bf16)], axis=-1)
            g1 = jnp.dot(hcat, wcat1, preferred_element_type=f32) + b1
            h1, c1 = gates_to_hc(g1, c1)
            h2_ref[s - 1] = h1.astype(bf16)
        if s < T:
            # Layer-0 step s (inter-layer dropout(0.3) is identity in eval mode).
            g0 = gx_ref[s] + jnp.dot(h0.astype(bf16), whh0, preferred_element_type=f32)
            h0, c0 = gates_to_hc(g0, c0)
            h0_out = h0.astype(bf16)

    # ---- attention pooling ---------------------------------------------------
    # One fused projection over the whole sequence; the H->1 bias is dropped
    # (softmax over t is shift-invariant, so it has no effect on the output).
    h2_flat = h2_ref[...].reshape(T * TB, H)
    att = jnp.tanh(jnp.dot(h2_flat, wa1_ref[...], preferred_element_type=f32)
                   + ba1_ref[...])                                  # (T*TB, H) f32
    wa2 = wa2_ref[...]                                              # (1, H)
    scores = jnp.concatenate(
        [jnp.sum(att[t * TB:(t + 1) * TB] * wa2, axis=-1, keepdims=True)
         for t in range(T)],
        axis=-1)                                                    # (TB, T) dense

    def softmax_lane(v):
        e = jnp.exp(v - jnp.max(v, axis=-1, keepdims=True))
        return e * pl.reciprocal(jnp.sum(e, axis=-1, keepdims=True), approx=True)

    w = softmax_lane(scores)      # nn.Softmax(dim=1) inside the attention Sequential
    w = softmax_lane(w)           # extra F.softmax(dim=1) in forward()

    attn = w[:, 0:1] * h2_ref[0]                                    # f32 accumulate
    for t in range(1, T):
        attn = attn + w[:, t:t + 1] * h2_ref[t]

    # ---- head: fc1 -> ReLU -> BN (folded into fc2) -> Dropout(eval) -> fc2 ---
    hfc = jnp.maximum(
        jnp.dot(attn.astype(bf16), wf1_ref[...], preferred_element_type=f32)
        + bf1_ref[...], 0.0)
    o_ref[...] = (jnp.dot(hfc.astype(bf16), wf2_ref[...], preferred_element_type=f32)
                  + bf2_ref[...])


# ---------------------------------------------------------------------------
# Parameter init (PyTorch layout) and host-side prep (transpose / pad / fold)
# ---------------------------------------------------------------------------
def init_params(key):
    H, F, C = HIDDEN_SIZE, INPUT_SIZE, NUM_CLASSES
    ks = jax.random.split(key, 20)
    kH = 1.0 / float(H) ** 0.5
    k64 = 1.0 / float(FC1_SIZE) ** 0.5

    def u(k, shape, s):
        return jax.random.uniform(k, shape, jnp.float32, -s, s)

    return {
        # nn.LSTM default init: U(-1/sqrt(H), 1/sqrt(H)).
        "w_ih_l0": u(ks[0], (4 * H, F), kH), "w_hh_l0": u(ks[1], (4 * H, H), kH),
        "b_ih_l0": u(ks[2], (4 * H,), kH),   "b_hh_l0": u(ks[3], (4 * H,), kH),
        "w_ih_l1": u(ks[4], (4 * H, H), kH), "w_hh_l1": u(ks[5], (4 * H, H), kH),
        "b_ih_l1": u(ks[6], (4 * H,), kH),   "b_hh_l1": u(ks[7], (4 * H,), kH),
        # attention: Linear(H,H), Tanh, Linear(H,1), Softmax(dim=1)
        "att_w1": u(ks[8], (H, H), kH),  "att_b1": u(ks[9], (H,), kH),
        "att_w2": u(ks[10], (1, H), kH), "att_b2": u(ks[11], (1,), kH),
        # fc1 / fc2
        "fc1_w": u(ks[12], (FC1_SIZE, H), kH), "fc1_b": u(ks[13], (FC1_SIZE,), kH),
        "fc2_w": u(ks[14], (C, FC1_SIZE), k64), "fc2_b": u(ks[15], (C,), k64),
        # BatchNorm1d(64) eval-mode running stats (non-trivial so the fold is exercised)
        "bn1_gamma": 1.0 + 0.1 * jax.random.normal(ks[16], (FC1_SIZE,), jnp.float32),
        "bn1_beta": 0.1 * jax.random.normal(ks[17], (FC1_SIZE,), jnp.float32),
        "bn1_mean": 0.1 * jax.random.normal(ks[18], (FC1_SIZE,), jnp.float32),
        "bn1_var": jax.random.uniform(ks[19], (FC1_SIZE,), jnp.float32, 0.5, 1.5),
    }


def _permute_gate_cols(w):
    """PyTorch gate order [i,f,g,o] -> [i,f,o,g] along the last axis."""
    H = HIDDEN_SIZE
    return jnp.concatenate([w[..., :2 * H], w[..., 3 * H:], w[..., 2 * H:3 * H]],
                           axis=-1)


def _prepare_kernel_params(p):
    H = HIDDEN_SIZE
    bf16 = jnp.bfloat16
    k = {}
    wih0 = jnp.pad(p["w_ih_l0"].T, ((0, F_PAD - INPUT_SIZE), (0, 0)))       # (384, 512)
    k["wih0"] = _permute_gate_cols(wih0).astype(bf16)
    k["whh0"] = _permute_gate_cols(p["w_hh_l0"].T).astype(bf16)             # (128, 512)
    k["b0"] = _permute_gate_cols(p["b_ih_l0"] + p["b_hh_l0"]).reshape(1, 4 * H)
    wcat1 = jnp.concatenate([p["w_ih_l1"].T, p["w_hh_l1"].T], axis=0)       # (256, 512)
    k["wcat1"] = _permute_gate_cols(wcat1).astype(bf16)
    k["b1"] = _permute_gate_cols(p["b_ih_l1"] + p["b_hh_l1"]).reshape(1, 4 * H)
    k["wa1"] = p["att_w1"].T.astype(bf16)                                   # (128, 128)
    k["ba1"] = p["att_b1"].reshape(1, H)
    k["wa2"] = p["att_w2"].reshape(1, H)     # att_b2 dropped: softmax shift-invariant
    k["wf1"] = p["fc1_w"].T.astype(bf16)                                    # (128, 64)
    k["bf1"] = p["fc1_b"].reshape(1, FC1_SIZE)
    # Fold eval-mode BatchNorm (z*s + t) into fc2: y = z @ (s[:,None]*W2^T) + (t@W2^T + b2)
    scale = p["bn1_gamma"] / jnp.sqrt(p["bn1_var"] + BN_EPS)
    shift = p["bn1_beta"] - p["bn1_mean"] * scale
    w2f = scale[:, None] * p["fc2_w"].T                                     # (64, 6)
    b2f = shift @ p["fc2_w"].T + p["fc2_b"]                                 # (6,)
    k["wf2"] = jnp.pad(w2f, ((0, 0), (0, OUT_PAD - NUM_CLASSES))).astype(bf16)
    k["bf2"] = jnp.pad(b2f, (0, OUT_PAD - NUM_CLASSES)).reshape(1, OUT_PAD)
    return k


_WEIGHT_ORDER = ("wih0", "whh0", "b0", "wcat1", "b1",
                 "wa1", "ba1", "wa2", "wf1", "bf1", "wf2", "bf2")


def _pick_tile_b(B):
    # Tiny batch: one 16-row tile (bf16 sublane packing wants multiples of 16).
    if B <= 16:
        return 16
    # Otherwise guarantee >= 2 tiles (both v7x TensorCores get work), cap at 256
    # which fills the 256-wide MXU M dimension on v6e/v7x and fits VMEM easily.
    return min(256, _round_up((B + 1) // 2, 16))


@jax.jit
def lstm_model_forward(x, params):
    B, T, F = x.shape
    assert F == INPUT_SIZE
    tile_b = _pick_tile_b(B)
    b_pad = _round_up(B, tile_b)

    # Single transpose + pad, shipped as bf16 (halves the per-tile x DMA).
    xt = jnp.transpose(x, (1, 0, 2)).astype(jnp.bfloat16)          # (T, B, F)
    xp = jnp.pad(xt, ((0, 0), (0, b_pad - B), (0, F_PAD - F)))

    kp = _prepare_kernel_params(params)
    w_args = [kp[name] for name in _WEIGHT_ORDER]

    def _resident(arr):   # whole-array block, constant index map -> stays in VMEM
        nd = arr.ndim
        return pl.BlockSpec(arr.shape, lambda i, _nd=nd: (0,) * _nd)

    out = pl.pallas_call(
        lstm_model_kernel,
        out_shape=jax.ShapeDtypeStruct((b_pad, OUT_PAD), jnp.float32),
        grid_spec=pltpu.PrefetchScalarGridSpec(
            num_scalar_prefetch=0,
            grid=(b_pad // tile_b,),
            in_specs=[pl.BlockSpec((T, tile_b, F_PAD), lambda i: (0, i, 0))]
                     + [_resident(a) for a in w_args],
            out_specs=pl.BlockSpec((tile_b, OUT_PAD), lambda i: (i, 0)),
            scratch_shapes=[
                pltpu.VMEM((T, tile_b, 4 * HIDDEN_SIZE), jnp.float32),  # gate pre-acts
                pltpu.VMEM((T, tile_b, HIDDEN_SIZE), jnp.bfloat16),     # layer-1 hiddens
            ],
        ),
        compiler_params=pltpu.CompilerParams(
            dimension_semantics=("parallel",),        # batch tiles shard across TCs
            vmem_limit_bytes=32 * 1024 * 1024,        # explicit headroom on all gens
        ),
    )(xp, *w_args)
    return out[:B, :NUM_CLASSES]


# ---------------------------------------------------------------------------
# Pure-JAX f32 reference (unfolded BN, explicit attention bias) for correctness
# ---------------------------------------------------------------------------
def _sigmoid(x):
    return 1.0 / (1.0 + jnp.exp(-x))


def lstm_model_ref(x, p):
    B, T, _ = x.shape
    H = HIDDEN_SIZE

    def lstm_layer(inp, w_ih, w_hh, b_ih, b_hh):
        def step(carry, x_t):
            h, c = carry
            gates = x_t @ w_ih.T + b_ih + h @ w_hh.T + b_hh
            i, f, g, o = jnp.split(gates, 4, axis=-1)
            i, f, o = _sigmoid(i), _sigmoid(f), _sigmoid(o)
            g = jnp.tanh(g)
            c = f * c + i * g
            h = o * jnp.tanh(c)
            return (h, c), h
        init = (jnp.zeros((B, H), jnp.float32), jnp.zeros((B, H), jnp.float32))
        _, hs = jax.lax.scan(step, init, jnp.swapaxes(inp, 0, 1))
        return jnp.swapaxes(hs, 0, 1)                       # (B, T, H)

    out1 = lstm_layer(x, p["w_ih_l0"], p["w_hh_l0"], p["b_ih_l0"], p["b_hh_l0"])
    out2 = lstm_layer(out1, p["w_ih_l1"], p["w_hh_l1"], p["b_ih_l1"], p["b_hh_l1"])

    a = jnp.tanh(out2 @ p["att_w1"].T + p["att_b1"])
    s = a @ p["att_w2"].T + p["att_b2"]                     # (B, T, 1)
    w = jax.nn.softmax(s, axis=1)                           # Softmax(dim=1) in Sequential
    w = jnp.squeeze(w, axis=2)
    w = jax.nn.softmax(w, axis=1)                           # extra F.softmax(dim=1)
    attn = jnp.einsum("bt,bth->bh", w, out2)

    h = jax.nn.relu(attn @ p["fc1_w"].T + p["fc1_b"])
    scale = p["bn1_gamma"] / jnp.sqrt(p["bn1_var"] + BN_EPS)
    h = (h - p["bn1_mean"]) * scale + p["bn1_beta"]
    return h @ p["fc2_w"].T + p["fc2_b"]


if __name__ == "__main__":
    key = jax.random.PRNGKey(0)
    k_param, k_x = jax.random.split(key)
    params = init_params(k_param)

    batch, seq_len = 4, 8
    x = jax.random.normal(k_x, (batch, seq_len, INPUT_SIZE), jnp.float32)

    out = jax.block_until_ready(lstm_model_forward(x, params))
    ref = lstm_model_ref(x, params)

    assert out.shape == (batch, NUM_CLASSES)
    assert bool(jnp.all(jnp.isfinite(out)))
    # bf16 MXU operands vs the f32 reference -> relaxed tolerance (per review).
    assert jnp.allclose(out, ref, atol=3e-2, rtol=3e-2), (
        "mismatch vs reference, max abs diff = "
        f"{float(jnp.max(jnp.abs(out - ref)))}")
    print("KERNEL_OK")
</pallas_src>

<mosaic_0001>
module attributes {stable_mosaic.version = 11 : i64} {
  func.func @lstm_model_kernel(%arg0: i32, %arg1: memref<8x16x384xbf16, #tpu.memory_space<vmem>>, %arg2: memref<384x512xbf16, #tpu.memory_space<vmem>>, %arg3: memref<128x512xbf16, #tpu.memory_space<vmem>>, %arg4: memref<1x512xf32, #tpu.memory_space<vmem>>, %arg5: memref<256x512xbf16, #tpu.memory_space<vmem>>, %arg6: memref<1x512xf32, #tpu.memory_space<vmem>>, %arg7: memref<128x128xbf16, #tpu.memory_space<vmem>>, %arg8: memref<1x128xf32, #tpu.memory_space<vmem>>, %arg9: memref<1x128xf32, #tpu.memory_space<vmem>>, %arg10: memref<128x64xbf16, #tpu.memory_space<vmem>>, %arg11: memref<1x64xf32, #tpu.memory_space<vmem>>, %arg12: memref<64x128xbf16, #tpu.memory_space<vmem>>, %arg13: memref<1x128xf32, #tpu.memory_space<vmem>>, %arg14: memref<16x128xf32, #tpu.memory_space<vmem>>, %arg15: memref<8x16x512xf32, #tpu.memory_space<vmem>>, %arg16: memref<8x16x128xbf16, #tpu.memory_space<vmem>>) attributes {dimension_semantics = [#tpu.dimension_semantics<parallel>], iteration_bounds = array<i64: 1>, scalar_prefetch = 0 : i64, scratch_operands = 2 : i64, tpu.core_type = #tpu.core_type<tc>, window_params = [{transform_indices = @transform_0, window_bounds = array<i64: 8, 16, 384>}, {pipeline_mode = #tpu.pipeline_mode<synchronous>, transform_indices = @transform_1, window_bounds = array<i64: 384, 512>}, {pipeline_mode = #tpu.pipeline_mode<synchronous>, transform_indices = @transform_2, window_bounds = array<i64: 128, 512>}, {pipeline_mode = #tpu.pipeline_mode<synchronous>, transform_indices = @transform_3, window_bounds = array<i64: 1, 512>}, {pipeline_mode = #tpu.pipeline_mode<synchronous>, transform_indices = @transform_4, window_bounds = array<i64: 256, 512>}, {pipeline_mode = #tpu.pipeline_mode<synchronous>, transform_indices = @transform_5, window_bounds = array<i64: 1, 512>}, {pipeline_mode = #tpu.pipeline_mode<synchronous>, transform_indices = @transform_6, window_bounds = array<i64: 128, 128>}, {pipeline_mode = #tpu.pipeline_mode<synchronous>, transform_indices = @transform_7, window_bounds = array<i64: 1, 128>}, {pipeline_mode = #tpu.pipeline_mode<synchronous>, transform_indices = @transform_8, window_bounds = array<i64: 1, 128>}, {pipeline_mode = #tpu.pipeline_mode<synchronous>, transform_indices = @transform_9, window_bounds = array<i64: 128, 64>}, {pipeline_mode = #tpu.pipeline_mode<synchronous>, transform_indices = @transform_10, window_bounds = array<i64: 1, 64>}, {pipeline_mode = #tpu.pipeline_mode<synchronous>, transform_indices = @transform_11, window_bounds = array<i64: 64, 128>}, {pipeline_mode = #tpu.pipeline_mode<synchronous>, transform_indices = @transform_12, window_bounds = array<i64: 1, 128>}, {transform_indices = @transform_13, window_bounds = array<i64: 16, 128>}]} {
    %c0 = arith.constant 0 : index
    %c0_0 = arith.constant 0 : index
    %c0_1 = arith.constant 0 : index
    %0 = vector.load %arg1[%c0, %c0_0, %c0_1] : memref<8x16x384xbf16, #tpu.memory_space<vmem>>, vector<8x16x384xbf16>
    %1 = vector.shape_cast %0 : vector<8x16x384xbf16> to vector<128x384xbf16>
    %c0_2 = arith.constant 0 : index
    %c0_3 = arith.constant 0 : index
    %2 = vector.load %arg2[%c0_2, %c0_3] : memref<384x512xbf16, #tpu.memory_space<vmem>>, vector<384x512xbf16>
    %cst = arith.constant dense<0.000000e+00> : vector<128x512xf32>
    %3 = tpu.matmul %1, %2, %cst {dimension_numbers = #tpu.dot_dimension_numbers<[1], [0], [0], [1], [0, 0, 1, 1], [], []>} : vector<128x384xbf16>, vector<384x512xbf16>, vector<128x512xf32> -> vector<128x512xf32>
    %c0_4 = arith.constant 0 : index
    %c0_5 = arith.constant 0 : index
    %4 = vector.load %arg4[%c0_4, %c0_5] : memref<1x512xf32, #tpu.memory_space<vmem>>, vector<1x512xf32>
    %5 = vector.broadcast %4 : vector<1x512xf32> to vector<128x512xf32>
    %6 = arith.addf %3, %5 : vector<128x512xf32>
    %7 = vector.shape_cast %6 : vector<128x512xf32> to vector<8x16x512xf32>
    %c0_6 = arith.constant 0 : index
    %c0_7 = arith.constant 0 : index
    %c0_8 = arith.constant 0 : index
    %8 = vector.load %arg15[%c0_6, %c0_7, %c0_8] : memref<8x16x512xf32, #tpu.memory_space<vmem>>, vector<8x16x512xf32>
    tpu.vector_store %arg15[%c0_6, %c0_7, %c0_8], %7 {strides = array<i32>} : memref<8x16x512xf32, #tpu.memory_space<vmem>>, vector<8x16x512xf32>,
    %c0_9 = arith.constant 0 : index
    %c0_10 = arith.constant 0 : index
    %9 = vector.load %arg3[%c0_9, %c0_10] : memref<128x512xbf16, #tpu.memory_space<vmem>>, vector<128x512xbf16>
    %c0_11 = arith.constant 0 : index
    %c0_12 = arith.constant 0 : index
    %10 = vector.load %arg5[%c0_11, %c0_12] : memref<256x512xbf16, #tpu.memory_space<vmem>>, vector<256x512xbf16>
    %c0_13 = arith.constant 0 : index
    %c0_14 = arith.constant 0 : index
    %11 = vector.load %arg6[%c0_13, %c0_14] : memref<1x512xf32, #tpu.memory_space<vmem>>, vector<1x512xf32>
    %cst_15 = arith.constant 0.000000e+00 : f32
    %12 = vector.broadcast %cst_15 : f32 to vector<16x128xf32>
    %cst_16 = arith.constant 0.000000e+00 : f32
    %13 = vector.broadcast %cst_16 : f32 to vector<16x128xf32>
    %cst_17 = arith.constant 0.000000e+00 : f32
    %14 = vector.broadcast %cst_17 : f32 to vector<16x128xf32>
    %cst_18 = arith.constant 0.000000e+00 : f32
    %15 = vector.broadcast %cst_18 : f32 to vector<16x128xf32>
    %c0_19 = arith.constant 0 : index
    %c0_20 = arith.constant 0 : index
    %c0_21 = arith.constant 0 : index
    %16 = vector.load %arg15[%c0_19, %c0_20, %c0_21] : memref<8x16x512xf32, #tpu.memory_space<vmem>>, vector<1x16x512xf32>
    %17 = vector.shape_cast %16 : vector<1x16x512xf32> to vector<16x512xf32>
    %18 = arith.truncf %12 : vector<16x128xf32> to vector<16x128xbf16>
    %cst_22 = arith.constant dense<0.000000e+00> : vector<16x512xf32>
    %19 = tpu.matmul %18, %9, %cst_22 {dimension_numbers = #tpu.dot_dimension_numbers<[1], [0], [0], [1], [0, 0, 1, 1], [], []>} : vector<16x128xbf16>, vector<128x512xbf16>, vector<16x512xf32> -> vector<16x512xf32>
    %20 = arith.addf %17, %19 : vector<16x512xf32>
    %21 = vector.extract_strided_slice %20 {offsets = [0, 0], sizes = [16, 384], strides = [1, 1]} : vector<16x512xf32> to vector<16x384xf32>
    %cst_23 = arith.constant 5.000000e-01 : f32
    %22 = vector.broadcast %cst_23 : f32 to vector<16x384xf32>
    %23 = arith.mulf %22, %21 : vector<16x384xf32>
    %24 = math.tanh %23 : vector<16x384xf32>
    %cst_24 = arith.constant 1.000000e+00 : f32
    %25 = vector.broadcast %cst_24 : f32 to vector<16x384xf32>
    %26 = arith.addf %24, %25 : vector<16x384xf32>
    %cst_25 = arith.constant 5.000000e-01 : f32
    %27 = vector.broadcast %cst_25 : f32 to vector<16x384xf32>
    %28 = arith.mulf %27, %26 : vector<16x384xf32>
    %29 = vector.extract_strided_slice %28 {offsets = [0, 0], sizes = [16, 128], strides = [1, 1]} : vector<16x384xf32> to vector<16x128xf32>
    %30 = vector.extract_strided_slice %28 {offsets = [0, 128], sizes = [16, 128], strides = [1, 1]} : vector<16x384xf32> to vector<16x128xf32>
    %31 = vector.extract_strided_slice %28 {offsets = [0, 256], sizes = [16, 128], strides = [1, 1]} : vector<16x384xf32> to vector<16x128xf32>
    %32 = vector.extract_strided_slice %20 {offsets = [0, 384], sizes = [16, 128], strides = [1, 1]} : vector<16x512xf32> to vector<16x128xf32>
    %33 = math.tanh %32 : vector<16x128xf32>
    %34 = arith.mulf %30, %13 : vector<16x128xf32>
    %35 = arith.mulf %29, %33 : vector<16x128xf32>
    %36 = arith.addf %34, %35 : vector<16x128xf32>
    %37 = math.tanh %36 : vector<16x128xf32>
    %38 = arith.mulf %31, %37 : vector<16x128xf32>
    %39 = arith.truncf %38 : vector<16x128xf32> to vector<16x128xbf16>
    %40 = arith.truncf %14 : vector<16x128xf32> to vector<16x128xbf16>
    %41 = tpu.concatenate %39, %40 in 1 : vector<16x128xbf16>, vector<16x128xbf16> -> vector<16x256xbf16>
    %cst_26 = arith.constant dense<0.000000e+00> : vector<16x512xf32>
    %42 = tpu.matmul %41, %10, %cst_26 {dimension_numbers = #tpu.dot_dimension_numbers<[1], [0], [0], [1], [0, 0, 1, 1], [], []>} : vector<16x256xbf16>, vector<256x512xbf16>, vector<16x512xf32> -> vector<16x512xf32>
    %43 = vector.broadcast %11 : vector<1x512xf32> to vector<16x512xf32>
    %44 = arith.addf %42, %43 : vector<16x512xf32>
    %45 = vector.extract_strided_slice %44 {offsets = [0, 0], sizes = [16, 384], strides = [1, 1]} : vector<16x512xf32> to vector<16x384xf32>
    %cst_27 = arith.constant 5.000000e-01 : f32
    %46 = vector.broadcast %cst_27 : f32 to vector<16x384xf32>
    %47 = arith.mulf %46, %45 : vector<16x384xf32>
    %48 = math.tanh %47 : vector<16x384xf32>
    %cst_28 = arith.constant 1.000000e+00 : f32
    %49 = vector.broadcast %cst_28 : f32 to vector<16x384xf32>
    %50 = arith.addf %48, %49 : vector<16x384xf32>
    %cst_29 = arith.constant 5.000000e-01 : f32
    %51 = vector.broadcast %cst_29 : f32 to vector<16x384xf32>
    %52 = arith.mulf %51, %50 : vector<16x384xf32>
    %53 = vector.extract_strided_slice %52 {offsets = [0, 0], sizes = [16, 128], strides = [1, 1]} : vector<16x384xf32> to vector<16x128xf32>
    %54 = vector.extract_strided_slice %52 {offsets = [0, 128], sizes = [16, 128], strides = [1, 1]} : vector<16x384xf32> to vector<16x128xf32>
    %55 = vector.extract_strided_slice %52 {offsets = [0, 256], sizes = [16, 128], strides = [1, 1]} : vector<16x384xf32> to vector<16x128xf32>
    %56 = vector.extract_strided_slice %44 {offsets = [0, 384], sizes = [16, 128], strides = [1, 1]} : vector<16x512xf32> to vector<16x128xf32>
    %57 = math.tanh %56 : vector<16x128xf32>
    %58 = arith.mulf %54, %15 : vector<16x128xf32>
    %59 = arith.mulf %53, %57 : vector<16x128xf32>
    %60 = arith.addf %58, %59 : vector<16x128xf32>
    %61 = math.tanh %60 : vector<16x128xf32>
    %62 = arith.mulf %55, %61 : vector<16x128xf32>
    %63 = arith.truncf %62 : vector<16x128xf32> to vector<16x128xbf16>
    %c0_30 = arith.constant 0 : index
    %c0_31 = arith.constant 0 : index
    %c0_32 = arith.constant 0 : index
    %64 = vector.load %arg16[%c0_30, %c0_31, %c0_32] : memref<8x16x128xbf16, #tpu.memory_space<vmem>>, vector<1x16x128xbf16>
    %65 = vector.shape_cast %64 : vector<1x16x128xbf16> to vector<16x128xbf16>
    %66 = vector.shape_cast %63 : vector<16x128xbf16> to vector<1x16x128xbf16>
    tpu.vector_store %arg16[%c0_30, %c0_31, %c0_32], %66 {strides = array<i32>} : memref<8x16x128xbf16, #tpu.memory_space<vmem>>, vector<1x16x128xbf16>,
    %c1 = arith.constant 1 : index
    %c0_33 = arith.constant 0 : index
    %c0_34 = arith.constant 0 : index
    %67 = vector.load %arg15[%c1, %c0_33, %c0_34] : memref<8x16x512xf32, #tpu.memory_space<vmem>>, vector<1x16x512xf32>
    %68 = vector.shape_cast %67 : vector<1x16x512xf32> to vector<16x512xf32>
    %69 = arith.truncf %38 : vector<16x128xf32> to vector<16x128xbf16>
    %cst_35 = arith.constant dense<0.000000e+00> : vector<16x512xf32>
    %70 = tpu.matmul %69, %9, %cst_35 {dimension_numbers = #tpu.dot_dimension_numbers<[1], [0], [0], [1], [0, 0, 1, 1], [], []>} : vector<16x128xbf16>, vector<128x512xbf16>, vector<16x512xf32> -> vector<16x512xf32>
    %71 = arith.addf %68, %70 : vector<16x512xf32>
    %72 = vector.extract_strided_slice %71 {offsets = [0, 0], sizes = [16, 384], strides = [1, 1]} : vector<16x512xf32> to vector<16x384xf32>
    %cst_36 = arith.constant 5.000000e-01 : f32
    %73 = vector.broadcast %cst_36 : f32 to vector<16x384xf32>
    %74 = arith.mulf %73, %72 : vector<16x384xf32>
    %75 = math.tanh %74 : vector<16x384xf32>
    %cst_37 = arith.constant 1.000000e+00 : f32
    %76 = vector.broadcast %cst_37 : f32 to vector<16x384xf32>
    %77 = arith.addf %75, %76 : vector<16x384xf32>
    %cst_38 = arith.constant 5.000000e-01 : f32
    %78 = vector.broadcast %cst_38 : f32 to vector<16x384xf32>
    %79 = arith.mulf %78, %77 : vector<16x384xf32>
    %80 = vector.extract_strided_slice %79 {offsets = [0, 0], sizes = [16, 128], strides = [1, 1]} : vector<16x384xf32> to vector<16x128xf32>
    %81 = vector.extract_strided_slice %79 {offsets = [0, 128], sizes = [16, 128], strides = [1, 1]} : vector<16x384xf32> to vector<16x128xf32>
    %82 = vector.extract_strided_slice %79 {offsets = [0, 256], sizes = [16, 128], strides = [1, 1]} : vector<16x384xf32> to vector<16x128xf32>
    %83 = vector.extract_strided_slice %71 {offsets = [0, 384], sizes = [16, 128], strides = [1, 1]} : vector<16x512xf32> to vector<16x128xf32>
    %84 = math.tanh %83 : vector<16x128xf32>
    %85 = arith.mulf %81, %36 : vector<16x128xf32>
    %86 = arith.mulf %80, %84 : vector<16x128xf32>
    %87 = arith.addf %85, %86 : vector<16x128xf32>
    %88 = math.tanh %87 : vector<16x128xf32>
    %89 = arith.mulf %82, %88 : vector<16x128xf32>
    %90 = arith.truncf %89 : vector<16x128xf32> to vector<16x128xbf16>
    %91 = arith.truncf %62 : vector<16x128xf32> to vector<16x128xbf16>
    %92 = tpu.concatenate %90, %91 in 1 : vector<16x128xbf16>, vector<16x128xbf16> -> vector<16x256xbf16>
    %cst_39 = arith.constant dense<0.000000e+00> : vector<16x512xf32>
    %93 = tpu.matmul %92, %10, %cst_39 {dimension_numbers = #tpu.dot_dimension_numbers<[1], [0], [0], [1], [0, 0, 1, 1], [], []>} : vector<16x256xbf16>, vector<256x512xbf16>, vector<16x512xf32> -> vector<16x512xf32>
    %94 = vector.broadcast %11 : vector<1x512xf32> to vector<16x512xf32>
    %95 = arith.addf %93, %94 : vector<16x512xf32>
    %96 = vector.extract_strided_slice %95 {offsets = [0, 0], sizes = [16, 384], strides = [1, 1]} : vector<16x512xf32> to vector<16x384xf32>
    %cst_40 = arith.constant 5.000000e-01 : f32
    %97 = vector.broadcast %cst_40 : f32 to vector<16x384xf32>
    %98 = arith.mulf %97, %96 : vector<16x384xf32>
    %99 = math.tanh %98 : vector<16x384xf32>
    %cst_41 = arith.constant 1.000000e+00 : f32
    %100 = vector.broadcast %cst_41 : f32 to vector<16x384xf32>
    %101 = arith.addf %99, %100 : vector<16x384xf32>
    %cst_42 = arith.constant 5.000000e-01 : f32
    %102 = vector.broadcast %cst_42 : f32 to vector<16x384xf32>
    %103 = arith.mulf %102, %101 : vector<16x384xf32>
    %104 = vector.extract_strided_slice %103 {offsets = [0, 0], sizes = [16, 128], strides = [1, 1]} : vector<16x384xf32> to vector<16x128xf32>
    %105 = vector.extract_strided_slice %103 {offsets = [0, 128], sizes = [16, 128], strides = [1, 1]} : vector<16x384xf32> to vector<16x128xf32>
    %106 = vector.extract_strided_slice %103 {offsets = [0, 256], sizes = [16, 128], strides = [1, 1]} : vector<16x384xf32> to vector<16x128xf32>
    %107 = vector.extract_strided_slice %95 {offsets = [0, 384], sizes = [16, 128], strides = [1, 1]} : vector<16x512xf32> to vector<16x128xf32>
    %108 = math.tanh %107 : vector<16x128xf32>
    %109 = arith.mulf %105, %60 : vector<16x128xf32>
    %110 = arith.mulf %104, %108 : vector<16x128xf32>
    %111 = arith.addf %109, %110 : vector<16x128xf32>
    %112 = math.tanh %111 : vector<16x128xf32>
    %113 = arith.mulf %106, %112 : vector<16x128xf32>
    %114 = arith.truncf %113 : vector<16x128xf32> to vector<16x128xbf16>
    %c1_43 = arith.constant 1 : index
    %c0_44 = arith.constant 0 : index
    %c0_45 = arith.constant 0 : index
    %115 = vector.load %arg16[%c1_43, %c0_44, %c0_45] : memref<8x16x128xbf16, #tpu.memory_space<vmem>>, vector<1x16x128xbf16>
    %116 = vector.shape_cast %115 : vector<1x16x128xbf16> to vector<16x128xbf16>
    %117 = vector.shape_cast %114 : vector<16x128xbf16> to vector<1x16x128xbf16>
    tpu.vector_store %arg16[%c1_43, %c0_44, %c0_45], %117 {strides = array<i32>} : memref<8x16x128xbf16, #tpu.memory_space<vmem>>, vector<1x16x128xbf16>,
    %c2 = arith.constant 2 : index
    %c0_46 = arith.constant 0 : index
    %c0_47 = arith.constant 0 : index
    %118 = vector.load %arg15[%c2, %c0_46, %c0_47] : memref<8x16x512xf32, #tpu.memory_space<vmem>>, vector<1x16x512xf32>
    %119 = vector.shape_cast %118 : vector<1x16x512xf32> to vector<16x512xf32>
    %120 = arith.truncf %89 : vector<16x128xf32> to vector<16x128xbf16>
    %cst_48 = arith.constant dense<0.000000e+00> : vector<16x512xf32>
    %121 = tpu.matmul %120, %9, %cst_48 {dimension_numbers = #tpu.dot_dimension_numbers<[1], [0], [0], [1], [0, 0, 1, 1], [], []>} : vector<16x128xbf16>, vector<128x512xbf16>, vector<16x512xf32> -> vector<16x512xf32>
    %122 = arith.addf %119, %121 : vector<16x512xf32>
    %123 = vector.extract_strided_slice %122 {offsets = [0, 0], sizes = [16, 384], strides = [1, 1]} : vector<16x512xf32> to vector<16x384xf32>
    %cst_49 = arith.constant 5.000000e-01 : f32
    %124 = vector.broadcast %cst_49 : f32 to vector<16x384xf32>
    %125 = arith.mulf %124, %123 : vector<16x384xf32>
    %126 = math.tanh %125 : vector<16x384xf32>
    %cst_50 = arith.constant 1.000000e+00 : f32
    %127 = vector.broadcast %cst_50 : f32 to vector<16x384xf32>
    %128 = arith.addf %126, %127 : vector<16x384xf32>
    %cst_51 = arith.constant 5.000000e-01 : f32
    %129 = vector.broadcast %cst_51 : f32 to vector<16x384xf32>
    %130 = arith.mulf %129, %128 : vector<16x384xf32>
    %131 = vector.extract_strided_slice %130 {offsets = [0, 0], sizes = [16, 128], strides = [1, 1]} : vector<16x384xf32> to vector<16x128xf32>
    %132 = vector.extract_strided_slice %130 {offsets = [0, 128], sizes = [16, 128], strides = [1, 1]} : vector<16x384xf32> to vector<16x128xf32>
    %133 = vector.extract_strided_slice %130 {offsets = [0, 256], sizes = [16, 128], strides = [1, 1]} : vector<16x384xf32> to vector<16x128xf32>
    %134 = vector.extract_strided_slice %122 {offsets = [0, 384], sizes = [16, 128], strides = [1, 1]} : vector<16x512xf32> to vector<16x128xf32>
    %135 = math.tanh %134 : vector<16x128xf32>
    %136 = arith.mulf %132, %87 : vector<16x128xf32>
    %137 = arith.mulf %131, %135 : vector<16x128xf32>
    %138 = arith.addf %136, %137 : vector<16x128xf32>
    %139 = math.tanh %138 : vector<16x128xf32>
    %140 = arith.mulf %133, %139 : vector<16x128xf32>
    %141 = arith.truncf %140 : vector<16x128xf32> to vector<16x128xbf16>
    %142 = arith.truncf %113 : vector<16x128xf32> to vector<16x128xbf16>
    %143 = tpu.concatenate %141, %142 in 1 : vector<16x128xbf16>, vector<16x128xbf16> -> vector<16x256xbf16>
    %cst_52 = arith.constant dense<0.000000e+00> : vector<16x512xf32>
    %144 = tpu.matmul %143, %10, %cst_52 {dimension_numbers = #tpu.dot_dimension_numbers<[1], [0], [0], [1], [0, 0, 1, 1], [], []>} : vector<16x256xbf16>, vector<256x512xbf16>, vector<16x512xf32> -> vector<16x512xf32>
    %145 = vector.broadcast %11 : vector<1x512xf32> to vector<16x512xf32>
    %146 = arith.addf %144, %145 : vector<16x512xf32>
    %147 = vector.extract_strided_slice %146 {offsets = [0, 0], sizes = [16, 384], strides = [1, 1]} : vector<16x512xf32> to vector<16x384xf32>
    %cst_53 = arith.constant 5.000000e-01 : f32
    %148 = vector.broadcast %cst_53 : f32 to vector<16x384xf32>
    %149 = arith.mulf %148, %147 : vector<16x384xf32>
    %150 = math.tanh %149 : vector<16x384xf32>
    %cst_54 = arith.constant 1.000000e+00 : f32
    %151 = vector.broadcast %cst_54 : f32 to vector<16x384xf32>
    %152 = arith.addf %150, %151 : vector<16x384xf32>
    %cst_55 = arith.constant 5.000000e-01 : f32
    %153 = vector.broadcast %cst_55 : f32 to vector<16x384xf32>
    %154 = arith.mulf %153, %152 : vector<16x384xf32>
    %155 = vector.extract_strided_slice %154 {offsets = [0, 0], sizes = [16, 128], strides = [1, 1]} : vector<16x384xf32> to vector<16x128xf32>
    %156 = vector.extract_strided_slice %154 {offsets = [0, 128], sizes = [16, 128], strides = [1, 1]} : vector<16x384xf32> to vector<16x128xf32>
    %157 = vector.extract_strided_slice %154 {offsets = [0, 256], sizes = [16, 128], strides = [1, 1]} : vector<16x384xf32> to vector<16x128xf32>
    %158 = vector.extract_strided_slice %146 {offsets = [0, 384], sizes = [16, 128], strides = [1, 1]} : vector<16x512xf32> to vector<16x128xf32>
    %159 = math.tanh %158 : vector<16x128xf32>
    %160 = arith.mulf %156, %111 : vector<16x128xf32>
    %161 = arith.mulf %155, %159 : vector<16x128xf32>
    %162 = arith.addf %160, %161 : vector<16x128xf32>
    %163 = math.tanh %162 : vector<16x128xf32>
    %164 = arith.mulf %157, %163 : vector<16x128xf32>
    %165 = arith.truncf %164 : vector<16x128xf32> to vector<16x128xbf16>
    %c2_56 = arith.constant 2 : index
    %c0_57 = arith.constant 0 : index
    %c0_58 = arith.constant 0 : index
    %166 = vector.load %arg16[%c2_56, %c0_57, %c0_58] : memref<8x16x128xbf16, #tpu.memory_space<vmem>>, vector<1x16x128xbf16>
    %167 = vector.shape_cast %166 : vector<1x16x128xbf16> to vector<16x128xbf16>
    %168 = vector.shape_cast %165 : vector<16x128xbf16> to vector<1x16x128xbf16>
    tpu.vector_store %arg16[%c2_56, %c0_57, %c0_58], %168 {strides = array<i32>} : memref<8x16x128xbf16, #tpu.memory_space<vmem>>, vector<1x16x128xbf16>,
    %c3 = arith.constant 3 : index
    %c0_59 = arith.constant 0 : index
    %c0_60 = arith.constant 0 : index
    %169 = vector.load %arg15[%c3, %c0_59, %c0_60] : memref<8x16x512xf32, #tpu.memory_space<vmem>>, vector<1x16x512xf32>
    %170 = vector.shape_cast %169 : vector<1x16x512xf32> to vector<16x512xf32>
    %171 = arith.truncf %140 : vector<16x128xf32> to vector<16x128xbf16>
    %cst_61 = arith.constant dense<0.000000e+00> : vector<16x512xf32>
    %172 = tpu.matmul %171, %9, %cst_61 {dimension_numbers = #tpu.dot_dimension_numbers<[1], [0], [0], [1], [0, 0, 1, 1], [], []>} : vector<16x128xbf16>, vector<128x512xbf16>, vector<16x512xf32> -> vector<16x512xf32>
    %173 = arith.addf %170, %172 : vector<16x512xf32>
    %174 = vector.extract_strided_slice %173 {offsets = [0, 0], sizes = [16, 384], strides = [1, 1]} : vector<16x512xf32> to vector<16x384xf32>
    %cst_62 = arith.constant 5.000000e-01 : f32
    %175 = vector.broadcast %cst_62 : f32 to vector<16x384xf32>
    %176 = arith.mulf %175, %174 : vector<16x384xf32>
    %177 = math.tanh %176 : vector<16x384xf32>
    %cst_63 = arith.constant 1.000000e+00 : f32
    %178 = vector.broadcast %cst_63 : f32 to vector<16x384xf32>
    %179 = arith.addf %177, %178 : vector<16x384xf32>
    %cst_64 = arith.constant 5.000000e-01 : f32
    %180 = vector.broadcast %cst_64 : f32 to vector<16x384xf32>
    %181 = arith.mulf %180, %179 : vector<16x384xf32>
    %182 = vector.extract_strided_slice %181 {offsets = [0, 0], sizes = [16, 128], strides = [1, 1]} : vector<16x384xf32> to vector<16x128xf32>
    %183 = vector.extract_strided_slice %181 {offsets = [0, 128], sizes = [16, 128], strides = [1, 1]} : vector<16x384xf32> to vector<16x128xf32>
    %184 = vector.extract_strided_slice %181 {offsets = [0, 256], sizes = [16, 128], strides = [1, 1]} : vector<16x384xf32> to vector<16x128xf32>
    %185 = vector.extract_strided_slice %173 {offsets = [0, 384], sizes = [16, 128], strides = [1, 1]} : vector<16x512xf32> to vector<16x128xf32>
    %186 = math.tanh %185 : vector<16x128xf32>
    %187 = arith.mulf %183, %138 : vector<16x128xf32>
    %188 = arith.mulf %182, %186 : vector<16x128xf32>
    %189 = arith.addf %187, %188 : vector<16x128xf32>
    %190 = math.tanh %189 : vector<16x128xf32>
    %191 = arith.mulf %184, %190 : vector<16x128xf32>
    %192 = arith.truncf %191 : vector<16x128xf32> to vector<16x128xbf16>
    %193 = arith.truncf %164 : vector<16x128xf32> to vector<16x128xbf16>
    %194 = tpu.concatenate %192, %193 in 1 : vector<16x128xbf16>, vector<16x128xbf16> -> vector<16x256xbf16>
    %cst_65 = arith.constant dense<0.000000e+00> : vector<16x512xf32>
    %195 = tpu.matmul %194, %10, %cst_65 {dimension_numbers = #tpu.dot_dimension_numbers<[1], [0], [0], [1], [0, 0, 1, 1], [], []>} : vector<16x256xbf16>, vector<256x512xbf16>, vector<16x512xf32> -> vector<16x512xf32>
    %196 = vector.broadcast %11 : vector<1x512xf32> to vector<16x512xf32>
    %197 = arith.addf %195, %196 : vector<16x512xf32>
    %198 = vector.extract_strided_slice %197 {offsets = [0, 0], sizes = [16, 384], strides = [1, 1]} : vector<16x512xf32> to vector<16x384xf32>
    %cst_66 = arith.constant 5.000000e-01 : f32
    %199 = vector.broadcast %cst_66 : f32 to vector<16x384xf32>
    %200 = arith.mulf %199, %198 : vector<16x384xf32>
    %201 = math.tanh %200 : vector<16x384xf32>
    %cst_67 = arith.constant 1.000000e+00 : f32
    %202 = vector.broadcast %cst_67 : f32 to vector<16x384xf32>
    %203 = arith.addf %201, %202 : vector<16x384xf32>
    %cst_68 = arith.constant 5.000000e-01 : f32
    %204 = vector.broadcast %cst_68 : f32 to vector<16x384xf32>
    %205 = arith.mulf %204, %203 : vector<16x384xf32>
    %206 = vector.extract_strided_slice %205 {offsets = [0, 0], sizes = [16, 128], strides = [1, 1]} : vector<16x384xf32> to vector<16x128xf32>
    %207 = vector.extract_strided_slice %205 {offsets = [0, 128], sizes = [16, 128], strides = [1, 1]} : vector<16x384xf32> to vector<16x128xf32>
    %208 = vector.extract_strided_slice %205 {offsets = [0, 256], sizes = [16, 128], strides = [1, 1]} : vector<16x384xf32> to vector<16x128xf32>
    %209 = vector.extract_strided_slice %197 {offsets = [0, 384], sizes = [16, 128], strides = [1, 1]} : vector<16x512xf32> to vector<16x128xf32>
    %210 = math.tanh %209 : vector<16x128xf32>
    %211 = arith.mulf %207, %162 : vector<16x128xf32>
    %212 = arith.mulf %206, %210 : vector<16x128xf32>
    %213 = arith.addf %211, %212 : vector<16x128xf32>
    %214 = math.tanh %213 : vector<16x128xf32>
    %215 = arith.mulf %208, %214 : vector<16x128xf32>
    %216 = arith.truncf %215 : vector<16x128xf32> to vector<16x128xbf16>
    %c3_69 = arith.constant 3 : index
    %c0_70 = arith.constant 0 : index
    %c0_71 = arith.constant 0 : index
    %217 = vector.load %arg16[%c3_69, %c0_70, %c0_71] : memref<8x16x128xbf16, #tpu.memory_space<vmem>>, vector<1x16x128xbf16>
    %218 = vector.shape_cast %217 : vector<1x16x128xbf16> to vector<16x128xbf16>
    %219 = vector.shape_cast %216 : vector<16x128xbf16> to vector<1x16x128xbf16>
    tpu.vector_store %arg16[%c3_69, %c0_70, %c0_71], %219 {strides = array<i32>} : memref<8x16x128xbf16, #tpu.memory_space<vmem>>, vector<1x16x128xbf16>,
    %c4 = arith.constant 4 : index
    %c0_72 = arith.constant 0 : index
    %c0_73 = arith.constant 0 : index
    %220 = vector.load %arg15[%c4, %c0_72, %c0_73] : memref<8x16x512xf32, #tpu.memory_space<vmem>>, vector<1x16x512xf32>
    %221 = vector.shape_cast %220 : vector<1x16x512xf32> to vector<16x512xf32>
    %222 = arith.truncf %191 : vector<16x128xf32> to vector<16x128xbf16>
    %cst_74 = arith.constant dense<0.000000e+00> : vector<16x512xf32>
    %223 = tpu.matmul %222, %9, %cst_74 {dimension_numbers = #tpu.dot_dimension_numbers<[1], [0], [0], [1], [0, 0, 1, 1], [], []>} : vector<16x128xbf16>, vector<128x512xbf16>, vector<16x512xf32> -> vector<16x512xf32>
    %224 = arith.addf %221, %223 : vector<16x512xf32>
    %225 = vector.extract_strided_slice %224 {offsets = [0, 0], sizes = [16, 384], strides = [1, 1]} : vector<16x512xf32> to vector<16x384xf32>
    %cst_75 = arith.constant 5.000000e-01 : f32
    %226 = vector.broadcast %cst_75 : f32 to vector<16x384xf32>
    %227 = arith.mulf %226, %225 : vector<16x384xf32>
    %228 = math.tanh %227 : vector<16x384xf32>
    %cst_76 = arith.constant 1.000000e+00 : f32
    %229 = vector.broadcast %cst_76 : f32 to vector<16x384xf32>
    %230 = arith.addf %228, %229 : vector<16x384xf32>
    %cst_77 = arith.constant 5.000000e-01 : f32
    %231 = vector.broadcast %cst_77 : f32 to vector<16x384xf32>
    %232 = arith.mulf %231, %230 : vector<16x384xf32>
    %233 = vector.extract_strided_slice %232 {offsets = [0, 0], sizes = [16, 128], strides = [1, 1]} : vector<16x384xf32> to vector<16x128xf32>
    %234 = vector.extract_strided_slice %232 {offsets = [0, 128], sizes = [16, 128], strides = [1, 1]} : vector<16x384xf32> to vector<16x128xf32>
    %235 = vector.extract_strided_slice %232 {offsets = [0, 256], sizes = [16, 128], strides = [1, 1]} : vector<16x384xf32> to vector<16x128xf32>
    %236 = vector.extract_strided_slice %224 {offsets = [0, 384], sizes = [16, 128], strides = [1, 1]} : vector<16x512xf32> to vector<16x128xf32>
    %237 = math.tanh %236 : vector<16x128xf32>
    %238 = arith.mulf %234, %189 : vector<16x128xf32>
    %239 = arith.mulf %233, %237 : vector<16x128xf32>
    %240 = arith.addf %238, %239 : vector<16x128xf32>
    %241 = math.tanh %240 : vector<16x128xf32>
    %242 = arith.mulf %235, %241 : vector<16x128xf32>
    %243 = arith.truncf %242 : vector<16x128xf32> to vector<16x128xbf16>
    %244 = arith.truncf %215 : vector<16x128xf32> to vector<16x128xbf16>
    %245 = tpu.concatenate %243, %244 in 1 : vector<16x128xbf16>, vector<16x128xbf16> -> vector<16x256xbf16>
    %cst_78 = arith.constant dense<0.000000e+00> : vector<16x512xf32>
    %246 = tpu.matmul %245, %10, %cst_78 {dimension_numbers = #tpu.dot_dimension_numbers<[1], [0], [0], [1], [0, 0, 1, 1], [], []>} : vector<16x256xbf16>, vector<256x512xbf16>, vector<16x512xf32> -> vector<16x512xf32>
    %247 = vector.broadcast %11 : vector<1x512xf32> to vector<16x512xf32>
    %248 = arith.addf %246, %247 : vector<16x512xf32>
    %249 = vector.extract_strided_slice %248 {offsets = [0, 0], sizes = [16, 384], strides = [1, 1]} : vector<16x512xf32> to vector<16x384xf32>
    %cst_79 = arith.constant 5.000000e-01 : f32
    %250 = vector.broadcast %cst_79 : f32 to vector<16x384xf32>
    %251 = arith.mulf %250, %249 : vector<16x384xf32>
    %252 = math.tanh %251 : vector<16x384xf32>
    %cst_80 = arith.constant 1.000000e+00 : f32
    %253 = vector.broadcast %cst_80 : f32 to vector<16x384xf32>
    %254 = arith.addf %252, %253 : vector<16x384xf32>
    %cst_81 = arith.constant 5.000000e-01 : f32
    %255 = vector.broadcast %cst_81 : f32 to vector<16x384xf32>
    %256 = arith.mulf %255, %254 : vector<16x384xf32>
    %257 = vector.extract_strided_slice %256 {offsets = [0, 0], sizes = [16, 128], strides = [1, 1]} : vector<16x384xf32> to vector<16x128xf32>
    %258 = vector.extract_strided_slice %256 {offsets = [0, 128], sizes = [16, 128], strides = [1, 1]} : vector<16x384xf32> to vector<16x128xf32>
    %259 = vector.extract_strided_slice %256 {offsets = [0, 256], sizes = [16, 128], strides = [1, 1]} : vector<16x384xf32> to vector<16x128xf32>
    %260 = vector.extract_strided_slice %248 {offsets = [0, 384], sizes = [16, 128], strides = [1, 1]} : vector<16x512xf32> to vector<16x128xf32>
    %261 = math.tanh %260 : vector<16x128xf32>
    %262 = arith.mulf %258, %213 : vector<16x128xf32>
    %263 = arith.mulf %257, %261 : vector<16x128xf32>
    %264 = arith.addf %262, %263 : vector<16x128xf32>
    %265 = math.tanh %264 : vector<16x128xf32>
    %266 = arith.mulf %259, %265 : vector<16x128xf32>
    %267 = arith.truncf %266 : vector<16x128xf32> to vector<16x128xbf16>
    %c4_82 = arith.constant 4 : index
    %c0_83 = arith.constant 0 : index
    %c0_84 = arith.constant 0 : index
    %268 = vector.load %arg16[%c4_82, %c0_83, %c0_84] : memref<8x16x128xbf16, #tpu.memory_space<vmem>>, vector<1x16x128xbf16>
    %269 = vector.shape_cast %268 : vector<1x16x128xbf16> to vector<16x128xbf16>
    %270 = vector.shape_cast %267 : vector<16x128xbf16> to vector<1x16x128xbf16>
    tpu.vector_store %arg16[%c4_82, %c0_83, %c0_84], %270 {strides = array<i32>} : memref<8x16x128xbf16, #tpu.memory_space<vmem>>, vector<1x16x128xbf16>,
    %c5 = arith.constant 5 : index
    %c0_85 = arith.constant 0 : index
    %c0_86 = arith.constant 0 : index
    %271 = vector.load %arg15[%c5, %c0_85, %c0_86] : memref<8x16x512xf32, #tpu.memory_space<vmem>>, vector<1x16x512xf32>
    %272 = vector.shape_cast %271 : vector<1x16x512xf32> to vector<16x512xf32>
    %273 = arith.truncf %242 : vector<16x128xf32> to vector<16x128xbf16>
    %cst_87 = arith.constant dense<0.000000e+00> : vector<16x512xf32>
    %274 = tpu.matmul %273, %9, %cst_87 {dimension_numbers = #tpu.dot_dimension_numbers<[1], [0], [0], [1], [0, 0, 1, 1], [], []>} : vector<16x128xbf16>, vector<128x512xbf16>, vector<16x512xf32> -> vector<16x512xf32>
    %275 = arith.addf %272, %274 : vector<16x512xf32>
    %276 = vector.extract_strided_slice %275 {offsets = [0, 0], sizes = [16, 384], strides = [1, 1]} : vector<16x512xf32> to vector<16x384xf32>
    %cst_88 = arith.constant 5.000000e-01 : f32
    %277 = vector.broadcast %cst_88 : f32 to vector<16x384xf32>
    %278 = arith.mulf %277, %276 : vector<16x384xf32>
    %279 = math.tanh %278 : vector<16x384xf32>
    %cst_89 = arith.constant 1.000000e+00 : f32
    %280 = vector.broadcast %cst_89 : f32 to vector<16x384xf32>
    %281 = arith.addf %279, %280 : vector<16x384xf32>
    %cst_90 = arith.constant 5.000000e-01 : f32
    %282 = vector.broadcast %cst_90 : f32 to vector<16x384xf32>
    %283 = arith.mulf %282, %281 : vector<16x384xf32>
    %284 = vector.extract_strided_slice %283 {offsets = [0, 0], sizes = [16, 128], strides = [1, 1]} : vector<16x384xf32> to vector<16x128xf32>
    %285 = vector.extract_strided_slice %283 {offsets = [0, 128], sizes = [16, 128], strides = [1, 1]} : vector<16x384xf32> to vector<16x128xf32>
    %286 = vector.extract_strided_slice %283 {offsets = [0, 256], sizes = [16, 128], strides = [1, 1]} : vector<16x384xf32> to vector<16x128xf32>
    %287 = vector.extract_strided_slice %275 {offsets = [0, 384], sizes = [16, 128], strides = [1, 1]} : vector<16x512xf32> to vector<16x128xf32>
    %288 = math.tanh %287 : vector<16x128xf32>
    %289 = arith.mulf %285, %240 : vector<16x128xf32>
    %290 = arith.mulf %284, %288 : vector<16x128xf32>
    %291 = arith.addf %289, %290 : vector<16x128xf32>
    %292 = math.tanh %291 : vector<16x128xf32>
    %293 = arith.mulf %286, %292 : vector<16x128xf32>
    %294 = arith.truncf %293 : vector<16x128xf32> to vector<16x128xbf16>
    %295 = arith.truncf %266 : vector<16x128xf32> to vector<16x128xbf16>
    %296 = tpu.concatenate %294, %295 in 1 : vector<16x128xbf16>, vector<16x128xbf16> -> vector<16x256xbf16>
    %cst_91 = arith.constant dense<0.000000e+00> : vector<16x512xf32>
    %297 = tpu.matmul %296, %10, %cst_91 {dimension_numbers = #tpu.dot_dimension_numbers<[1], [0], [0], [1], [0, 0, 1, 1], [], []>} : vector<16x256xbf16>, vector<256x512xbf16>, vector<16x512xf32> -> vector<16x512xf32>
    %298 = vector.broadcast %11 : vector<1x512xf32> to vector<16x512xf32>
    %299 = arith.addf %297, %298 : vector<16x512xf32>
    %300 = vector.extract_strided_slice %299 {offsets = [0, 0], sizes = [16, 384], strides = [1, 1]} : vector<16x512xf32> to vector<16x384xf32>
    %cst_92 = arith.constant 5.000000e-01 : f32
    %301 = vector.broadcast %cst_92 : f32 to vector<16x384xf32>
    %302 = arith.mulf %301, %300 : vector<16x384xf32>
    %303 = math.tanh %302 : vector<16x384xf32>
    %cst_93 = arith.constant 1.000000e+00 : f32
    %304 = vector.broadcast %cst_93 : f32 to vector<16x384xf32>
    %305 = arith.addf %303, %304 : vector<16x384xf32>
    %cst_94 = arith.constant 5.000000e-01 : f32
    %306 = vector.broadcast %cst_94 : f32 to vector<16x384xf32>
    %307 = arith.mulf %306, %305 : vector<16x384xf32>
    %308 = vector.extract_strided_slice %307 {offsets = [0, 0], sizes = [16, 128], strides = [1, 1]} : vector<16x384xf32> to vector<16x128xf32>
    %309 = vector.extract_strided_slice %307 {offsets = [0, 128], sizes = [16, 128], strides = [1, 1]} : vector<16x384xf32> to vector<16x128xf32>
    %310 = vector.extract_strided_slice %307 {offsets = [0, 256], sizes = [16, 128], strides = [1, 1]} : vector<16x384xf32> to vector<16x128xf32>
    %311 = vector.extract_strided_slice %299 {offsets = [0, 384], sizes = [16, 128], strides = [1, 1]} : vector<16x512xf32> to vector<16x128xf32>
    %312 = math.tanh %311 : vector<16x128xf32>
    %313 = arith.mulf %309, %264 : vector<16x128xf32>
    %314 = arith.mulf %308, %312 : vector<16x128xf32>
    %315 = arith.addf %313, %314 : vector<16x128xf32>
    %316 = math.tanh %315 : vector<16x128xf32>
    %317 = arith.mulf %310, %316 : vector<16x128xf32>
    %318 = arith.truncf %317 : vector<16x128xf32> to vector<16x128xbf16>
    %c5_95 = arith.constant 5 : index
    %c0_96 = arith.constant 0 : index
    %c0_97 = arith.constant 0 : index
    %319 = vector.load %arg16[%c5_95, %c0_96, %c0_97] : memref<8x16x128xbf16, #tpu.memory_space<vmem>>, vector<1x16x128xbf16>
    %320 = vector.shape_cast %319 : vector<1x16x128xbf16> to vector<16x128xbf16>
    %321 = vector.shape_cast %318 : vector<16x128xbf16> to vector<1x16x128xbf16>
    tpu.vector_store %arg16[%c5_95, %c0_96, %c0_97], %321 {strides = array<i32>} : memref<8x16x128xbf16, #tpu.memory_space<vmem>>, vector<1x16x128xbf16>,
    %c6 = arith.constant 6 : index
    %c0_98 = arith.constant 0 : index
    %c0_99 = arith.constant 0 : index
    %322 = vector.load %arg15[%c6, %c0_98, %c0_99] : memref<8x16x512xf32, #tpu.memory_space<vmem>>, vector<1x16x512xf32>
    %323 = vector.shape_cast %322 : vector<1x16x512xf32> to vector<16x512xf32>
    %324 = arith.truncf %293 : vector<16x128xf32> to vector<16x128xbf16>
    %cst_100 = arith.constant dense<0.000000e+00> : vector<16x512xf32>
    %325 = tpu.matmul %324, %9, %cst_100 {dimension_numbers = #tpu.dot_dimension_numbers<[1], [0], [0], [1], [0, 0, 1, 1], [], []>} : vector<16x128xbf16>, vector<128x512xbf16>, vector<16x512xf32> -> vector<16x512xf32>
    %326 = arith.addf %323, %325 : vector<16x512xf32>
    %327 = vector.extract_strided_slice %326 {offsets = [0, 0], sizes = [16, 384], strides = [1, 1]} : vector<16x512xf32> to vector<16x384xf32>
    %cst_101 = arith.constant 5.000000e-01 : f32
    %328 = vector.broadcast %cst_101 : f32 to vector<16x384xf32>
    %329 = arith.mulf %328, %327 : vector<16x384xf32>
    %330 = math.tanh %329 : vector<16x384xf32>
    %cst_102 = arith.constant 1.000000e+00 : f32
    %331 = vector.broadcast %cst_102 : f32 to vector<16x384xf32>
    %332 = arith.addf %330, %331 : vector<16x384xf32>
    %cst_103 = arith.constant 5.000000e-01 : f32
    %333 = vector.broadcast %cst_103 : f32 to vector<16x384xf32>
    %334 = arith.mulf %333, %332 : vector<16x384xf32>
    %335 = vector.extract_strided_slice %334 {offsets = [0, 0], sizes = [16, 128], strides = [1, 1]} : vector<16x384xf32> to vector<16x128xf32>
    %336 = vector.extract_strided_slice %334 {offsets = [0, 128], sizes = [16, 128], strides = [1, 1]} : vector<16x384xf32> to vector<16x128xf32>
    %337 = vector.extract_strided_slice %334 {offsets = [0, 256], sizes = [16, 128], strides = [1, 1]} : vector<16x384xf32> to vector<16x128xf32>
    %338 = vector.extract_strided_slice %326 {offsets = [0, 384], sizes = [16, 128], strides = [1, 1]} : vector<16x512xf32> to vector<16x128xf32>
    %339 = math.tanh %338 : vector<16x128xf32>
    %340 = arith.mulf %336, %291 : vector<16x128xf32>
    %341 = arith.mulf %335, %339 : vector<16x128xf32>
    %342 = arith.addf %340, %341 : vector<16x128xf32>
    %343 = math.tanh %342 : vector<16x128xf32>
    %344 = arith.mulf %337, %343 : vector<16x128xf32>
    %345 = arith.truncf %344 : vector<16x128xf32> to vector<16x128xbf16>
    %346 = arith.truncf %317 : vector<16x128xf32> to vector<16x128xbf16>
    %347 = tpu.concatenate %345, %346 in 1 : vector<16x128xbf16>, vector<16x128xbf16> -> vector<16x256xbf16>
    %cst_104 = arith.constant dense<0.000000e+00> : vector<16x512xf32>
    %348 = tpu.matmul %347, %10, %cst_104 {dimension_numbers = #tpu.dot_dimension_numbers<[1], [0], [0], [1], [0, 0, 1, 1], [], []>} : vector<16x256xbf16>, vector<256x512xbf16>, vector<16x512xf32> -> vector<16x512xf32>
    %349 = vector.broadcast %11 : vector<1x512xf32> to vector<16x512xf32>
    %350 = arith.addf %348, %349 : vector<16x512xf32>
    %351 = vector.extract_strided_slice %350 {offsets = [0, 0], sizes = [16, 384], strides = [1, 1]} : vector<16x512xf32> to vector<16x384xf32>
    %cst_105 = arith.constant 5.000000e-01 : f32
    %352 = vector.broadcast %cst_105 : f32 to vector<16x384xf32>
    %353 = arith.mulf %352, %351 : vector<16x384xf32>
    %354 = math.tanh %353 : vector<16x384xf32>
    %cst_106 = arith.constant 1.000000e+00 : f32
    %355 = vector.broadcast %cst_106 : f32 to vector<16x384xf32>
    %356 = arith.addf %354, %355 : vector<16x384xf32>
    %cst_107 = arith.constant 5.000000e-01 : f32
    %357 = vector.broadcast %cst_107 : f32 to vector<16x384xf32>
    %358 = arith.mulf %357, %356 : vector<16x384xf32>
    %359 = vector.extract_strided_slice %358 {offsets = [0, 0], sizes = [16, 128], strides = [1, 1]} : vector<16x384xf32> to vector<16x128xf32>
    %360 = vector.extract_strided_slice %358 {offsets = [0, 128], sizes = [16, 128], strides = [1, 1]} : vector<16x384xf32> to vector<16x128xf32>
    %361 = vector.extract_strided_slice %358 {offsets = [0, 256], sizes = [16, 128], strides = [1, 1]} : vector<16x384xf32> to vector<16x128xf32>
    %362 = vector.extract_strided_slice %350 {offsets = [0, 384], sizes = [16, 128], strides = [1, 1]} : vector<16x512xf32> to vector<16x128xf32>
    %363 = math.tanh %362 : vector<16x128xf32>
    %364 = arith.mulf %360, %315 : vector<16x128xf32>
    %365 = arith.mulf %359, %363 : vector<16x128xf32>
    %366 = arith.addf %364, %365 : vector<16x128xf32>
    %367 = math.tanh %366 : vector<16x128xf32>
    %368 = arith.mulf %361, %367 : vector<16x128xf32>
    %369 = arith.truncf %368 : vector<16x128xf32> to vector<16x128xbf16>
    %c6_108 = arith.constant 6 : index
    %c0_109 = arith.constant 0 : index
    %c0_110 = arith.constant 0 : index
    %370 = vector.load %arg16[%c6_108, %c0_109, %c0_110] : memref<8x16x128xbf16, #tpu.memory_space<vmem>>, vector<1x16x128xbf16>
    %371 = vector.shape_cast %370 : vector<1x16x128xbf16> to vector<16x128xbf16>
    %372 = vector.shape_cast %369 : vector<16x128xbf16> to vector<1x16x128xbf16>
    tpu.vector_store %arg16[%c6_108, %c0_109, %c0_110], %372 {strides = array<i32>} : memref<8x16x128xbf16, #tpu.memory_space<vmem>>, vector<1x16x128xbf16>,
    %c7 = arith.constant 7 : index
    %c0_111 = arith.constant 0 : index
    %c0_112 = arith.constant 0 : index
    %373 = vector.load %arg15[%c7, %c0_111, %c0_112] : memref<8x16x512xf32, #tpu.memory_space<vmem>>, vector<1x16x512xf32>
    %374 = vector.shape_cast %373 : vector<1x16x512xf32> to vector<16x512xf32>
    %375 = arith.truncf %344 : vector<16x128xf32> to vector<16x128xbf16>
    %cst_113 = arith.constant dense<0.000000e+00> : vector<16x512xf32>
    %376 = tpu.matmul %375, %9, %cst_113 {dimension_numbers = #tpu.dot_dimension_numbers<[1], [0], [0], [1], [0, 0, 1, 1], [], []>} : vector<16x128xbf16>, vector<128x512xbf16>, vector<16x512xf32> -> vector<16x512xf32>
    %377 = arith.addf %374, %376 : vector<16x512xf32>
    %378 = vector.extract_strided_slice %377 {offsets = [0, 0], sizes = [16, 384], strides = [1, 1]} : vector<16x512xf32> to vector<16x384xf32>
    %cst_114 = arith.constant 5.000000e-01 : f32
    %379 = vector.broadcast %cst_114 : f32 to vector<16x384xf32>
    %380 = arith.mulf %379, %378 : vector<16x384xf32>
    %381 = math.tanh %380 : vector<16x384xf32>
    %cst_115 = arith.constant 1.000000e+00 : f32
    %382 = vector.broadcast %cst_115 : f32 to vector<16x384xf32>
    %383 = arith.addf %381, %382 : vector<16x384xf32>
    %cst_116 = arith.constant 5.000000e-01 : f32
    %384 = vector.broadcast %cst_116 : f32 to vector<16x384xf32>
    %385 = arith.mulf %384, %383 : vector<16x384xf32>
    %386 = vector.extract_strided_slice %385 {offsets = [0, 0], sizes = [16, 128], strides = [1, 1]} : vector<16x384xf32> to vector<16x128xf32>
    %387 = vector.extract_strided_slice %385 {offsets = [0, 128], sizes = [16, 128], strides = [1, 1]} : vector<16x384xf32> to vector<16x128xf32>
    %388 = vector.extract_strided_slice %385 {offsets = [0, 256], sizes = [16, 128], strides = [1, 1]} : vector<16x384xf32> to vector<16x128xf32>
    %389 = vector.extract_strided_slice %377 {offsets = [0, 384], sizes = [16, 128], strides = [1, 1]} : vector<16x512xf32> to vector<16x128xf32>
    %390 = math.tanh %389 : vector<16x128xf32>
    %391 = arith.mulf %387, %342 : vector<16x128xf32>
    %392 = arith.mulf %386, %390 : vector<16x128xf32>
    %393 = arith.addf %391, %392 : vector<16x128xf32>
    %394 = math.tanh %393 : vector<16x128xf32>
    %395 = arith.mulf %388, %394 : vector<16x128xf32>
    %396 = arith.truncf %395 : vector<16x128xf32> to vector<16x128xbf16>
    %397 = arith.truncf %368 : vector<16x128xf32> to vector<16x128xbf16>
    %398 = tpu.concatenate %396, %397 in 1 : vector<16x128xbf16>, vector<16x128xbf16> -> vector<16x256xbf16>
    %cst_117 = arith.constant dense<0.000000e+00> : vector<16x512xf32>
    %399 = tpu.matmul %398, %10, %cst_117 {dimension_numbers = #tpu.dot_dimension_numbers<[1], [0], [0], [1], [0, 0, 1, 1], [], []>} : vector<16x256xbf16>, vector<256x512xbf16>, vector<16x512xf32> -> vector<16x512xf32>
    %400 = vector.broadcast %11 : vector<1x512xf32> to vector<16x512xf32>
    %401 = arith.addf %399, %400 : vector<16x512xf32>
    %402 = vector.extract_strided_slice %401 {offsets = [0, 0], sizes = [16, 384], strides = [1, 1]} : vector<16x512xf32> to vector<16x384xf32>
    %cst_118 = arith.constant 5.000000e-01 : f32
    %403 = vector.broadcast %cst_118 : f32 to vector<16x384xf32>
    %404 = arith.mulf %403, %402 : vector<16x384xf32>
    %405 = math.tanh %404 : vector<16x384xf32>
    %cst_119 = arith.constant 1.000000e+00 : f32
    %406 = vector.broadcast %cst_119 : f32 to vector<16x384xf32>
    %407 = arith.addf %405, %406 : vector<16x384xf32>
    %cst_120 = arith.constant 5.000000e-01 : f32
    %408 = vector.broadcast %cst_120 : f32 to vector<16x384xf32>
    %409 = arith.mulf %408, %407 : vector<16x384xf32>
    %410 = vector.extract_strided_slice %409 {offsets = [0, 0], sizes = [16, 128], strides = [1, 1]} : vector<16x384xf32> to vector<16x128xf32>
    %411 = vector.extract_strided_slice %409 {offsets = [0, 128], sizes = [16, 128], strides = [1, 1]} : vector<16x384xf32> to vector<16x128xf32>
    %412 = vector.extract_strided_slice %409 {offsets = [0, 256], sizes = [16, 128], strides = [1, 1]} : vector<16x384xf32> to vector<16x128xf32>
    %413 = vector.extract_strided_slice %401 {offsets = [0, 384], sizes = [16, 128], strides = [1, 1]} : vector<16x512xf32> to vector<16x128xf32>
    %414 = math.tanh %413 : vector<16x128xf32>
    %415 = arith.mulf %411, %366 : vector<16x128xf32>
    %416 = arith.mulf %410, %414 : vector<16x128xf32>
    %417 = arith.addf %415, %416 : vector<16x128xf32>
    %418 = math.tanh %417 : vector<16x128xf32>
    %419 = arith.mulf %412, %418 : vector<16x128xf32>
    %420 = arith.truncf %419 : vector<16x128xf32> to vector<16x128xbf16>
    %c7_121 = arith.constant 7 : index
    %c0_122 = arith.constant 0 : index
    %c0_123 = arith.constant 0 : index
    %421 = vector.load %arg16[%c7_121, %c0_122, %c0_123] : memref<8x16x128xbf16, #tpu.memory_space<vmem>>, vector<1x16x128xbf16>
    %422 = vector.shape_cast %421 : vector<1x16x128xbf16> to vector<16x128xbf16>
    %423 = vector.shape_cast %420 : vector<16x128xbf16> to vector<1x16x128xbf16>
    tpu.vector_store %arg16[%c7_121, %c0_122, %c0_123], %423 {strides = array<i32>} : memref<8x16x128xbf16, #tpu.memory_space<vmem>>, vector<1x16x128xbf16>,
    %c0_124 = arith.constant 0 : index
    %c0_125 = arith.constant 0 : index
    %c0_126 = arith.constant 0 : index
    %424 = vector.load %arg16[%c0_124, %c0_125, %c0_126] : memref<8x16x128xbf16, #tpu.memory_space<vmem>>, vector<8x16x128xbf16>
    %425 = vector.shape_cast %424 : vector<8x16x128xbf16> to vector<128x128xbf16>
    %c0_127 = arith.constant 0 : index
    %c0_128 = arith.constant 0 : index
    %426 = vector.load %arg7[%c0_127, %c0_128] : memref<128x128xbf16, #tpu.memory_space<vmem>>, vector<128x128xbf16>
    %cst_129 = arith.constant dense<0.000000e+00> : vector<128x128xf32>
    %427 = tpu.matmul %425, %426, %cst_129 {dimension_numbers = #tpu.dot_dimension_numbers<[1], [0], [0], [1], [0, 0, 1, 1], [], []>} : vector<128x128xbf16>, vector<128x128xbf16>, vector<128x128xf32> -> vector<128x128xf32>
    %c0_130 = arith.constant 0 : index
    %c0_131 = arith.constant 0 : index
    %428 = vector.load %arg8[%c0_130, %c0_131] : memref<1x128xf32, #tpu.memory_space<vmem>>, vector<1x128xf32>
    %429 = vector.broadcast %428 : vector<1x128xf32> to vector<128x128xf32>
    %430 = arith.addf %427, %429 : vector<128x128xf32>
    %431 = math.tanh %430 : vector<128x128xf32>
    %c0_132 = arith.constant 0 : index
    %c0_133 = arith.constant 0 : index
    %432 = vector.load %arg9[%c0_132, %c0_133] : memref<1x128xf32, #tpu.memory_space<vmem>>, vector<1x128xf32>
    %433 = vector.extract_strided_slice %431 {offsets = [0, 0], sizes = [16, 128], strides = [1, 1]} : vector<128x128xf32> to vector<16x128xf32>
    %434 = vector.broadcast %432 : vector<1x128xf32> to vector<16x128xf32>
    %435 = arith.mulf %433, %434 : vector<16x128xf32>
    %cst_134 = arith.constant dense<0.000000e+00> : vector<16xf32>
    %436 = vector.multi_reduction <add>, %435, %cst_134 [1] : vector<16x128xf32> to vector<16xf32>
    %437 = vector.shape_cast %436 : vector<16xf32> to vector<16x1xf32>
    %438 = vector.extract_strided_slice %431 {offsets = [16, 0], sizes = [16, 128], strides = [1, 1]} : vector<128x128xf32> to vector<16x128xf32>
    %439 = vector.broadcast %432 : vector<1x128xf32> to vector<16x128xf32>
    %440 = arith.mulf %438, %439 : vector<16x128xf32>
    %cst_135 = arith.constant dense<0.000000e+00> : vector<16xf32>
    %441 = vector.multi_reduction <add>, %440, %cst_135 [1] : vector<16x128xf32> to vector<16xf32>
    %442 = vector.shape_cast %441 : vector<16xf32> to vector<16x1xf32>
    %443 = vector.extract_strided_slice %431 {offsets = [32, 0], sizes = [16, 128], strides = [1, 1]} : vector<128x128xf32> to vector<16x128xf32>
    %444 = vector.broadcast %432 : vector<1x128xf32> to vector<16x128xf32>
    %445 = arith.mulf %443, %444 : vector<16x128xf32>
    %cst_136 = arith.constant dense<0.000000e+00> : vector<16xf32>
    %446 = vector.multi_reduction <add>, %445, %cst_136 [1] : vector<16x128xf32> to vector<16xf32>
    %447 = vector.shape_cast %446 : vector<16xf32> to vector<16x1xf32>
    %448 = vector.extract_strided_slice %431 {offsets = [48, 0], sizes = [16, 128], strides = [1, 1]} : vector<128x128xf32> to vector<16x128xf32>
    %449 = vector.broadcast %432 : vector<1x128xf32> to vector<16x128xf32>
    %450 = arith.mulf %448, %449 : vector<16x128xf32>
    %cst_137 = arith.constant dense<0.000000e+00> : vector<16xf32>
    %451 = vector.multi_reduction <add>, %450, %cst_137 [1] : vector<16x128xf32> to vector<16xf32>
    %452 = vector.shape_cast %451 : vector<16xf32> to vector<16x1xf32>
    %453 = vector.extract_strided_slice %431 {offsets = [64, 0], sizes = [16, 128], strides = [1, 1]} : vector<128x128xf32> to vector<16x128xf32>
    %454 = vector.broadcast %432 : vector<1x128xf32> to vector<16x128xf32>
    %455 = arith.mulf %453, %454 : vector<16x128xf32>
    %cst_138 = arith.constant dense<0.000000e+00> : vector<16xf32>
    %456 = vector.multi_reduction <add>, %455, %cst_138 [1] : vector<16x128xf32> to vector<16xf32>
    %457 = vector.shape_cast %456 : vector<16xf32> to vector<16x1xf32>
    %458 = vector.extract_strided_slice %431 {offsets = [80, 0], sizes = [16, 128], strides = [1, 1]} : vector<128x128xf32> to vector<16x128xf32>
    %459 = vector.broadcast %432 : vector<1x128xf32> to vector<16x128xf32>
    %460 = arith.mulf %458, %459 : vector<16x128xf32>
    %cst_139 = arith.constant dense<0.000000e+00> : vector<16xf32>
    %461 = vector.multi_reduction <add>, %460, %cst_139 [1] : vector<16x128xf32> to vector<16xf32>
    %462 = vector.shape_cast %461 : vector<16xf32> to vector<16x1xf32>
    %463 = vector.extract_strided_slice %431 {offsets = [96, 0], sizes = [16, 128], strides = [1, 1]} : vector<128x128xf32> to vector<16x128xf32>
    %464 = vector.broadcast %432 : vector<1x128xf32> to vector<16x128xf32>
    %465 = arith.mulf %463, %464 : vector<16x128xf32>
    %cst_140 = arith.constant dense<0.000000e+00> : vector<16xf32>
    %466 = vector.multi_reduction <add>, %465, %cst_140 [1] : vector<16x128xf32> to vector<16xf32>
    %467 = vector.shape_cast %466 : vector<16xf32> to vector<16x1xf32>
    %468 = vector.extract_strided_slice %431 {offsets = [112, 0], sizes = [16, 128], strides = [1, 1]} : vector<128x128xf32> to vector<16x128xf32>
    %469 = vector.broadcast %432 : vector<1x128xf32> to vector<16x128xf32>
    %470 = arith.mulf %468, %469 : vector<16x128xf32>
    %cst_141 = arith.constant dense<0.000000e+00> : vector<16xf32>
    %471 = vector.multi_reduction <add>, %470, %cst_141 [1] : vector<16x128xf32> to vector<16xf32>
    %472 = vector.shape_cast %471 : vector<16xf32> to vector<16x1xf32>
    %473 = tpu.concatenate %437, %442, %447, %452, %457, %462, %467, %472 in 1 : vector<16x1xf32>, vector<16x1xf32>, vector<16x1xf32>, vector<16x1xf32>, vector<16x1xf32>, vector<16x1xf32>, vector<16x1xf32>, vector<16x1xf32> -> vector<16x8xf32>
    %cst_142 = arith.constant dense<0xFF800000> : vector<16xf32>
    %474 = vector.multi_reduction <maximumf>, %473, %cst_142 [1] : vector<16x8xf32> to vector<16xf32>
    %475 = vector.shape_cast %474 : vector<16xf32> to vector<16x1xf32>
    %476 = vector.broadcast %475 : vector<16x1xf32> to vector<16x8xf32>
    %477 = arith.subf %473, %476 : vector<16x8xf32>
    %478 = math.exp %477 : vector<16x8xf32>
    %cst_143 = arith.constant dense<0.000000e+00> : vector<16xf32>
    %479 = vector.multi_reduction <add>, %478, %cst_143 [1] : vector<16x8xf32> to vector<16xf32>
    %480 = vector.shape_cast %479 : vector<16xf32> to vector<16x1xf32>
    %481 = tpu.reciprocal %480 {approx = true} : vector<16x1xf32> -> vector<16x1xf32>
    %482 = vector.broadcast %481 : vector<16x1xf32> to vector<16x8xf32>
    %483 = arith.mulf %478, %482 : vector<16x8xf32>
    %cst_144 = arith.constant dense<0xFF800000> : vector<16xf32>
    %484 = vector.multi_reduction <maximumf>, %483, %cst_144 [1] : vector<16x8xf32> to vector<16xf32>
    %485 = vector.shape_cast %484 : vector<16xf32> to vector<16x1xf32>
    %486 = vector.broadcast %485 : vector<16x1xf32> to vector<16x8xf32>
    %487 = arith.subf %483, %486 : vector<16x8xf32>
    %488 = math.exp %487 : vector<16x8xf32>
    %cst_145 = arith.constant dense<0.000000e+00> : vector<16xf32>
    %489 = vector.multi_reduction <add>, %488, %cst_145 [1] : vector<16x8xf32> to vector<16xf32>
    %490 = vector.shape_cast %489 : vector<16xf32> to vector<16x1xf32>
    %491 = tpu.reciprocal %490 {approx = true} : vector<16x1xf32> -> vector<16x1xf32>
    %492 = vector.broadcast %491 : vector<16x1xf32> to vector<16x8xf32>
    %493 = arith.mulf %488, %492 : vector<16x8xf32>
    %494 = vector.extract_strided_slice %493 {offsets = [0, 0], sizes = [16, 1], strides = [1, 1]} : vector<16x8xf32> to vector<16x1xf32>
    %c0_146 = arith.constant 0 : index
    %c0_147 = arith.constant 0 : index
    %c0_148 = arith.constant 0 : index
    %495 = vector.load %arg16[%c0_146, %c0_147, %c0_148] : memref<8x16x128xbf16, #tpu.memory_space<vmem>>, vector<1x16x128xbf16>
    %496 = vector.shape_cast %495 : vector<1x16x128xbf16> to vector<16x128xbf16>
    %497 = arith.extf %496 : vector<16x128xbf16> to vector<16x128xf32>
    %498 = vector.broadcast %494 : vector<16x1xf32> to vector<16x128xf32>
    %499 = arith.mulf %498, %497 : vector<16x128xf32>
    %500 = vector.extract_strided_slice %493 {offsets = [0, 1], sizes = [16, 1], strides = [1, 1]} : vector<16x8xf32> to vector<16x1xf32>
    %c1_149 = arith.constant 1 : index
    %c0_150 = arith.constant 0 : index
    %c0_151 = arith.constant 0 : index
    %501 = vector.load %arg16[%c1_149, %c0_150, %c0_151] : memref<8x16x128xbf16, #tpu.memory_space<vmem>>, vector<1x16x128xbf16>
    %502 = vector.shape_cast %501 : vector<1x16x128xbf16> to vector<16x128xbf16>
    %503 = arith.extf %502 : vector<16x128xbf16> to vector<16x128xf32>
    %504 = vector.broadcast %500 : vector<16x1xf32> to vector<16x128xf32>
    %505 = arith.mulf %504, %503 : vector<16x128xf32>
    %506 = arith.addf %499, %505 : vector<16x128xf32>
    %507 = vector.extract_strided_slice %493 {offsets = [0, 2], sizes = [16, 1], strides = [1, 1]} : vector<16x8xf32> to vector<16x1xf32>
    %c2_152 = arith.constant 2 : index
    %c0_153 = arith.constant 0 : index
    %c0_154 = arith.constant 0 : index
    %508 = vector.load %arg16[%c2_152, %c0_153, %c0_154] : memref<8x16x128xbf16, #tpu.memory_space<vmem>>, vector<1x16x128xbf16>
    %509 = vector.shape_cast %508 : vector<1x16x128xbf16> to vector<16x128xbf16>
    %510 = arith.extf %509 : vector<16x128xbf16> to vector<16x128xf32>
    %511 = vector.broadcast %507 : vector<16x1xf32> to vector<16x128xf32>
    %512 = arith.mulf %511, %510 : vector<16x128xf32>
    %513 = arith.addf %506, %512 : vector<16x128xf32>
    %514 = vector.extract_strided_slice %493 {offsets = [0, 3], sizes = [16, 1], strides = [1, 1]} : vector<16x8xf32> to vector<16x1xf32>
    %c3_155 = arith.constant 3 : index
    %c0_156 = arith.constant 0 : index
    %c0_157 = arith.constant 0 : index
    %515 = vector.load %arg16[%c3_155, %c0_156, %c0_157] : memref<8x16x128xbf16, #tpu.memory_space<vmem>>, vector<1x16x128xbf16>
    %516 = vector.shape_cast %515 : vector<1x16x128xbf16> to vector<16x128xbf16>
    %517 = arith.extf %516 : vector<16x128xbf16> to vector<16x128xf32>
    %518 = vector.broadcast %514 : vector<16x1xf32> to vector<16x128xf32>
    %519 = arith.mulf %518, %517 : vector<16x128xf32>
    %520 = arith.addf %513, %519 : vector<16x128xf32>
    %521 = vector.extract_strided_slice %493 {offsets = [0, 4], sizes = [16, 1], strides = [1, 1]} : vector<16x8xf32> to vector<16x1xf32>
    %c4_158 = arith.constant 4 : index
    %c0_159 = arith.constant 0 : index
    %c0_160 = arith.constant 0 : index
    %522 = vector.load %arg16[%c4_158, %c0_159, %c0_160] : memref<8x16x128xbf16, #tpu.memory_space<vmem>>, vector<1x16x128xbf16>
    %523 = vector.shape_cast %522 : vector<1x16x128xbf16> to vector<16x128xbf16>
    %524 = arith.extf %523 : vector<16x128xbf16> to vector<16x128xf32>
    %525 = vector.broadcast %521 : vector<16x1xf32> to vector<16x128xf32>
    %526 = arith.mulf %525, %524 : vector<16x128xf32>
    %527 = arith.addf %520, %526 : vector<16x128xf32>
    %528 = vector.extract_strided_slice %493 {offsets = [0, 5], sizes = [16, 1], strides = [1, 1]} : vector<16x8xf32> to vector<16x1xf32>
    %c5_161 = arith.constant 5 : index
    %c0_162 = arith.constant 0 : index
    %c0_163 = arith.constant 0 : index
    %529 = vector.load %arg16[%c5_161, %c0_162, %c0_163] : memref<8x16x128xbf16, #tpu.memory_space<vmem>>, vector<1x16x128xbf16>
    %530 = vector.shape_cast %529 : vector<1x16x128xbf16> to vector<16x128xbf16>
    %531 = arith.extf %530 : vector<16x128xbf16> to vector<16x128xf32>
    %532 = vector.broadcast %528 : vector<16x1xf32> to vector<16x128xf32>
    %533 = arith.mulf %532, %531 : vector<16x128xf32>
    %534 = arith.addf %527, %533 : vector<16x128xf32>
    %535 = vector.extract_strided_slice %493 {offsets = [0, 6], sizes = [16, 1], strides = [1, 1]} : vector<16x8xf32> to vector<16x1xf32>
    %c6_164 = arith.constant 6 : index
    %c0_165 = arith.constant 0 : index
    %c0_166 = arith.constant 0 : index
    %536 = vector.load %arg16[%c6_164, %c0_165, %c0_166] : memref<8x16x128xbf16, #tpu.memory_space<vmem>>, vector<1x16x128xbf16>
    %537 = vector.shape_cast %536 : vector<1x16x128xbf16> to vector<16x128xbf16>
    %538 = arith.extf %537 : vector<16x128xbf16> to vector<16x128xf32>
    %539 = vector.broadcast %535 : vector<16x1xf32> to vector<16x128xf32>
    %540 = arith.mulf %539, %538 : vector<16x128xf32>
    %541 = arith.addf %534, %540 : vector<16x128xf32>
    %542 = vector.extract_strided_slice %493 {offsets = [0, 7], sizes = [16, 1], strides = [1, 1]} : vector<16x8xf32> to vector<16x1xf32>
    %c7_167 = arith.constant 7 : index
    %c0_168 = arith.constant 0 : index
    %c0_169 = arith.constant 0 : index
    %543 = vector.load %arg16[%c7_167, %c0_168, %c0_169] : memref<8x16x128xbf16, #tpu.memory_space<vmem>>, vector<1x16x128xbf16>
    %544 = vector.shape_cast %543 : vector<1x16x128xbf16> to vector<16x128xbf16>
    %545 = arith.extf %544 : vector<16x128xbf16> to vector<16x128xf32>
    %546 = vector.broadcast %542 : vector<16x1xf32> to vector<16x128xf32>
    %547 = arith.mulf %546, %545 : vector<16x128xf32>
    %548 = arith.addf %541, %547 : vector<16x128xf32>
    %549 = arith.truncf %548 : vector<16x128xf32> to vector<16x128xbf16>
    %c0_170 = arith.constant 0 : index
    %c0_171 = arith.constant 0 : index
    %550 = vector.load %arg10[%c0_170, %c0_171] : memref<128x64xbf16, #tpu.memory_space<vmem>>, vector<128x64xbf16>
    %cst_172 = arith.constant dense<0.000000e+00> : vector<16x64xf32>
    %551 = tpu.matmul %549, %550, %cst_172 {dimension_numbers = #tpu.dot_dimension_numbers<[1], [0], [0], [1], [0, 0, 1, 1], [], []>} : vector<16x128xbf16>, vector<128x64xbf16>, vector<16x64xf32> -> vector<16x64xf32>
    %c0_173 = arith.constant 0 : index
    %c0_174 = arith.constant 0 : index
    %552 = vector.load %arg11[%c0_173, %c0_174] : memref<1x64xf32, #tpu.memory_space<vmem>>, vector<1x64xf32>
    %553 = vector.broadcast %552 : vector<1x64xf32> to vector<16x64xf32>
    %554 = arith.addf %551, %553 : vector<16x64xf32>
    %cst_175 = arith.constant 0.000000e+00 : f32
    %555 = vector.broadcast %cst_175 : f32 to vector<16x64xf32>
    %556 = arith.maximumf %554, %555 : vector<16x64xf32>
    %557 = arith.truncf %556 : vector<16x64xf32> to vector<16x64xbf16>
    %c0_176 = arith.constant 0 : index
    %c0_177 = arith.constant 0 : index
    %558 = vector.load %arg12[%c0_176, %c0_177] : memref<64x128xbf16, #tpu.memory_space<vmem>>, vector<64x128xbf16>
    %cst_178 = arith.constant dense<0.000000e+00> : vector<16x128xf32>
    %559 = tpu.matmul %557, %558, %cst_178 {dimension_numbers = #tpu.dot_dimension_numbers<[1], [0], [0], [1], [0, 0, 1, 1], [], []>} : vector<16x64xbf16>, vector<64x128xbf16>, vector<16x128xf32> -> vector<16x128xf32>
    %c0_179 = arith.constant 0 : index
    %c0_180 = arith.constant 0 : index
    %560 = vector.load %arg13[%c0_179, %c0_180] : memref<1x128xf32, #tpu.memory_space<vmem>>, vector<1x128xf32>
    %561 = vector.broadcast %560 : vector<1x128xf32> to vector<16x128xf32>
    %562 = arith.addf %559, %561 : vector<16x128xf32>
    %c0_181 = arith.constant 0 : index
    %c0_182 = arith.constant 0 : index
    %563 = vector.load %arg14[%c0_181, %c0_182] : memref<16x128xf32, #tpu.memory_space<vmem>>, vector<16x128xf32>
    tpu.vector_store %arg14[%c0_181, %c0_182], %562 {strides = array<i32>} : memref<16x128xf32, #tpu.memory_space<vmem>>, vector<16x128xf32>,
    return
  }
  func.func @transform_0(%arg0: i32) -> (i32, i32, i32) {
    %c0_i32 = arith.constant 0 : i32
    %c0_i32_0 = arith.constant 0 : i32
    %c0_i32_1 = arith.constant 0 : i32
    return %c0_i32, %arg0, %c0_i32_0 : i32, i32, i32
  }
  func.func @transform_1(%arg0: i32) -> (i32, i32) {
    %c0_i32 = arith.constant 0 : i32
    %c0_i32_0 = arith.constant 0 : i32
    %c0_i32_1 = arith.constant 0 : i32
    return %c0_i32, %c0_i32_0 : i32, i32
  }
  func.func @transform_2(%arg0: i32) -> (i32, i32) {
    %c0_i32 = arith.constant 0 : i32
    %c0_i32_0 = arith.constant 0 : i32
    %c0_i32_1 = arith.constant 0 : i32
    return %c0_i32, %c0_i32_0 : i32, i32
  }
  func.func @transform_3(%arg0: i32) -> (i32, i32) {
    %c0_i32 = arith.constant 0 : i32
    %c0_i32_0 = arith.constant 0 : i32
    %c0_i32_1 = arith.constant 0 : i32
    return %c0_i32, %c0_i32_0 : i32, i32
  }
  func.func @transform_4(%arg0: i32) -> (i32, i32) {
    %c0_i32 = arith.constant 0 : i32
    %c0_i32_0 = arith.constant 0 : i32
    %c0_i32_1 = arith.constant 0 : i32
    return %c0_i32, %c0_i32_0 : i32, i32
  }
  func.func @transform_5(%arg0: i32) -> (i32, i32) {
    %c0_i32 = arith.constant 0 : i32
    %c0_i32_0 = arith.constant 0 : i32
    %c0_i32_1 = arith.constant 0 : i32
    return %c0_i32, %c0_i32_0 : i32, i32
  }
  func.func @transform_6(%arg0: i32) -> (i32, i32) {
    %c0_i32 = arith.constant 0 : i32
    %c0_i32_0 = arith.constant 0 : i32
    %c0_i32_1 = arith.constant 0 : i32
    return %c0_i32, %c0_i32_0 : i32, i32
  }
  func.func @transform_7(%arg0: i32) -> (i32, i32) {
    %c0_i32 = arith.constant 0 : i32
    %c0_i32_0 = arith.constant 0 : i32
    %c0_i32_1 = arith.constant 0 : i32
    return %c0_i32, %c0_i32_0 : i32, i32
  }
  func.func @transform_8(%arg0: i32) -> (i32, i32) {
    %c0_i32 = arith.constant 0 : i32
    %c0_i32_0 = arith.constant 0 : i32
    %c0_i32_1 = arith.constant 0 : i32
    return %c0_i32, %c0_i32_0 : i32, i32
  }
  func.func @transform_9(%arg0: i32) -> (i32, i32) {
    %c0_i32 = arith.constant 0 : i32
    %c0_i32_0 = arith.constant 0 : i32
    %c0_i32_1 = arith.constant 0 : i32
    return %c0_i32, %c0_i32_0 : i32, i32
  }
  func.func @transform_10(%arg0: i32) -> (i32, i32) {
    %c0_i32 = arith.constant 0 : i32
    %c0_i32_0 = arith.constant 0 : i32
    %c0_i32_1 = arith.constant 0 : i32
    return %c0_i32, %c0_i32_0 : i32, i32
  }
  func.func @transform_11(%arg0: i32) -> (i32, i32) {
    %c0_i32 = arith.constant 0 : i32
    %c0_i32_0 = arith.constant 0 : i32
    %c0_i32_1 = arith.constant 0 : i32
    return %c0_i32, %c0_i32_0 : i32, i32
  }
  func.func @transform_12(%arg0: i32) -> (i32, i32) {
    %c0_i32 = arith.constant 0 : i32
    %c0_i32_0 = arith.constant 0 : i32
    %c0_i32_1 = arith.constant 0 : i32
    return %c0_i32, %c0_i32_0 : i32, i32
  }
  func.func @transform_13(%arg0: i32) -> (i32, i32) {
    %c0_i32 = arith.constant 0 : i32
    %c0_i32_0 = arith.constant 0 : i32
    return %arg0, %c0_i32 : i32, i32
  }
}

</mosaic_0001>

<bundles_post_ra>
// kernel: lstm_model_forward.1
= control target key start
LH: loop header
LB: loop body
LE: loop exit
PB: predicated region body
PF: predicated region fallthrough
CT: control target
= control target key end

     0   :  { %v9746_v1 = vmov 0   ;;  %vm4402_vm0 = vcmask 7168   ;;  %vm4405_vm1 = vcmask 15360   ;;  %vm4408_vm2 = vcmask 23552   ;;  %s9730_s1 = inlined_call_operand.vmem [shape: bf16[384,512], index: 1, kind: input, shape index: {}]   ;;  %s9731_s0 = inlined_call_operand.vmem [shape: bf16[8,16,384], index: 0, kind: input, shape index: {}]   ;;  %s9732_s2 = inlined_call_operand.vmem [shape: bf16[128,512], index: 2, kind: input, shape index: {}]   ;;  %s9733_s4 = inlined_call_operand.vmem [shape: bf16[256,512], index: 4, kind: input, shape index: {}]   ;;  %s9734_s3 = inlined_call_operand.vmem [shape: f32[1,512], index: 3, kind: input, shape index: {}]   ;;  %s9735_s5 = inlined_call_operand.vmem [shape: f32[1,512], index: 5, kind: input, shape index: {}]   ;;  %s9736_s6 = inlined_call_operand.vmem [shape: bf16[128,128], index: 6, kind: input, shape index: {}]   ;;  %s9737_s7 = inlined_call_operand.vmem [shape: f32[1,128], index: 7, kind: input, shape index: {}]   ;;  %s9738_s8 = inlined_call_operand.vmem [shape: f32[1,128], index: 8, kind: input, shape index: {}]   ;;  %s9739_s9 = inlined_call_operand.vmem [shape: bf16[128,64], index: 9, kind: input, shape index: {}]   ;;  %s9740_s11 = inlined_call_operand.vmem [shape: bf16[64,128], index: 11, kind: input, shape index: {}]   ;;  %s9741_s10 = inlined_call_operand.vmem [shape: f32[1,64], index: 10, kind: input, shape index: {}]   ;;  %s9742_s12 = inlined_call_operand.vmem [shape: f32[1,128], index: 12, kind: input, shape index: {}]   ;;  %s9743_s13 = inlined_call_operand.vmem [shape: f32[16,128], index: 13, kind: output, shape index: {}]  }
   0x1   :  { %v5275_v0 = vld [vmem:[%s9730_s1 + $0xe4] ss:$16 sps:$4 sm:$0xff]   ;;  %948 = vmatprep.mubr.bf16.mxu1 %v9746_v1  ;;  %5259 = vset.pattern.permute.xlu0 %v9746_v1  ;;  %v5279_v3 = vld [vmem:[%s9730_s1 + $0xe0] ss:$16 sps:$4 sm:$0xff]   ;;  %v5328_v34 = vld [vmem:[%s9730_s1 + $0xec] ss:$16 sps:$4 sm:$0xff]  }
   0x2   :  { %v5277_v2 = vld [vmem:[%s9730_s1 + $0x2e4] ss:$16 sps:$4 sm:$0xff]   ;;  %803 = vmatprep.subr.bf16.mxu0 %v5275_v0  ;;  %v5280_v4 = vld [vmem:[%s9730_s1 + $0x2e0] ss:$16 sps:$4 sm:$0xff]   ;;  %v5326_v36 = vld [vmem:[%s9730_s1 + $0xe8] ss:$16 sps:$4 sm:$0xff]  }
   0x3   :  { %916 = vmatprep.subr.bf16.mxu1 %v5277_v2  ;;  %v5281_v5 = vld [vmem:[%s9730_s1 + $0xc4] ss:$16 sps:$4 sm:$0xff]   ;;  %804 = vmatpush1.bf16.msra.mxu0 %v5279_v3  ;;  %v5285_v7 = vld [vmem:[%s9730_s1 + $0xc0] ss:$16 sps:$4 sm:$0xff]   ;;  %v5334_v39 = vld [vmem:[%s9730_s1 + $0xcc] ss:$16 sps:$4 sm:$0xff]  }
   0x4   :  { %917 = vmatpush1.bf16.msra.mxu1 %v5280_v4  ;;  %v5283_v6 = vld [vmem:[%s9730_s1 + $0x2c4] ss:$16 sps:$4 sm:$0xff]   ;;  %805 = vmatprep.subr.bf16.mxu0 %v5281_v5  ;;  %v5286_v8 = vld [vmem:[%s9730_s1 + $0x2c0] ss:$16 sps:$4 sm:$0xff]   ;;  %v5332_v40 = vld [vmem:[%s9730_s1 + $0xc8] ss:$16 sps:$4 sm:$0xff]  }
   0x5   :  { %918 = vmatprep.subr.bf16.mxu1 %v5283_v6  ;;  %v5287_v9 = vld [vmem:[%s9730_s1 + $0xa4] ss:$16 sps:$4 sm:$0xff]   ;;  %v5291_v11 = vld [vmem:[%s9730_s1 + $0xa0] ss:$16 sps:$4 sm:$0xff]   ;;  %v5341_v43 = vld [vmem:[%s9730_s1 + $0xac] ss:$16 sps:$4 sm:$0xff]  }
   0x6   :  { %v5289_v10 = vld [vmem:[%s9730_s1 + $0x2a4] ss:$16 sps:$4 sm:$0xff]   ;;  %v5292_v12 = vld [vmem:[%s9730_s1 + $0x2a0] ss:$16 sps:$4 sm:$0xff]   ;;  %v5339_v45 = vld [vmem:[%s9730_s1 + $0xa8] ss:$16 sps:$4 sm:$0xff]  }
   0x7   :  { %806 = vmatpush1.bf16.msra.mxu0 %v5285_v7  ;;  %v5293_v13 = vld [vmem:[%s9730_s1 + $0x84] ss:$16 sps:$4 sm:$0xff]   ;;  %v5297_v15 = vld [vmem:[%s9730_s1 + $0x80] ss:$16 sps:$4 sm:$0xff]   ;;  %v5347_v48 = vld [vmem:[%s9730_s1 + $0x8c] ss:$16 sps:$4 sm:$0xff]  }
   0x8   :  { %919 = vmatpush1.bf16.msra.mxu1 %v5286_v8  ;;  %807 = vmatprep.subr.bf16.mxu0 %v5287_v9  ;;  %v5295_v14 = vld [vmem:[%s9730_s1 + $0x284] ss:$16 sps:$4 sm:$0xff]   ;;  %v5298_v16 = vld [vmem:[%s9730_s1 + $0x280] ss:$16 sps:$4 sm:$0xff]   ;;  %v5345_v49 = vld [vmem:[%s9730_s1 + $0x88] ss:$16 sps:$4 sm:$0xff]  }
   0x9   :  { %920 = vmatprep.subr.bf16.mxu1 %v5289_v10  ;;  %v5299_v17 = vld [vmem:[%s9730_s1 + $0x64] ss:$16 sps:$4 sm:$0xff]   ;;  %v5303_v19 = vld [vmem:[%s9730_s1 + $0x60] ss:$16 sps:$4 sm:$0xff]   ;;  %v5354_v52 = vld [vmem:[%s9730_s1 + $0x6c] ss:$16 sps:$4 sm:$0xff]  }
   0xa   :  { %v5301_v18 = vld [vmem:[%s9730_s1 + $0x264] ss:$16 sps:$4 sm:$0xff]   ;;  %v5304_v20 = vld [vmem:[%s9730_s1 + $0x260] ss:$16 sps:$4 sm:$0xff]   ;;  %v5352_v54 = vld [vmem:[%s9730_s1 + $0x68] ss:$16 sps:$4 sm:$0xff]  }
   0xb   :  { %808 = vmatpush1.bf16.msra.mxu0 %v5291_v11  ;;  %v5305_v21 = vld [vmem:[%s9730_s1 + $0x44] ss:$16 sps:$4 sm:$0xff]   ;;  %v5309_v23 = vld [vmem:[%s9730_s1 + $0x40] ss:$16 sps:$4 sm:$0xff]   ;;  %v5360_v58 = vld [vmem:[%s9730_s1 + $0x4c] ss:$16 sps:$4 sm:$0xff]  }
   0xc   :  { %921 = vmatpush1.bf16.msra.mxu1 %v5292_v12  ;;  %809 = vmatprep.subr.bf16.mxu0 %v5293_v13  ;;  %v5307_v22 = vld [vmem:[%s9730_s1 + $0x244] ss:$16 sps:$4 sm:$0xff]   ;;  %v5310_v24 = vld [vmem:[%s9730_s1 + $0x240] ss:$16 sps:$4 sm:$0xff]   ;;  %v5358_v59 = vld [vmem:[%s9730_s1 + $0x48] ss:$16 sps:$4 sm:$0xff]  }
   0xd   :  { %922 = vmatprep.subr.bf16.mxu1 %v5295_v14  ;;  %v5311_v25 = vld [vmem:[%s9730_s1 + $0x24] ss:$16 sps:$4 sm:$0xff]   ;;  %v5315_v27 = vld [vmem:[%s9730_s1 + $0x20] ss:$16 sps:$4 sm:$0xff]   ;;  %v5367_v62 = vld [vmem:[%s9730_s1 + $0x2c] ss:$16 sps:$4 sm:$0xff]  }
   0xe   :  { %v5313_v26 = vld [vmem:[%s9730_s1 + $0x224] ss:$16 sps:$4 sm:$0xff]   ;;  %v5316_v28 = vld [vmem:[%s9730_s1 + $0x220] ss:$16 sps:$4 sm:$0xff]   ;;  %v5365_v0 = vld [vmem:[%s9730_s1 + $0x28] ss:$16 sps:$4 sm:$0xff]  }
   0xf   :  { %810 = vmatpush1.bf16.msra.mxu0 %v5297_v15  ;;  %v5317_v29 = vld [vmem:[%s9730_s1 + $0x4] ss:$16 sps:$4 sm:$0xff]   ;;  %v5321_v31 = vld [vmem:[%s9730_s1] ss:$16 sps:$4 sm:$0xff]   ;;  %v5373_v4 = vld [vmem:[%s9730_s1 + $0xc] ss:$16 sps:$4 sm:$0xff]  }
  0x10   :  { %923 = vmatpush1.bf16.msra.mxu1 %v5298_v16  ;;  %811 = vmatprep.subr.bf16.mxu0 %v5299_v17  ;;  %v5319_v30 = vld [vmem:[%s9730_s1 + $0x204] ss:$16 sps:$4 sm:$0xff]   ;;  %v5322_v32 = vld [vmem:[%s9730_s1 + $0x200] ss:$16 sps:$4 sm:$0xff]   ;;  %v5371_v5 = vld [vmem:[%s9730_s1 + $0x8] ss:$16 sps:$4 sm:$0xff]  }
  0x11   :  { %924 = vmatprep.subr.bf16.mxu1 %v5301_v18  ;;  %v5323_v33 = vld [vmem:[%s9730_s1 + $0x1e4] ss:$16 sps:$4 sm:$0xff]   ;;  %v5329_v37 = vld [vmem:[%s9730_s1 + $0x1e0] ss:$16 sps:$4 sm:$0xff]   ;;  %v5381_v7 = vld [vmem:[%s9730_s1 + $0x1ec] ss:$16 sps:$4 sm:$0xff]  }
  0x12   :  { %v6412_v35 = vld [vmem:[%s9731_s0 + $0x8] ss:$12 sps:$4 sm:$0xff]   ;;  %v5335_v41 = vld [vmem:[%s9730_s1 + $0x1c0] ss:$16 sps:$4 sm:$0xff]   ;;  %v6474_v53 = vld [vmem:[%s9731_s0 + $0x38] ss:$12 sps:$4 sm:$0xff]  }
  0x13   :  { %812 = vmatpush1.bf16.msra.mxu0 %v5303_v19  ;;  %v5330_v38 = vld [vmem:[%s9730_s1 + $0x1c4] ss:$16 sps:$4 sm:$0xff]   ;;  %v6443_v44 = vld [vmem:[%s9731_s0 + $0x20] ss:$12 sps:$4 sm:$0xff]   ;;  %v6511_v63 = vld [vmem:[%s9731_s0 + $0x50] ss:$12 sps:$4 sm:$0xff]  }
  0x14   :  { %925 = vmatpush1.bf16.msra.mxu1 %v5304_v20  ;;  %813 = vmatprep.subr.bf16.mxu0 %v5305_v21  ;;  %v5336_v42 = vld [vmem:[%s9730_s1 + $0x1a4] ss:$16 sps:$4 sm:$0xff]   ;;  %v5342_v46 = vld [vmem:[%s9730_s1 + $0x1a0] ss:$16 sps:$4 sm:$0xff]   ;;  %v5384_v8 = vld [vmem:[%s9730_s1 + $0x2ec] ss:$16 sps:$4 sm:$0xff]  }
  0x15   :  { %926 = vmatprep.subr.bf16.mxu1 %v5307_v22  ;;  %v5343_v47 = vld [vmem:[%s9730_s1 + $0x184] ss:$16 sps:$4 sm:$0xff]   ;;  %v5348_v50 = vld [vmem:[%s9730_s1 + $0x180] ss:$16 sps:$4 sm:$0xff]   ;;  %v5379_v11 = vld [vmem:[%s9730_s1 + $0x1e8] ss:$16 sps:$4 sm:$0xff]  }
  0x16   :  { %v5349_v51 = vld [vmem:[%s9730_s1 + $0x164] ss:$16 sps:$4 sm:$0xff]   ;;  %v5355_v55 = vld [vmem:[%s9730_s1 + $0x160] ss:$16 sps:$4 sm:$0xff]   ;;  %v5382_v12 = vld [vmem:[%s9730_s1 + $0x2e8] ss:$16 sps:$4 sm:$0xff]  }
  0x17   :  { %814 = vmatpush1.bf16.msra.mxu0 %v5309_v23  ;;  %v6485_v56 = vld [vmem:[%s9731_s0 + $0x4] ss:$12 sps:$4 sm:$0xff]   ;;  %v6541_v9 = vld [vmem:[%s9731_s0] ss:$12 sps:$4 sm:$0xff]   ;;  %v6547_v10 = vld [vmem:[%s9731_s0 + $0x68] ss:$12 sps:$4 sm:$0xff]  }
  0x18   :  { %927 = vmatpush1.bf16.msra.mxu1 %v5310_v24  ;;  %815 = vmatprep.subr.bf16.mxu0 %v5311_v25  ;;  %v5356_v57 = vld [vmem:[%s9730_s1 + $0x144] ss:$16 sps:$4 sm:$0xff]   ;;  %v5361_v60 = vld [vmem:[%s9730_s1 + $0x140] ss:$16 sps:$4 sm:$0xff]   ;;  %v5387_v13 = vld [vmem:[%s9730_s1 + $0x1cc] ss:$16 sps:$4 sm:$0xff]  }
  0x19   :  { %928 = vmatprep.subr.bf16.mxu1 %v5313_v26  ;;  %835 = vmatprep.mubr.bf16.mxu0 %v6485_v56  ;;  %v5362_v61 = vld [vmem:[%s9730_s1 + $0x124] ss:$16 sps:$4 sm:$0xff]   ;;  %v5368_v2 = vld [vmem:[%s9730_s1 + $0x120] ss:$16 sps:$4 sm:$0xff]   ;;  %v6561_v14 = vld [vmem:[%s9731_s0 + $0x1c] ss:$12 sps:$4 sm:$0xff]  }
  0x1a   :  { %v5369_v3 = vld [vmem:[%s9730_s1 + $0x104] ss:$16 sps:$4 sm:$0xff]   ;;  %v5374_v6 = vld [vmem:[%s9730_s1 + $0x100] ss:$16 sps:$4 sm:$0xff]   ;;  %v5385_v15 = vld [vmem:[%s9730_s1 + $0x1c8] ss:$16 sps:$4 sm:$0xff]  }
  0x1b   :  { %816 = vmatpush1.bf16.msra.mxu0 %v5315_v27  ;;  %v5397_v16 = vld [vmem:[%s9730_s1 + $0x2cc] ss:$16 sps:$4 sm:$0xff]   ;;  %v5395_v18 = vld [vmem:[%s9730_s1 + $0x2c8] ss:$16 sps:$4 sm:$0xff]   ;;  %v6598_v23 = vld [vmem:[%s9731_s0 + $0x34] ss:$12 sps:$4 sm:$0xff]  }
  0x1c   :  { %929 = vmatpush1.bf16.msra.mxu1 %v5316_v28  ;;  %817 = vmatprep.subr.bf16.mxu0 %v5317_v29  ;;  %v5394_v17 = vld [vmem:[%s9730_s1 + $0x1ac] ss:$16 sps:$4 sm:$0xff]   ;;  %v6585_v20 = vld [vmem:[%s9731_s0 + $0x18] ss:$12 sps:$4 sm:$0xff]   ;;  %vm4411_vm3 = vcmask 31744   ;;  %vm4414_vm4 = vcmask 39936  }
  0x1d   :  { %930 = vmatprep.subr.bf16.mxu1 %v5319_v30  ;;  %v5410_v19 = vld [vmem:[%s9730_s1 + $0x2ac] ss:$16 sps:$4 sm:$0xff]   ;;  %v5392_v22 = vld [vmem:[%s9730_s1 + $0x1a8] ss:$16 sps:$4 sm:$0xff]   ;;  %vm4417_vm5 = vcmask 48128   ;;  %vm4420_vm6 = vcmask 56320  }
  0x1e   :  { %v6590_v21 = vld [vmem:[%s9731_s0 + $0x80] ss:$12 sps:$4 sm:$0xff]   ;;  %v5408_v25 = vld [vmem:[%s9730_s1 + $0x2a8] ss:$16 sps:$4 sm:$0xff]   ;;  %v6622_v29 = vld [vmem:[%s9731_s0 + $0x30] ss:$12 sps:$4 sm:$0xff]  }
  0x1f   :  { %818 = vmatpush1.bf16.msra.mxu0 %v5321_v31  ;;  %v5400_v24 = vld [vmem:[%s9730_s1 + $0x18c] ss:$16 sps:$4 sm:$0xff]   ;;  %v5398_v27 = vld [vmem:[%s9730_s1 + $0x188] ss:$16 sps:$4 sm:$0xff]   ;;  %vm4423_vm7 = vcmask 64512   ;;  %vm6234_vm8 = vmmov 0  }
  0x20   :  { %931 = vmatpush1.bf16.msra.mxu1 %v5322_v32  ;;  %819 = vmatprep.subr.bf16.mxu0 %v5323_v33  ;;  %v5423_v26 = vld [vmem:[%s9730_s1 + $0x28c] ss:$16 sps:$4 sm:$0xff]   ;;  %v5421_v30 = vld [vmem:[%s9730_s1 + $0x288] ss:$16 sps:$4 sm:$0xff]   ;;  %vm4751_vm9 = vcmask 523264  }
  0x21   :  { %1029 = vmatprep.subr.bf16.mxu1 %v5328_v34  ;;  %v5407_v28 = vld [vmem:[%s9730_s1 + $0x16c] ss:$16 sps:$4 sm:$0xff]   ;;  %v6630_v31 = vld [vmem:[%s9731_s0 + $0x98] ss:$12 sps:$4 sm:$0xff]  }
  0x22   :  { %v5405_v32 = vld [vmem:[%s9730_s1 + $0x168] ss:$16 sps:$4 sm:$0xff]   ;;  %v5413_v34 = vld [vmem:[%s9730_s1 + $0x14c] ss:$16 sps:$4 sm:$0xff]  }
  0x23   :  { %949 = vmatmul.mubr.bf16.vlgmr.msra.gmra.mxu1 %v6412_v35  ;;  %820 = vmatpush2.bf16.msra.mxu0 %v5329_v37  ;;  %v6638_v33 = vld [vmem:[%s9731_s0 + $0x4c] ss:$12 sps:$4 sm:$0xff]  }
  0x24   :  { %1030 = vmatpush1.bf16.msra.mxu1 %v5326_v36  ;;  %821 = vmatprep.subr.bf16.mxu0 %v5330_v38  ;;  %v5432_v36 = vld [vmem:[%s9730_s1 + $0x26c] ss:$16 sps:$4 sm:$0xff]   ;;  %v5411_v37 = vld [vmem:[%s9730_s1 + $0x148] ss:$16 sps:$4 sm:$0xff]  }
  0x25   :  { %1031 = vmatprep.subr.bf16.mxu1 %v5334_v39  ;;  %958 = vmatprep.mubr.bf16.mxu1 %v9746_v1  ;;  %v5430_v38 = vld [vmem:[%s9730_s1 + $0x268] ss:$16 sps:$4 sm:$0xff]   ;;  %v5438_v39 = vld [vmem:[%s9730_s1 + $0x24c] ss:$16 sps:$4 sm:$0xff]  }
  0x27   :  { %822 = vmatpush2.bf16.msra.mxu0 %v5335_v41  ;;  %v6665_v41 = vld [vmem:[%s9731_s0 + $0x48] ss:$12 sps:$4 sm:$0xff]  }
  0x28   :  { %1032 = vmatpush1.bf16.msra.mxu1 %v5332_v40  ;;  %823 = vmatprep.subr.bf16.mxu0 %v5336_v42  ;;  %v5420_v40 = vld [vmem:[%s9730_s1 + $0x12c] ss:$16 sps:$4 sm:$0xff]  }
  0x29   :  { %1033 = vmatprep.subr.bf16.mxu1 %v5341_v43  ;;  %v6670_v42 = vld [vmem:[%s9731_s0 + $0xb0] ss:$12 sps:$4 sm:$0xff]   ;;  %v5418_v43 = vld [vmem:[%s9730_s1 + $0x128] ss:$16 sps:$4 sm:$0xff]  }
  0x2b   :  { %959 = vmatmul.mubr.bf16.gmra.mxu1 %v6443_v44  ;;  %824 = vmatpush2.bf16.msra.mxu0 %v5342_v46  ;;  %v5426_v46 = vld [vmem:[%s9730_s1 + $0x10c] ss:$16 sps:$4 sm:$0xff]  }
  0x2c   :  { %1034 = vmatpush1.bf16.msra.mxu1 %v5339_v45  ;;  %825 = vmatprep.subr.bf16.mxu0 %v5343_v47  ;;  %v6678_v45 = vld [vmem:[%s9731_s0 + $0x64] ss:$12 sps:$4 sm:$0xff]   ;;  %v5436_v47 = vld [vmem:[%s9730_s1 + $0x248] ss:$16 sps:$4 sm:$0xff]  }
  0x2d   :  { %1035 = vmatprep.subr.bf16.mxu1 %v5347_v48  ;;  %968 = vmatprep.mubr.bf16.mxu1 %v9746_v1  ;;  %v5444_v48 = vld [vmem:[%s9730_s1 + $0x22c] ss:$16 sps:$4 sm:$0xff]  }
  0x2f   :  { %826 = vmatpush2.bf16.msra.mxu0 %v5348_v50  ;;  %v6699_v50 = vld [vmem:[%s9732_s2 + $0xe4] ss:$16 sps:$4 sm:$0xff]  }
  0x30   :  { %1036 = vmatpush1.bf16.msra.mxu1 %v5345_v49  ;;  %827 = vmatprep.subr.bf16.mxu0 %v5349_v51  ;;  %v5424_v49 = vld [vmem:[%s9730_s1 + $0x108] ss:$16 sps:$4 sm:$0xff]  }
  0x31   :  { %1037 = vmatprep.subr.bf16.mxu1 %v5354_v52  ;;  %v5442_v51 = vld [vmem:[%s9730_s1 + $0x228] ss:$16 sps:$4 sm:$0xff]   ;;  %v6707_v52 = vld [vmem:[%s9731_s0 + $0x60] ss:$12 sps:$4 sm:$0xff]  }
  0x33   :  { %969 = vmatmul.mubr.bf16.gmra.mxu1 %v6474_v53  ;;  %828 = vmatpush2.bf16.msra.mxu0 %v5355_v55  ;;  %v5450_v55 = vld [vmem:[%s9730_s1 + $0x20c] ss:$16 sps:$4 sm:$0xff]  }
  0x34   :  { %1038 = vmatpush1.bf16.msra.mxu1 %v5352_v54  ;;  %829 = vmatprep.subr.bf16.mxu0 %v5356_v57  ;;  %v6712_v54 = vld [vmem:[%s9731_s0 + $0x7c] ss:$12 sps:$4 sm:$0xff]  }
  0x35   :  { %1039 = vmatprep.subr.bf16.mxu1 %v5360_v58  ;;  %978 = vmatprep.mubr.bf16.mxu1 %v9746_v1  ;;  %v5448_v57 = vld [vmem:[%s9730_s1 + $0x208] ss:$16 sps:$4 sm:$0xff]   ;;  %v5457_v58 = vld [vmem:[%s9732_s2 + $0xc4] ss:$16 sps:$4 sm:$0xff]  }
  0x37   :  { %830 = vmatpush2.bf16.msra.mxu0 %v5361_v60  ;;  %v5459_v60 = vld [vmem:[%s9732_s2 + $0xc0] ss:$16 sps:$4 sm:$0xff]  }
  0x38   :  { %1040 = vmatpush1.bf16.msra.mxu1 %v5358_v59  ;;  %831 = vmatprep.subr.bf16.mxu0 %v5362_v61  ;;  %v6732_v59 = vld [vmem:[%s9732_s2 + $0xec] ss:$16 sps:$4 sm:$0xff]   ;;  %v5460_v61 = vld [vmem:[%s9732_s2 + $0xa4] ss:$16 sps:$4 sm:$0xff]  }
  0x39   :  { %1041 = vmatprep.subr.bf16.mxu1 %v5367_v62  ;;  %v5435_v62 = vld [vmem:[%s9731_s0 + $0x78] ss:$12 sps:$4 sm:$0xff]  }
  0x3b   :  { %979 = vmatmul.mubr.bf16.gmra.mxu1 %v6511_v63  ;;  %832 = vmatpush2.bf16.msra.mxu0 %v5368_v2  ;;  %v5464_v2 = vld [vmem:[%s9732_s2 + $0xa0] ss:$16 sps:$4 sm:$0xff]  }
  0x3c   :  { %1042 = vmatpush1.bf16.msra.mxu1 %v5365_v0  ;;  %833 = vmatprep.subr.bf16.mxu0 %v5369_v3  ;;  %v5439_v0 = vld [vmem:[%s9731_s0 + $0x94] ss:$12 sps:$4 sm:$0xff]  }
  0x3d   :  { %1043 = vmatprep.subr.bf16.mxu1 %v5373_v4  ;;  %988 = vmatprep.mubr.bf16.mxu1 %v9746_v1  ;;  %v5466_v3 = vld [vmem:[%s9732_s2 + $0x84] ss:$16 sps:$4 sm:$0xff]   ;;  %v5468_v4 = vld [vmem:[%s9732_s2 + $0x80] ss:$16 sps:$4 sm:$0xff]  }
  0x3f   :  { %834 = vmatpush2.bf16.msra.mxu0 %v5374_v6  ;;  %v5441_v6 = vld [vmem:[%s9731_s0 + $0x90] ss:$12 sps:$4 sm:$0xff]  }
  0x40   :  { %1044 = vmatpush1.bf16.msra.mxu1 %v5371_v5  ;;  %1142 = vmatprep.subr.bf16.mxu0 %v5384_v8  ;;  %v5469_v5 = vld [vmem:[%s9732_s2 + $0x64] ss:$16 sps:$4 sm:$0xff]   ;;  %v5473_v8 = vld [vmem:[%s9732_s2 + $0x60] ss:$16 sps:$4 sm:$0xff]  }
  0x41   :  { %1045 = vmatprep.subr.bf16.mxu1 %v5381_v7  ;;  %v5445_v7 = vld [vmem:[%s9731_s0 + $0xac] ss:$12 sps:$4 sm:$0xff]  }
  0x42   :  { %836 = vmatmul.mubr.bf16.vlgmr.msra.gmra.mxu0 %v6541_v9 }
  0x43   :  { %989 = vmatmul.mubr.bf16.gmra.mxu1 %v6547_v10  ;;  %1143 = vmatpush1.bf16.msra.mxu0 %v5382_v12  ;;  %v5478_v12 = vld [vmem:[%s9732_s2 + $0x24] ss:$16 sps:$4 sm:$0xff]  }
  0x44   :  { %1046 = vmatpush2.bf16.msra.mxu1 %v5379_v11  ;;  %845 = vmatprep.mubr.bf16.mxu0 %v6561_v14  ;;  %v5477_v11 = vld [vmem:[%s9732_s2 + $0x40] ss:$16 sps:$4 sm:$0xff]  }
  0x45   :  { %1047 = vmatprep.subr.bf16.mxu1 %v5387_v13  ;;  %998 = vmatprep.mubr.bf16.mxu1 %v9746_v1  ;;  %v5447_v13 = vld [vmem:[%s9731_s0 + $0xa8] ss:$12 sps:$4 sm:$0xff]  }
  0x46   :  { %1144 = vmatprep.subr.bf16.mxu0 %v5397_v16  ;;  %v5486_v16 = vld [vmem:[%s9732_s2] ss:$16 sps:$4 sm:$0xff]  }
  0x47   :  { %1145 = vmatpush1.bf16.msra.mxu0 %v5395_v18  ;;  %v5462_v18 = vld [vmem:[%s9732_s2 + $0xcc] ss:$16 sps:$4 sm:$0xff]  }
  0x48   :  { %1048 = vmatpush2.bf16.msra.mxu1 %v5385_v15  ;;  %1146 = vmatprep.subr.bf16.mxu0 %v5410_v19  ;;  %v5484_v15 = vld [vmem:[%s9732_s2 + $0x4] ss:$16 sps:$4 sm:$0xff]   ;;  %v5465_v19 = vld [vmem:[%s9732_s2 + $0xc8] ss:$16 sps:$4 sm:$0xff]  }
  0x49   :  { %1049 = vmatprep.subr.bf16.mxu1 %v5394_v17  ;;  %v5456_v17 = vld [vmem:[%s9732_s2 + $0xe8] ss:$16 sps:$4 sm:$0xff]  }
  0x4a   :  { %846 = vmatmul.mubr.bf16.gmra.mxu0 %v6585_v20 }
  0x4b   :  { %999 = vmatmul.mubr.bf16.gmra.mxu1 %v6590_v21  ;;  %855 = vmatprep.mubr.bf16.mxu0 %v6598_v23 }
  0x4c   :  { %1050 = vmatpush2.bf16.msra.mxu1 %v5392_v22  ;;  %1008 = vmatprep.mubr.bf16.mxu1 %v9746_v1  ;;  %v5480_v22 = vld [vmem:[%s9732_s2 + $0x8c] ss:$16 sps:$4 sm:$0xff]  }
  0x4d   :  { %1051 = vmatprep.subr.bf16.mxu1 %v5400_v24  ;;  %1147 = vmatpush1.bf16.msra.mxu0 %v5408_v25  ;;  %v5487_v24 = vld [vmem:[%s9732_s2 + $0x6c] ss:$16 sps:$4 sm:$0xff]   ;;  %v5489_v25 = vld [vmem:[%s9732_s2 + $0x68] ss:$16 sps:$4 sm:$0xff]  }
  0x4e   :  { %1148 = vmatprep.subr.bf16.mxu0 %v5423_v26  ;;  %v5492_v26 = vld [vmem:[%s9732_s2 + $0x48] ss:$16 sps:$4 sm:$0xff]  }
  0x50   :  { %1052 = vmatpush2.bf16.msra.mxu1 %v5398_v27  ;;  %v5493_v27 = vld [vmem:[%s9732_s2 + $0x2c] ss:$16 sps:$4 sm:$0xff]  }
  0x51   :  { %1053 = vmatprep.subr.bf16.mxu1 %v5407_v28  ;;  %1149 = vmatpush1.bf16.msra.mxu0 %v5421_v30  ;;  %v5495_v28 = vld [vmem:[%s9732_s2 + $0x28] ss:$16 sps:$4 sm:$0xff]  }
  0x52   :  { %856 = vmatmul.mubr.bf16.gmra.mxu0 %v6622_v29  ;;  %1150 = vmatprep.subr.bf16.mxu0 %v5432_v36 }
  0x53   :  { %1009 = vmatmul.mubr.bf16.gmra.mxu1 %v6630_v31  ;;  %865 = vmatprep.mubr.bf16.mxu0 %v6638_v33 }
  0x54   :  { %1054 = vmatpush2.bf16.msra.mxu1 %v5405_v32  ;;  %1018 = vmatprep.mubr.bf16.mxu1 %v9746_v1 }
  0x55   :  { %1055 = vmatprep.subr.bf16.mxu1 %v5413_v34  ;;  %1151 = vmatpush1.bf16.msra.mxu0 %v5430_v38  ;;  %v5501_v34 = vld [vmem:[%s9733_s4 + $0xec] ss:$16 sps:$4 sm:$0xff]   ;;  %v5504_v38 = vld [vmem:[%s9733_s4 + $0xe8] ss:$16 sps:$4 sm:$0xff]  }
  0x56   :  { %1152 = vmatprep.subr.bf16.mxu0 %v5438_v39 }
  0x58   :  { %1056 = vmatpush2.bf16.msra.mxu1 %v5411_v37  ;;  %v5503_v37 = vld [vmem:[%s9733_s4 + $0xe0] ss:$16 sps:$4 sm:$0xff]  }
  0x59   :  { %1057 = vmatprep.subr.bf16.mxu1 %v5420_v40  ;;  %1153 = vmatpush1.bf16.msra.mxu0 %v5436_v47  ;;  %v5505_v40 = vld [vmem:[%s9733_s4 + $0xc4] ss:$16 sps:$4 sm:$0xff]  }
  0x5a   :  { %866 = vmatmul.mubr.bf16.gmra.mxu0 %v6665_v41  ;;  %1154 = vmatprep.subr.bf16.mxu0 %v5444_v48  ;;  %v5511_v48 = vld [vmem:[%s9733_s4 + $0xa4] ss:$16 sps:$4 sm:$0xff]  }
  0x5b   :  { %1019 = vmatmul.mubr.bf16.gmra.mxu1 %v6670_v42  ;;  %875 = vmatprep.mubr.bf16.mxu0 %v6678_v45 }
  0x5c   :  { %1058 = vmatpush2.bf16.msra.mxu1 %v5418_v43  ;;  %1061 = vmatprep.mubr.bf16.mxu1 %v6485_v56  ;;  %v5453_v56 = vld [vmem:[%s9732_s2 + $0xe0] ss:$16 sps:$4 sm:$0xff]   ;;  %v5510_v43 = vld [vmem:[%s9733_s4 + $0xc8] ss:$16 sps:$4 sm:$0xff]  }
  0x5d   :  { %1059 = vmatprep.subr.bf16.mxu1 %v5426_v46  ;;  %1155 = vmatpush1.bf16.msra.mxu0 %v5442_v51  ;;  %v175_v46 = vlaneseq  ;;  %v5515_v51 = vld [vmem:[%s9733_s4 + $0xa0] ss:$16 sps:$4 sm:$0xff]  }
  0x5e   :  { %1156 = vmatprep.subr.bf16.mxu0 %v5450_v55 }
  0x5f   :  { %v6924_v55 = vshrl.u32 %v175_v46, 7 }
  0x60   :  { %1060 = vmatpush2.bf16.msra.mxu1 %v5424_v49  ;;  %v5513_v49 = vld [vmem:[%s9733_s4 + $0xac] ss:$16 sps:$4 sm:$0xff]  }
  0x61   :  { %1584 = vmatprep.subr.bf16.mxu1 %v6699_v50  ;;  %1157 = vmatpush1.bf16.msra.mxu0 %v5448_v57  ;;  %10083 = vst [vmem:[#allocation5_spill] sm:$0xff] %v6924_v55  ;;  %v6931_v57 = vld [vmem:[%s9733_s4 + $0x84] ss:$16 sps:$4 sm:$0xff]  }
  0x62   :  { %876 = vmatmul.mubr.bf16.gmra.mxu0 %v6707_v52  ;;  %1627 = vmatprep.subr.bf16.mxu0 %v6732_v59 }
  0x63   :  { %1062 = vmatmul.mubr.bf16.vlgmr.msra.gmra.mxu1 %v6541_v9  ;;  %885 = vmatprep.mubr.bf16.mxu0 %v6712_v54  ;;  %v5475_v9 = vld [vmem:[%s9732_s2 + $0x44] ss:$16 sps:$4 sm:$0xff]  }
  0x64   :  { %1071 = vmatprep.mubr.bf16.mxu1 %v6561_v14  ;;  %1585 = vmatpush1.bf16.msra.mxu1 %v5453_v56  ;;  %v5482_v14 = vld [vmem:[%s9732_s2 + $0x20] ss:$16 sps:$4 sm:$0xff]  }
  0x65   :  { %1586 = vmatprep.subr.bf16.mxu1 %v5457_v58  ;;  %v6936_v58 = vld [vmem:[%s9733_s4 + $0x8c] ss:$16 sps:$4 sm:$0xff]  }
  0x68   :  { %1587 = vmatpush1.bf16.msra.mxu1 %v5459_v60  ;;  %v6941_v60 = vld [vmem:[%s9733_s4 + $0x80] ss:$16 sps:$4 sm:$0xff]  }
  0x69   :  { %1588 = vmatprep.subr.bf16.mxu1 %v5460_v61  ;;  %v6946_v61 = vld [vmem:[%s9733_s4 + $0x88] ss:$16 sps:$4 sm:$0xff]  }
  0x6a   :  { %886 = vmatmul.mubr.bf16.gmra.mxu0 %v5435_v62 }
  0x6b   :  { %1072 = vmatmul.mubr.bf16.gmra.mxu1 %v6585_v20  ;;  %895 = vmatprep.mubr.bf16.mxu0 %v5439_v0  ;;  %v5471_v20 = vld [vmem:[%s9732_s2 + $0xac] ss:$16 sps:$4 sm:$0xff]  }
  0x6c   :  { %1081 = vmatprep.mubr.bf16.mxu1 %v6598_v23  ;;  %1589 = vmatpush1.bf16.msra.mxu1 %v5464_v2  ;;  %v5483_v23 = vld [vmem:[%s9732_s2 + $0x88] ss:$16 sps:$4 sm:$0xff]   ;;  %v9745_v2 = vsub.s32 0, %v6924_v55 }
  0x6d   :  { %1590 = vmatprep.subr.bf16.mxu1 %v5466_v3 }
  0x70   :  { %1591 = vmatpush1.bf16.msra.mxu1 %v5468_v4  ;;  %v6965_v4 = vld [vmem:[%s9733_s4 + $0x64] ss:$16 sps:$4 sm:$0xff]  }
  0x71   :  { %1592 = vmatprep.subr.bf16.mxu1 %v5469_v5  ;;  %v6970_v5 = vld [vmem:[%s9733_s4 + $0x6c] ss:$16 sps:$4 sm:$0xff]  }
  0x72   :  { %896 = vmatmul.mubr.bf16.gmra.mxu0 %v5441_v6 }
  0x73   :  { %1082 = vmatmul.mubr.bf16.gmra.mxu1 %v6622_v29  ;;  %905 = vmatprep.mubr.bf16.mxu0 %v5445_v7  ;;  %v5498_v29 = vld [vmem:[%s9732_s2 + $0x8] ss:$16 sps:$4 sm:$0xff]  }
  0x74   :  { %1091 = vmatprep.mubr.bf16.mxu1 %v6638_v33  ;;  %1593 = vmatpush1.bf16.msra.mxu1 %v5473_v8  ;;  %v5499_v33 = vld [vmem:[%s9733_s4 + $0xe4] ss:$16 sps:$4 sm:$0xff]   ;;  %v6981_v8 = vld [vmem:[%s9733_s4 + $0x68] ss:$16 sps:$4 sm:$0xff]  }
  0x75   :  { %1594 = vmatprep.subr.bf16.mxu1 %v5475_v9 }
  0x78   :  { %1595 = vmatpush1.bf16.msra.mxu1 %v5477_v11 }
  0x79   :  { %1596 = vmatprep.subr.bf16.mxu1 %v5478_v12 }
  0x7a   :  { %906 = vmatmul.mubr.bf16.gmra.mxu0 %v5447_v13 }
  0x7b   :  { %1092 = vmatmul.mubr.bf16.gmra.mxu1 %v6665_v41  ;;  %1174 = vmatprep.mubr.bf16.mxu0 %v9746_v1  ;;  %v5507_v41 = vld [vmem:[%s9733_s4 + $0xcc] ss:$16 sps:$4 sm:$0xff]  }
  0x7c   :  { %1101 = vmatprep.mubr.bf16.mxu1 %v6678_v45  ;;  %1597 = vmatpush1.bf16.msra.mxu1 %v5482_v14  ;;  %v7004_v14 = vld [vmem:[%s9733_s4 + $0x4c] ss:$16 sps:$4 sm:$0xff]  }
  0x7d   :  { %1598 = vmatprep.subr.bf16.mxu1 %v5484_v15 }
  0x80   :  { %1599 = vmatpush1.bf16.msra.mxu1 %v5486_v16  ;;  %v7014_v16 = vld [vmem:[%s9733_s4 + $0x40] ss:$16 sps:$4 sm:$0xff]  }
  0x81   :  { %2056 = vmatprep.subr.bf16.mxu1 %v5499_v33 }
  0x82   :  { %1175 = vmatmul.mubr.bf16.vlgmr.msra.gmra.mxu0 %v6412_v35  ;;  %v5474_v35 = vld [vmem:[%s9732_s2 + $0xa8] ss:$16 sps:$4 sm:$0xff]  }
  0x83   :  { %1102 = vmatmul.mubr.bf16.gmra.mxu1 %v6707_v52  ;;  %1628 = vmatpush1.bf16.msra.mxu0 %v5456_v17  ;;  %v5516_v52 = vld [vmem:[%s9733_s4 + $0xa8] ss:$16 sps:$4 sm:$0xff]  }
  0x84   :  { %1111 = vmatprep.mubr.bf16.mxu1 %v6712_v54  ;;  %1184 = vmatprep.mubr.bf16.mxu0 %v9746_v1  ;;  %v7019_v17 = vld [vmem:[%s9733_s4 + $0x48] ss:$16 sps:$4 sm:$0xff]  }
  0x85   :  { %1629 = vmatprep.subr.bf16.mxu0 %v5462_v18 }
  0x87   :  { %1630 = vmatpush1.bf16.msra.mxu0 %v5465_v19 }
  0x88   :  { %1631 = vmatprep.subr.bf16.mxu0 %v5471_v20 }
  0x8a   :  { %1185 = vmatmul.mubr.bf16.gmra.mxu0 %v6443_v44  ;;  %v5490_v44 = vld [vmem:[%s9732_s2 + $0x4c] ss:$16 sps:$4 sm:$0xff]  }
  0x8b   :  { %1112 = vmatmul.mubr.bf16.gmra.mxu1 %v5435_v62  ;;  %1194 = vmatprep.mubr.bf16.mxu0 %v9746_v1 }
  0x8c   :  { %1121 = vmatprep.mubr.bf16.mxu1 %v5439_v0  ;;  %1632 = vmatpush1.bf16.msra.mxu0 %v5474_v35  ;;  %v6953_v0 = vld [vmem:[%s9734_s3] sm:$0xf] }
  0x8d   :  { %1633 = vmatprep.subr.bf16.mxu0 %v5480_v22  ;;  %v6990_v11 = vrot.slane %v6953_v0, %v9745_v2  ;;  %v7156_v2 = vld [vmem:[%s9733_s4 + $0x1c0] ss:$16 sps:$4 sm:$0xff]  }
  0x8e   :  { %10098 = vst [vmem:[#allocation20_spill] sm:$0xff] %v7156_v2 }
  0x90   :  { %1634 = vmatpush1.bf16.msra.mxu0 %v5483_v23 }
  0x91   :  { %1635 = vmatprep.subr.bf16.mxu0 %v5487_v24 }
  0x92   :  { %1195 = vmatmul.mubr.bf16.gmra.mxu0 %v6474_v53  ;;  %v5496_v53 = vld [vmem:[%s9732_s2 + $0xc] ss:$16 sps:$4 sm:$0xff]  }
  0x93   :  { %1122 = vmatmul.mubr.bf16.gmra.mxu1 %v5441_v6  ;;  %1204 = vmatprep.mubr.bf16.mxu0 %v9746_v1  ;;  %v9744_v6 = vsub.s32 1, %v6924_v55 }
  0x94   :  { %1131 = vmatprep.mubr.bf16.mxu1 %v5445_v7  ;;  %1636 = vmatpush1.bf16.msra.mxu0 %v5489_v25  ;;  %v6976_v7 = vld [vmem:[%s9733_s4 + $0x60] ss:$16 sps:$4 sm:$0xff]   ;;  %v7037_v25 = vld [vmem:[%s9733_s4 + $0x24] ss:$16 sps:$4 sm:$0xff]  }
  0x95   :  { %1637 = vmatprep.subr.bf16.mxu0 %v5490_v44  ;;  %v7009_v15 = vrot.slane %v6953_v0, %v9744_v6  ;;  %v7042_v44 = vld [vmem:[%s9733_s4 + $0x2c] ss:$16 sps:$4 sm:$0xff]  }
  0x97   :  { %10086 = vst [vmem:[#allocation8_spill] sm:$0xff] %v7009_v15 }
  0x98   :  { %1638 = vmatpush1.bf16.msra.mxu0 %v5492_v26 }
  0x99   :  { %1639 = vmatprep.subr.bf16.mxu0 %v5493_v27 }
  0x9a   :  { %1205 = vmatmul.mubr.bf16.gmra.mxu0 %v6511_v63 }
  0x9b   :  { %1132 = vmatmul.mubr.bf16.gmra.mxu1 %v5447_v13  ;;  %1214 = vmatprep.mubr.bf16.mxu0 %v9746_v1  ;;  %v6999_v13 = vld [vmem:[%s9733_s4 + $0x44] ss:$16 sps:$4 sm:$0xff]  }
  0x9c   :  { %1616 = vmatprep.mubr.bf16.mxu1 %v9746_v1  ;;  %1640 = vmatpush1.bf16.msra.mxu0 %v5495_v28  ;;  %v7049_v28 = vld [vmem:[%s9733_s4 + $0x20] ss:$16 sps:$4 sm:$0xff]  }
  0x9d   :  { %1641 = vmatprep.subr.bf16.mxu0 %v5496_v53  ;;  %v7054_v53 = vld [vmem:[%s9733_s4 + $0x28] ss:$16 sps:$4 sm:$0xff]  }
  0xa0   :  { %1642 = vmatpush1.bf16.msra.mxu0 %v5498_v29 }
  0xa1   :  { %2099 = vmatprep.subr.bf16.mxu0 %v5501_v34 }
  0xa2   :  { %1215 = vmatmul.mubr.bf16.gmra.mxu0 %v6547_v10 }
  0xa3   :  { %1617 = vmatmul.mubr.bf16.vlgmr.msra.gmra.mxu1 %v9746_v1  ;;  %1224 = vmatprep.mubr.bf16.mxu0 %v9746_v1 }
  0xa4   :  { %2088 = vmatprep.mubr.bf16.mxu1 %v9746_v1  ;;  %2057 = vmatpush1.bf16.msra.mxu1 %v5503_v37 }
  0xa5   :  { %2058 = vmatprep.subr.bf16.mxu1 %v5505_v40 }
  0xaa   :  { %1225 = vmatmul.mubr.bf16.gmra.mxu0 %v6590_v21 }
  0xab   :  { %1234 = vmatprep.mubr.bf16.mxu0 %v9746_v1 }
  0xb2   :  { %1235 = vmatmul.mubr.bf16.gmra.mxu0 %v6630_v31 }
  0xb3   :  { %1244 = vmatprep.mubr.bf16.mxu0 %v9746_v1 }
  0xba   :  { %1245 = vmatmul.mubr.bf16.gmra.mxu0 %v6670_v42  ;;  %v5509_v42 = vld [vmem:[%s9733_s4 + $0xc0] ss:$16 sps:$4 sm:$0xff]  }
  0xbb   :  { %1659 = vmatprep.mubr.bf16.mxu0 %v9746_v1  ;;  %2059 = vmatpush1.bf16.msra.mxu1 %v5509_v42  ;;  %v7086_v42 = vld [vmem:[%s9733_s4] ss:$16 sps:$4 sm:$0xff]  }
  0xbc   :  { %2060 = vmatprep.subr.bf16.mxu1 %v5511_v48 }
  0xbf   :  { %2061 = vmatpush1.bf16.msra.mxu1 %v5515_v51  ;;  %v7104_v51 = vld [vmem:[%s9733_s4 + $0x1e4] ss:$16 sps:$4 sm:$0xff]  }
  0xc0   :  { %2062 = vmatprep.subr.bf16.mxu1 %v6931_v57 }
  0xc2   :  { %1660 = vmatmul.mubr.bf16.vlgmr.msra.gmra.mxu0 %v9746_v1 }
  0xc3   :  { %2131 = vmatprep.mubr.bf16.mxu0 %v9746_v1  ;;  %2100 = vmatpush1.bf16.msra.mxu0 %v5504_v38  ;;  %v7079_v38 = vld [vmem:[%s9733_s4 + $0xc] ss:$16 sps:$4 sm:$0xff]   ;;  %v7161_v1 = vld [vmem:[%s9733_s4 + $0x1c8] ss:$16 sps:$4 sm:$0xff]  }
  0xc4   :  { %2101 = vmatprep.subr.bf16.mxu0 %v5507_v41  ;;  %2063 = vmatpush1.bf16.msra.mxu1 %v6941_v60  ;;  %10099 = vst [vmem:[#allocation21_spill] sm:$0xff] %v7161_v1 }
  0xc5   :  { %2064 = vmatprep.subr.bf16.mxu1 %v6965_v4 }
  0xc7   :  { %2102 = vmatpush1.bf16.msra.mxu0 %v5510_v43 }
  0xc8   :  { %2103 = vmatprep.subr.bf16.mxu0 %v5513_v49  ;;  %2065 = vmatpush1.bf16.msra.mxu1 %v6976_v7 }
  0xc9   :  { %2066 = vmatprep.subr.bf16.mxu1 %v6999_v13 }
  0xcb   :  { %2104 = vmatpush1.bf16.msra.mxu0 %v5516_v52  ;;  %v7109_v52 = vld [vmem:[%s9733_s4 + $0x1ec] ss:$16 sps:$4 sm:$0xff]  }
  0xcc   :  { %2105 = vmatprep.subr.bf16.mxu0 %v6936_v58  ;;  %2067 = vmatpush1.bf16.msra.mxu1 %v7014_v16  ;;  %10088 = vst [vmem:[#allocation10_spill] sm:$0xff] %v7109_v52 }
  0xcd   :  { %2068 = vmatprep.subr.bf16.mxu1 %v7037_v25 }
  0xcf   :  { %2106 = vmatpush1.bf16.msra.mxu0 %v6946_v61 }
  0xd0   :  { %2107 = vmatprep.subr.bf16.mxu0 %v6970_v5  ;;  %2069 = vmatpush1.bf16.msra.mxu1 %v7049_v28 }
  0xd3   :  { %2108 = vmatpush1.bf16.msra.mxu0 %v6981_v8 }
  0xd4   :  { %2109 = vmatprep.subr.bf16.mxu0 %v7004_v14 }
  0xd7   :  { %2110 = vmatpush1.bf16.msra.mxu0 %v7019_v17 }
  0xd8   :  { %2111 = vmatprep.subr.bf16.mxu0 %v7042_v44 }
  0xdb   :  { %2112 = vmatpush1.bf16.msra.mxu0 %v7054_v53 }
  0xdc   :  { %2113 = vmatprep.subr.bf16.mxu0 %v7079_v38 }
  0xe3   :  { %v6866_v63 = vpop.f32.mrf.mxu1 }
  0xe5   :  { %v6868_v10 = vpop.f32.mrf.mxu1 }
  0xe7   :  { %v6870_v30 = vpop.f32.mrf.mxu1 }
  0xe9   :  { %v6872_v21 = vpop.f32.mrf.mxu1 }
  0xeb   :  { %v6874_v32 = vpop.f32.mrf.mxu1 }
  0xed   :  { %v6876_v31 = vpop.f32.mrf.mxu1 }
  0xef   :  { %v6884_v36 = vpop.f32.mrf.mxu1 }
  0xf1   :  { %v6892_v39 = vpop.f32.mrf.mxu1 }
  0xf2   :  { %10082 = vst [vmem:[#allocation4_spill] sm:$0xff] %v6892_v39 }
  0xf3   :  { %v6906_v45 = vpop.f32.mrf.mxu1 }
  0xf5   :  { %v6908_v47 = vpop.f32.mrf.mxu1 }
  0xf7   :  { %v6922_v54 = vpop.f32.mrf.mxu1 }
  0xf9   :  { %v6926_v56 = vpop.f32.mrf.mxu1 }
  0xfa   :  { %10084 = vst [vmem:[#allocation6_spill] sm:$0xff] %v6926_v56 }
  0xfb   :  { %v6948_v62 = vpop.f32.mrf.mxu1 }
  0xfd   :  { %v6958_v3 = vpop.f32.mrf.mxu1 }
  0xff   :  { %v6983_v9 = vpop.f32.mrf.mxu1 }
 0x101   :  { %v6992_v12 = vpop.f32.mrf.mxu1 }
 0x102   :  { %10085 = vst [vmem:[#allocation7_spill] sm:$0xff] %v6992_v12  ;;  %v837_v18 = vpop.f32.mrf.mxu0  ;;  %v7174_v12 = vld [vmem:[%s9733_s4 + $0x1a4] ss:$16 sps:$4 sm:$0xff]  }
 0x103   :  { %v7021_v19 = vpop.f32.mrf.mxu1  ;;  %v838_v20 = vadd.f32 %v837_v18, %v6990_v11  ;;  %10100 = vst [vmem:[#allocation22_spill] sm:$0xff] %v7174_v12 }
 0x104   :  { %v839_v35 = vpop.f32.mrf.mxu0 }
 0x105   :  { %v7026_v22 = vpop.f32.mrf.mxu1  ;;  %v840_v23 = vadd.f32 %v839_v35, %v7009_v15  ;;  %v7032_v24 = vadd.f32 %v6866_v63, %v838_v20 }
 0x106   :  { %v841_v26 = vpop.f32.mrf.mxu0 }
 0x107   :  { %v7044_v27 = vpop.f32.mrf.mxu1  ;;  %v842_v29 = vadd.f32 %v841_v26, %v6990_v11  ;;  %v7058_v63 = vadd.f32 %v6868_v10, %v840_v23  ;;  %v7074_v10 = vld [vmem:[%s9733_s4 + $0x4] ss:$16 sps:$4 sm:$0xff]   ;;  %v7119_v23 = vld [vmem:[%s9733_s4 + $0x1e0] ss:$16 sps:$4 sm:$0xff]   ;;  %v7124_v26 = vld [vmem:[%s9733_s4 + $0x1e8] ss:$16 sps:$4 sm:$0xff]  }
 0x108   :  { %v7062_v33 = vpop.f32.mrf.mxu0  ;;  %2070 = vmatprep.subr.bf16.mxu1 %v7074_v10  ;;  %10090 = vst [vmem:[#allocation12_spill] sm:$0xff] %v7119_v23  ;;  %10091 = vst [vmem:[#allocation13_spill] sm:$0xff] %v7124_v26 }
 0x109   :  { %v7064_v34 = vpop.f32.mrf.mxu1  ;;  %v7069_v37 = vadd.f32 %v6870_v30, %v842_v29  ;;  %v7091_v30 = vld [vmem:[%s9733_s4 + $0x8] ss:$16 sps:$4 sm:$0xff]   ;;  %2071 = vmatpush1.bf16.msra.mxu1 %v7086_v42 }
 0x10a   :  { %10087 = vst [vmem:[#allocation9_spill] sm:$0xff] %v7064_v34  ;;  %v847_v40 = vpop.f32.mrf.mxu0  ;;  %2114 = vmatpush1.bf16.msra.mxu0 %v7091_v30  ;;  %2072 = vmatprep.subr.bf16.mxu1 %v7104_v51 }
 0x10b   :  { %v7081_v41 = vpop.f32.mrf.mxu1  ;;  %v848_v43 = vadd.f32 %v847_v40, %v6990_v11  ;;  %2115 = vmatprep.subr.bf16.mxu0 %v7109_v52 }
 0x10c   :  { %v849_v46 = vpop.f32.mrf.mxu0 }
 0x10d   :  { %v7096_v48 = vpop.f32.mrf.mxu1  ;;  %v850_v49 = vadd.f32 %v849_v46, %v7009_v15  ;;  %v7112_v18 = vadd.f32 %v6874_v32, %v848_v43  ;;  %2073 = vmatpush2.bf16.msra.mxu1 %v7119_v23  ;;  %v7141_v46 = vld [vmem:[%s9733_s4 + $0x1c4] ss:$16 sps:$4 sm:$0xff]  }
 0x10e   :  { %v851_v20 = vpop.f32.mrf.mxu0  ;;  %2116 = vmatpush2.bf16.msra.mxu0 %v7124_v26  ;;  %10095 = vst [vmem:[#allocation17_spill] sm:$0xff] %v7141_v46  ;;  %2074 = vmatprep.subr.bf16.mxu1 %v7141_v46 }
 0x10f   :  { %10089 = vst [vmem:[#allocation11_spill] sm:$0xff] %v7112_v18  ;;  %v7114_v35 = vpop.f32.mrf.mxu1  ;;  %v852_v29 = vadd.f32 %v851_v20, %v6990_v11  ;;  %v7130_v32 = vadd.f32 %v6876_v31, %v850_v49  ;;  %v7146_v20 = vld [vmem:[%s9733_s4 + $0x1cc] ss:$16 sps:$4 sm:$0xff]  }
 0x110   :  { %v7132_v40 = vpop.f32.mrf.mxu0  ;;  %10096 = vst [vmem:[#allocation18_spill] sm:$0xff] %v7146_v20  ;;  %2117 = vmatprep.subr.bf16.mxu0 %v7146_v20 }
 0x111   :  { %10092 = vst [vmem:[#allocation14_spill] sm:$0xff] %v7130_v32  ;;  %10093 = vst [vmem:[#allocation15_spill] sm:$0xff] %v7132_v40  ;;  %v7134_v43 = vpop.f32.mrf.mxu1  ;;  %v7149_v31 = vadd.f32 %v6884_v36, %v852_v29  ;;  %2075 = vmatpush2.bf16.msra.mxu1 %v7156_v2  ;;  %v7194_v32 = vld [vmem:[%s9733_s4 + $0x1a8] ss:$16 sps:$4 sm:$0xff]   ;;  %v7211_v40 = vld [vmem:[%s9733_s4 + $0x184] ss:$16 sps:$4 sm:$0xff]  }
 0x112   :  { %10094 = vst [vmem:[#allocation16_spill] sm:$0xff] %v7134_v43  ;;  %v857_v49 = vpop.f32.mrf.mxu0  ;;  %2118 = vmatpush2.bf16.msra.mxu0 %v7161_v1  ;;  %10104 = vst [vmem:[#allocation26_spill] sm:$0xff] %v7194_v32  ;;  %2076 = vmatprep.subr.bf16.mxu1 %v7174_v12 }
 0x113   :  { %10097 = vst [vmem:[#allocation19_spill] sm:$0xff] %v7149_v31  ;;  %v7151_v6 = vpop.f32.mrf.mxu1  ;;  %v858_v43 = vadd.f32 %v857_v49, %v6990_v11  ;;  %v7179_v49 = vld [vmem:[%s9733_s4 + $0x1ac] ss:$16 sps:$4 sm:$0xff]   ;;  %10108 = vst [vmem:[#allocation30_spill] sm:$0xff] %v7211_v40 }
 0x114   :  { %v859_v36 = vpop.f32.mrf.mxu0  ;;  %10101 = vst [vmem:[#allocation23_spill] sm:$0xff] %v7179_v49  ;;  %2119 = vmatprep.subr.bf16.mxu0 %v7179_v49 }
 0x115   :  { %v7166_v29 = vpop.f32.mrf.mxu1  ;;  %v860_v34 = vadd.f32 %v859_v36, %v7009_v15  ;;  %v7182_v56 = vadd.f32 %v6906_v45, %v858_v43  ;;  %v7189_v36 = vld [vmem:[%s9733_s4 + $0x1a0] ss:$16 sps:$4 sm:$0xff]  }
 0x116   :  { %v861_v39 = vpop.f32.mrf.mxu0  ;;  %10103 = vst [vmem:[#allocation25_spill] sm:$0xff] %v7189_v36  ;;  %2077 = vmatpush2.bf16.msra.mxu1 %v7189_v36  ;;  %2120 = vmatpush2.bf16.msra.mxu0 %v7194_v32  ;;  %v7244_v36 = vld [vmem:[%s9733_s4 + $0x164] ss:$16 sps:$4 sm:$0xff]  }
 0x117   :  { %10102 = vst [vmem:[#allocation24_spill] sm:$0xff] %v7182_v56  ;;  %v7184_v31 = vpop.f32.mrf.mxu1  ;;  %v862_v18 = vadd.f32 %v861_v39, %v6990_v11  ;;  %v7200_v45 = vadd.f32 %v6908_v47, %v860_v34  ;;  %v7216_v39 = vld [vmem:[%s9733_s4 + $0x18c] ss:$16 sps:$4 sm:$0xff]   ;;  %2078 = vmatprep.subr.bf16.mxu1 %v7211_v40  ;;  %10113 = vst [vmem:[#allocation35_spill] sm:$0xff] %v7244_v36 }
 0x118   :  { %v7202_v43 = vpop.f32.mrf.mxu0  ;;  %10109 = vst [vmem:[#allocation31_spill] sm:$0xff] %v7216_v39  ;;  %2121 = vmatprep.subr.bf16.mxu0 %v7216_v39 }
 0x119   :  { %10105 = vst [vmem:[#allocation27_spill] sm:$0xff] %v7200_v45  ;;  %10106 = vst [vmem:[#allocation28_spill] sm:$0xff] %v7202_v43  ;;  %v7204_v56 = vpop.f32.mrf.mxu1  ;;  %v7219_v47 = vadd.f32 %v6922_v54, %v862_v18  ;;  %v7231_v43 = vld [vmem:[%s9733_s4 + $0x188] ss:$16 sps:$4 sm:$0xff]  }
 0x11a   :  { %10107 = vst [vmem:[#allocation29_spill] sm:$0xff] %v7204_v56  ;;  %v867_v34 = vpop.f32.mrf.mxu0  ;;  %v7226_v56 = vld [vmem:[%s9733_s4 + $0x180] ss:$16 sps:$4 sm:$0xff]   ;;  %10112 = vst [vmem:[#allocation34_spill] sm:$0xff] %v7231_v43  ;;  %2122 = vmatpush2.bf16.msra.mxu0 %v7231_v43  ;;  %v7264_v43 = vld [vmem:[%s9733_s4 + $0x168] ss:$16 sps:$4 sm:$0xff]  }
 0x11b   :  { %10110 = vst [vmem:[#allocation32_spill] sm:$0xff] %v7219_v47  ;;  %v7221_v45 = vpop.f32.mrf.mxu1  ;;  %10111 = vst [vmem:[#allocation33_spill] sm:$0xff] %v7226_v56  ;;  %v868_v32 = vadd.f32 %v867_v34, %v6990_v11  ;;  %2079 = vmatpush2.bf16.msra.mxu1 %v7226_v56  ;;  %v7249_v34 = vld [vmem:[%s9733_s4 + $0x16c] ss:$16 sps:$4 sm:$0xff]   ;;  %v7269_v56 = vld [vmem:[%s9733_s4 + $0x144] ss:$16 sps:$4 sm:$0xff]  }
 0x11c   :  { %v869_v54 = vpop.f32.mrf.mxu0  ;;  %10114 = vst [vmem:[#allocation36_spill] sm:$0xff] %v7249_v34  ;;  %10117 = vst [vmem:[#allocation39_spill] sm:$0xff] %v7264_v43  ;;  %2080 = vmatprep.subr.bf16.mxu1 %v7244_v36  ;;  %2123 = vmatprep.subr.bf16.mxu0 %v7249_v34  ;;  %v7296_v34 = vld [vmem:[%s9733_s4 + $0x148] ss:$16 sps:$4 sm:$0xff]  }
 0x11d   :  { %v7236_v18 = vpop.f32.mrf.mxu1  ;;  %v870_v47 = vadd.f32 %v869_v54, %v7009_v15  ;;  %v7252_v39 = vadd.f32 %v6948_v62, %v868_v32  ;;  %v7259_v54 = vld [vmem:[%s9733_s4 + $0x160] ss:$16 sps:$4 sm:$0xff]   ;;  %10118 = vst [vmem:[#allocation40_spill] sm:$0xff] %v7269_v56  ;;  %v7277_v32 = vld [vmem:[%s9733_s4 + $0x14c] ss:$16 sps:$4 sm:$0xff]   ;;  %10124 = vst [vmem:[#allocation46_spill] sm:$0xff] %v7296_v34 }
 0x11e   :  { %v871_v40 = vpop.f32.mrf.mxu0  ;;  %10116 = vst [vmem:[#allocation38_spill] sm:$0xff] %v7259_v54  ;;  %10119 = vst [vmem:[#allocation41_spill] sm:$0xff] %v7277_v32  ;;  %2124 = vmatpush2.bf16.msra.mxu0 %v7264_v43 }
 0x11f   :  { %10115 = vst [vmem:[#allocation37_spill] sm:$0xff] %v7252_v39  ;;  %v7254_v49 = vpop.f32.mrf.mxu1  ;;  %v872_v62 = vadd.f32 %v871_v40, %v6990_v11  ;;  %v7280_v39 = vadd.f32 %v6958_v3, %v870_v47  ;;  %2081 = vmatpush2.bf16.msra.mxu1 %v7259_v54  ;;  %v7291_v40 = vld [vmem:[%s9733_s4 + $0x140] ss:$16 sps:$4 sm:$0xff]   ;;  %2125 = vmatprep.subr.bf16.mxu0 %v7277_v32  ;;  %v7303_v3 = vld [vmem:[%s9733_s4 + $0x124] ss:$16 sps:$4 sm:$0xff]  }
 0x120   :  { %v7282_v12 = vpop.f32.mrf.mxu0  ;;  %10123 = vst [vmem:[#allocation45_spill] sm:$0xff] %v7291_v40  ;;  %2082 = vmatprep.subr.bf16.mxu1 %v7269_v56  ;;  %10125 = vst [vmem:[#allocation47_spill] sm:$0xff] %v7303_v3  ;;  %v7308_v47 = vld [vmem:[%s9733_s4 + $0x12c] ss:$16 sps:$4 sm:$0xff]   ;;  %v7323_v54 = vld [vmem:[%s9733_s4 + $0x120] ss:$16 sps:$4 sm:$0xff]  }
 0x121   :  { %10120 = vst [vmem:[#allocation42_spill] sm:$0xff] %v7280_v39  ;;  %10121 = vst [vmem:[#allocation43_spill] sm:$0xff] %v7282_v12  ;;  %v7284_v1 = vpop.f32.mrf.mxu1 }
 0x122   :  { %10122 = vst [vmem:[#allocation44_spill] sm:$0xff] %v7284_v1  ;;  %10126 = vst [vmem:[#allocation48_spill] sm:$0xff] %v7308_v47  ;;  %v7311_v1 = vadd.f32 %v6983_v9, %v872_v62  ;;  %v877_v39 = vpop.f32.mrf.mxu0  ;;  %2126 = vmatpush2.bf16.msra.mxu0 %v7296_v34  ;;  %v7328_v9 = vld [vmem:[%s9733_s4 + $0x128] ss:$16 sps:$4 sm:$0xff]   ;;  %v7342_v34 = vld [vmem:[%s9733_s4 + $0x10c] ss:$16 sps:$4 sm:$0xff]  }
 0x123   :  { %v7313_v12 = vpop.f32.mrf.mxu1  ;;  %v878_v56 = vadd.f32 %v877_v39, %v6990_v11  ;;  %2083 = vmatpush2.bf16.msra.mxu1 %v7291_v40  ;;  %10128 = vst [vmem:[#allocation50_spill] sm:$0xff] %v7323_v54  ;;  %10129 = vst [vmem:[#allocation51_spill] sm:$0xff] %v7328_v9  ;;  %2127 = vmatprep.subr.bf16.mxu0 %v7308_v47 }
 0x124   :  { %10127 = vst [vmem:[#allocation49_spill] sm:$0xff] %v7311_v1  ;;  %v879_v43 = vpop.f32.mrf.mxu0  ;;  %2084 = vmatprep.subr.bf16.mxu1 %v7303_v3  ;;  %v7337_v1 = vld [vmem:[%s9733_s4 + $0x104] ss:$16 sps:$4 sm:$0xff]   ;;  %10131 = vst [vmem:[#allocation53_spill] sm:$0xff] %v7342_v34 }
 0x125   :  { %v7316_v32 = vpop.f32.mrf.mxu1  ;;  %v880_v39 = vadd.f32 %v879_v43, %v7009_v15  ;;  %10130 = vst [vmem:[#allocation52_spill] sm:$0xff] %v7337_v1  ;;  %v7345_v40 = vadd.f32 %v7021_v19, %v878_v56  ;;  %v7363_v56 = vld [vmem:[%s9733_s4 + $0x100] ss:$16 sps:$4 sm:$0xff]   ;;  %v7368_v19 = vld [vmem:[%s9733_s4 + $0x108] ss:$16 sps:$4 sm:$0xff]  }
 0x126   :  { %v881_v62 = vpop.f32.mrf.mxu0  ;;  %2128 = vmatpush2.bf16.msra.mxu0 %v7328_v9  ;;  %10135 = vst [vmem:[#allocation57_spill] sm:$0xff] %v7363_v56  ;;  %10136 = vst [vmem:[#allocation58_spill] sm:$0xff] %v7368_v19 }
 0x127   :  { %10132 = vst [vmem:[#allocation54_spill] sm:$0xff] %v7345_v40  ;;  %v7347_v36 = vpop.f32.mrf.mxu1  ;;  %v882_v47 = vadd.f32 %v881_v62, %v6990_v11  ;;  %v7352_v3 = vadd.f32 %v7026_v22, %v880_v39  ;;  %2085 = vmatpush2.bf16.msra.mxu1 %v7323_v54  ;;  %v10137_v22 = vsub.s32 2, %v6924_v55  ;;  %2129 = vmatprep.subr.bf16.mxu0 %v7342_v34  ;;  %v10139_v40 = vsub.s32 3, %v6924_v55 }
 0x128   :  { %v7354_v2 = vpop.f32.mrf.mxu0  ;;  %2086 = vmatprep.subr.bf16.mxu1 %v7337_v1 }
 0x129   :  { %10133 = vst [vmem:[#allocation55_spill] sm:$0xff] %v7352_v3  ;;  %10134 = vst [vmem:[#allocation56_spill] sm:$0xff] %v7354_v2  ;;  %v7356_v20 = vpop.f32.mrf.mxu1  ;;  %v7373_v62 = vrot.slane %v6953_v0, %v10137_v22  ;;  %v7378_v39 = vadd.f32 %v7044_v27, %v882_v47  ;;  %v7383_v2 = vrot.slane %v6953_v0, %v10139_v40 }
 0x12a   :  { %v887_v43 = vpop.f32.mrf.mxu0  ;;  %2130 = vmatpush2.bf16.msra.mxu0 %v7368_v19 }
 0x12b   :  { %10138 = vst [vmem:[#allocation59_spill] sm:$0xff] %v7378_v39  ;;  %v1073_v3 = vpop.f32.mrf.mxu1  ;;  %v888_v9 = vadd.f32 %v887_v43, %v6990_v11  ;;  %2087 = vmatpush2.bf16.msra.mxu1 %v7363_v56  ;;  %2240 = vmatprep.subr.bf16.mxu0 %v6732_v59 }
 0x12c   :  { %v7387_v54 = vadd.f32 %v1073_v3, %v7373_v62  ;;  %v889_v22 = vpop.f32.mrf.mxu0  ;;  %2197 = vmatprep.subr.bf16.mxu1 %v6699_v50 }
 0x12d   :  { %v1075_v46 = vpop.f32.mrf.mxu1  ;;  %v890_v27 = vadd.f32 %v889_v22, %v7009_v15  ;;  %v7398_v0 = vadd.f32 %v7081_v41, %v888_v9 }
 0x12e   :  { %v7393_v47 = vadd.f32 %v1075_v46, %v7383_v2  ;;  %v891_v40 = vpop.f32.mrf.mxu0 }
 0x12f   :  { %10140 = vst [vmem:[#allocation60_spill] sm:$0xff] %v7398_v0  ;;  %v1077_v3 = vpop.f32.mrf.mxu1  ;;  %v892_v43 = vadd.f32 %v891_v40, %v6990_v11  ;;  %v7405_v55 = vadd.f32 %v7096_v48, %v890_v27 }
 0x130   :  { %v7402_v39 = vadd.f32 %v1077_v3, %v7373_v62  ;;  %v893_v22 = vpop.f32.mrf.mxu0 }
 0x131   :  { %10141 = vst [vmem:[#allocation61_spill] sm:$0xff] %v7405_v55  ;;  %v1079_v46 = vpop.f32.mrf.mxu1  ;;  %v7408_v19 = vadd.f32 %v893_v22, %v7009_v15  ;;  %v7414_v59 = vadd.f32 %v7114_v35, %v892_v43 }
 0x132   :  { %v7411_v50 = vadd.f32 %v1079_v46, %v7383_v2  ;;  %v897_v41 = vpop.f32.mrf.mxu0 }
 0x133   :  { %10142 = vst [vmem:[#allocation62_spill] sm:$0xff] %v7408_v19  ;;  %10143 = vst [vmem:[#allocation63_spill] sm:$0xff] %v7414_v59  ;;  %v1083_v9 = vpop.f32.mrf.mxu1  ;;  %v898_v40 = vadd.f32 %v897_v41, %v6990_v11 }
 0x134   :  { %v7418_v3 = vadd.f32 %v1083_v9, %v7373_v62  ;;  %v899_v48 = vpop.f32.mrf.mxu0 }
 0x135   :  { %v1085_v27 = vpop.f32.mrf.mxu1  ;;  %v900_v55 = vadd.f32 %v899_v48, %v7009_v15  ;;  %v7425_v46 = vadd.f32 %v7151_v6, %v898_v40 }
 0x136   :  { %v7422_v22 = vadd.f32 %v1085_v27, %v7383_v2  ;;  %v901_v19 = vpop.f32.mrf.mxu0 }
 0x137   :  { %10144 = vst [vmem:[#allocation64_spill] sm:$0xff] %v7425_v46  ;;  %v1087_v35 = vpop.f32.mrf.mxu1  ;;  %v902_v43 = vadd.f32 %v901_v19, %v6990_v11  ;;  %v7432_v41 = vadd.f32 %v7166_v29, %v900_v55 }
 0x138   :  { %v7429_v59 = vadd.f32 %v1087_v35, %v7373_v62  ;;  %v903_v9 = vpop.f32.mrf.mxu0 }
 0x139   :  { %10145 = vst [vmem:[#allocation65_spill] sm:$0xff] %v7432_v41  ;;  %v1089_v0 = vpop.f32.mrf.mxu1  ;;  %v7435_v48 = vadd.f32 %v903_v9, %v7009_v15  ;;  %v7441_v6 = vadd.f32 %v7184_v31, %v902_v43 }
 0x13a   :  { %v7438_v27 = vadd.f32 %v1089_v0, %v7383_v2  ;;  %v907_v40 = vpop.f32.mrf.mxu0 }
 0x13b   :  { %10146 = vst [vmem:[#allocation66_spill] sm:$0xff] %v7435_v48  ;;  %10147 = vst [vmem:[#allocation67_spill] sm:$0xff] %v7441_v6  ;;  %v1093_v46 = vpop.f32.mrf.mxu1  ;;  %v908_v19 = vadd.f32 %v907_v40, %v6990_v11 }
 0x13c   :  { %v7445_v35 = vadd.f32 %v1093_v46, %v7373_v62  ;;  %v909_v55 = vpop.f32.mrf.mxu0 }
 0x13d   :  { %v1095_v29 = vpop.f32.mrf.mxu1  ;;  %v910_v41 = vadd.f32 %v909_v55, %v7009_v15  ;;  %v7452_v0 = vadd.f32 %v7221_v45, %v908_v19  ;;  %v1064_v55 = vadd.f32 %v7313_v12, %v7373_v62 }
 0x13e   :  { %v7449_v9 = vadd.f32 %v1095_v29, %v7383_v2  ;;  %v911_v48 = vpop.f32.mrf.mxu0 }
 0x13f   :  { %10148 = vst [vmem:[#allocation68_spill] sm:$0xff] %v7452_v0  ;;  %v1097_v31 = vpop.f32.mrf.mxu1  ;;  %v912_v43 = vadd.f32 %v911_v48, %v6990_v11  ;;  %v7459_v46 = vadd.f32 %v7236_v18, %v910_v41  ;;  %v1066_v18 = vadd.f32 %v7316_v32, %v7383_v2 }
 0x140   :  { %v7456_v6 = vadd.f32 %v1097_v31, %v7373_v62  ;;  %v913_v40 = vpop.f32.mrf.mxu0 }
 0x141   :  { %10149 = vst [vmem:[#allocation69_spill] sm:$0xff] %v7459_v46  ;;  %v1099_v56 = vpop.f32.mrf.mxu1  ;;  %v7464_v29 = vadd.f32 %v913_v40, %v7009_v15  ;;  %v7470_v19 = vadd.f32 %v7254_v49, %v912_v43  ;;  %v1068_v40 = vadd.f32 %v7347_v36, %v7373_v62 }
 0x142   :  { %v7467_v45 = vadd.f32 %v1099_v56, %v7383_v2  ;;  %v1176_v48 = vpop.f32.mrf.mxu0 }
 0x143   :  { %10150 = vst [vmem:[#allocation70_spill] sm:$0xff] %v7464_v29  ;;  %10151 = vst [vmem:[#allocation71_spill] sm:$0xff] %v7470_v19  ;;  %v1103_v11 = vpop.f32.mrf.mxu1  ;;  %v7477_v31 = vadd.f32 %v1176_v48, %v1064_v55 }
 0x144   :  { %v7475_v41 = vadd.f32 %v1103_v11, %v7373_v62  ;;  %v1178_v46 = vpop.f32.mrf.mxu0 }
 0x145   :  { %v1105_v12 = vpop.f32.mrf.mxu1  ;;  %v7482_v29 = vadd.f32 %v1178_v46, %v1066_v18 }
 0x146   :  { %v1106_v56 = vadd.f32 %v1105_v12, %v7383_v2  ;;  %v1180_v43 = vpop.f32.mrf.mxu0 }
 0x147   :  { %v1107_v49 = vpop.f32.mrf.mxu1  ;;  %v7485_v0 = vadd.f32 %v1180_v43, %v1068_v40 }
 0x148   :  { %v1108_v19 = vadd.f32 %v1107_v49, %v7373_v62  ;;  %v7487_v11 = vpop.f32.mrf.mxu0 }
 0x149   :  { %v1109_v32 = vpop.f32.mrf.mxu1 }
 0x14a   :  { %v1110_v55 = vadd.f32 %v1109_v32, %v7383_v2  ;;  %v1186_v34 = vpop.f32.mrf.mxu0 }
 0x14b   :  { %v1113_v48 = vpop.f32.mrf.mxu1  ;;  %v7492_v36 = vadd.f32 %v1186_v34, %v7387_v54 }
 0x14c   :  { %v1114_v1 = vadd.f32 %v1113_v48, %v7373_v62  ;;  %v1188_v18 = vpop.f32.mrf.mxu0 }
 0x14d   :  { %10152 = vst [vmem:[#allocation72_spill] sm:$0xff] %v7492_v36  ;;  %v1115_v46 = vpop.f32.mrf.mxu1  ;;  %v7496_v49 = vadd.f32 %v1188_v18, %v7393_v47 }
 0x14e   :  { %v1116_v12 = vadd.f32 %v1115_v46, %v7383_v2  ;;  %v1190_v43 = vpop.f32.mrf.mxu0 }
 0x14f   :  { %10153 = vst [vmem:[#allocation73_spill] sm:$0xff] %v7496_v49  ;;  %v1117_v40 = vpop.f32.mrf.mxu1  ;;  %v7500_v32 = vadd.f32 %v1190_v43, %v7402_v39 }
 0x150   :  { %v1118_v26 = vadd.f32 %v1117_v40, %v7373_v62  ;;  %v1192_v52 = vpop.f32.mrf.mxu0 }
 0x151   :  { %10154 = vst [vmem:[#allocation74_spill] sm:$0xff] %v7500_v32  ;;  %v1119_v23 = vpop.f32.mrf.mxu1  ;;  %v7504_v34 = vadd.f32 %v1192_v52, %v7411_v50 }
 0x152   :  { %v1120_v48 = vadd.f32 %v1119_v23, %v7383_v2  ;;  %v1196_v36 = vpop.f32.mrf.mxu0 }
 0x153   :  { %10155 = vst [vmem:[#allocation75_spill] sm:$0xff] %v7504_v34  ;;  %v1123_v54 = vpop.f32.mrf.mxu1  ;;  %v7508_v47 = vadd.f32 %v1196_v36, %v7418_v3 }
 0x154   :  { %v1124_v46 = vadd.f32 %v1123_v54, %v7373_v62  ;;  %v1198_v49 = vpop.f32.mrf.mxu0 }
 0x155   :  { %10156 = vst [vmem:[#allocation76_spill] sm:$0xff] %v7508_v47  ;;  %v1125_v18 = vpop.f32.mrf.mxu1  ;;  %v7512_v39 = vadd.f32 %v1198_v49, %v7422_v22 }
 0x156   :  { %v1126_v40 = vadd.f32 %v1125_v18, %v7383_v2  ;;  %v1200_v32 = vpop.f32.mrf.mxu0 }
 0x157   :  { %10157 = vst [vmem:[#allocation77_spill] sm:$0xff] %v7512_v39  ;;  %v1127_v43 = vpop.f32.mrf.mxu1  ;;  %v7516_v52 = vadd.f32 %v1200_v32, %v7429_v59 }
 0x158   :  { %v1128_v23 = vadd.f32 %v1127_v43, %v7373_v62  ;;  %v1202_v34 = vpop.f32.mrf.mxu0 }
 0x159   :  { %10158 = vst [vmem:[#allocation78_spill] sm:$0xff] %v7516_v52  ;;  %v1129_v50 = vpop.f32.mrf.mxu1  ;;  %v7520_v3 = vadd.f32 %v1202_v34, %v7438_v27 }
 0x15a   :  { %v1130_v54 = vadd.f32 %v1129_v50, %v7383_v2  ;;  %v1206_v47 = vpop.f32.mrf.mxu0 }
 0x15b   :  { %10159 = vst [vmem:[#allocation79_spill] sm:$0xff] %v7520_v3  ;;  %v1133_v36 = vpop.f32.mrf.mxu1  ;;  %v7524_v22 = vadd.f32 %v1206_v47, %v7445_v35 }
 0x15c   :  { %v1134_v18 = vadd.f32 %v1133_v36, %v7373_v62  ;;  %v1208_v39 = vpop.f32.mrf.mxu0 }
 0x15d   :  { %10160 = vst [vmem:[#allocation80_spill] sm:$0xff] %v7524_v22  ;;  %v1135_v49 = vpop.f32.mrf.mxu1  ;;  %v7528_v59 = vadd.f32 %v1208_v39, %v7449_v9 }
 0x15e   :  { %v1136_v43 = vadd.f32 %v1135_v49, %v7383_v2  ;;  %v1210_v52 = vpop.f32.mrf.mxu0 }
 0x15f   :  { %10161 = vst [vmem:[#allocation81_spill] sm:$0xff] %v7528_v59  ;;  %v1137_v32 = vpop.f32.mrf.mxu1  ;;  %v7532_v27 = vadd.f32 %v1210_v52, %v7456_v6 }
 0x160   :  { %v1138_v50 = vadd.f32 %v1137_v32, %v7373_v62  ;;  %v1212_v3 = vpop.f32.mrf.mxu0 }
 0x161   :  { %10162 = vst [vmem:[#allocation82_spill] sm:$0xff] %v7532_v27  ;;  %v1139_v34 = vpop.f32.mrf.mxu1  ;;  %v7536_v35 = vadd.f32 %v1212_v3, %v7467_v45 }
 0x162   :  { %v1140_v36 = vadd.f32 %v1139_v34, %v7383_v2  ;;  %v1216_v47 = vpop.f32.mrf.mxu0 }
 0x163   :  { %10163 = vst [vmem:[#allocation83_spill] sm:$0xff] %v7536_v35  ;;  %v7539_v49 = vadd.f32 %v1216_v47, %v7475_v41  ;;  %v1618_v32 = vpop.f32.mrf.mxu1 }
 0x164   :  { %v1218_v9 = vpop.f32.mrf.mxu0 }
 0x165   :  { %10164 = vst [vmem:[#allocation84_spill] sm:$0xff] %v7539_v49  ;;  %v7541_v39 = vadd.f32 %v1218_v9, %v1106_v56  ;;  %v1620_v35 = vpop.f32.mrf.mxu1  ;;  %v7816_v49 = vld [vmem:[%s9733_s4 + $0xc0] ss:$16 sps:$4 sm:$0xff]  }
 0x166   :  { %v1220_v22 = vpop.f32.mrf.mxu0  ;;  %10182 = vst [vmem:[#allocation101_spill] sm:$0xff] %v7816_v49 }
 0x167   :  { %10165 = vst [vmem:[#allocation85_spill] sm:$0xff] %v7541_v39  ;;  %v7543_v59 = vadd.f32 %v1220_v22, %v1108_v19  ;;  %v1622_v19 = vpop.f32.mrf.mxu1  ;;  %v7828_v39 = vld [vmem:[%s9733_s4 + $0xa4] ss:$16 sps:$4 sm:$0xff]  }
 0x168   :  { %v1222_v62 = vpop.f32.mrf.mxu0  ;;  %10184 = vst [vmem:[#allocation103_spill] sm:$0xff] %v7828_v39 }
 0x169   :  { %10166 = vst [vmem:[#allocation86_spill] sm:$0xff] %v7543_v59  ;;  %v7545_v6 = vadd.f32 %v1222_v62, %v1110_v55  ;;  %v844_v55 = vadd.f32 %v7062_v33, %v7009_v15  ;;  %v7804_v59 = vld [vmem:[%s9733_s4 + $0xc4] ss:$16 sps:$4 sm:$0xff]  }
 0x16a   :  { %v1226_v52 = vpop.f32.mrf.mxu0 }
 0x16b   :  { %10167 = vst [vmem:[#allocation87_spill] sm:$0xff] %v7545_v6  ;;  %v7547_v27 = vadd.f32 %v1226_v52, %v1114_v1  ;;  %v7822_v6 = vld [vmem:[%s9733_s4 + $0xc8] ss:$16 sps:$4 sm:$0xff]  }
 0x16c   :  { %v1228_v34 = vpop.f32.mrf.mxu0  ;;  %10183 = vst [vmem:[#allocation102_spill] sm:$0xff] %v7822_v6 }
 0x16d   :  { %10168 = vst [vmem:[#allocation88_spill] sm:$0xff] %v7547_v27  ;;  %v7549_v45 = vadd.f32 %v1228_v34, %v1116_v12  ;;  %v1671_v12 = vadd.f32 %v1620_v35, %v7058_v63  ;;  %v1624_v34 = vpop.f32.mrf.mxu1 }
 0x16e   :  { %v1230_v3 = vpop.f32.mrf.mxu0 }
 0x16f   :  { %10169 = vst [vmem:[#allocation89_spill] sm:$0xff] %v7549_v45  ;;  %v7551_v41 = vadd.f32 %v1230_v3, %v1118_v26  ;;  %v1670_v26 = vadd.f32 %v1618_v32, %v7032_v24  ;;  %v7798_v45 = vld [vmem:[%s9733_s4 + $0xe8] ss:$16 sps:$4 sm:$0xff]  }
 0x170   :  { %v1232_v47 = vpop.f32.mrf.mxu0 }
 0x171   :  { %10170 = vst [vmem:[#allocation90_spill] sm:$0xff] %v7551_v41  ;;  %v7553_v56 = vadd.f32 %v1232_v47, %v1120_v48  ;;  %v957_v48 = vadd.f32 %v6872_v21, %v844_v55  ;;  %v7784_v41 = vld [vmem:[%s9733_s4 + $0xec] ss:$16 sps:$4 sm:$0xff]  }
 0x172   :  { %v1236_v9 = vpop.f32.mrf.mxu0 }
 0x173   :  { %10171 = vst [vmem:[#allocation91_spill] sm:$0xff] %v7553_v56  ;;  %v7555_v22 = vadd.f32 %v1236_v9, %v1124_v46  ;;  %v1679_v46 = vmul.f32 0.5, %v1671_v12  ;;  %v1675_v9 = vadd.f32 %v1624_v34, %v957_v48  ;;  %v7792_v56 = vld [vmem:[%s9733_s4 + $0xe0] ss:$16 sps:$4 sm:$0xff]  }
 0x174   :  { %v1238_v62 = vpop.f32.mrf.mxu0 }
 0x175   :  { %10172 = vst [vmem:[#allocation92_spill] sm:$0xff] %v7555_v22  ;;  %v7559_v1 = vadd.f32 %v1238_v62, %v1126_v40  ;;  %v1678_v40 = vmul.f32 0.5, %v1670_v26  ;;  %v1674_v62 = vadd.f32 %v1622_v19, %v7069_v37  ;;  %5623 = vtanh.f32 %v1679_v46 }
 0x176   :  { %v1240_v52 = vpop.f32.mrf.mxu0  ;;  %v1070_v37 = vadd.f32 %v7356_v20, %v7383_v2 }
 0x177   :  { %10173 = vst [vmem:[#allocation93_spill] sm:$0xff] %v7559_v1  ;;  %v7562_v27 = vadd.f32 %v1240_v52, %v1128_v23  ;;  %v1682_v23 = vmul.f32 0.5, %v1675_v9  ;;  %5625 = vtanh.f32 %v1678_v40  ;;  %v1681_v21 = vmul.f32 0.5, %v1674_v62  ;;  %v7778_v1 = vld [vmem:[%s9733_s4 + $0xe4] ss:$16 sps:$4 sm:$0xff]  }
 0x178   :  { %v1242_v3 = vpop.f32.mrf.mxu0 }
 0x179   :  { %10174 = vst [vmem:[#allocation94_spill] sm:$0xff] %v7562_v27  ;;  %v7566_v47 = vadd.f32 %v1242_v3, %v1130_v54  ;;  %5627 = vtanh.f32 %v1682_v23  ;;  %v7766_v27 = vld [vmem:[%s9732_s2] ss:$16 sps:$4 sm:$0xff]  }
 0x17a   :  { %v1246_v22 = vpop.f32.mrf.mxu0  ;;  %5629 = vtanh.f32 %v1681_v21 }
 0x17b   :  { %10175 = vst [vmem:[#allocation95_spill] sm:$0xff] %v7566_v47  ;;  %v7568_v33 = vadd.f32 %v1246_v22, %v1134_v18  ;;  %v1183_v22 = vadd.f32 %v7487_v11, %v1070_v37  ;;  %v7772_v47 = vld [vmem:[%s9732_s2 + $0x8] ss:$16 sps:$4 sm:$0xff]  }
 0x17c   :  { %v1248_v63 = vpop.f32.mrf.mxu0 }
 0x17d   :  { %10176 = vst [vmem:[#allocation96_spill] sm:$0xff] %v7568_v33  ;;  %v7571_v35 = vadd.f32 %v1248_v63, %v1136_v43  ;;  %v7748_v33 = vld [vmem:[%s9732_s2 + $0x28] ss:$16 sps:$4 sm:$0xff]  }
 0x17e   :  { %v1250_v52 = vpop.f32.mrf.mxu0 }
 0x17f   :  { %10177 = vst [vmem:[#allocation97_spill] sm:$0xff] %v7571_v35  ;;  %v7573_v24 = vadd.f32 %v1250_v52, %v1138_v50  ;;  %v7760_v35 = vld [vmem:[%s9732_s2 + $0xc] ss:$16 sps:$4 sm:$0xff]  }
 0x180   :  { %v1252_v54 = vpop.f32.mrf.mxu0 }
 0x181   :  { %10178 = vst [vmem:[#allocation98_spill] sm:$0xff] %v7573_v24  ;;  %v7575_v32 = vadd.f32 %v1252_v54, %v1140_v36  ;;  %v7742_v24 = vld [vmem:[%s9732_s2 + $0x20] ss:$16 sps:$4 sm:$0xff]  }
 0x182   :  { %v1661_v55 = vpop.f32.mrf.mxu0  ;;  %v5624_v34 = vpop.eup %5623 }
 0x183   :  { %10179 = vst [vmem:[#allocation99_spill] sm:$0xff] %v7575_v32  ;;  %v1672_v36 = vadd.f32 %v1661_v55, %v7477_v31  ;;  %v1691_v48 = vadd.f32 1.0, %v5624_v34  ;;  %v7754_v32 = vld [vmem:[%s9732_s2 + $0x4] ss:$16 sps:$4 sm:$0xff]  }
 0x184   :  { %v1663_v18 = vpop.f32.mrf.mxu0  ;;  %v5626_v26 = vpop.eup %5625 }
 0x185   :  { %v1673_v43 = vadd.f32 %v1663_v18, %v7482_v29  ;;  %v1690_v9 = vadd.f32 1.0, %v5626_v26  ;;  %v1680_v2 = vmul.f32 0.5, %v1672_v36  ;;  %v1697_v20 = vmul.f32 0.5, %v1691_v48 }
 0x186   :  { %v1665_v19 = vpop.f32.mrf.mxu0  ;;  %v5628_v46 = vpop.eup %5627 }
 0x187   :  { %5631 = vtanh.f32 %v1673_v43  ;;  %v1676_v3 = vadd.f32 %v1665_v19, %v7485_v0  ;;  %v5630_v40 = vpop.eup %5629  ;;  %v1694_v29 = vadd.f32 1.0, %v5628_v46  ;;  %v1696_v63 = vmul.f32 0.5, %v1690_v9 }
 0x188   :  { %v1667_v50 = vpop.f32.mrf.mxu0  ;;  %v1693_v11 = vadd.f32 1.0, %v5630_v40  ;;  %v1704_v52 = vmul.f32 0.0, %v1697_v20  ;;  %v7596_v40 = vld [vmem:[%s9732_s2 + $0xe0] ss:$16 sps:$4 sm:$0xff]   ;;  %v7608_v20 = vld [vmem:[%s9732_s2 + $0xc4] ss:$16 sps:$4 sm:$0xff]  }
 0x189   :  { %v1677_v12 = vadd.f32 %v1667_v50, %v1183_v22  ;;  %v1683_v62 = vmul.f32 0.5, %v1676_v3  ;;  %v1700_v21 = vmul.f32 0.5, %v1694_v29  ;;  %v7614_v29 = vld [vmem:[%s9732_s2 + $0xcc] ss:$16 sps:$4 sm:$0xff]  }
 0x18a   :  { %v1699_v18 = vmul.f32 0.5, %v1693_v11  ;;  %v7628_v11 = vld [vmem:[%s9732_s2 + $0xc8] ss:$16 sps:$4 sm:$0xff]  }
 0x18b   :  { %5633 = vtanh.f32 %v1677_v12  ;;  %v1705_v0 = vmul.f32 0.0, %v1700_v21  ;;  %v7646_v21 = vld [vmem:[%s9732_s2 + $0xa0] ss:$16 sps:$4 sm:$0xff]  }
 0x18c   :  { %5635 = vtanh.f32 %v1680_v2  ;;  %v7602_v2 = vld [vmem:[%s9732_s2 + $0xe8] ss:$16 sps:$4 sm:$0xff]  }
 0x18d   :  { %5637 = vtanh.f32 %v1683_v62  ;;  %v10180_v62 = vmov 0  }
 0x194   :  { %v5632_v23 = vpop.eup %5631 }
 0x195   :  { %v1706_v54 = vmul.f32 %v5632_v23, %v1696_v63  ;;  %v7622_v63 = vld [vmem:[%s9732_s2 + $0xc0] ss:$16 sps:$4 sm:$0xff]   ;;  %v7634_v23 = vld [vmem:[%s9732_s2 + $0xa4] ss:$16 sps:$4 sm:$0xff]  }
 0x197   :  { %v7583_v31 = vadd.f32 %v1706_v54, %v1704_v52  ;;  %v7640_v52 = vld [vmem:[%s9732_s2 + $0xac] ss:$16 sps:$4 sm:$0xff]   ;;  %v7652_v54 = vld [vmem:[%s9732_s2 + $0xa8] ss:$16 sps:$4 sm:$0xff]  }
 0x198   :  { %v5634_v55 = vpop.eup %5633 }
 0x199   :  { %v1707_v37 = vmul.f32 %v5634_v55, %v1699_v18  ;;  %5639 = vtanh.f32 %v7583_v31  ;;  %v5636_v19 = vpop.eup %5635  ;;  %v7658_v18 = vld [vmem:[%s9732_s2 + $0x84] ss:$16 sps:$4 sm:$0xff]   ;;  %v7664_v55 = vld [vmem:[%s9732_s2 + $0x8c] ss:$16 sps:$4 sm:$0xff]  }
 0x19a   :  { %v5638_v22 = vpop.eup %5637  ;;  %v1692_v50 = vadd.f32 1.0, %v5636_v19  ;;  %v7682_v19 = vld [vmem:[%s9732_s2 + $0x64] ss:$16 sps:$4 sm:$0xff]  }
 0x19b   :  { %v7586_v43 = vadd.f32 %v1707_v37, %v1705_v0  ;;  %v1695_v12 = vadd.f32 1.0, %v5638_v22  ;;  %v7670_v0 = vld [vmem:[%s9732_s2 + $0x80] ss:$16 sps:$4 sm:$0xff]   ;;  %v7676_v37 = vld [vmem:[%s9732_s2 + $0x88] ss:$16 sps:$4 sm:$0xff]  }
 0x19c   :  { %v1698_v26 = vmul.f32 0.5, %v1692_v50  ;;  %v7688_v22 = vld [vmem:[%s9732_s2 + $0x6c] ss:$16 sps:$4 sm:$0xff]   ;;  %v7694_v50 = vld [vmem:[%s9732_s2 + $0x60] ss:$16 sps:$4 sm:$0xff]  }
 0x19d   :  { %5641 = vtanh.f32 %v7586_v43  ;;  %v1701_v36 = vmul.f32 0.5, %v1695_v12  ;;  %v7700_v12 = vld [vmem:[%s9732_s2 + $0x68] ss:$16 sps:$4 sm:$0xff]  }
 0x1a6   :  { %v5640_v34 = vpop.eup %5639 }
 0x1a7   :  { %v1712_v3 = vmul.f32 %v5640_v34, %v1698_v26  ;;  %v7706_v34 = vld [vmem:[%s9732_s2 + $0x44] ss:$16 sps:$4 sm:$0xff]   ;;  %v7712_v26 = vld [vmem:[%s9732_s2 + $0x4c] ss:$16 sps:$4 sm:$0xff]  }
 0x1aa   :  { %v5642_v48 = vpop.eup %5641 }
 0x1ab   :  { %v1713_v46 = vmul.f32 %v5642_v48, %v1701_v36  ;;  %v7718_v36 = vld [vmem:[%s9732_s2 + $0x40] ss:$16 sps:$4 sm:$0xff]   ;;  %v7724_v48 = vld [vmem:[%s9732_s2 + $0x48] ss:$16 sps:$4 sm:$0xff]  }
 0x1ad   :  { %v7589_v9 = vpack.c.bf16 %v1713_v46, %v1712_v3  ;;  %v7730_v3 = vld [vmem:[%s9732_s2 + $0x24] ss:$16 sps:$4 sm:$0xff]   ;;  %v7736_v46 = vld [vmem:[%s9732_s2 + $0x2c] ss:$16 sps:$4 sm:$0xff]  }
 0x1af   :  { %2089 = vmatmul.mubr.bf16.vlgmr.msra.gmra.mxu1 %v7589_v9  ;;  %2132 = vmatmul.mubr.bf16.vlgmr.msra.gmra.mxu0 %v7589_v9 }
 0x1b0   :  { %2198 = vmatpush1.bf16.msra.mxu1 %v7596_v40  ;;  %2241 = vmatpush1.bf16.msra.mxu0 %v7602_v2 }
 0x1b1   :  { %2199 = vmatprep.subr.bf16.mxu1 %v7608_v20  ;;  %2242 = vmatprep.subr.bf16.mxu0 %v7614_v29 }
 0x1b2   :  { %2229 = vmatprep.mubr.bf16.mxu1 %v10180_v62  ;;  %2272 = vmatprep.mubr.bf16.mxu0 %v10180_v62 }
 0x1b4   :  { %2200 = vmatpush1.bf16.msra.mxu1 %v7622_v63  ;;  %2243 = vmatpush1.bf16.msra.mxu0 %v7628_v11 }
 0x1b5   :  { %2201 = vmatprep.subr.bf16.mxu1 %v7634_v23  ;;  %2244 = vmatprep.subr.bf16.mxu0 %v7640_v52 }
 0x1b8   :  { %2202 = vmatpush1.bf16.msra.mxu1 %v7646_v21  ;;  %2245 = vmatpush1.bf16.msra.mxu0 %v7652_v54 }
 0x1b9   :  { %2203 = vmatprep.subr.bf16.mxu1 %v7658_v18  ;;  %2246 = vmatprep.subr.bf16.mxu0 %v7664_v55 }
 0x1bc   :  { %2204 = vmatpush1.bf16.msra.mxu1 %v7670_v0  ;;  %2247 = vmatpush1.bf16.msra.mxu0 %v7676_v37 }
 0x1bd   :  { %2205 = vmatprep.subr.bf16.mxu1 %v7682_v19  ;;  %2248 = vmatprep.subr.bf16.mxu0 %v7688_v22 }
 0x1c0   :  { %2206 = vmatpush1.bf16.msra.mxu1 %v7694_v50  ;;  %2249 = vmatpush1.bf16.msra.mxu0 %v7700_v12 }
 0x1c1   :  { %2207 = vmatprep.subr.bf16.mxu1 %v7706_v34  ;;  %2250 = vmatprep.subr.bf16.mxu0 %v7712_v26 }
 0x1c4   :  { %2208 = vmatpush1.bf16.msra.mxu1 %v7718_v36  ;;  %2251 = vmatpush1.bf16.msra.mxu0 %v7724_v48 }
 0x1c5   :  { %2209 = vmatprep.subr.bf16.mxu1 %v7730_v3  ;;  %2252 = vmatprep.subr.bf16.mxu0 %v7736_v46 }
 0x1c8   :  { %2210 = vmatpush1.bf16.msra.mxu1 %v7742_v24  ;;  %2253 = vmatpush1.bf16.msra.mxu0 %v7748_v33 }
 0x1c9   :  { %2211 = vmatprep.subr.bf16.mxu1 %v7754_v32  ;;  %2254 = vmatprep.subr.bf16.mxu0 %v7760_v35 }
 0x1cc   :  { %2212 = vmatpush1.bf16.msra.mxu1 %v7766_v27  ;;  %2255 = vmatpush1.bf16.msra.mxu0 %v7772_v47 }
 0x1cd   :  { %2328 = vmatprep.subr.bf16.mxu1 %v7778_v1  ;;  %2371 = vmatprep.subr.bf16.mxu0 %v7784_v41 }
 0x1cf   :  { %2230 = vmatmul.mubr.bf16.vlgmr.msra.gmra.mxu1 %v7589_v9  ;;  %2273 = vmatmul.mubr.bf16.vlgmr.msra.gmra.mxu0 %v7589_v9  ;;  %v7810_v9 = vld [vmem:[%s9733_s4 + $0xcc] ss:$16 sps:$4 sm:$0xff]  }
 0x1d0   :  { %2329 = vmatpush1.bf16.msra.mxu1 %v7792_v56  ;;  %2372 = vmatpush1.bf16.msra.mxu0 %v7798_v45  ;;  %10181 = vst [vmem:[#allocation100_spill] sm:$0xff] %v7810_v9 }
 0x1d1   :  { %2330 = vmatprep.subr.bf16.mxu1 %v7804_v59  ;;  %2373 = vmatprep.subr.bf16.mxu0 %v7810_v9  ;;  %v7834_v9 = vld [vmem:[%s9733_s4 + $0xac] ss:$16 sps:$4 sm:$0xff]  }
 0x1d2   :  { %10185 = vst [vmem:[#allocation104_spill] sm:$0xff] %v7834_v9 }
 0x1d4   :  { %2331 = vmatpush1.bf16.msra.mxu1 %v7816_v49  ;;  %2374 = vmatpush1.bf16.msra.mxu0 %v7822_v6  ;;  %v7840_v49 = vld [vmem:[%s9733_s4 + $0xa0] ss:$16 sps:$4 sm:$0xff]   ;;  %v7846_v6 = vld [vmem:[%s9733_s4 + $0xa8] ss:$16 sps:$4 sm:$0xff]  }
 0x1d5   :  { %2332 = vmatprep.subr.bf16.mxu1 %v7828_v39  ;;  %2375 = vmatprep.subr.bf16.mxu0 %v7834_v9  ;;  %10186 = vst [vmem:[#allocation105_spill] sm:$0xff] %v7840_v49  ;;  %10187 = vst [vmem:[#allocation106_spill] sm:$0xff] %v7846_v6 }
 0x1d8   :  { %2333 = vmatpush1.bf16.msra.mxu1 %v7840_v49  ;;  %2376 = vmatpush1.bf16.msra.mxu0 %v7846_v6 }
 0x1d9   :  { %2334 = vmatprep.subr.bf16.mxu1 %v6931_v57  ;;  %2377 = vmatprep.subr.bf16.mxu0 %v6936_v58  ;;  %v10188_v57 = vld [vmem:[#allocation10_spill] sm:$0xff]  ;;  %v10189_v58 = vld [vmem:[#allocation12_spill] sm:$0xff] }
 0x1dc   :  { %2335 = vmatpush1.bf16.msra.mxu1 %v6941_v60  ;;  %2378 = vmatpush1.bf16.msra.mxu0 %v6946_v61  ;;  %v10190_v60 = vld [vmem:[#allocation13_spill] sm:$0xff] }
 0x1dd   :  { %2336 = vmatprep.subr.bf16.mxu1 %v6965_v4  ;;  %2379 = vmatprep.subr.bf16.mxu0 %v6970_v5  ;;  %v10191_v61 = vld [vmem:[#allocation17_spill] sm:$0xff]  ;;  %v10192_v4 = vld [vmem:[#allocation18_spill] sm:$0xff]  ;;  %v10193_v5 = vld [vmem:[#allocation20_spill] sm:$0xff] }
 0x1e0   :  { %2337 = vmatpush1.bf16.msra.mxu1 %v6976_v7  ;;  %2380 = vmatpush1.bf16.msra.mxu0 %v6981_v8  ;;  %v10194_v7 = vld [vmem:[#allocation21_spill] sm:$0xff]  ;;  %v10195_v8 = vld [vmem:[#allocation22_spill] sm:$0xff] }
 0x1e1   :  { %2338 = vmatprep.subr.bf16.mxu1 %v6999_v13  ;;  %2381 = vmatprep.subr.bf16.mxu0 %v7004_v14  ;;  %v10196_v13 = vld [vmem:[#allocation23_spill] sm:$0xff]  ;;  %v10197_v14 = vld [vmem:[#allocation25_spill] sm:$0xff] }
 0x1e4   :  { %2339 = vmatpush1.bf16.msra.mxu1 %v7014_v16  ;;  %2382 = vmatpush1.bf16.msra.mxu0 %v7019_v17  ;;  %v10198_v16 = vld [vmem:[#allocation26_spill] sm:$0xff] }
 0x1e5   :  { %2340 = vmatprep.subr.bf16.mxu1 %v7037_v25  ;;  %2383 = vmatprep.subr.bf16.mxu0 %v7042_v44  ;;  %v10199_v17 = vld [vmem:[#allocation30_spill] sm:$0xff]  ;;  %v10200_v25 = vld [vmem:[#allocation31_spill] sm:$0xff]  ;;  %v10201_v44 = vld [vmem:[#allocation33_spill] sm:$0xff] }
 0x1e8   :  { %2341 = vmatpush1.bf16.msra.mxu1 %v7049_v28  ;;  %2384 = vmatpush1.bf16.msra.mxu0 %v7054_v53  ;;  %v10202_v28 = vld [vmem:[#allocation34_spill] sm:$0xff]  ;;  %v10203_v53 = vld [vmem:[#allocation35_spill] sm:$0xff] }
 0x1e9   :  { %2342 = vmatprep.subr.bf16.mxu1 %v7074_v10  ;;  %2385 = vmatprep.subr.bf16.mxu0 %v7079_v38  ;;  %v10204_v10 = vld [vmem:[#allocation36_spill] sm:$0xff]  ;;  %v10205_v38 = vld [vmem:[#allocation38_spill] sm:$0xff] }
 0x1ec   :  { %2343 = vmatpush1.bf16.msra.mxu1 %v7086_v42  ;;  %2386 = vmatpush1.bf16.msra.mxu0 %v7091_v30  ;;  %v10206_v42 = vld [vmem:[#allocation39_spill] sm:$0xff]  ;;  %v10207_v30 = vld [vmem:[#allocation40_spill] sm:$0xff] }
 0x1ed   :  { %2344 = vmatprep.subr.bf16.mxu1 %v7104_v51  ;;  %2387 = vmatprep.subr.bf16.mxu0 %v10188_v57  ;;  %v10208_v51 = vld [vmem:[#allocation41_spill] sm:$0xff] }
 0x1ee   :  { %v10209_v57 = vld [vmem:[#allocation45_spill] sm:$0xff] }
 0x1f0   :  { %2345 = vmatpush2.bf16.msra.mxu1 %v10189_v58  ;;  %2388 = vmatpush2.bf16.msra.mxu0 %v10190_v60  ;;  %v10210_v58 = vld [vmem:[#allocation46_spill] sm:$0xff]  ;;  %v10211_v60 = vld [vmem:[#allocation47_spill] sm:$0xff] }
 0x1f1   :  { %2346 = vmatprep.subr.bf16.mxu1 %v10191_v61  ;;  %2389 = vmatprep.subr.bf16.mxu0 %v10192_v4  ;;  %v10212_v61 = vld [vmem:[#allocation48_spill] sm:$0xff]  ;;  %v10213_v4 = vld [vmem:[#allocation50_spill] sm:$0xff] }
 0x1f4   :  { %2347 = vmatpush2.bf16.msra.mxu1 %v10193_v5  ;;  %2390 = vmatpush2.bf16.msra.mxu0 %v10194_v7  ;;  %v10214_v5 = vld [vmem:[#allocation51_spill] sm:$0xff]  ;;  %v10215_v7 = vld [vmem:[#allocation52_spill] sm:$0xff] }
 0x1f5   :  { %2348 = vmatprep.subr.bf16.mxu1 %v10195_v8  ;;  %2391 = vmatprep.subr.bf16.mxu0 %v10196_v13  ;;  %v10216_v8 = vld [vmem:[#allocation53_spill] sm:$0xff] }
 0x1f6   :  { %v10217_v13 = vld [vmem:[#allocation57_spill] sm:$0xff] }
 0x1f8   :  { %2349 = vmatpush2.bf16.msra.mxu1 %v10197_v14  ;;  %2392 = vmatpush2.bf16.msra.mxu0 %v10198_v16  ;;  %v10218_v14 = vld [vmem:[#allocation58_spill] sm:$0xff] }
 0x1f9   :  { %2350 = vmatprep.subr.bf16.mxu1 %v10199_v17  ;;  %2393 = vmatprep.subr.bf16.mxu0 %v10200_v25  ;;  %v7904_v16 = vld [vmem:[%s9732_s2 + $0xe4] ss:$16 sps:$4 sm:$0xff]   ;;  %v7910_v17 = vld [vmem:[%s9732_s2 + $0xec] ss:$16 sps:$4 sm:$0xff]   ;;  %v1415_v25 = vld [vmem:[%s9735_s5] sm:$0xf] }
 0x1fa   :  { %10219 = vst [vmem:[#allocation10_spill] sm:$0xff] %v7904_v16  ;;  %10220 = vst [vmem:[#allocation12_spill] sm:$0xff] %v7910_v17 }
 0x1fc   :  { %2351 = vmatpush2.bf16.msra.mxu1 %v10201_v44  ;;  %2394 = vmatpush2.bf16.msra.mxu0 %v10202_v28  ;;  %v10221_v44 = vld [vmem:[#allocation5_spill] sm:$0xff] }
 0x1fd   :  { %2352 = vmatprep.subr.bf16.mxu1 %v10203_v53  ;;  %2395 = vmatprep.subr.bf16.mxu0 %v10204_v10  ;;  %v10222_v28 = vsub.s32 0, %v10221_v44  ;;  %v10224_v10 = vsub.s32 1, %v10221_v44 }
 0x1ff   :  { %v7918_v53 = vrot.slane %v1415_v25, %v10222_v28 }
 0x200   :  { %2353 = vmatpush2.bf16.msra.mxu1 %v10205_v38  ;;  %2396 = vmatpush2.bf16.msra.mxu0 %v10206_v42  ;;  %v7922_v38 = vrot.slane %v1415_v25, %v10224_v10 }
 0x201   :  { %2354 = vmatprep.subr.bf16.mxu1 %v10207_v30  ;;  %2397 = vmatprep.subr.bf16.mxu0 %v10208_v51  ;;  %10223 = vst [vmem:[#allocation13_spill] sm:$0xff] %v7918_v53 }
 0x202   :  { %10225 = vst [vmem:[#allocation17_spill] sm:$0xff] %v7922_v38 }
 0x204   :  { %2355 = vmatpush2.bf16.msra.mxu1 %v10209_v57  ;;  %2398 = vmatpush2.bf16.msra.mxu0 %v10210_v58  ;;  %v10226_v58 = vsub.s32 3, %v10221_v44 }
 0x205   :  { %2356 = vmatprep.subr.bf16.mxu1 %v10211_v60  ;;  %2399 = vmatprep.subr.bf16.mxu0 %v10212_v61 }
 0x206   :  { %v7927_v60 = vrot.slane %v1415_v25, %v10226_v58 }
 0x208   :  { %2357 = vmatpush2.bf16.msra.mxu1 %v10213_v4  ;;  %2400 = vmatpush2.bf16.msra.mxu0 %v10214_v5  ;;  %10227 = vst [vmem:[#allocation18_spill] sm:$0xff] %v7927_v60 }
 0x209   :  { %2358 = vmatprep.subr.bf16.mxu1 %v10215_v7  ;;  %2401 = vmatprep.subr.bf16.mxu0 %v10216_v8 }
 0x20c   :  { %2359 = vmatpush2.bf16.msra.mxu1 %v10217_v13  ;;  %2402 = vmatpush2.bf16.msra.mxu0 %v10218_v14 }
 0x20d   :  { %2470 = vmatprep.subr.bf16.mxu1 %v7904_v16  ;;  %2513 = vmatprep.subr.bf16.mxu0 %v7910_v17 }
 0x26f   :  { %v2090_v42 = vpop.f32.mrf.mxu1  ;;  %v2133_v30 = vpop.f32.mrf.mxu0 }
 0x270   :  { %v2091_v51 = vadd.f32 %v2090_v42, %v7918_v53 }
 0x271   :  { %v2092_v57 = vpop.f32.mrf.mxu1  ;;  %v2135_v61 = vpop.f32.mrf.mxu0 }
 0x272   :  { %v2142_v4 = vmul.f32 0.5, %v2091_v51  ;;  %v2093_v5 = vadd.f32 %v2092_v57, %v7922_v38  ;;  %v2136_v28 = vadd.f32 %v2135_v61, %v7927_v60  ;;  %v10228_v51 = vsub.s32 2, %v10221_v44 }
 0x273   :  { %v2094_v7 = vpop.f32.mrf.mxu1  ;;  %v2137_v8 = vpop.f32.mrf.mxu0 }
 0x274   :  { %5643 = vtanh.f32 %v2142_v4  ;;  %v2143_v13 = vmul.f32 0.5, %v2093_v5  ;;  %v2095_v14 = vadd.f32 %v2094_v7, %v7918_v53  ;;  %v7935_v57 = vrot.slane %v1415_v25, %v10228_v51 }
 0x275   :  { %v2096_v10 = vpop.f32.mrf.mxu1  ;;  %v2139_v16 = vpop.f32.mrf.mxu0 }
 0x276   :  { %5645 = vtanh.f32 %v2143_v13  ;;  %v2145_v42 = vmul.f32 0.5, %v2095_v14  ;;  %v2097_v17 = vadd.f32 %v2096_v10, %v7922_v38  ;;  %10229 = vst [vmem:[#allocation20_spill] sm:$0xff] %v7935_v57  ;;  %v2140_v4 = vadd.f32 %v2139_v16, %v7927_v60 }
 0x277   :  { %v2134_v5 = vadd.f32 %v2133_v30, %v7935_v57  ;;  %v2138_v61 = vadd.f32 %v2137_v8, %v7935_v57 }
 0x278   :  { %5647 = vtanh.f32 %v2145_v42  ;;  %v2146_v58 = vmul.f32 0.5, %v2097_v17 }
 0x279   :  { %5649 = vtanh.f32 %v2136_v28  ;;  %v2144_v14 = vmul.f32 0.5, %v2134_v5  ;;  %v2147_v38 = vmul.f32 0.5, %v2138_v61 }
 0x27a   :  { %5651 = vtanh.f32 %v2146_v58 }
 0x27b   :  { %5653 = vtanh.f32 %v2140_v4 }
 0x27c   :  { %5655 = vtanh.f32 %v2144_v14 }
 0x27d   :  { %5657 = vtanh.f32 %v2147_v38 }
 0x281   :  { %v5644_v7 = vpop.eup %5643 }
 0x282   :  { %v2154_v13 = vadd.f32 1.0, %v5644_v7 }
 0x283   :  { %v5646_v10 = vpop.eup %5645 }
 0x284   :  { %v2160_v42 = vmul.f32 0.5, %v2154_v13  ;;  %v2155_v17 = vadd.f32 1.0, %v5646_v10  ;;  %v10232_v10 = vld [vmem:[#allocation15_spill] sm:$0xff] }
 0x285   :  { %v5648_v28 = vpop.eup %5647 }
 0x286   :  { %v5650_v53 = vpop.eup %5649  ;;  %v2161_v25 = vmul.f32 0.5, %v2155_v17  ;;  %v2157_v44 = vadd.f32 1.0, %v5648_v28  ;;  %v854_v17 = vadd.f32 %v10232_v10, %v7009_v15  ;;  %v10237_v10 = vld [vmem:[#allocation4_spill] sm:$0xff] }
 0x287   :  { %v5652_v58 = vpop.eup %5651  ;;  %v2170_v51 = vmul.f32 %v5650_v53, %v2160_v42  ;;  %v10233_v53 = vld [vmem:[#allocation11_spill] sm:$0xff] }
 0x288   :  { %v2168_v16 = vmul.f32 0.0, %v2161_v25  ;;  %v2163_v30 = vmul.f32 0.5, %v2157_v44  ;;  %v2158_v4 = vadd.f32 1.0, %v5652_v58  ;;  %v5654_v7 = vpop.eup %5653  ;;  %v10234_v44 = vld [vmem:[#allocation14_spill] sm:$0xff]  ;;  %v967_v15 = vadd.f32 %v10237_v10, %v854_v17  ;;  %v10239_v10 = vld [vmem:[#allocation72_spill] sm:$0xff] }
 0x28a   :  { %v7940_v60 = vadd.f32 %v2170_v51, %v2168_v16  ;;  %v2164_v8 = vmul.f32 0.5, %v2158_v4  ;;  %v2171_v57 = vmul.f32 %v5654_v7, %v2163_v30  ;;  %v5656_v16 = vpop.eup %5655  ;;  %v10235_v51 = vld [vmem:[#allocation73_spill] sm:$0xff] }
 0x28c   :  { %10230 = vst [vmem:[#allocation21_spill] sm:$0xff] %v7940_v60  ;;  %v2169_v5 = vmul.f32 0.0, %v2164_v8  ;;  %5659 = vtanh.f32 %v7940_v60  ;;  %v5658_v8 = vpop.eup %5657 }
 0x28e   :  { %v7943_v61 = vadd.f32 %v2171_v57, %v2169_v5  ;;  %v10236_v5 = vld [vmem:[#allocation19_spill] sm:$0xff] }
 0x28f   :  { %v2231_v13 = vpop.f32.mrf.mxu1  ;;  %v2274_v14 = vpop.f32.mrf.mxu0 }
 0x290   :  { %10231 = vst [vmem:[#allocation22_spill] sm:$0xff] %v7943_v61  ;;  %5661 = vtanh.f32 %v7943_v61  ;;  %v2283_v38 = vadd.f32 %v2231_v13, %v10233_v53  ;;  %v2285_v9 = vadd.f32 %v2274_v14, %v10239_v10 }
 0x291   :  { %v2233_v42 = vpop.f32.mrf.mxu1  ;;  %v2276_v28 = vpop.f32.mrf.mxu0 }
 0x292   :  { %v2291_v25 = vmul.f32 0.5, %v2283_v38  ;;  %v2284_v58 = vadd.f32 %v2233_v42, %v10234_v44  ;;  %v2286_v30 = vadd.f32 %v2276_v28, %v10235_v51  ;;  %v2156_v38 = vadd.f32 1.0, %v5656_v16  ;;  %v10238_v28 = vld [vmem:[#allocation75_spill] sm:$0xff] }
 0x293   :  { %v2235_v4 = vpop.f32.mrf.mxu1  ;;  %v2278_v57 = vpop.f32.mrf.mxu0  ;;  %v2159_v42 = vadd.f32 1.0, %v5658_v8 }
 0x294   :  { %5663 = vtanh.f32 %v2291_v25  ;;  %v2292_v7 = vmul.f32 0.5, %v2284_v58  ;;  %v2287_v60 = vadd.f32 %v2235_v4, %v10236_v5  ;;  %v2162_v25 = vmul.f32 0.5, %v2156_v38 }
 0x295   :  { %v2237_v61 = vpop.f32.mrf.mxu1  ;;  %v2280_v6 = vpop.f32.mrf.mxu0  ;;  %v2165_v58 = vmul.f32 0.5, %v2159_v42 }
 0x296   :  { %5665 = vtanh.f32 %v2292_v7  ;;  %v2294_v13 = vmul.f32 0.5, %v2287_v60  ;;  %v2288_v53 = vadd.f32 %v2237_v61, %v967_v15  ;;  %v2290_v51 = vadd.f32 %v2280_v6, %v10238_v28  ;;  %v10240_v7 = vld [vmem:[#allocation74_spill] sm:$0xff] }
 0x297   :  { %5667 = vtanh.f32 %v2286_v30  ;;  %v2289_v60 = vadd.f32 %v2278_v57, %v10240_v7  ;;  %v2293_v6 = vmul.f32 0.5, %v2285_v9 }
 0x298   :  { %5669 = vtanh.f32 %v2294_v13  ;;  %v2295_v44 = vmul.f32 0.5, %v2288_v53 }
 0x299   :  { %v5660_v49 = vpop.eup %5659  ;;  %v2296_v38 = vmul.f32 0.5, %v2289_v60 }
 0x29a   :  { %5671 = vtanh.f32 %v2295_v44  ;;  %v2176_v5 = vmul.f32 %v5660_v49, %v2162_v25 }
 0x29b   :  { %5673 = vtanh.f32 %v2290_v51 }
 0x29c   :  { %5675 = vtanh.f32 %v2293_v6 }
 0x29d   :  { %v5662_v4 = vpop.eup %5661  ;;  %5677 = vtanh.f32 %v2296_v38  ;;  %v10242_v38 = vld [vmem:[#allocation101_spill] sm:$0xff] }
 0x29e   :  { %v2177_v17 = vmul.f32 %v5662_v4, %v2165_v58 }
 0x2a0   :  { %v2178_v15 = vpack.c.bf16 %v2177_v17, %v2176_v5 }
 0x2a1   :  { %v5664_v61 = vpop.eup %5663 }
 0x2a2   :  { %v2303_v16 = vadd.f32 1.0, %v5664_v61  ;;  %5087 = vst [vmem:[#allocation3] sm:$0xff] %v2178_v15   ;;  %2360 = vmatprep.mubr.bf16.mxu1 %v2178_v15  ;;  %2403 = vmatprep.mubr.bf16.mxu0 %v2178_v15 }
 0x2a3   :  { %v5666_v30 = vpop.eup %5665 }
 0x2a4   :  { %v5668_v8 = vpop.eup %5667  ;;  %v2309_v13 = vmul.f32 0.5, %v2303_v16  ;;  %v2304_v53 = vadd.f32 1.0, %v5666_v30 }
 0x2a5   :  { %v5670_v42 = vpop.eup %5669 }
 0x2a6   :  { %v2310_v44 = vmul.f32 0.5, %v2304_v53  ;;  %v2319_v49 = vmul.f32 %v5668_v8, %v2309_v13  ;;  %v2306_v28 = vadd.f32 1.0, %v5670_v42  ;;  %v10243_v42 = vld [vmem:[#allocation102_spill] sm:$0xff] }
 0x2a7   :  { %v5672_v51 = vpop.eup %5671 }
 0x2a8   :  { %v2317_v14 = vmul.f32 %v2310_v44, %v7583_v31  ;;  %v2312_v57 = vmul.f32 0.5, %v2306_v28  ;;  %v2307_v25 = vadd.f32 1.0, %v5672_v51  ;;  %v5674_v58 = vpop.eup %5673  ;;  %v10244_v44 = vld [vmem:[#allocation104_spill] sm:$0xff]  ;;  %v10246_v28 = vld [vmem:[#allocation106_spill] sm:$0xff] }
 0x2a9   :  { %v5676_v7 = vpop.eup %5675  ;;  %v8011_v51 = vld [vmem:[%s9733_s4 + $0x84] ss:$16 sps:$4 sm:$0xff]  }
 0x2aa   :  { %v7957_v4 = vadd.f32 %v2319_v49, %v2317_v14  ;;  %v2313_v5 = vmul.f32 0.5, %v2307_v25  ;;  %v2320_v9 = vmul.f32 %v5674_v58, %v2312_v57  ;;  %v5678_v60 = vpop.eup %5677  ;;  %v2305_v15 = vadd.f32 1.0, %v5676_v7  ;;  %v10245_v49 = vld [vmem:[#allocation105_spill] sm:$0xff]  ;;  %10247 = vst [vmem:[#allocation23_spill] sm:$0xff] %v8011_v51  ;;  %v8023_v57 = vld [vmem:[%s9733_s4 + $0x80] ss:$16 sps:$4 sm:$0xff]  }
 0x2ab   :  { %v2308_v31 = vadd.f32 1.0, %v5678_v60  ;;  %v8017_v14 = vld [vmem:[%s9733_s4 + $0x8c] ss:$16 sps:$4 sm:$0xff]   ;;  %10249 = vst [vmem:[#allocation26_spill] sm:$0xff] %v8023_v57  ;;  %v8029_v25 = vld [vmem:[%s9733_s4 + $0x88] ss:$16 sps:$4 sm:$0xff]  }
 0x2ac   :  { %v2318_v17 = vmul.f32 %v2313_v5, %v7586_v43  ;;  %5679 = vtanh.f32 %v7957_v4  ;;  %v2311_v16 = vmul.f32 0.5, %v2305_v15  ;;  %v10241_v43 = vld [vmem:[#allocation100_spill] sm:$0xff]  ;;  %10248 = vst [vmem:[#allocation25_spill] sm:$0xff] %v8017_v14  ;;  %10250 = vst [vmem:[#allocation30_spill] sm:$0xff] %v8029_v25  ;;  %v8041_v5 = vld [vmem:[%s9733_s4 + $0x6c] ss:$16 sps:$4 sm:$0xff]  }
 0x2ad   :  { %v2314_v30 = vmul.f32 0.5, %v2308_v31  ;;  %v8035_v58 = vld [vmem:[%s9733_s4 + $0x64] ss:$16 sps:$4 sm:$0xff]   ;;  %10252 = vst [vmem:[#allocation33_spill] sm:$0xff] %v8041_v5  ;;  %v8065_v60 = vld [vmem:[%s9733_s4 + $0x4c] ss:$16 sps:$4 sm:$0xff]  }
 0x2ae   :  { %v7961_v10 = vadd.f32 %v2320_v9, %v2318_v17  ;;  %10251 = vst [vmem:[#allocation31_spill] sm:$0xff] %v8035_v58  ;;  %v8047_v9 = vld [vmem:[%s9733_s4 + $0x60] ss:$16 sps:$4 sm:$0xff]   ;;  %v8053_v17 = vld [vmem:[%s9733_s4 + $0x68] ss:$16 sps:$4 sm:$0xff]   ;;  %10256 = vst [vmem:[#allocation38_spill] sm:$0xff] %v8065_v60 }
 0x2af   :  { %10253 = vst [vmem:[#allocation34_spill] sm:$0xff] %v8047_v9  ;;  %10254 = vst [vmem:[#allocation35_spill] sm:$0xff] %v8053_v17  ;;  %v8059_v7 = vld [vmem:[%s9733_s4 + $0x44] ss:$16 sps:$4 sm:$0xff]   ;;  %v8071_v15 = vld [vmem:[%s9733_s4 + $0x40] ss:$16 sps:$4 sm:$0xff]  }
 0x2b0   :  { %5681 = vtanh.f32 %v7961_v10  ;;  %10255 = vst [vmem:[#allocation36_spill] sm:$0xff] %v8059_v7  ;;  %10257 = vst [vmem:[#allocation39_spill] sm:$0xff] %v8071_v15  ;;  %v8077_v31 = vld [vmem:[%s9733_s4 + $0x48] ss:$16 sps:$4 sm:$0xff]  }
 0x2b1   :  { %10258 = vst [vmem:[#allocation40_spill] sm:$0xff] %v8077_v31 }
 0x2b9   :  { %v5680_v61 = vpop.eup %5679 }
 0x2ba   :  { %v2325_v8 = vmul.f32 %v5680_v61, %v2311_v16  ;;  %v8083_v61 = vld [vmem:[%s9733_s4 + $0x24] ss:$16 sps:$4 sm:$0xff]   ;;  %v8089_v16 = vld [vmem:[%s9733_s4 + $0x2c] ss:$16 sps:$4 sm:$0xff]  }
 0x2bb   :  { %10259 = vst [vmem:[#allocation41_spill] sm:$0xff] %v8083_v61  ;;  %10260 = vst [vmem:[#allocation45_spill] sm:$0xff] %v8089_v16 }
 0x2bd   :  { %v5682_v6 = vpop.eup %5681 }
 0x2be   :  { %v2326_v13 = vmul.f32 %v5682_v6, %v2314_v30  ;;  %v8095_v30 = vld [vmem:[%s9733_s4 + $0x20] ss:$16 sps:$4 sm:$0xff]   ;;  %v8101_v6 = vld [vmem:[%s9733_s4 + $0x28] ss:$16 sps:$4 sm:$0xff]  }
 0x2bf   :  { %10261 = vst [vmem:[#allocation46_spill] sm:$0xff] %v8095_v30  ;;  %10262 = vst [vmem:[#allocation47_spill] sm:$0xff] %v8101_v6 }
 0x2c0   :  { %v2327_v53 = vpack.c.bf16 %v2326_v13, %v2325_v8  ;;  %v8107_v8 = vld [vmem:[%s9733_s4 + $0x4] ss:$16 sps:$4 sm:$0xff]   ;;  %v8113_v13 = vld [vmem:[%s9733_s4 + $0xc] ss:$16 sps:$4 sm:$0xff]  }
 0x2c1   :  { %10263 = vst [vmem:[#allocation48_spill] sm:$0xff] %v8107_v8  ;;  %10264 = vst [vmem:[#allocation50_spill] sm:$0xff] %v8113_v13 }
 0x2c2   :  { %2361 = vmatmul.mubr.bf16.vlgmr.msra.gmra.mxu1 %v2327_v53  ;;  %2404 = vmatmul.mubr.bf16.vlgmr.msra.gmra.mxu0 %v2327_v53 }
 0x2c3   :  { %2471 = vmatpush1.bf16.msra.mxu1 %v7596_v40  ;;  %2514 = vmatpush1.bf16.msra.mxu0 %v7602_v2 }
 0x2c4   :  { %2472 = vmatprep.subr.bf16.mxu1 %v7608_v20  ;;  %2515 = vmatprep.subr.bf16.mxu0 %v7614_v29 }
 0x2c5   :  { %2502 = vmatprep.mubr.bf16.mxu1 %v10180_v62  ;;  %2545 = vmatprep.mubr.bf16.mxu0 %v10180_v62 }
 0x2c7   :  { %2473 = vmatpush1.bf16.msra.mxu1 %v7622_v63  ;;  %2516 = vmatpush1.bf16.msra.mxu0 %v7628_v11 }
 0x2c8   :  { %2474 = vmatprep.subr.bf16.mxu1 %v7634_v23  ;;  %2517 = vmatprep.subr.bf16.mxu0 %v7640_v52 }
 0x2cb   :  { %2475 = vmatpush1.bf16.msra.mxu1 %v7646_v21  ;;  %2518 = vmatpush1.bf16.msra.mxu0 %v7652_v54 }
 0x2cc   :  { %2476 = vmatprep.subr.bf16.mxu1 %v7658_v18  ;;  %2519 = vmatprep.subr.bf16.mxu0 %v7664_v55 }
 0x2cf   :  { %2477 = vmatpush1.bf16.msra.mxu1 %v7670_v0  ;;  %2520 = vmatpush1.bf16.msra.mxu0 %v7676_v37 }
 0x2d0   :  { %2478 = vmatprep.subr.bf16.mxu1 %v7682_v19  ;;  %2521 = vmatprep.subr.bf16.mxu0 %v7688_v22 }
 0x2d3   :  { %2479 = vmatpush1.bf16.msra.mxu1 %v7694_v50  ;;  %2522 = vmatpush1.bf16.msra.mxu0 %v7700_v12 }
 0x2d4   :  { %2480 = vmatprep.subr.bf16.mxu1 %v7706_v34  ;;  %2523 = vmatprep.subr.bf16.mxu0 %v7712_v26 }
 0x2d7   :  { %2481 = vmatpush1.bf16.msra.mxu1 %v7718_v36  ;;  %2524 = vmatpush1.bf16.msra.mxu0 %v7724_v48 }
 0x2d8   :  { %2482 = vmatprep.subr.bf16.mxu1 %v7730_v3  ;;  %2525 = vmatprep.subr.bf16.mxu0 %v7736_v46 }
 0x2db   :  { %2483 = vmatpush1.bf16.msra.mxu1 %v7742_v24  ;;  %2526 = vmatpush1.bf16.msra.mxu0 %v7748_v33 }
 0x2dc   :  { %2484 = vmatprep.subr.bf16.mxu1 %v7754_v32  ;;  %2527 = vmatprep.subr.bf16.mxu0 %v7760_v35 }
 0x2df   :  { %2485 = vmatpush1.bf16.msra.mxu1 %v7766_v27  ;;  %2528 = vmatpush1.bf16.msra.mxu0 %v7772_v47 }
 0x2e0   :  { %2601 = vmatprep.subr.bf16.mxu1 %v7778_v1  ;;  %2644 = vmatprep.subr.bf16.mxu0 %v7784_v41 }
 0x2e2   :  { %2503 = vmatmul.mubr.bf16.vlgmr.msra.gmra.mxu1 %v2327_v53  ;;  %2546 = vmatmul.mubr.bf16.vlgmr.msra.gmra.mxu0 %v2327_v53  ;;  %v8119_v53 = vld [vmem:[%s9733_s4] ss:$16 sps:$4 sm:$0xff]  }
 0x2e3   :  { %2602 = vmatpush1.bf16.msra.mxu1 %v7792_v56  ;;  %2645 = vmatpush1.bf16.msra.mxu0 %v7798_v45  ;;  %10265 = vst [vmem:[#allocation51_spill] sm:$0xff] %v8119_v53 }
 0x2e4   :  { %2603 = vmatprep.subr.bf16.mxu1 %v7804_v59  ;;  %2646 = vmatprep.subr.bf16.mxu0 %v10241_v43 }
 0x2e7   :  { %2604 = vmatpush1.bf16.msra.mxu1 %v10242_v38  ;;  %2647 = vmatpush1.bf16.msra.mxu0 %v10243_v42 }
 0x2e8   :  { %2605 = vmatprep.subr.bf16.mxu1 %v7828_v39  ;;  %2648 = vmatprep.subr.bf16.mxu0 %v10244_v44 }
 0x2eb   :  { %2606 = vmatpush1.bf16.msra.mxu1 %v10245_v49  ;;  %2649 = vmatpush1.bf16.msra.mxu0 %v10246_v28 }
 0x2ec   :  { %2607 = vmatprep.subr.bf16.mxu1 %v8011_v51  ;;  %2650 = vmatprep.subr.bf16.mxu0 %v8017_v14 }
 0x2ef   :  { %2608 = vmatpush1.bf16.msra.mxu1 %v8023_v57  ;;  %2651 = vmatpush1.bf16.msra.mxu0 %v8029_v25 }
 0x2f0   :  { %2609 = vmatprep.subr.bf16.mxu1 %v8035_v58  ;;  %2652 = vmatprep.subr.bf16.mxu0 %v8041_v5 }
 0x2f3   :  { %2610 = vmatpush1.bf16.msra.mxu1 %v8047_v9  ;;  %2653 = vmatpush1.bf16.msra.mxu0 %v8053_v17  ;;  %v10302_v17 = vld [vmem:[#allocation17_spill] sm:$0xff] }
 0x2f4   :  { %2611 = vmatprep.subr.bf16.mxu1 %v8059_v7  ;;  %2654 = vmatprep.subr.bf16.mxu0 %v8065_v60 }
 0x2f7   :  { %2612 = vmatpush1.bf16.msra.mxu1 %v8071_v15  ;;  %2655 = vmatpush1.bf16.msra.mxu0 %v8077_v31 }
 0x2f8   :  { %2613 = vmatprep.subr.bf16.mxu1 %v8083_v61  ;;  %2656 = vmatprep.subr.bf16.mxu0 %v8089_v16  ;;  %v10301_v61 = vld [vmem:[#allocation13_spill] sm:$0xff] }
 0x2fb   :  { %2614 = vmatpush1.bf16.msra.mxu1 %v8095_v30  ;;  %2657 = vmatpush1.bf16.msra.mxu0 %v8101_v6  ;;  %v8125_v6 = vld [vmem:[%s9733_s4 + $0x8] ss:$16 sps:$4 sm:$0xff]   ;;  %v10300_v30 = vld [vmem:[#allocation12_spill] sm:$0xff] }
 0x2fc   :  { %2615 = vmatprep.subr.bf16.mxu1 %v8107_v8  ;;  %2658 = vmatprep.subr.bf16.mxu0 %v8113_v13  ;;  %10266 = vst [vmem:[#allocation52_spill] sm:$0xff] %v8125_v6  ;;  %v8131_v8 = vld [vmem:[%s9733_s4 + $0x1e4] ss:$16 sps:$4 sm:$0xff]   ;;  %v8137_v13 = vld [vmem:[%s9733_s4 + $0x1ec] ss:$16 sps:$4 sm:$0xff]  }
 0x2fd   :  { %10267 = vst [vmem:[#allocation53_spill] sm:$0xff] %v8131_v8  ;;  %10268 = vst [vmem:[#allocation57_spill] sm:$0xff] %v8137_v13 }
 0x2ff   :  { %2616 = vmatpush1.bf16.msra.mxu1 %v8119_v53  ;;  %2659 = vmatpush1.bf16.msra.mxu0 %v8125_v6  ;;  %v8143_v53 = vld [vmem:[%s9733_s4 + $0x1e0] ss:$16 sps:$4 sm:$0xff]   ;;  %v8149_v6 = vld [vmem:[%s9733_s4 + $0x1e8] ss:$16 sps:$4 sm:$0xff]  }
 0x300   :  { %2617 = vmatprep.subr.bf16.mxu1 %v8131_v8  ;;  %2660 = vmatprep.subr.bf16.mxu0 %v8137_v13  ;;  %10269 = vst [vmem:[#allocation58_spill] sm:$0xff] %v8143_v53  ;;  %10270 = vst [vmem:[#allocation5_spill] sm:$0xff] %v8149_v6  ;;  %v8155_v8 = vld [vmem:[%s9733_s4 + $0x1c4] ss:$16 sps:$4 sm:$0xff]   ;;  %v8161_v13 = vld [vmem:[%s9733_s4 + $0x1cc] ss:$16 sps:$4 sm:$0xff]  }
 0x301   :  { %10271 = vst [vmem:[#allocation15_spill] sm:$0xff] %v8155_v8  ;;  %10272 = vst [vmem:[#allocation11_spill] sm:$0xff] %v8161_v13 }
 0x303   :  { %2618 = vmatpush2.bf16.msra.mxu1 %v8143_v53  ;;  %2661 = vmatpush2.bf16.msra.mxu0 %v8149_v6  ;;  %v8167_v53 = vld [vmem:[%s9733_s4 + $0x1c0] ss:$16 sps:$4 sm:$0xff]   ;;  %v8173_v6 = vld [vmem:[%s9733_s4 + $0x1c8] ss:$16 sps:$4 sm:$0xff]  }
 0x304   :  { %2619 = vmatprep.subr.bf16.mxu1 %v8155_v8  ;;  %2662 = vmatprep.subr.bf16.mxu0 %v8161_v13  ;;  %10273 = vst [vmem:[#allocation14_spill] sm:$0xff] %v8167_v53  ;;  %10274 = vst [vmem:[#allocation73_spill] sm:$0xff] %v8173_v6  ;;  %v8179_v8 = vld [vmem:[%s9733_s4 + $0x1a4] ss:$16 sps:$4 sm:$0xff]   ;;  %v8185_v13 = vld [vmem:[%s9733_s4 + $0x1ac] ss:$16 sps:$4 sm:$0xff]  }
 0x305   :  { %10275 = vst [vmem:[#allocation19_spill] sm:$0xff] %v8179_v8  ;;  %10276 = vst [vmem:[#allocation4_spill] sm:$0xff] %v8185_v13 }
 0x307   :  { %2620 = vmatpush2.bf16.msra.mxu1 %v8167_v53  ;;  %2663 = vmatpush2.bf16.msra.mxu0 %v8173_v6  ;;  %v8191_v53 = vld [vmem:[%s9733_s4 + $0x1a0] ss:$16 sps:$4 sm:$0xff]   ;;  %v8197_v6 = vld [vmem:[%s9733_s4 + $0x1a8] ss:$16 sps:$4 sm:$0xff]  }
 0x308   :  { %2621 = vmatprep.subr.bf16.mxu1 %v8179_v8  ;;  %2664 = vmatprep.subr.bf16.mxu0 %v8185_v13  ;;  %10277 = vst [vmem:[#allocation75_spill] sm:$0xff] %v8191_v53  ;;  %10278 = vst [vmem:[#allocation72_spill] sm:$0xff] %v8197_v6  ;;  %v8203_v8 = vld [vmem:[%s9733_s4 + $0x184] ss:$16 sps:$4 sm:$0xff]   ;;  %v8209_v13 = vld [vmem:[%s9733_s4 + $0x18c] ss:$16 sps:$4 sm:$0xff]  }
 0x309   :  { %10279 = vst [vmem:[#allocation74_spill] sm:$0xff] %v8203_v8  ;;  %10280 = vst [vmem:[#allocation100_spill] sm:$0xff] %v8209_v13 }
 0x30b   :  { %2622 = vmatpush2.bf16.msra.mxu1 %v8191_v53  ;;  %2665 = vmatpush2.bf16.msra.mxu0 %v8197_v6  ;;  %v8215_v53 = vld [vmem:[%s9733_s4 + $0x180] ss:$16 sps:$4 sm:$0xff]   ;;  %v8221_v6 = vld [vmem:[%s9733_s4 + $0x188] ss:$16 sps:$4 sm:$0xff]  }
 0x30c   :  { %2623 = vmatprep.subr.bf16.mxu1 %v8203_v8  ;;  %2666 = vmatprep.subr.bf16.mxu0 %v8209_v13  ;;  %10281 = vst [vmem:[#allocation107_spill] sm:$0xff] %v8215_v53  ;;  %10282 = vst [vmem:[#allocation108_spill] sm:$0xff] %v8221_v6  ;;  %v8227_v8 = vld [vmem:[%s9733_s4 + $0x164] ss:$16 sps:$4 sm:$0xff]   ;;  %v8233_v13 = vld [vmem:[%s9733_s4 + $0x16c] ss:$16 sps:$4 sm:$0xff]  }
 0x30d   :  { %10283 = vst [vmem:[#allocation109_spill] sm:$0xff] %v8227_v8  ;;  %10284 = vst [vmem:[#allocation110_spill] sm:$0xff] %v8233_v13 }
 0x30f   :  { %2624 = vmatpush2.bf16.msra.mxu1 %v8215_v53  ;;  %2667 = vmatpush2.bf16.msra.mxu0 %v8221_v6  ;;  %v8239_v53 = vld [vmem:[%s9733_s4 + $0x160] ss:$16 sps:$4 sm:$0xff]   ;;  %v8245_v6 = vld [vmem:[%s9733_s4 + $0x168] ss:$16 sps:$4 sm:$0xff]  }
 0x310   :  { %2625 = vmatprep.subr.bf16.mxu1 %v8227_v8  ;;  %2668 = vmatprep.subr.bf16.mxu0 %v8233_v13  ;;  %10285 = vst [vmem:[#allocation111_spill] sm:$0xff] %v8239_v53  ;;  %10286 = vst [vmem:[#allocation112_spill] sm:$0xff] %v8245_v6  ;;  %v8251_v8 = vld [vmem:[%s9733_s4 + $0x144] ss:$16 sps:$4 sm:$0xff]   ;;  %v8257_v13 = vld [vmem:[%s9733_s4 + $0x14c] ss:$16 sps:$4 sm:$0xff]  }
 0x311   :  { %10287 = vst [vmem:[#allocation113_spill] sm:$0xff] %v8251_v8  ;;  %10288 = vst [vmem:[#allocation114_spill] sm:$0xff] %v8257_v13 }
 0x313   :  { %2626 = vmatpush2.bf16.msra.mxu1 %v8239_v53  ;;  %2669 = vmatpush2.bf16.msra.mxu0 %v8245_v6  ;;  %v8263_v53 = vld [vmem:[%s9733_s4 + $0x140] ss:$16 sps:$4 sm:$0xff]   ;;  %v8269_v6 = vld [vmem:[%s9733_s4 + $0x148] ss:$16 sps:$4 sm:$0xff]  }
 0x314   :  { %2627 = vmatprep.subr.bf16.mxu1 %v8251_v8  ;;  %2670 = vmatprep.subr.bf16.mxu0 %v8257_v13  ;;  %10289 = vst [vmem:[#allocation115_spill] sm:$0xff] %v8263_v53  ;;  %10290 = vst [vmem:[#allocation116_spill] sm:$0xff] %v8269_v6  ;;  %v8275_v8 = vld [vmem:[%s9733_s4 + $0x124] ss:$16 sps:$4 sm:$0xff]   ;;  %v8281_v13 = vld [vmem:[%s9733_s4 + $0x12c] ss:$16 sps:$4 sm:$0xff]  }
 0x315   :  { %10291 = vst [vmem:[#allocation117_spill] sm:$0xff] %v8275_v8  ;;  %10292 = vst [vmem:[#allocation118_spill] sm:$0xff] %v8281_v13 }
 0x317   :  { %2628 = vmatpush2.bf16.msra.mxu1 %v8263_v53  ;;  %2671 = vmatpush2.bf16.msra.mxu0 %v8269_v6  ;;  %v8287_v53 = vld [vmem:[%s9733_s4 + $0x120] ss:$16 sps:$4 sm:$0xff]   ;;  %v8293_v6 = vld [vmem:[%s9733_s4 + $0x128] ss:$16 sps:$4 sm:$0xff]  }
 0x318   :  { %2629 = vmatprep.subr.bf16.mxu1 %v8275_v8  ;;  %2672 = vmatprep.subr.bf16.mxu0 %v8281_v13  ;;  %10293 = vst [vmem:[#allocation119_spill] sm:$0xff] %v8287_v53  ;;  %10294 = vst [vmem:[#allocation120_spill] sm:$0xff] %v8293_v6  ;;  %v8299_v8 = vld [vmem:[%s9733_s4 + $0x104] ss:$16 sps:$4 sm:$0xff]   ;;  %v8305_v13 = vld [vmem:[%s9733_s4 + $0x10c] ss:$16 sps:$4 sm:$0xff]  }
 0x319   :  { %10295 = vst [vmem:[#allocation121_spill] sm:$0xff] %v8299_v8  ;;  %10296 = vst [vmem:[#allocation122_spill] sm:$0xff] %v8305_v13 }
 0x31b   :  { %2630 = vmatpush2.bf16.msra.mxu1 %v8287_v53  ;;  %2673 = vmatpush2.bf16.msra.mxu0 %v8293_v6  ;;  %v8311_v53 = vld [vmem:[%s9733_s4 + $0x100] ss:$16 sps:$4 sm:$0xff]   ;;  %v8317_v6 = vld [vmem:[%s9733_s4 + $0x108] ss:$16 sps:$4 sm:$0xff]  }
 0x31c   :  { %2631 = vmatprep.subr.bf16.mxu1 %v8299_v8  ;;  %2674 = vmatprep.subr.bf16.mxu0 %v8305_v13  ;;  %10297 = vst [vmem:[#allocation123_spill] sm:$0xff] %v8311_v53  ;;  %10298 = vst [vmem:[#allocation124_spill] sm:$0xff] %v8317_v6  ;;  %v10299_v8 = vld [vmem:[#allocation10_spill] sm:$0xff] }
 0x31f   :  { %2632 = vmatpush2.bf16.msra.mxu1 %v8311_v53  ;;  %2675 = vmatpush2.bf16.msra.mxu0 %v8317_v6  ;;  %v10303_v6 = vld [vmem:[#allocation18_spill] sm:$0xff] }
 0x320   :  { %2743 = vmatprep.subr.bf16.mxu1 %v10299_v8  ;;  %2786 = vmatprep.subr.bf16.mxu0 %v10300_v30 }
 0x382   :  { %v2362_v16 = vpop.f32.mrf.mxu1  ;;  %v2405_v13 = vpop.f32.mrf.mxu0 }
 0x383   :  { %v2363_v31 = vadd.f32 %v2362_v16, %v10301_v61 }
 0x384   :  { %v2364_v15 = vpop.f32.mrf.mxu1  ;;  %v2407_v60 = vpop.f32.mrf.mxu0 }
 0x385   :  { %v2414_v7 = vmul.f32 0.5, %v2363_v31  ;;  %v2365_v53 = vadd.f32 %v2364_v15, %v10302_v17  ;;  %v2408_v57 = vadd.f32 %v2407_v60, %v10303_v6  ;;  %v10304_v31 = vld [vmem:[#allocation20_spill] sm:$0xff] }
 0x386   :  { %v2366_v9 = vpop.f32.mrf.mxu1  ;;  %v2409_v5 = vpop.f32.mrf.mxu0  ;;  %v2406_v28 = vadd.f32 %v2405_v13, %v10304_v31 }
 0x387   :  { %5683 = vtanh.f32 %v2414_v7  ;;  %v2415_v58 = vmul.f32 0.5, %v2365_v53  ;;  %v2367_v25 = vadd.f32 %v2366_v9, %v10301_v61  ;;  %v2410_v7 = vadd.f32 %v2409_v5, %v10304_v31  ;;  %v10307_v31 = vld [vmem:[#allocation22_spill] sm:$0xff] }
 0x388   :  { %v2368_v8 = vpop.f32.mrf.mxu1  ;;  %v2411_v51 = vpop.f32.mrf.mxu0  ;;  %v2416_v60 = vmul.f32 0.5, %v2406_v28 }
 0x389   :  { %5685 = vtanh.f32 %v2415_v58  ;;  %v2417_v30 = vmul.f32 0.5, %v2367_v25  ;;  %v2369_v14 = vadd.f32 %v2368_v8, %v10302_v17  ;;  %v2412_v15 = vadd.f32 %v2411_v51, %v10303_v6  ;;  %v10305_v51 = vld [vmem:[#allocation21_spill] sm:$0xff] }
 0x38a   :  { %v2419_v58 = vmul.f32 0.5, %v2410_v7 }
 0x38b   :  { %5687 = vtanh.f32 %v2417_v30  ;;  %v2418_v16 = vmul.f32 0.5, %v2369_v14 }
 0x38c   :  { %5689 = vtanh.f32 %v2408_v57 }
 0x38d   :  { %5691 = vtanh.f32 %v2418_v16 }
 0x38e   :  { %5693 = vtanh.f32 %v2412_v15 }
 0x38f   :  { %5695 = vtanh.f32 %v2416_v60 }
 0x390   :  { %5697 = vtanh.f32 %v2419_v58  ;;  %v10310_v58 = vld [vmem:[#allocation28_spill] sm:$0xff] }
 0x394   :  { %v5684_v9 = vpop.eup %5683 }
 0x395   :  { %v2426_v53 = vadd.f32 1.0, %v5684_v9 }
 0x396   :  { %v5686_v61 = vpop.eup %5685 }
 0x397   :  { %v2432_v25 = vmul.f32 0.5, %v2426_v53  ;;  %v2427_v49 = vadd.f32 1.0, %v5686_v61 }
 0x398   :  { %v5688_v8 = vpop.eup %5687 }
 0x399   :  { %v5690_v17 = vpop.eup %5689  ;;  %v2433_v14 = vmul.f32 0.5, %v2427_v49  ;;  %v2429_v57 = vadd.f32 1.0, %v5688_v8  ;;  %v10309_v8 = vld [vmem:[#allocation8_spill] sm:$0xff] }
 0x39a   :  { %v5692_v30 = vpop.eup %5691  ;;  %v2442_v13 = vmul.f32 %v5690_v17, %v2432_v25  ;;  %v864_v44 = vadd.f32 %v10310_v58, %v10309_v8  ;;  %v10311_v17 = vld [vmem:[#allocation24_spill] sm:$0xff]  ;;  %v10315_v58 = vld [vmem:[#allocation6_spill] sm:$0xff] }
 0x39b   :  { %v2440_v16 = vmul.f32 %v2433_v14, %v10305_v51  ;;  %v2435_v15 = vmul.f32 0.5, %v2429_v57  ;;  %v2430_v6 = vadd.f32 1.0, %v5692_v30  ;;  %v5694_v28 = vpop.eup %5693  ;;  %v10312_v30 = vld [vmem:[#allocation27_spill] sm:$0xff] }
 0x39c   :  { %v977_v8 = vadd.f32 %v10315_v58, %v864_v44  ;;  %v10317_v58 = vld [vmem:[#allocation76_spill] sm:$0xff] }
 0x39d   :  { %v8331_v5 = vadd.f32 %v2442_v13, %v2440_v16  ;;  %v2436_v9 = vmul.f32 0.5, %v2430_v6  ;;  %v2443_v53 = vmul.f32 %v5694_v28, %v2435_v15  ;;  %v10313_v16 = vld [vmem:[#allocation77_spill] sm:$0xff] }
 0x39f   :  { %10306 = vst [vmem:[#allocation21_spill] sm:$0xff] %v8331_v5  ;;  %v2441_v7 = vmul.f32 %v2436_v9, %v10307_v31  ;;  %5699 = vtanh.f32 %v8331_v5  ;;  %v5696_v31 = vpop.eup %5695 }
 0x3a0   :  { %v5698_v28 = vpop.eup %5697 }
 0x3a1   :  { %v8335_v61 = vadd.f32 %v2443_v53, %v2441_v7  ;;  %v10314_v53 = vld [vmem:[#allocation32_spill] sm:$0xff] }
 0x3a2   :  { %v2504_v49 = vpop.f32.mrf.mxu1  ;;  %v2547_v60 = vpop.f32.mrf.mxu0 }
 0x3a3   :  { %10308 = vst [vmem:[#allocation22_spill] sm:$0xff] %v8335_v61  ;;  %5701 = vtanh.f32 %v8335_v61  ;;  %v2556_v25 = vadd.f32 %v2504_v49, %v10311_v17  ;;  %v2558_v38 = vadd.f32 %v2547_v60, %v10317_v58 }
 0x3a4   :  { %v2506_v14 = vpop.f32.mrf.mxu1  ;;  %v2549_v57 = vpop.f32.mrf.mxu0 }
 0x3a5   :  { %v2564_v6 = vmul.f32 0.5, %v2556_v25  ;;  %v2557_v51 = vadd.f32 %v2506_v14, %v10312_v30  ;;  %v2559_v13 = vadd.f32 %v2549_v57, %v10313_v16  ;;  %v2428_v25 = vadd.f32 1.0, %v5696_v31  ;;  %v10316_v57 = vld [vmem:[#allocation79_spill] sm:$0xff] }
 0x3a6   :  { %v2508_v15 = vpop.f32.mrf.mxu1  ;;  %v2551_v9 = vpop.f32.mrf.mxu0  ;;  %v2431_v14 = vadd.f32 1.0, %v5698_v28 }
 0x3a7   :  { %5703 = vtanh.f32 %v2564_v6  ;;  %v2565_v7 = vmul.f32 0.5, %v2557_v51  ;;  %v2560_v5 = vadd.f32 %v2508_v15, %v10314_v53  ;;  %v2434_v6 = vmul.f32 0.5, %v2428_v25 }
 0x3a8   :  { %v2510_v61 = vpop.f32.mrf.mxu1  ;;  %v2553_v39 = vpop.f32.mrf.mxu0  ;;  %v2437_v51 = vmul.f32 0.5, %v2431_v14 }
 0x3a9   :  { %5705 = vtanh.f32 %v2565_v7  ;;  %v2567_v49 = vmul.f32 0.5, %v2560_v5  ;;  %v2561_v17 = vadd.f32 %v2510_v61, %v977_v8  ;;  %v2563_v16 = vadd.f32 %v2553_v39, %v10316_v57  ;;  %v10318_v7 = vld [vmem:[#allocation78_spill] sm:$0xff] }
 0x3aa   :  { %5707 = vtanh.f32 %v2559_v13  ;;  %v2562_v5 = vadd.f32 %v2551_v9, %v10318_v7  ;;  %v2566_v39 = vmul.f32 0.5, %v2558_v38 }
 0x3ab   :  { %5709 = vtanh.f32 %v2567_v49  ;;  %v2568_v30 = vmul.f32 0.5, %v2561_v17 }
 0x3ac   :  { %v5700_v42 = vpop.eup %5699  ;;  %v2569_v25 = vmul.f32 0.5, %v2562_v5 }
 0x3ad   :  { %5711 = vtanh.f32 %v2568_v30  ;;  %v2448_v53 = vmul.f32 %v5700_v42, %v2434_v6 }
 0x3ae   :  { %5713 = vtanh.f32 %v2563_v16 }
 0x3af   :  { %5715 = vtanh.f32 %v2566_v39 }
 0x3b0   :  { %v5702_v15 = vpop.eup %5701  ;;  %5717 = vtanh.f32 %v2569_v25  ;;  %v10356_v25 = vld [vmem:[#allocation72_spill] sm:$0xff] }
 0x3b1   :  { %v2449_v44 = vmul.f32 %v5702_v15, %v2437_v51 }
 0x3b3   :  { %v2450_v61 = vpack.c.bf16 %v2449_v44, %v2448_v53 }
 0x3b4   :  { %v5704_v8 = vpop.eup %5703 }
 0x3b5   :  { %v2576_v31 = vadd.f32 1.0, %v5704_v8  ;;  %5092 = vst [vmem:[#allocation3 + $0x8] sm:$0xff] %v2450_v61   ;;  %2633 = vmatprep.mubr.bf16.mxu1 %v2450_v61  ;;  %2676 = vmatprep.mubr.bf16.mxu0 %v2450_v61 }
 0x3b6   :  { %v5706_v13 = vpop.eup %5705 }
 0x3b7   :  { %v5708_v28 = vpop.eup %5707  ;;  %v2582_v49 = vmul.f32 0.5, %v2576_v31  ;;  %v2577_v17 = vadd.f32 1.0, %v5706_v13 }
 0x3b8   :  { %v5710_v14 = vpop.eup %5709 }
 0x3b9   :  { %v2583_v30 = vmul.f32 0.5, %v2577_v17  ;;  %v2592_v42 = vmul.f32 %v5708_v28, %v2582_v49  ;;  %v2579_v57 = vadd.f32 1.0, %v5710_v14  ;;  %v10357_v14 = vld [vmem:[#allocation74_spill] sm:$0xff] }
 0x3ba   :  { %v5712_v16 = vpop.eup %5711 }
 0x3bb   :  { %v2590_v60 = vmul.f32 %v2583_v30, %v7957_v4  ;;  %v2585_v9 = vmul.f32 0.5, %v2579_v57  ;;  %v2580_v6 = vadd.f32 1.0, %v5712_v16  ;;  %v5714_v51 = vpop.eup %5713  ;;  %v10358_v30 = vld [vmem:[#allocation100_spill] sm:$0xff]  ;;  %v10361_v16 = vld [vmem:[#allocation109_spill] sm:$0xff] }
 0x3bc   :  { %v5716_v7 = vpop.eup %5715  ;;  %v10360_v57 = vld [vmem:[#allocation108_spill] sm:$0xff] }
 0x3bd   :  { %v8349_v15 = vadd.f32 %v2592_v42, %v2590_v60  ;;  %v2586_v53 = vmul.f32 0.5, %v2580_v6  ;;  %v2593_v38 = vmul.f32 %v5714_v51, %v2585_v9  ;;  %v5718_v5 = vpop.eup %5717  ;;  %v2578_v61 = vadd.f32 1.0, %v5716_v7  ;;  %v10359_v42 = vld [vmem:[#allocation107_spill] sm:$0xff]  ;;  %v10362_v60 = vld [vmem:[#allocation110_spill] sm:$0xff]  ;;  %v10364_v6 = vld [vmem:[#allocation112_spill] sm:$0xff] }
 0x3be   :  { %v2581_v4 = vadd.f32 1.0, %v5718_v5  ;;  %v10363_v9 = vld [vmem:[#allocation111_spill] sm:$0xff]  ;;  %v10365_v51 = vld [vmem:[#allocation113_spill] sm:$0xff]  ;;  %v10370_v5 = vld [vmem:[#allocation118_spill] sm:$0xff] }
 0x3bf   :  { %v2591_v44 = vmul.f32 %v2586_v53, %v7961_v10  ;;  %5719 = vtanh.f32 %v8349_v15  ;;  %v2584_v31 = vmul.f32 0.5, %v2578_v61  ;;  %v10354_v10 = vld [vmem:[#allocation4_spill] sm:$0xff]  ;;  %v10366_v53 = vld [vmem:[#allocation114_spill] sm:$0xff]  ;;  %v10369_v7 = vld [vmem:[#allocation117_spill] sm:$0xff] }
 0x3c0   :  { %v2587_v13 = vmul.f32 0.5, %v2581_v4  ;;  %v10371_v61 = vld [vmem:[#allocation119_spill] sm:$0xff]  ;;  %v10372_v4 = vld [vmem:[#allocation120_spill] sm:$0xff] }
 0x3c1   :  { %v8353_v58 = vadd.f32 %v2593_v38, %v2591_v44  ;;  %v10367_v38 = vld [vmem:[#allocation115_spill] sm:$0xff]  ;;  %v10368_v44 = vld [vmem:[#allocation116_spill] sm:$0xff] }
 0x3c3   :  { %5721 = vtanh.f32 %v8353_v58 }
 0x3cc   :  { %v5720_v8 = vpop.eup %5719 }
 0x3cd   :  { %v2598_v28 = vmul.f32 %v5720_v8, %v2584_v31  ;;  %v10373_v8 = vld [vmem:[#allocation121_spill] sm:$0xff]  ;;  %v10374_v31 = vld [vmem:[#allocation122_spill] sm:$0xff] }
 0x3d0   :  { %v5722_v39 = vpop.eup %5721 }
 0x3d1   :  { %v2599_v49 = vmul.f32 %v5722_v39, %v2587_v13  ;;  %v10375_v13 = vld [vmem:[#allocation123_spill] sm:$0xff]  ;;  %v10376_v39 = vld [vmem:[#allocation124_spill] sm:$0xff] }
 0x3d3   :  { %v2600_v17 = vpack.c.bf16 %v2599_v49, %v2598_v28  ;;  %v10377_v28 = vld [vmem:[#allocation10_spill] sm:$0xff]  ;;  %v10378_v49 = vld [vmem:[#allocation12_spill] sm:$0xff] }
 0x3d5   :  { %2634 = vmatmul.mubr.bf16.vlgmr.msra.gmra.mxu1 %v2600_v17  ;;  %2677 = vmatmul.mubr.bf16.vlgmr.msra.gmra.mxu0 %v2600_v17 }
 0x3d6   :  { %2744 = vmatpush1.bf16.msra.mxu1 %v7596_v40  ;;  %2787 = vmatpush1.bf16.msra.mxu0 %v7602_v2  ;;  %v10330_v40 = vld [vmem:[#allocation33_spill] sm:$0xff]  ;;  %v10331_v2 = vld [vmem:[#allocation34_spill] sm:$0xff] }
 0x3d7   :  { %2745 = vmatprep.subr.bf16.mxu1 %v7608_v20  ;;  %2788 = vmatprep.subr.bf16.mxu0 %v7614_v29  ;;  %v10332_v20 = vld [vmem:[#allocation35_spill] sm:$0xff]  ;;  %v10333_v29 = vld [vmem:[#allocation36_spill] sm:$0xff] }
 0x3d8   :  { %2775 = vmatprep.mubr.bf16.mxu1 %v10180_v62  ;;  %2818 = vmatprep.mubr.bf16.mxu0 %v10180_v62 }
 0x3da   :  { %2746 = vmatpush1.bf16.msra.mxu1 %v7622_v63  ;;  %2789 = vmatpush1.bf16.msra.mxu0 %v7628_v11  ;;  %v10334_v63 = vld [vmem:[#allocation38_spill] sm:$0xff]  ;;  %v10335_v11 = vld [vmem:[#allocation39_spill] sm:$0xff] }
 0x3db   :  { %2747 = vmatprep.subr.bf16.mxu1 %v7634_v23  ;;  %2790 = vmatprep.subr.bf16.mxu0 %v7640_v52  ;;  %v10336_v23 = vld [vmem:[#allocation40_spill] sm:$0xff]  ;;  %v10337_v52 = vld [vmem:[#allocation41_spill] sm:$0xff] }
 0x3de   :  { %2748 = vmatpush1.bf16.msra.mxu1 %v7646_v21  ;;  %2791 = vmatpush1.bf16.msra.mxu0 %v7652_v54  ;;  %v10338_v21 = vld [vmem:[#allocation45_spill] sm:$0xff]  ;;  %v10339_v54 = vld [vmem:[#allocation46_spill] sm:$0xff] }
 0x3df   :  { %2749 = vmatprep.subr.bf16.mxu1 %v7658_v18  ;;  %2792 = vmatprep.subr.bf16.mxu0 %v7664_v55  ;;  %v10340_v18 = vld [vmem:[#allocation47_spill] sm:$0xff]  ;;  %v10341_v55 = vld [vmem:[#allocation48_spill] sm:$0xff] }
 0x3e2   :  { %2750 = vmatpush1.bf16.msra.mxu1 %v7670_v0  ;;  %2793 = vmatpush1.bf16.msra.mxu0 %v7676_v37  ;;  %v10342_v0 = vld [vmem:[#allocation50_spill] sm:$0xff]  ;;  %v10343_v37 = vld [vmem:[#allocation51_spill] sm:$0xff] }
 0x3e3   :  { %2751 = vmatprep.subr.bf16.mxu1 %v7682_v19  ;;  %2794 = vmatprep.subr.bf16.mxu0 %v7688_v22  ;;  %v10344_v19 = vld [vmem:[#allocation52_spill] sm:$0xff]  ;;  %v10345_v22 = vld [vmem:[#allocation53_spill] sm:$0xff] }
 0x3e6   :  { %2752 = vmatpush1.bf16.msra.mxu1 %v7694_v50  ;;  %2795 = vmatpush1.bf16.msra.mxu0 %v7700_v12  ;;  %v10346_v50 = vld [vmem:[#allocation57_spill] sm:$0xff]  ;;  %v10347_v12 = vld [vmem:[#allocation58_spill] sm:$0xff] }
 0x3e7   :  { %2753 = vmatprep.subr.bf16.mxu1 %v7706_v34  ;;  %2796 = vmatprep.subr.bf16.mxu0 %v7712_v26  ;;  %v10348_v34 = vld [vmem:[#allocation5_spill] sm:$0xff]  ;;  %v10349_v26 = vld [vmem:[#allocation15_spill] sm:$0xff] }
 0x3ea   :  { %2754 = vmatpush1.bf16.msra.mxu1 %v7718_v36  ;;  %2797 = vmatpush1.bf16.msra.mxu0 %v7724_v48  ;;  %v10350_v36 = vld [vmem:[#allocation11_spill] sm:$0xff]  ;;  %v10351_v48 = vld [vmem:[#allocation14_spill] sm:$0xff] }
 0x3eb   :  { %2755 = vmatprep.subr.bf16.mxu1 %v7730_v3  ;;  %2798 = vmatprep.subr.bf16.mxu0 %v7736_v46  ;;  %v10352_v3 = vld [vmem:[#allocation73_spill] sm:$0xff]  ;;  %v10353_v46 = vld [vmem:[#allocation19_spill] sm:$0xff] }
 0x3ee   :  { %2756 = vmatpush1.bf16.msra.mxu1 %v7742_v24  ;;  %2799 = vmatpush1.bf16.msra.mxu0 %v7748_v33  ;;  %v10319_v33 = vld [vmem:[#allocation101_spill] sm:$0xff]  ;;  %v10325_v24 = vld [vmem:[#allocation23_spill] sm:$0xff] }
 0x3ef   :  { %2757 = vmatprep.subr.bf16.mxu1 %v7754_v32  ;;  %2800 = vmatprep.subr.bf16.mxu0 %v7760_v35  ;;  %v10320_v35 = vld [vmem:[#allocation102_spill] sm:$0xff]  ;;  %v10329_v32 = vld [vmem:[#allocation31_spill] sm:$0xff] }
 0x3f2   :  { %2758 = vmatpush1.bf16.msra.mxu1 %v7766_v27  ;;  %2801 = vmatpush1.bf16.msra.mxu0 %v7772_v47  ;;  %v10321_v27 = vld [vmem:[#allocation103_spill] sm:$0xff]  ;;  %v10322_v47 = vld [vmem:[#allocation104_spill] sm:$0xff] }
 0x3f3   :  { %2874 = vmatprep.subr.bf16.mxu1 %v7778_v1  ;;  %2917 = vmatprep.subr.bf16.mxu0 %v7784_v41  ;;  %v10323_v1 = vld [vmem:[#allocation105_spill] sm:$0xff]  ;;  %v10324_v41 = vld [vmem:[#allocation106_spill] sm:$0xff] }
 0x3f5   :  { %2776 = vmatmul.mubr.bf16.vlgmr.msra.gmra.mxu1 %v2600_v17  ;;  %2819 = vmatmul.mubr.bf16.vlgmr.msra.gmra.mxu0 %v2600_v17 }
 0x3f6   :  { %2875 = vmatpush1.bf16.msra.mxu1 %v7792_v56  ;;  %2918 = vmatpush1.bf16.msra.mxu0 %v7798_v45  ;;  %v10326_v56 = vld [vmem:[#allocation25_spill] sm:$0xff]  ;;  %v10327_v45 = vld [vmem:[#allocation26_spill] sm:$0xff] }
 0x3f7   :  { %2876 = vmatprep.subr.bf16.mxu1 %v7804_v59  ;;  %2919 = vmatprep.subr.bf16.mxu0 %v10241_v43  ;;  %v10328_v59 = vld [vmem:[#allocation30_spill] sm:$0xff]  ;;  %v10355_v43 = vld [vmem:[#allocation75_spill] sm:$0xff] }
 0x3fa   :  { %2877 = vmatpush1.bf16.msra.mxu1 %v10319_v33  ;;  %2920 = vmatpush1.bf16.msra.mxu0 %v10320_v35  ;;  %v10379_v35 = vld [vmem:[#allocation13_spill] sm:$0xff] }
 0x3fb   :  { %2878 = vmatprep.subr.bf16.mxu1 %v10321_v27  ;;  %2921 = vmatprep.subr.bf16.mxu0 %v10322_v47 }
 0x3fe   :  { %2879 = vmatpush1.bf16.msra.mxu1 %v10323_v1  ;;  %2922 = vmatpush1.bf16.msra.mxu0 %v10324_v41 }
 0x3ff   :  { %2880 = vmatprep.subr.bf16.mxu1 %v10325_v24  ;;  %2923 = vmatprep.subr.bf16.mxu0 %v10326_v56 }
 0x402   :  { %2881 = vmatpush1.bf16.msra.mxu1 %v10327_v45  ;;  %2924 = vmatpush1.bf16.msra.mxu0 %v10328_v59 }
 0x403   :  { %2882 = vmatprep.subr.bf16.mxu1 %v10329_v32  ;;  %2925 = vmatprep.subr.bf16.mxu0 %v10330_v40 }
 0x406   :  { %2883 = vmatpush1.bf16.msra.mxu1 %v10331_v2  ;;  %2926 = vmatpush1.bf16.msra.mxu0 %v10332_v20 }
 0x407   :  { %2884 = vmatprep.subr.bf16.mxu1 %v10333_v29  ;;  %2927 = vmatprep.subr.bf16.mxu0 %v10334_v63 }
 0x40a   :  { %2885 = vmatpush1.bf16.msra.mxu1 %v10335_v11  ;;  %2928 = vmatpush1.bf16.msra.mxu0 %v10336_v23 }
 0x40b   :  { %2886 = vmatprep.subr.bf16.mxu1 %v10337_v52  ;;  %2929 = vmatprep.subr.bf16.mxu0 %v10338_v21 }
 0x40e   :  { %2887 = vmatpush1.bf16.msra.mxu1 %v10339_v54  ;;  %2930 = vmatpush1.bf16.msra.mxu0 %v10340_v18 }
 0x40f   :  { %2888 = vmatprep.subr.bf16.mxu1 %v10341_v55  ;;  %2931 = vmatprep.subr.bf16.mxu0 %v10342_v0 }
 0x412   :  { %2889 = vmatpush1.bf16.msra.mxu1 %v10343_v37  ;;  %2932 = vmatpush1.bf16.msra.mxu0 %v10344_v19 }
 0x413   :  { %2890 = vmatprep.subr.bf16.mxu1 %v10345_v22  ;;  %2933 = vmatprep.subr.bf16.mxu0 %v10346_v50 }
 0x416   :  { %2891 = vmatpush2.bf16.msra.mxu1 %v10347_v12  ;;  %2934 = vmatpush2.bf16.msra.mxu0 %v10348_v34 }
 0x417   :  { %2892 = vmatprep.subr.bf16.mxu1 %v10349_v26  ;;  %2935 = vmatprep.subr.bf16.mxu0 %v10350_v36 }
 0x41a   :  { %2893 = vmatpush2.bf16.msra.mxu1 %v10351_v48  ;;  %2936 = vmatpush2.bf16.msra.mxu0 %v10352_v3 }
 0x41b   :  { %2894 = vmatprep.subr.bf16.mxu1 %v10353_v46  ;;  %2937 = vmatprep.subr.bf16.mxu0 %v10354_v10 }
 0x41e   :  { %2895 = vmatpush2.bf16.msra.mxu1 %v10355_v43  ;;  %2938 = vmatpush2.bf16.msra.mxu0 %v10356_v25 }
 0x41f   :  { %2896 = vmatprep.subr.bf16.mxu1 %v10357_v14  ;;  %2939 = vmatprep.subr.bf16.mxu0 %v10358_v30 }
 0x422   :  { %2897 = vmatpush2.bf16.msra.mxu1 %v10359_v42  ;;  %2940 = vmatpush2.bf16.msra.mxu0 %v10360_v57 }
 0x423   :  { %2898 = vmatprep.subr.bf16.mxu1 %v10361_v16  ;;  %2941 = vmatprep.subr.bf16.mxu0 %v10362_v60 }
 0x426   :  { %2899 = vmatpush2.bf16.msra.mxu1 %v10363_v9  ;;  %2942 = vmatpush2.bf16.msra.mxu0 %v10364_v6 }
 0x427   :  { %2900 = vmatprep.subr.bf16.mxu1 %v10365_v51  ;;  %2943 = vmatprep.subr.bf16.mxu0 %v10366_v53 }
 0x42a   :  { %2901 = vmatpush2.bf16.msra.mxu1 %v10367_v38  ;;  %2944 = vmatpush2.bf16.msra.mxu0 %v10368_v44 }
 0x42b   :  { %2902 = vmatprep.subr.bf16.mxu1 %v10369_v7  ;;  %2945 = vmatprep.subr.bf16.mxu0 %v10370_v5 }
 0x42e   :  { %2903 = vmatpush2.bf16.msra.mxu1 %v10371_v61  ;;  %2946 = vmatpush2.bf16.msra.mxu0 %v10372_v4  ;;  %v10380_v4 = vld [vmem:[#allocation17_spill] sm:$0xff] }
 0x42f   :  { %2904 = vmatprep.subr.bf16.mxu1 %v10373_v8  ;;  %2947 = vmatprep.subr.bf16.mxu0 %v10374_v31 }
 0x432   :  { %2905 = vmatpush2.bf16.msra.mxu1 %v10375_v13  ;;  %2948 = vmatpush2.bf16.msra.mxu0 %v10376_v39  ;;  %v10381_v39 = vld [vmem:[#allocation18_spill] sm:$0xff] }
 0x433   :  { %3016 = vmatprep.subr.bf16.mxu1 %v10377_v28  ;;  %3059 = vmatprep.subr.bf16.mxu0 %v10378_v49 }
 0x495   :  { %v2635_v17 = vpop.f32.mrf.mxu1  ;;  %v2678_v33 = vpop.f32.mrf.mxu0 }
 0x496   :  { %v2636_v27 = vadd.f32 %v2635_v17, %v10379_v35 }
 0x497   :  { %v2637_v47 = vpop.f32.mrf.mxu1  ;;  %v2680_v1 = vpop.f32.mrf.mxu0 }
 0x498   :  { %v2687_v41 = vmul.f32 0.5, %v2636_v27  ;;  %v2638_v61 = vadd.f32 %v2637_v47, %v10380_v4  ;;  %v2681_v7 = vadd.f32 %v2680_v1, %v10381_v39  ;;  %v10382_v47 = vld [vmem:[#allocation20_spill] sm:$0xff] }
 0x499   :  { %v2639_v8 = vpop.f32.mrf.mxu1  ;;  %v2682_v5 = vpop.f32.mrf.mxu0  ;;  %v2679_v53 = vadd.f32 %v2678_v33, %v10382_v47 }
 0x49a   :  { %5723 = vtanh.f32 %v2687_v41  ;;  %v2688_v31 = vmul.f32 0.5, %v2638_v61  ;;  %v2640_v13 = vadd.f32 %v2639_v8, %v10379_v35  ;;  %v2683_v61 = vadd.f32 %v2682_v5, %v10382_v47  ;;  %v10385_v47 = vld [vmem:[#allocation22_spill] sm:$0xff] }
 0x49b   :  { %v2641_v28 = vpop.f32.mrf.mxu1  ;;  %v2684_v38 = vpop.f32.mrf.mxu0  ;;  %v2689_v1 = vmul.f32 0.5, %v2679_v53 }
 0x49c   :  { %5725 = vtanh.f32 %v2688_v31  ;;  %v2690_v49 = vmul.f32 0.5, %v2640_v13  ;;  %v2642_v44 = vadd.f32 %v2641_v28, %v10380_v4  ;;  %v2685_v27 = vadd.f32 %v2684_v38, %v10381_v39  ;;  %v10383_v38 = vld [vmem:[#allocation21_spill] sm:$0xff] }
 0x49d   :  { %v2692_v31 = vmul.f32 0.5, %v2683_v61 }
 0x49e   :  { %5727 = vtanh.f32 %v2690_v49  ;;  %v2691_v17 = vmul.f32 0.5, %v2642_v44 }
 0x49f   :  { %5729 = vtanh.f32 %v2681_v7 }
 0x4a0   :  { %5731 = vtanh.f32 %v2691_v17 }
 0x4a1   :  { %5733 = vtanh.f32 %v2685_v27 }
 0x4a2   :  { %5735 = vtanh.f32 %v2689_v1 }
 0x4a3   :  { %5737 = vtanh.f32 %v2692_v31  ;;  %v10388_v31 = vld [vmem:[#allocation43_spill] sm:$0xff] }
 0x4a7   :  { %v5724_v8 = vpop.eup %5723 }
 0x4a8   :  { %v2699_v41 = vadd.f32 1.0, %v5724_v8 }
 0x4a9   :  { %v5726_v35 = vpop.eup %5725 }
 0x4aa   :  { %v2705_v13 = vmul.f32 0.5, %v2699_v41  ;;  %v2700_v51 = vadd.f32 1.0, %v5726_v35 }
 0x4ab   :  { %v5728_v28 = vpop.eup %5727 }
 0x4ac   :  { %v5730_v4 = vpop.eup %5729  ;;  %v2706_v44 = vmul.f32 0.5, %v2700_v51  ;;  %v2702_v7 = vadd.f32 1.0, %v5728_v28  ;;  %v10387_v28 = vld [vmem:[#allocation8_spill] sm:$0xff] }
 0x4ad   :  { %v5732_v49 = vpop.eup %5731  ;;  %v2715_v33 = vmul.f32 %v5730_v4, %v2705_v13  ;;  %v874_v6 = vadd.f32 %v10388_v31, %v10387_v28  ;;  %v10389_v4 = vld [vmem:[#allocation37_spill] sm:$0xff]  ;;  %v10393_v31 = vld [vmem:[#allocation7_spill] sm:$0xff] }
 0x4ae   :  { %v2713_v17 = vmul.f32 %v2706_v44, %v10383_v38  ;;  %v2708_v27 = vmul.f32 0.5, %v2702_v7  ;;  %v2703_v39 = vadd.f32 1.0, %v5732_v49  ;;  %v5734_v53 = vpop.eup %5733  ;;  %v10390_v49 = vld [vmem:[#allocation42_spill] sm:$0xff] }
 0x4af   :  { %v987_v28 = vadd.f32 %v10393_v31, %v874_v6  ;;  %v10395_v31 = vld [vmem:[#allocation80_spill] sm:$0xff] }
 0x4b0   :  { %v8463_v5 = vadd.f32 %v2715_v33, %v2713_v17  ;;  %v2709_v8 = vmul.f32 0.5, %v2703_v39  ;;  %v2716_v41 = vmul.f32 %v5734_v53, %v2708_v27  ;;  %v10391_v17 = vld [vmem:[#allocation81_spill] sm:$0xff] }
 0x4b2   :  { %10384 = vst [vmem:[#allocation28_spill] sm:$0xff] %v8463_v5  ;;  %v2714_v61 = vmul.f32 %v2709_v8, %v10385_v47  ;;  %5739 = vtanh.f32 %v8463_v5  ;;  %v5736_v47 = vpop.eup %5735 }
 0x4b3   :  { %v5738_v53 = vpop.eup %5737 }
 0x4b4   :  { %v8467_v35 = vadd.f32 %v2716_v41, %v2714_v61  ;;  %v10392_v41 = vld [vmem:[#allocation49_spill] sm:$0xff] }
 0x4b5   :  { %v2777_v51 = vpop.f32.mrf.mxu1  ;;  %v2820_v1 = vpop.f32.mrf.mxu0 }
 0x4b6   :  { %10386 = vst [vmem:[#allocation24_spill] sm:$0xff] %v8467_v35  ;;  %5741 = vtanh.f32 %v8467_v35  ;;  %v2829_v13 = vadd.f32 %v2777_v51, %v10389_v4  ;;  %v2831_v16 = vadd.f32 %v2820_v1, %v10395_v31 }
 0x4b7   :  { %v2779_v44 = vpop.f32.mrf.mxu1  ;;  %v2822_v7 = vpop.f32.mrf.mxu0 }
 0x4b8   :  { %v2837_v39 = vmul.f32 0.5, %v2829_v13  ;;  %v2830_v38 = vadd.f32 %v2779_v44, %v10390_v49  ;;  %v2832_v33 = vadd.f32 %v2822_v7, %v10391_v17  ;;  %v2701_v13 = vadd.f32 1.0, %v5736_v47  ;;  %v10394_v7 = vld [vmem:[#allocation83_spill] sm:$0xff] }
 0x4b9   :  { %v2781_v27 = vpop.f32.mrf.mxu1  ;;  %v2824_v8 = vpop.f32.mrf.mxu0  ;;  %v2704_v44 = vadd.f32 1.0, %v5738_v53 }
 0x4ba   :  { %5743 = vtanh.f32 %v2837_v39  ;;  %v2838_v61 = vmul.f32 0.5, %v2830_v38  ;;  %v2833_v5 = vadd.f32 %v2781_v27, %v10392_v41  ;;  %v2707_v39 = vmul.f32 0.5, %v2701_v13 }
 0x4bb   :  { %v2783_v35 = vpop.f32.mrf.mxu1  ;;  %v2826_v9 = vpop.f32.mrf.mxu0  ;;  %v2710_v38 = vmul.f32 0.5, %v2704_v44 }
 0x4bc   :  { %5745 = vtanh.f32 %v2838_v61  ;;  %v2840_v51 = vmul.f32 0.5, %v2833_v5  ;;  %v2834_v4 = vadd.f32 %v2783_v35, %v987_v28  ;;  %v2836_v17 = vadd.f32 %v2826_v9, %v10394_v7  ;;  %v10396_v61 = vld [vmem:[#allocation82_spill] sm:$0xff] }
 0x4bd   :  { %5747 = vtanh.f32 %v2832_v33  ;;  %v2835_v5 = vadd.f32 %v2824_v8, %v10396_v61  ;;  %v2839_v9 = vmul.f32 0.5, %v2831_v16 }
 0x4be   :  { %5749 = vtanh.f32 %v2840_v51  ;;  %v2841_v49 = vmul.f32 0.5, %v2834_v4 }
 0x4bf   :  { %v5740_v60 = vpop.eup %5739  ;;  %v2842_v13 = vmul.f32 0.5, %v2835_v5 }
 0x4c0   :  { %5751 = vtanh.f32 %v2841_v49  ;;  %v2721_v41 = vmul.f32 %v5740_v60, %v2707_v39 }
 0x4c1   :  { %5753 = vtanh.f32 %v2836_v17 }
 0x4c2   :  { %5755 = vtanh.f32 %v2839_v9 }
 0x4c3   :  { %v5742_v27 = vpop.eup %5741  ;;  %5757 = vtanh.f32 %v2842_v13  ;;  %v8501_v13 = vld [vmem:[%s9732_s2 + $0xe8] ss:$16 sps:$4 sm:$0xff]  }
 0x4c4   :  { %v2722_v6 = vmul.f32 %v5742_v27, %v2710_v38 }
 0x4c6   :  { %v2723_v35 = vpack.c.bf16 %v2722_v6, %v2721_v41 }
 0x4c7   :  { %v5744_v28 = vpop.eup %5743 }
 0x4c8   :  { %v2849_v47 = vadd.f32 1.0, %v5744_v28  ;;  %5097 = vst [vmem:[#allocation3 + $0x10] sm:$0xff] %v2723_v35   ;;  %2906 = vmatprep.mubr.bf16.mxu1 %v2723_v35  ;;  %2949 = vmatprep.mubr.bf16.mxu0 %v2723_v35 }
 0x4c9   :  { %v5746_v33 = vpop.eup %5745 }
 0x4ca   :  { %v5748_v53 = vpop.eup %5747  ;;  %v2855_v51 = vmul.f32 0.5, %v2849_v47  ;;  %v2850_v4 = vadd.f32 1.0, %v5746_v33 }
 0x4cb   :  { %v5750_v44 = vpop.eup %5749 }
 0x4cc   :  { %v2856_v49 = vmul.f32 0.5, %v2850_v4  ;;  %v2865_v60 = vmul.f32 %v5748_v53, %v2855_v51  ;;  %v2852_v7 = vadd.f32 1.0, %v5750_v44  ;;  %v8507_v44 = vld [vmem:[%s9732_s2 + $0xc4] ss:$16 sps:$4 sm:$0xff]  }
 0x4cd   :  { %v5752_v17 = vpop.eup %5751 }
 0x4ce   :  { %v2863_v1 = vmul.f32 %v2856_v49, %v8349_v15  ;;  %v2858_v8 = vmul.f32 0.5, %v2852_v7  ;;  %v2853_v39 = vadd.f32 1.0, %v5752_v17  ;;  %v5754_v38 = vpop.eup %5753  ;;  %v8513_v49 = vld [vmem:[%s9732_s2 + $0xcc] ss:$16 sps:$4 sm:$0xff]   ;;  %v8527_v7 = vld [vmem:[%s9732_s2 + $0xc8] ss:$16 sps:$4 sm:$0xff]  }
 0x4cf   :  { %v5756_v61 = vpop.eup %5755  ;;  %v8533_v17 = vld [vmem:[%s9732_s2 + $0xa4] ss:$16 sps:$4 sm:$0xff]  }
 0x4d0   :  { %v8481_v27 = vadd.f32 %v2865_v60, %v2863_v1  ;;  %v2859_v41 = vmul.f32 0.5, %v2853_v39  ;;  %v2866_v16 = vmul.f32 %v5754_v38, %v2858_v8  ;;  %v5758_v5 = vpop.eup %5757  ;;  %v2851_v35 = vadd.f32 1.0, %v5756_v61  ;;  %v8521_v60 = vld [vmem:[%s9732_s2 + $0xc0] ss:$16 sps:$4 sm:$0xff]   ;;  %v8539_v1 = vld [vmem:[%s9732_s2 + $0xac] ss:$16 sps:$4 sm:$0xff]  }
 0x4d1   :  { %v2854_v15 = vadd.f32 1.0, %v5758_v5  ;;  %v8545_v8 = vld [vmem:[%s9732_s2 + $0xa0] ss:$16 sps:$4 sm:$0xff]   ;;  %v8551_v39 = vld [vmem:[%s9732_s2 + $0xa8] ss:$16 sps:$4 sm:$0xff]  }
 0x4d2   :  { %v2864_v6 = vmul.f32 %v2859_v41, %v8353_v58  ;;  %5759 = vtanh.f32 %v8481_v27  ;;  %v2857_v47 = vmul.f32 0.5, %v2851_v35  ;;  %v8495_v58 = vld [vmem:[%s9732_s2 + $0xe0] ss:$16 sps:$4 sm:$0xff]   ;;  %v8557_v38 = vld [vmem:[%s9732_s2 + $0x84] ss:$16 sps:$4 sm:$0xff]  }
 0x4d3   :  { %v2860_v33 = vmul.f32 0.5, %v2854_v15  ;;  %v8563_v41 = vld [vmem:[%s9732_s2 + $0x8c] ss:$16 sps:$4 sm:$0xff]   ;;  %v8581_v61 = vld [vmem:[%s9732_s2 + $0x64] ss:$16 sps:$4 sm:$0xff]  }
 0x4d4   :  { %v8485_v31 = vadd.f32 %v2866_v16, %v2864_v6  ;;  %v8569_v16 = vld [vmem:[%s9732_s2 + $0x80] ss:$16 sps:$4 sm:$0xff]   ;;  %v8575_v6 = vld [vmem:[%s9732_s2 + $0x88] ss:$16 sps:$4 sm:$0xff]   ;;  %v8587_v5 = vld [vmem:[%s9732_s2 + $0x6c] ss:$16 sps:$4 sm:$0xff]  }
 0x4d5   :  { %v8593_v35 = vld [vmem:[%s9732_s2 + $0x60] ss:$16 sps:$4 sm:$0xff]   ;;  %v8599_v15 = vld [vmem:[%s9732_s2 + $0x68] ss:$16 sps:$4 sm:$0xff]  }
 0x4d6   :  { %5761 = vtanh.f32 %v8485_v31 }
 0x4df   :  { %v5760_v28 = vpop.eup %5759 }
 0x4e0   :  { %v2871_v53 = vmul.f32 %v5760_v28, %v2857_v47  ;;  %v8605_v28 = vld [vmem:[%s9732_s2 + $0x44] ss:$16 sps:$4 sm:$0xff]   ;;  %v8611_v47 = vld [vmem:[%s9732_s2 + $0x4c] ss:$16 sps:$4 sm:$0xff]  }
 0x4e3   :  { %v5762_v9 = vpop.eup %5761 }
 0x4e4   :  { %v2872_v51 = vmul.f32 %v5762_v9, %v2860_v33  ;;  %v8617_v33 = vld [vmem:[%s9732_s2 + $0x40] ss:$16 sps:$4 sm:$0xff]   ;;  %v8623_v9 = vld [vmem:[%s9732_s2 + $0x48] ss:$16 sps:$4 sm:$0xff]  }
 0x4e5   :  { %10397 = vst [vmem:[#allocation27_spill] sm:$0xff] %v8617_v33  ;;  %10398 = vst [vmem:[#allocation77_spill] sm:$0xff] %v8623_v9 }
 0x4e6   :  { %v8488_v4 = vpack.c.bf16 %v2872_v51, %v2871_v53  ;;  %v8629_v53 = vld [vmem:[%s9732_s2 + $0x24] ss:$16 sps:$4 sm:$0xff]   ;;  %v8635_v51 = vld [vmem:[%s9732_s2 + $0x2c] ss:$16 sps:$4 sm:$0xff]  }
 0x4e7   :  { %10399 = vst [vmem:[#allocation32_spill] sm:$0xff] %v8629_v53  ;;  %10400 = vst [vmem:[#allocation6_spill] sm:$0xff] %v8635_v51 }
 0x4e8   :  { %2907 = vmatmul.mubr.bf16.vlgmr.msra.gmra.mxu1 %v8488_v4  ;;  %2950 = vmatmul.mubr.bf16.vlgmr.msra.gmra.mxu0 %v8488_v4 }
 0x4e9   :  { %3017 = vmatpush1.bf16.msra.mxu1 %v8495_v58  ;;  %3060 = vmatpush1.bf16.msra.mxu0 %v8501_v13 }
 0x4ea   :  { %3018 = vmatprep.subr.bf16.mxu1 %v8507_v44  ;;  %3061 = vmatprep.subr.bf16.mxu0 %v8513_v49 }
 0x4eb   :  { %3048 = vmatprep.mubr.bf16.mxu1 %v10180_v62  ;;  %3091 = vmatprep.mubr.bf16.mxu0 %v10180_v62 }
 0x4ed   :  { %3019 = vmatpush1.bf16.msra.mxu1 %v8521_v60  ;;  %3062 = vmatpush1.bf16.msra.mxu0 %v8527_v7 }
 0x4ee   :  { %3020 = vmatprep.subr.bf16.mxu1 %v8533_v17  ;;  %3063 = vmatprep.subr.bf16.mxu0 %v8539_v1 }
 0x4f1   :  { %3021 = vmatpush1.bf16.msra.mxu1 %v8545_v8  ;;  %3064 = vmatpush1.bf16.msra.mxu0 %v8551_v39 }
 0x4f2   :  { %3022 = vmatprep.subr.bf16.mxu1 %v8557_v38  ;;  %3065 = vmatprep.subr.bf16.mxu0 %v8563_v41 }
 0x4f5   :  { %3023 = vmatpush1.bf16.msra.mxu1 %v8569_v16  ;;  %3066 = vmatpush1.bf16.msra.mxu0 %v8575_v6 }
 0x4f6   :  { %3024 = vmatprep.subr.bf16.mxu1 %v8581_v61  ;;  %3067 = vmatprep.subr.bf16.mxu0 %v8587_v5 }
 0x4f9   :  { %3025 = vmatpush1.bf16.msra.mxu1 %v8593_v35  ;;  %3068 = vmatpush1.bf16.msra.mxu0 %v8599_v15 }
 0x4fa   :  { %3026 = vmatprep.subr.bf16.mxu1 %v8605_v28  ;;  %3069 = vmatprep.subr.bf16.mxu0 %v8611_v47 }
 0x4fd   :  { %3027 = vmatpush1.bf16.msra.mxu1 %v8617_v33  ;;  %3070 = vmatpush1.bf16.msra.mxu0 %v8623_v9  ;;  %v8641_v33 = vld [vmem:[%s9732_s2 + $0x20] ss:$16 sps:$4 sm:$0xff]   ;;  %v8647_v9 = vld [vmem:[%s9732_s2 + $0x28] ss:$16 sps:$4 sm:$0xff]  }
 0x4fe   :  { %3028 = vmatprep.subr.bf16.mxu1 %v8629_v53  ;;  %3071 = vmatprep.subr.bf16.mxu0 %v8635_v51  ;;  %10401 = vst [vmem:[#allocation79_spill] sm:$0xff] %v8641_v33  ;;  %10402 = vst [vmem:[#allocation76_spill] sm:$0xff] %v8647_v9  ;;  %v8653_v53 = vld [vmem:[%s9732_s2 + $0x4] ss:$16 sps:$4 sm:$0xff]   ;;  %v8659_v51 = vld [vmem:[%s9732_s2 + $0xc] ss:$16 sps:$4 sm:$0xff]  }
 0x4ff   :  { %10403 = vst [vmem:[#allocation78_spill] sm:$0xff] %v8653_v53  ;;  %10404 = vst [vmem:[#allocation101_spill] sm:$0xff] %v8659_v51 }
 0x501   :  { %3029 = vmatpush1.bf16.msra.mxu1 %v8641_v33  ;;  %3072 = vmatpush1.bf16.msra.mxu0 %v8647_v9  ;;  %v8665_v33 = vld [vmem:[%s9732_s2] ss:$16 sps:$4 sm:$0xff]   ;;  %v8671_v9 = vld [vmem:[%s9732_s2 + $0x8] ss:$16 sps:$4 sm:$0xff]  }
 0x502   :  { %3030 = vmatprep.subr.bf16.mxu1 %v8653_v53  ;;  %3073 = vmatprep.subr.bf16.mxu0 %v8659_v51  ;;  %10405 = vst [vmem:[#allocation102_spill] sm:$0xff] %v8671_v9  ;;  %v8677_v53 = vld [vmem:[%s9733_s4 + $0xe4] ss:$16 sps:$4 sm:$0xff]   ;;  %v8683_v51 = vld [vmem:[%s9733_s4 + $0xec] ss:$16 sps:$4 sm:$0xff]  }
 0x503   :  { %10406 = vst [vmem:[#allocation103_spill] sm:$0xff] %v8677_v53  ;;  %10407 = vst [vmem:[#allocation104_spill] sm:$0xff] %v8683_v51 }
 0x505   :  { %3031 = vmatpush1.bf16.msra.mxu1 %v8665_v33  ;;  %3074 = vmatpush1.bf16.msra.mxu0 %v8671_v9  ;;  %v8691_v9 = vld [vmem:[%s9733_s4 + $0xe0] ss:$16 sps:$4 sm:$0xff]  }
 0x506   :  { %3147 = vmatprep.subr.bf16.mxu1 %v8677_v53  ;;  %3190 = vmatprep.subr.bf16.mxu0 %v8683_v51  ;;  %10408 = vst [vmem:[#allocation105_spill] sm:$0xff] %v8691_v9  ;;  %v8697_v53 = vld [vmem:[%s9733_s4 + $0xe8] ss:$16 sps:$4 sm:$0xff]   ;;  %v8703_v51 = vld [vmem:[%s9733_s4 + $0xc4] ss:$16 sps:$4 sm:$0xff]  }
 0x507   :  { %10409 = vst [vmem:[#allocation106_spill] sm:$0xff] %v8697_v53  ;;  %10410 = vst [vmem:[#allocation23_spill] sm:$0xff] %v8703_v51 }
 0x508   :  { %3049 = vmatmul.mubr.bf16.vlgmr.msra.gmra.mxu1 %v8488_v4  ;;  %3092 = vmatmul.mubr.bf16.vlgmr.msra.gmra.mxu0 %v8488_v4  ;;  %v8709_v4 = vld [vmem:[%s9733_s4 + $0xcc] ss:$16 sps:$4 sm:$0xff]  }
 0x509   :  { %3148 = vmatpush1.bf16.msra.mxu1 %v8691_v9  ;;  %3191 = vmatpush1.bf16.msra.mxu0 %v8697_v53  ;;  %10411 = vst [vmem:[#allocation25_spill] sm:$0xff] %v8709_v4  ;;  %v8715_v9 = vld [vmem:[%s9733_s4 + $0xc0] ss:$16 sps:$4 sm:$0xff]   ;;  %v8721_v53 = vld [vmem:[%s9733_s4 + $0xc8] ss:$16 sps:$4 sm:$0xff]  }
 0x50a   :  { %3149 = vmatprep.subr.bf16.mxu1 %v8703_v51  ;;  %3192 = vmatprep.subr.bf16.mxu0 %v8709_v4  ;;  %10412 = vst [vmem:[#allocation26_spill] sm:$0xff] %v8715_v9  ;;  %10413 = vst [vmem:[#allocation30_spill] sm:$0xff] %v8721_v53  ;;  %v8727_v51 = vld [vmem:[%s9733_s4 + $0xa4] ss:$16 sps:$4 sm:$0xff]   ;;  %v8733_v4 = vld [vmem:[%s9733_s4 + $0xac] ss:$16 sps:$4 sm:$0xff]  }
 0x50b   :  { %10414 = vst [vmem:[#allocation31_spill] sm:$0xff] %v8727_v51  ;;  %10415 = vst [vmem:[#allocation33_spill] sm:$0xff] %v8733_v4 }
 0x50d   :  { %3150 = vmatpush1.bf16.msra.mxu1 %v8715_v9  ;;  %3193 = vmatpush1.bf16.msra.mxu0 %v8721_v53  ;;  %v8739_v9 = vld [vmem:[%s9733_s4 + $0xa0] ss:$16 sps:$4 sm:$0xff]   ;;  %v8745_v53 = vld [vmem:[%s9733_s4 + $0xa8] ss:$16 sps:$4 sm:$0xff]  }
 0x50e   :  { %3151 = vmatprep.subr.bf16.mxu1 %v8727_v51  ;;  %3194 = vmatprep.subr.bf16.mxu0 %v8733_v4  ;;  %10416 = vst [vmem:[#allocation34_spill] sm:$0xff] %v8739_v9  ;;  %10417 = vst [vmem:[#allocation35_spill] sm:$0xff] %v8745_v53 }
 0x511   :  { %3152 = vmatpush1.bf16.msra.mxu1 %v8739_v9  ;;  %3195 = vmatpush1.bf16.msra.mxu0 %v8745_v53 }
 0x512   :  { %3153 = vmatprep.subr.bf16.mxu1 %v10325_v24  ;;  %3196 = vmatprep.subr.bf16.mxu0 %v10326_v56  ;;  %v10418_v24 = vld [vmem:[#allocation109_spill] sm:$0xff]  ;;  %v10419_v56 = vld [vmem:[#allocation110_spill] sm:$0xff] }
 0x515   :  { %3154 = vmatpush1.bf16.msra.mxu1 %v10327_v45  ;;  %3197 = vmatpush1.bf16.msra.mxu0 %v10328_v59  ;;  %v10420_v45 = vld [vmem:[#allocation111_spill] sm:$0xff]  ;;  %v10421_v59 = vld [vmem:[#allocation112_spill] sm:$0xff] }
 0x516   :  { %3155 = vmatprep.subr.bf16.mxu1 %v10329_v32  ;;  %3198 = vmatprep.subr.bf16.mxu0 %v10330_v40  ;;  %v10422_v32 = vld [vmem:[#allocation113_spill] sm:$0xff]  ;;  %v10423_v40 = vld [vmem:[#allocation114_spill] sm:$0xff] }
 0x519   :  { %3156 = vmatpush1.bf16.msra.mxu1 %v10331_v2  ;;  %3199 = vmatpush1.bf16.msra.mxu0 %v10332_v20  ;;  %v10424_v2 = vld [vmem:[#allocation115_spill] sm:$0xff]  ;;  %v10425_v20 = vld [vmem:[#allocation116_spill] sm:$0xff] }
 0x51a   :  { %3157 = vmatprep.subr.bf16.mxu1 %v10333_v29  ;;  %3200 = vmatprep.subr.bf16.mxu0 %v10334_v63  ;;  %v10426_v29 = vld [vmem:[#allocation117_spill] sm:$0xff]  ;;  %v10427_v63 = vld [vmem:[#allocation118_spill] sm:$0xff] }
 0x51d   :  { %3158 = vmatpush1.bf16.msra.mxu1 %v10335_v11  ;;  %3201 = vmatpush1.bf16.msra.mxu0 %v10336_v23  ;;  %v10428_v11 = vld [vmem:[#allocation119_spill] sm:$0xff]  ;;  %v10429_v23 = vld [vmem:[#allocation120_spill] sm:$0xff] }
 0x51e   :  { %3159 = vmatprep.subr.bf16.mxu1 %v10337_v52  ;;  %3202 = vmatprep.subr.bf16.mxu0 %v10338_v21  ;;  %v10430_v52 = vld [vmem:[#allocation121_spill] sm:$0xff]  ;;  %v10431_v21 = vld [vmem:[#allocation122_spill] sm:$0xff] }
 0x521   :  { %3160 = vmatpush1.bf16.msra.mxu1 %v10339_v54  ;;  %3203 = vmatpush1.bf16.msra.mxu0 %v10340_v18  ;;  %v10432_v54 = vld [vmem:[#allocation123_spill] sm:$0xff]  ;;  %v10433_v18 = vld [vmem:[#allocation124_spill] sm:$0xff] }
 0x522   :  { %3161 = vmatprep.subr.bf16.mxu1 %v10341_v55  ;;  %3204 = vmatprep.subr.bf16.mxu0 %v10342_v0  ;;  %v8803_v55 = vld [vmem:[%s9732_s2 + $0xe4] ss:$16 sps:$4 sm:$0xff]   ;;  %v8809_v0 = vld [vmem:[%s9732_s2 + $0xec] ss:$16 sps:$4 sm:$0xff]  }
 0x523   :  { %10434 = vst [vmem:[#allocation36_spill] sm:$0xff] %v8803_v55  ;;  %10435 = vst [vmem:[#allocation38_spill] sm:$0xff] %v8809_v0 }
 0x525   :  { %3162 = vmatpush1.bf16.msra.mxu1 %v10343_v37  ;;  %3205 = vmatpush1.bf16.msra.mxu0 %v10344_v19 }
 0x526   :  { %3163 = vmatprep.subr.bf16.mxu1 %v10345_v22  ;;  %3206 = vmatprep.subr.bf16.mxu0 %v10346_v50  ;;  %v10436_v22 = vld [vmem:[#allocation13_spill] sm:$0xff] }
 0x529   :  { %3164 = vmatpush2.bf16.msra.mxu1 %v10347_v12  ;;  %3207 = vmatpush2.bf16.msra.mxu0 %v10348_v34 }
 0x52a   :  { %3165 = vmatprep.subr.bf16.mxu1 %v10349_v26  ;;  %3208 = vmatprep.subr.bf16.mxu0 %v10350_v36  ;;  %v10437_v36 = vld [vmem:[#allocation17_spill] sm:$0xff] }
 0x52d   :  { %3166 = vmatpush2.bf16.msra.mxu1 %v10351_v48  ;;  %3209 = vmatpush2.bf16.msra.mxu0 %v10352_v3 }
 0x52e   :  { %3167 = vmatprep.subr.bf16.mxu1 %v10353_v46  ;;  %3210 = vmatprep.subr.bf16.mxu0 %v10354_v10 }
 0x531   :  { %3168 = vmatpush2.bf16.msra.mxu1 %v10355_v43  ;;  %3211 = vmatpush2.bf16.msra.mxu0 %v10356_v25  ;;  %v10438_v25 = vld [vmem:[#allocation18_spill] sm:$0xff] }
 0x532   :  { %3169 = vmatprep.subr.bf16.mxu1 %v10357_v14  ;;  %3212 = vmatprep.subr.bf16.mxu0 %v10358_v30 }
 0x535   :  { %3170 = vmatpush2.bf16.msra.mxu1 %v10359_v42  ;;  %3213 = vmatpush2.bf16.msra.mxu0 %v10360_v57 }
 0x536   :  { %3171 = vmatprep.subr.bf16.mxu1 %v10418_v24  ;;  %3214 = vmatprep.subr.bf16.mxu0 %v10419_v56 }
 0x539   :  { %3172 = vmatpush2.bf16.msra.mxu1 %v10420_v45  ;;  %3215 = vmatpush2.bf16.msra.mxu0 %v10421_v59  ;;  %v10439_v59 = vld [vmem:[#allocation20_spill] sm:$0xff] }
 0x53a   :  { %3173 = vmatprep.subr.bf16.mxu1 %v10422_v32  ;;  %3216 = vmatprep.subr.bf16.mxu0 %v10423_v40 }
 0x53d   :  { %3174 = vmatpush2.bf16.msra.mxu1 %v10424_v2  ;;  %3217 = vmatpush2.bf16.msra.mxu0 %v10425_v20 }
 0x53e   :  { %3175 = vmatprep.subr.bf16.mxu1 %v10426_v29  ;;  %3218 = vmatprep.subr.bf16.mxu0 %v10427_v63 }
 0x541   :  { %3176 = vmatpush2.bf16.msra.mxu1 %v10428_v11  ;;  %3219 = vmatpush2.bf16.msra.mxu0 %v10429_v23 }
 0x542   :  { %3177 = vmatprep.subr.bf16.mxu1 %v10430_v52  ;;  %3220 = vmatprep.subr.bf16.mxu0 %v10431_v21 }
 0x545   :  { %3178 = vmatpush2.bf16.msra.mxu1 %v10432_v54  ;;  %3221 = vmatpush2.bf16.msra.mxu0 %v10433_v18 }
 0x546   :  { %3289 = vmatprep.subr.bf16.mxu1 %v8803_v55  ;;  %3332 = vmatprep.subr.bf16.mxu0 %v8809_v0 }
 0x5a8   :  { %v2908_v37 = vpop.f32.mrf.mxu1  ;;  %v2951_v19 = vpop.f32.mrf.mxu0 }
 0x5a9   :  { %v2909_v50 = vadd.f32 %v2908_v37, %v10436_v22  ;;  %v2952_v32 = vadd.f32 %v2951_v19, %v10439_v59 }
 0x5aa   :  { %v2910_v12 = vpop.f32.mrf.mxu1  ;;  %v2953_v34 = vpop.f32.mrf.mxu0 }
 0x5ab   :  { %v2960_v26 = vmul.f32 0.5, %v2909_v50  ;;  %v2911_v48 = vadd.f32 %v2910_v12, %v10437_v36  ;;  %v2954_v14 = vadd.f32 %v2953_v34, %v10438_v25  ;;  %v2962_v29 = vmul.f32 0.5, %v2952_v32  ;;  %v10440_v12 = vld [vmem:[#allocation28_spill] sm:$0xff] }
 0x5ac   :  { %v2912_v3 = vpop.f32.mrf.mxu1  ;;  %v2955_v46 = vpop.f32.mrf.mxu0 }
 0x5ad   :  { %5763 = vtanh.f32 %v2960_v26  ;;  %v2961_v10 = vmul.f32 0.5, %v2911_v48  ;;  %v2913_v43 = vadd.f32 %v2912_v3, %v10436_v22  ;;  %v2956_v40 = vadd.f32 %v2955_v46, %v10439_v59 }
 0x5ae   :  { %v2914_v30 = vpop.f32.mrf.mxu1  ;;  %v2957_v24 = vpop.f32.mrf.mxu0 }
 0x5af   :  { %5765 = vtanh.f32 %v2961_v10  ;;  %v2963_v42 = vmul.f32 0.5, %v2913_v43  ;;  %v2915_v57 = vadd.f32 %v2914_v30, %v10437_v36  ;;  %v2958_v45 = vadd.f32 %v2957_v24, %v10438_v25  ;;  %v10441_v43 = vld [vmem:[#allocation24_spill] sm:$0xff] }
 0x5b0   :  { %v2965_v11 = vmul.f32 0.5, %v2956_v40  ;;  %v10444_v40 = vld [vmem:[#allocation54_spill] sm:$0xff] }
 0x5b1   :  { %5767 = vtanh.f32 %v2963_v42  ;;  %v2964_v56 = vmul.f32 0.5, %v2915_v57 }
 0x5b2   :  { %5769 = vtanh.f32 %v2954_v14 }
 0x5b3   :  { %5771 = vtanh.f32 %v2964_v56  ;;  %v10442_v56 = vld [vmem:[#allocation8_spill] sm:$0xff] }
 0x5b4   :  { %5773 = vtanh.f32 %v2958_v45  ;;  %v10443_v45 = vld [vmem:[#allocation56_spill] sm:$0xff] }
 0x5b5   :  { %5775 = vtanh.f32 %v2962_v29  ;;  %v884_v32 = vadd.f32 %v10443_v45, %v10442_v56  ;;  %v10449_v45 = vld [vmem:[#allocation87_spill] sm:$0xff] }
 0x5b6   :  { %5777 = vtanh.f32 %v2965_v11  ;;  %v10445_v11 = vld [vmem:[#allocation55_spill] sm:$0xff] }
 0x5ba   :  { %v5764_v2 = vpop.eup %5763 }
 0x5bb   :  { %v2972_v20 = vadd.f32 1.0, %v5764_v2 }
 0x5bc   :  { %v5766_v63 = vpop.eup %5765 }
 0x5bd   :  { %v2978_v23 = vmul.f32 0.5, %v2972_v20  ;;  %v2973_v52 = vadd.f32 1.0, %v5766_v63 }
 0x5be   :  { %v5768_v21 = vpop.eup %5767 }
 0x5bf   :  { %v5770_v54 = vpop.eup %5769  ;;  %v2979_v18 = vmul.f32 0.5, %v2973_v52  ;;  %v2975_v37 = vadd.f32 1.0, %v5768_v21  ;;  %v10446_v21 = vld [vmem:[#allocation85_spill] sm:$0xff] }
 0x5c0   :  { %v5772_v50 = vpop.eup %5771  ;;  %v2988_v19 = vmul.f32 %v5770_v54, %v2978_v23 }
 0x5c1   :  { %v2986_v34 = vmul.f32 %v2979_v18, %v10440_v12  ;;  %v2981_v26 = vmul.f32 0.5, %v2975_v37  ;;  %v2976_v48 = vadd.f32 1.0, %v5772_v50  ;;  %v5774_v10 = vpop.eup %5773 }
 0x5c2   :  { %v5776_v52 = vpop.eup %5775 }
 0x5c3   :  { %v8821_v3 = vadd.f32 %v2988_v19, %v2986_v34  ;;  %v2982_v46 = vmul.f32 0.5, %v2976_v48  ;;  %v2989_v30 = vmul.f32 %v5774_v10, %v2981_v26  ;;  %v5778_v50 = vpop.eup %5777  ;;  %v10447_v34 = vld [vmem:[#allocation59_spill] sm:$0xff]  ;;  %v10448_v26 = vld [vmem:[#allocation9_spill] sm:$0xff] }
 0x5c4   :  { %v997_v48 = vadd.f32 %v10448_v26, %v884_v32 }
 0x5c5   :  { %v2987_v14 = vmul.f32 %v2982_v46, %v10441_v43  ;;  %5779 = vtanh.f32 %v8821_v3 }
 0x5c7   :  { %v8825_v42 = vadd.f32 %v2989_v30, %v2987_v14  ;;  %v2974_v30 = vadd.f32 1.0, %v5776_v52 }
 0x5c8   :  { %v3050_v57 = vpop.f32.mrf.mxu1  ;;  %v3093_v24 = vpop.f32.mrf.mxu0 }
 0x5c9   :  { %5781 = vtanh.f32 %v8825_v42  ;;  %v3102_v2 = vadd.f32 %v3050_v57, %v10444_v40  ;;  %v2977_v57 = vadd.f32 1.0, %v5778_v50 }
 0x5ca   :  { %v3052_v20 = vpop.f32.mrf.mxu1  ;;  %v3095_v29 = vpop.f32.mrf.mxu0 }
 0x5cb   :  { %v3110_v63 = vmul.f32 0.5, %v3102_v2  ;;  %v3103_v23 = vadd.f32 %v3052_v20, %v10445_v11  ;;  %v3105_v54 = vadd.f32 %v3095_v29, %v10446_v21  ;;  %v2980_v20 = vmul.f32 0.5, %v2974_v30 }
 0x5cc   :  { %v3054_v18 = vpop.f32.mrf.mxu1  ;;  %v3097_v37 = vpop.f32.mrf.mxu0  ;;  %v2983_v29 = vmul.f32 0.5, %v2977_v57 }
 0x5cd   :  { %5783 = vtanh.f32 %v3110_v63  ;;  %v3111_v12 = vmul.f32 0.5, %v3103_v23  ;;  %v3106_v19 = vadd.f32 %v3054_v18, %v10447_v34  ;;  %v10450_v23 = vld [vmem:[#allocation84_spill] sm:$0xff]  ;;  %v10451_v18 = vld [vmem:[#allocation86_spill] sm:$0xff] }
 0x5ce   :  { %v3056_v46 = vpop.f32.mrf.mxu1  ;;  %v3099_v10 = vpop.f32.mrf.mxu0  ;;  %v3104_v21 = vadd.f32 %v3093_v24, %v10450_v23 }
 0x5cf   :  { %5785 = vtanh.f32 %v3111_v12  ;;  %v3113_v43 = vmul.f32 0.5, %v3106_v19  ;;  %v3107_v14 = vadd.f32 %v3056_v46, %v997_v48  ;;  %v3109_v40 = vadd.f32 %v3099_v10, %v10449_v45 }
 0x5d0   :  { %5787 = vtanh.f32 %v3105_v54  ;;  %v3108_v12 = vadd.f32 %v3097_v37, %v10451_v18  ;;  %v3112_v19 = vmul.f32 0.5, %v3104_v21 }
 0x5d1   :  { %5789 = vtanh.f32 %v3113_v43  ;;  %v3114_v56 = vmul.f32 0.5, %v3107_v14 }
 0x5d2   :  { %v5780_v2 = vpop.eup %5779  ;;  %v3115_v10 = vmul.f32 0.5, %v3108_v12 }
 0x5d3   :  { %5791 = vtanh.f32 %v3114_v56  ;;  %v2994_v11 = vmul.f32 %v5780_v2, %v2980_v20 }
 0x5d4   :  { %5793 = vtanh.f32 %v3109_v40 }
 0x5d5   :  { %5795 = vtanh.f32 %v3112_v19 }
 0x5d6   :  { %v5782_v63 = vpop.eup %5781  ;;  %5797 = vtanh.f32 %v3115_v10  ;;  %v10456_v10 = vld [vmem:[#allocation79_spill] sm:$0xff] }
 0x5d7   :  { %v2995_v32 = vmul.f32 %v5782_v63, %v2983_v29 }
 0x5d9   :  { %v2996_v34 = vpack.c.bf16 %v2995_v32, %v2994_v11 }
 0x5da   :  { %v5784_v52 = vpop.eup %5783 }
 0x5db   :  { %v3122_v54 = vadd.f32 1.0, %v5784_v52  ;;  %5102 = vst [vmem:[#allocation3 + $0x18] sm:$0xff] %v2996_v34   ;;  %3179 = vmatprep.mubr.bf16.mxu1 %v2996_v34  ;;  %3222 = vmatprep.mubr.bf16.mxu0 %v2996_v34 }
 0x5dc   :  { %v5786_v50 = vpop.eup %5785 }
 0x5dd   :  { %v5788_v26 = vpop.eup %5787  ;;  %v3128_v48 = vmul.f32 0.5, %v3122_v54  ;;  %v3123_v46 = vadd.f32 1.0, %v5786_v50 }
 0x5de   :  { %v5790_v43 = vpop.eup %5789 }
 0x5df   :  { %v3129_v14 = vmul.f32 0.5, %v3123_v46  ;;  %v3138_v30 = vmul.f32 %v5788_v26, %v3128_v48  ;;  %v3125_v57 = vadd.f32 1.0, %v5790_v43  ;;  %v10453_v26 = vld [vmem:[#allocation77_spill] sm:$0xff]  ;;  %v10454_v48 = vld [vmem:[#allocation32_spill] sm:$0xff]  ;;  %v10455_v46 = vld [vmem:[#allocation6_spill] sm:$0xff] }
 0x5e0   :  { %v5792_v56 = vpop.eup %5791  ;;  %v10457_v43 = vld [vmem:[#allocation76_spill] sm:$0xff] }
 0x5e1   :  { %v3136_v24 = vmul.f32 %v3129_v14, %v8481_v27  ;;  %v3131_v37 = vmul.f32 0.5, %v3125_v57  ;;  %v3126_v45 = vadd.f32 1.0, %v5792_v56  ;;  %v5794_v40 = vpop.eup %5793  ;;  %v10458_v14 = vld [vmem:[#allocation78_spill] sm:$0xff]  ;;  %v10461_v56 = vld [vmem:[#allocation103_spill] sm:$0xff] }
 0x5e2   :  { %v5796_v32 = vpop.eup %5795  ;;  %v10460_v57 = vld [vmem:[#allocation102_spill] sm:$0xff] }
 0x5e3   :  { %v8839_v2 = vadd.f32 %v3138_v30, %v3136_v24  ;;  %v3132_v20 = vmul.f32 0.5, %v3126_v45  ;;  %v3139_v29 = vmul.f32 %v5794_v40, %v3131_v37  ;;  %v5798_v23 = vpop.eup %5797  ;;  %v3124_v21 = vadd.f32 1.0, %v5796_v32  ;;  %v10459_v30 = vld [vmem:[#allocation101_spill] sm:$0xff]  ;;  %v10462_v24 = vld [vmem:[#allocation104_spill] sm:$0xff]  ;;  %v10464_v45 = vld [vmem:[#allocation106_spill] sm:$0xff] }
 0x5e4   :  { %v3127_v27 = vadd.f32 1.0, %v5798_v23  ;;  %v10463_v37 = vld [vmem:[#allocation105_spill] sm:$0xff]  ;;  %v10465_v40 = vld [vmem:[#allocation23_spill] sm:$0xff]  ;;  %v8893_v32 = vld [vmem:[%s9733_s4 + $0x84] ss:$16 sps:$4 sm:$0xff]  }
 0x5e5   :  { %v3137_v63 = vmul.f32 %v3132_v20, %v8485_v31  ;;  %5799 = vtanh.f32 %v8839_v2  ;;  %v3130_v12 = vmul.f32 0.5, %v3124_v21  ;;  %v10452_v31 = vld [vmem:[#allocation27_spill] sm:$0xff]  ;;  %v10466_v20 = vld [vmem:[#allocation25_spill] sm:$0xff]  ;;  %10469 = vst [vmem:[#allocation39_spill] sm:$0xff] %v8893_v32  ;;  %v8905_v21 = vld [vmem:[%s9733_s4 + $0x80] ss:$16 sps:$4 sm:$0xff]  }
 0x5e6   :  { %v3133_v34 = vmul.f32 0.5, %v3127_v27  ;;  %v8899_v23 = vld [vmem:[%s9733_s4 + $0x8c] ss:$16 sps:$4 sm:$0xff]   ;;  %10471 = vst [vmem:[#allocation41_spill] sm:$0xff] %v8905_v21  ;;  %v8911_v27 = vld [vmem:[%s9733_s4 + $0x88] ss:$16 sps:$4 sm:$0xff]  }
 0x5e7   :  { %v8843_v11 = vadd.f32 %v3139_v29, %v3137_v63  ;;  %v10467_v29 = vld [vmem:[#allocation26_spill] sm:$0xff]  ;;  %10470 = vst [vmem:[#allocation40_spill] sm:$0xff] %v8899_v23  ;;  %10472 = vst [vmem:[#allocation45_spill] sm:$0xff] %v8911_v27 }
 0x5e8   :  { %v10468_v63 = vld [vmem:[#allocation30_spill] sm:$0xff] }
 0x5e9   :  { %5801 = vtanh.f32 %v8843_v11 }
 0x5f2   :  { %v5800_v18 = vpop.eup %5799 }
 0x5f3   :  { %v3144_v54 = vmul.f32 %v5800_v18, %v3130_v12  ;;  %v8917_v18 = vld [vmem:[%s9733_s4 + $0x64] ss:$16 sps:$4 sm:$0xff]   ;;  %v8923_v12 = vld [vmem:[%s9733_s4 + $0x6c] ss:$16 sps:$4 sm:$0xff]  }
 0x5f4   :  { %10473 = vst [vmem:[#allocation46_spill] sm:$0xff] %v8917_v18  ;;  %10474 = vst [vmem:[#allocation47_spill] sm:$0xff] %v8923_v12 }
 0x5f6   :  { %v5802_v52 = vpop.eup %5801 }
 0x5f7   :  { %v3145_v50 = vmul.f32 %v5802_v52, %v3133_v34  ;;  %v8929_v34 = vld [vmem:[%s9733_s4 + $0x60] ss:$16 sps:$4 sm:$0xff]   ;;  %v8935_v52 = vld [vmem:[%s9733_s4 + $0x68] ss:$16 sps:$4 sm:$0xff]  }
 0x5f8   :  { %10475 = vst [vmem:[#allocation48_spill] sm:$0xff] %v8929_v34  ;;  %10476 = vst [vmem:[#allocation50_spill] sm:$0xff] %v8935_v52 }
 0x5f9   :  { %v3146_v19 = vpack.c.bf16 %v3145_v50, %v3144_v54  ;;  %v8941_v54 = vld [vmem:[%s9733_s4 + $0x44] ss:$16 sps:$4 sm:$0xff]   ;;  %v8947_v50 = vld [vmem:[%s9733_s4 + $0x4c] ss:$16 sps:$4 sm:$0xff]  }
 0x5fa   :  { %10477 = vst [vmem:[#allocation51_spill] sm:$0xff] %v8941_v54  ;;  %10478 = vst [vmem:[#allocation52_spill] sm:$0xff] %v8947_v50 }
 0x5fb   :  { %3180 = vmatmul.mubr.bf16.vlgmr.msra.gmra.mxu1 %v3146_v19  ;;  %3223 = vmatmul.mubr.bf16.vlgmr.msra.gmra.mxu0 %v3146_v19 }
 0x5fc   :  { %3290 = vmatpush1.bf16.msra.mxu1 %v8495_v58  ;;  %3333 = vmatpush1.bf16.msra.mxu0 %v8501_v13 }
 0x5fd   :  { %3291 = vmatprep.subr.bf16.mxu1 %v8507_v44  ;;  %3334 = vmatprep.subr.bf16.mxu0 %v8513_v49 }
 0x5fe   :  { %3321 = vmatprep.mubr.bf16.mxu1 %v10180_v62  ;;  %3364 = vmatprep.mubr.bf16.mxu0 %v10180_v62 }
 0x600   :  { %3292 = vmatpush1.bf16.msra.mxu1 %v8521_v60  ;;  %3335 = vmatpush1.bf16.msra.mxu0 %v8527_v7 }
 0x601   :  { %3293 = vmatprep.subr.bf16.mxu1 %v8533_v17  ;;  %3336 = vmatprep.subr.bf16.mxu0 %v8539_v1 }
 0x604   :  { %3294 = vmatpush1.bf16.msra.mxu1 %v8545_v8  ;;  %3337 = vmatpush1.bf16.msra.mxu0 %v8551_v39 }
 0x605   :  { %3295 = vmatprep.subr.bf16.mxu1 %v8557_v38  ;;  %3338 = vmatprep.subr.bf16.mxu0 %v8563_v41 }
 0x608   :  { %3296 = vmatpush1.bf16.msra.mxu1 %v8569_v16  ;;  %3339 = vmatpush1.bf16.msra.mxu0 %v8575_v6 }
 0x609   :  { %3297 = vmatprep.subr.bf16.mxu1 %v8581_v61  ;;  %3340 = vmatprep.subr.bf16.mxu0 %v8587_v5 }
 0x60c   :  { %3298 = vmatpush1.bf16.msra.mxu1 %v8593_v35  ;;  %3341 = vmatpush1.bf16.msra.mxu0 %v8599_v15 }
 0x60d   :  { %3299 = vmatprep.subr.bf16.mxu1 %v8605_v28  ;;  %3342 = vmatprep.subr.bf16.mxu0 %v8611_v47 }
 0x610   :  { %3300 = vmatpush1.bf16.msra.mxu1 %v10452_v31  ;;  %3343 = vmatpush1.bf16.msra.mxu0 %v10453_v26 }
 0x611   :  { %3301 = vmatprep.subr.bf16.mxu1 %v10454_v48  ;;  %3344 = vmatprep.subr.bf16.mxu0 %v10455_v46 }
 0x614   :  { %3302 = vmatpush1.bf16.msra.mxu1 %v10456_v10  ;;  %3345 = vmatpush1.bf16.msra.mxu0 %v10457_v43 }
 0x615   :  { %3303 = vmatprep.subr.bf16.mxu1 %v10458_v14  ;;  %3346 = vmatprep.subr.bf16.mxu0 %v10459_v30 }
 0x618   :  { %3304 = vmatpush1.bf16.msra.mxu1 %v8665_v33  ;;  %3347 = vmatpush1.bf16.msra.mxu0 %v10460_v57 }
 0x619   :  { %3420 = vmatprep.subr.bf16.mxu1 %v10461_v56  ;;  %3463 = vmatprep.subr.bf16.mxu0 %v10462_v24 }
 0x61b   :  { %3322 = vmatmul.mubr.bf16.vlgmr.msra.gmra.mxu1 %v3146_v19  ;;  %3365 = vmatmul.mubr.bf16.vlgmr.msra.gmra.mxu0 %v3146_v19  ;;  %v8953_v19 = vld [vmem:[%s9733_s4 + $0x40] ss:$16 sps:$4 sm:$0xff]  }
 0x61c   :  { %3421 = vmatpush1.bf16.msra.mxu1 %v10463_v37  ;;  %3464 = vmatpush1.bf16.msra.mxu0 %v10464_v45  ;;  %10479 = vst [vmem:[#allocation53_spill] sm:$0xff] %v8953_v19 }
 0x61d   :  { %3422 = vmatprep.subr.bf16.mxu1 %v10465_v40  ;;  %3465 = vmatprep.subr.bf16.mxu0 %v10466_v20 }
 0x620   :  { %3423 = vmatpush1.bf16.msra.mxu1 %v10467_v29  ;;  %3466 = vmatpush1.bf16.msra.mxu0 %v10468_v63 }
 0x621   :  { %3424 = vmatprep.subr.bf16.mxu1 %v8727_v51  ;;  %3467 = vmatprep.subr.bf16.mxu0 %v8733_v4 }
 0x624   :  { %3425 = vmatpush1.bf16.msra.mxu1 %v8739_v9  ;;  %3468 = vmatpush1.bf16.msra.mxu0 %v8745_v53 }
 0x625   :  { %3426 = vmatprep.subr.bf16.mxu1 %v8893_v32  ;;  %3469 = vmatprep.subr.bf16.mxu0 %v8899_v23 }
 0x628   :  { %3427 = vmatpush1.bf16.msra.mxu1 %v8905_v21  ;;  %3470 = vmatpush1.bf16.msra.mxu0 %v8911_v27 }
 0x629   :  { %3428 = vmatprep.subr.bf16.mxu1 %v8917_v18  ;;  %3471 = vmatprep.subr.bf16.mxu0 %v8923_v12 }
 0x62c   :  { %3429 = vmatpush1.bf16.msra.mxu1 %v8929_v34  ;;  %3472 = vmatpush1.bf16.msra.mxu0 %v8935_v52  ;;  %v8959_v52 = vld [vmem:[%s9733_s4 + $0x48] ss:$16 sps:$4 sm:$0xff]  }
 0x62d   :  { %3430 = vmatprep.subr.bf16.mxu1 %v8941_v54  ;;  %3473 = vmatprep.subr.bf16.mxu0 %v8947_v50  ;;  %10480 = vst [vmem:[#allocation57_spill] sm:$0xff] %v8959_v52  ;;  %v8965_v54 = vld [vmem:[%s9733_s4 + $0x24] ss:$16 sps:$4 sm:$0xff]   ;;  %v8971_v50 = vld [vmem:[%s9733_s4 + $0x2c] ss:$16 sps:$4 sm:$0xff]  }
 0x62e   :  { %10481 = vst [vmem:[#allocation58_spill] sm:$0xff] %v8965_v54  ;;  %10482 = vst [vmem:[#allocation5_spill] sm:$0xff] %v8971_v50 }
 0x630   :  { %3431 = vmatpush1.bf16.msra.mxu1 %v8953_v19  ;;  %3474 = vmatpush1.bf16.msra.mxu0 %v8959_v52  ;;  %v8977_v19 = vld [vmem:[%s9733_s4 + $0x20] ss:$16 sps:$4 sm:$0xff]   ;;  %v8983_v52 = vld [vmem:[%s9733_s4 + $0x28] ss:$16 sps:$4 sm:$0xff]  }
 0x631   :  { %3432 = vmatprep.subr.bf16.mxu1 %v8965_v54  ;;  %3475 = vmatprep.subr.bf16.mxu0 %v8971_v50  ;;  %10483 = vst [vmem:[#allocation15_spill] sm:$0xff] %v8977_v19  ;;  %10484 = vst [vmem:[#allocation11_spill] sm:$0xff] %v8983_v52  ;;  %v8989_v54 = vld [vmem:[%s9733_s4 + $0x4] ss:$16 sps:$4 sm:$0xff]   ;;  %v8995_v50 = vld [vmem:[%s9733_s4 + $0xc] ss:$16 sps:$4 sm:$0xff]  }
 0x632   :  { %10485 = vst [vmem:[#allocation14_spill] sm:$0xff] %v8989_v54  ;;  %10486 = vst [vmem:[#allocation73_spill] sm:$0xff] %v8995_v50 }
 0x634   :  { %3433 = vmatpush1.bf16.msra.mxu1 %v8977_v19  ;;  %3476 = vmatpush1.bf16.msra.mxu0 %v8983_v52  ;;  %v9001_v19 = vld [vmem:[%s9733_s4] ss:$16 sps:$4 sm:$0xff]   ;;  %v9007_v52 = vld [vmem:[%s9733_s4 + $0x8] ss:$16 sps:$4 sm:$0xff]  }
 0x635   :  { %3434 = vmatprep.subr.bf16.mxu1 %v8989_v54  ;;  %3477 = vmatprep.subr.bf16.mxu0 %v8995_v50  ;;  %10487 = vst [vmem:[#allocation19_spill] sm:$0xff] %v9001_v19  ;;  %10488 = vst [vmem:[#allocation4_spill] sm:$0xff] %v9007_v52  ;;  %v9013_v54 = vld [vmem:[%s9733_s4 + $0x1e4] ss:$16 sps:$4 sm:$0xff]   ;;  %v9019_v50 = vld [vmem:[%s9733_s4 + $0x1ec] ss:$16 sps:$4 sm:$0xff]  }
 0x636   :  { %10489 = vst [vmem:[#allocation75_spill] sm:$0xff] %v9013_v54  ;;  %10490 = vst [vmem:[#allocation72_spill] sm:$0xff] %v9019_v50 }
 0x638   :  { %3435 = vmatpush1.bf16.msra.mxu1 %v9001_v19  ;;  %3478 = vmatpush1.bf16.msra.mxu0 %v9007_v52  ;;  %v9025_v19 = vld [vmem:[%s9733_s4 + $0x1e0] ss:$16 sps:$4 sm:$0xff]   ;;  %v9031_v52 = vld [vmem:[%s9733_s4 + $0x1e8] ss:$16 sps:$4 sm:$0xff]  }
 0x639   :  { %3436 = vmatprep.subr.bf16.mxu1 %v9013_v54  ;;  %3479 = vmatprep.subr.bf16.mxu0 %v9019_v50  ;;  %10491 = vst [vmem:[#allocation74_spill] sm:$0xff] %v9025_v19  ;;  %10492 = vst [vmem:[#allocation100_spill] sm:$0xff] %v9031_v52  ;;  %v9037_v54 = vld [vmem:[%s9733_s4 + $0x1c4] ss:$16 sps:$4 sm:$0xff]   ;;  %v9043_v50 = vld [vmem:[%s9733_s4 + $0x1cc] ss:$16 sps:$4 sm:$0xff]  }
 0x63a   :  { %10493 = vst [vmem:[#allocation107_spill] sm:$0xff] %v9037_v54  ;;  %10494 = vst [vmem:[#allocation108_spill] sm:$0xff] %v9043_v50 }
 0x63c   :  { %3437 = vmatpush2.bf16.msra.mxu1 %v9025_v19  ;;  %3480 = vmatpush2.bf16.msra.mxu0 %v9031_v52  ;;  %v9049_v19 = vld [vmem:[%s9733_s4 + $0x1c0] ss:$16 sps:$4 sm:$0xff]   ;;  %v9055_v52 = vld [vmem:[%s9733_s4 + $0x1c8] ss:$16 sps:$4 sm:$0xff]  }
 0x63d   :  { %3438 = vmatprep.subr.bf16.mxu1 %v9037_v54  ;;  %3481 = vmatprep.subr.bf16.mxu0 %v9043_v50  ;;  %10495 = vst [vmem:[#allocation10_spill] sm:$0xff] %v9049_v19  ;;  %10496 = vst [vmem:[#allocation12_spill] sm:$0xff] %v9055_v52  ;;  %v9061_v54 = vld [vmem:[%s9733_s4 + $0x1a4] ss:$16 sps:$4 sm:$0xff]   ;;  %v9067_v50 = vld [vmem:[%s9733_s4 + $0x1ac] ss:$16 sps:$4 sm:$0xff]  }
 0x63e   :  { %10497 = vst [vmem:[#allocation21_spill] sm:$0xff] %v9061_v54  ;;  %10498 = vst [vmem:[#allocation22_spill] sm:$0xff] %v9067_v50 }
 0x640   :  { %3439 = vmatpush2.bf16.msra.mxu1 %v9049_v19  ;;  %3482 = vmatpush2.bf16.msra.mxu0 %v9055_v52  ;;  %v9073_v19 = vld [vmem:[%s9733_s4 + $0x1a0] ss:$16 sps:$4 sm:$0xff]   ;;  %v9079_v52 = vld [vmem:[%s9733_s4 + $0x1a8] ss:$16 sps:$4 sm:$0xff]  }
 0x641   :  { %3440 = vmatprep.subr.bf16.mxu1 %v9061_v54  ;;  %3483 = vmatprep.subr.bf16.mxu0 %v9067_v50  ;;  %10499 = vst [vmem:[#allocation43_spill] sm:$0xff] %v9073_v19  ;;  %10500 = vst [vmem:[#allocation37_spill] sm:$0xff] %v9079_v52  ;;  %v9085_v54 = vld [vmem:[%s9733_s4 + $0x184] ss:$16 sps:$4 sm:$0xff]   ;;  %v9091_v50 = vld [vmem:[%s9733_s4 + $0x18c] ss:$16 sps:$4 sm:$0xff]  }
 0x642   :  { %10501 = vst [vmem:[#allocation42_spill] sm:$0xff] %v9085_v54  ;;  %10502 = vst [vmem:[#allocation81_spill] sm:$0xff] %v9091_v50 }
 0x644   :  { %3441 = vmatpush2.bf16.msra.mxu1 %v9073_v19  ;;  %3484 = vmatpush2.bf16.msra.mxu0 %v9079_v52  ;;  %v9097_v19 = vld [vmem:[%s9733_s4 + $0x180] ss:$16 sps:$4 sm:$0xff]   ;;  %v9103_v52 = vld [vmem:[%s9733_s4 + $0x188] ss:$16 sps:$4 sm:$0xff]  }
 0x645   :  { %3442 = vmatprep.subr.bf16.mxu1 %v9085_v54  ;;  %3485 = vmatprep.subr.bf16.mxu0 %v9091_v50  ;;  %10503 = vst [vmem:[#allocation49_spill] sm:$0xff] %v9097_v19  ;;  %10504 = vst [vmem:[#allocation7_spill] sm:$0xff] %v9103_v52  ;;  %v9109_v54 = vld [vmem:[%s9733_s4 + $0x164] ss:$16 sps:$4 sm:$0xff]   ;;  %v9115_v50 = vld [vmem:[%s9733_s4 + $0x16c] ss:$16 sps:$4 sm:$0xff]  }
 0x646   :  { %10505 = vst [vmem:[#allocation83_spill] sm:$0xff] %v9109_v54  ;;  %10506 = vst [vmem:[#allocation80_spill] sm:$0xff] %v9115_v50 }
 0x648   :  { %3443 = vmatpush2.bf16.msra.mxu1 %v9097_v19  ;;  %3486 = vmatpush2.bf16.msra.mxu0 %v9103_v52  ;;  %v9121_v19 = vld [vmem:[%s9733_s4 + $0x160] ss:$16 sps:$4 sm:$0xff]   ;;  %v9127_v52 = vld [vmem:[%s9733_s4 + $0x168] ss:$16 sps:$4 sm:$0xff]  }
 0x649   :  { %3444 = vmatprep.subr.bf16.mxu1 %v9109_v54  ;;  %3487 = vmatprep.subr.bf16.mxu0 %v9115_v50  ;;  %10507 = vst [vmem:[#allocation82_spill] sm:$0xff] %v9121_v19  ;;  %10508 = vst [vmem:[#allocation109_spill] sm:$0xff] %v9127_v52  ;;  %v9133_v54 = vld [vmem:[%s9733_s4 + $0x144] ss:$16 sps:$4 sm:$0xff]   ;;  %v9139_v50 = vld [vmem:[%s9733_s4 + $0x14c] ss:$16 sps:$4 sm:$0xff]  }
 0x64a   :  { %10509 = vst [vmem:[#allocation110_spill] sm:$0xff] %v9133_v54  ;;  %10510 = vst [vmem:[#allocation111_spill] sm:$0xff] %v9139_v50 }
 0x64c   :  { %3445 = vmatpush2.bf16.msra.mxu1 %v9121_v19  ;;  %3488 = vmatpush2.bf16.msra.mxu0 %v9127_v52  ;;  %v9145_v19 = vld [vmem:[%s9733_s4 + $0x140] ss:$16 sps:$4 sm:$0xff]   ;;  %v9151_v52 = vld [vmem:[%s9733_s4 + $0x148] ss:$16 sps:$4 sm:$0xff]  }
 0x64d   :  { %3446 = vmatprep.subr.bf16.mxu1 %v9133_v54  ;;  %3489 = vmatprep.subr.bf16.mxu0 %v9139_v50  ;;  %10511 = vst [vmem:[#allocation112_spill] sm:$0xff] %v9145_v19  ;;  %10512 = vst [vmem:[#allocation113_spill] sm:$0xff] %v9151_v52  ;;  %v9157_v54 = vld [vmem:[%s9733_s4 + $0x124] ss:$16 sps:$4 sm:$0xff]   ;;  %v9163_v50 = vld [vmem:[%s9733_s4 + $0x12c] ss:$16 sps:$4 sm:$0xff]  }
 0x64e   :  { %10513 = vst [vmem:[#allocation114_spill] sm:$0xff] %v9157_v54  ;;  %10514 = vst [vmem:[#allocation115_spill] sm:$0xff] %v9163_v50 }
 0x650   :  { %3447 = vmatpush2.bf16.msra.mxu1 %v9145_v19  ;;  %3490 = vmatpush2.bf16.msra.mxu0 %v9151_v52  ;;  %v9169_v19 = vld [vmem:[%s9733_s4 + $0x120] ss:$16 sps:$4 sm:$0xff]   ;;  %v9175_v52 = vld [vmem:[%s9733_s4 + $0x128] ss:$16 sps:$4 sm:$0xff]  }
 0x651   :  { %3448 = vmatprep.subr.bf16.mxu1 %v9157_v54  ;;  %3491 = vmatprep.subr.bf16.mxu0 %v9163_v50  ;;  %10515 = vst [vmem:[#allocation116_spill] sm:$0xff] %v9169_v19  ;;  %10516 = vst [vmem:[#allocation117_spill] sm:$0xff] %v9175_v52  ;;  %v9181_v54 = vld [vmem:[%s9733_s4 + $0x104] ss:$16 sps:$4 sm:$0xff]   ;;  %v9187_v50 = vld [vmem:[%s9733_s4 + $0x10c] ss:$16 sps:$4 sm:$0xff]  }
 0x652   :  { %10517 = vst [vmem:[#allocation118_spill] sm:$0xff] %v9181_v54  ;;  %10518 = vst [vmem:[#allocation119_spill] sm:$0xff] %v9187_v50 }
 0x654   :  { %3449 = vmatpush2.bf16.msra.mxu1 %v9169_v19  ;;  %3492 = vmatpush2.bf16.msra.mxu0 %v9175_v52  ;;  %v9193_v19 = vld [vmem:[%s9733_s4 + $0x100] ss:$16 sps:$4 sm:$0xff]   ;;  %v9199_v52 = vld [vmem:[%s9733_s4 + $0x108] ss:$16 sps:$4 sm:$0xff]  }
 0x655   :  { %3450 = vmatprep.subr.bf16.mxu1 %v9181_v54  ;;  %3493 = vmatprep.subr.bf16.mxu0 %v9187_v50  ;;  %10519 = vst [vmem:[#allocation120_spill] sm:$0xff] %v9193_v19  ;;  %10520 = vst [vmem:[#allocation121_spill] sm:$0xff] %v9199_v52 }
 0x658   :  { %3451 = vmatpush2.bf16.msra.mxu1 %v9193_v19  ;;  %3494 = vmatpush2.bf16.msra.mxu0 %v9199_v52 }
 0x659   :  { %3562 = vmatprep.subr.bf16.mxu1 %v8803_v55  ;;  %3605 = vmatprep.subr.bf16.mxu0 %v8809_v0 }
 0x6bb   :  { %v3181_v54 = vpop.f32.mrf.mxu1  ;;  %v3224_v50 = vpop.f32.mrf.mxu0 }
 0x6bc   :  { %v3182_v34 = vadd.f32 %v3181_v54, %v10436_v22 }
 0x6bd   :  { %v3183_v12 = vpop.f32.mrf.mxu1  ;;  %v3226_v18 = vpop.f32.mrf.mxu0 }
 0x6be   :  { %v3233_v27 = vmul.f32 0.5, %v3182_v34  ;;  %v3184_v19 = vadd.f32 %v3183_v12, %v10437_v36  ;;  %v3227_v52 = vadd.f32 %v3226_v18, %v10438_v25  ;;  %v3225_v34 = vadd.f32 %v3224_v50, %v10439_v59 }
 0x6bf   :  { %v3185_v21 = vpop.f32.mrf.mxu1  ;;  %v3228_v23 = vpop.f32.mrf.mxu0 }
 0x6c0   :  { %5803 = vtanh.f32 %v3233_v27  ;;  %v3234_v32 = vmul.f32 0.5, %v3184_v19  ;;  %v3186_v53 = vadd.f32 %v3185_v21, %v10436_v22  ;;  %v3229_v27 = vadd.f32 %v3228_v23, %v10439_v59 }
 0x6c1   :  { %v3187_v55 = vpop.f32.mrf.mxu1  ;;  %v3230_v4 = vpop.f32.mrf.mxu0  ;;  %v3235_v18 = vmul.f32 0.5, %v3225_v34 }
 0x6c2   :  { %5805 = vtanh.f32 %v3234_v32  ;;  %v3236_v0 = vmul.f32 0.5, %v3186_v53  ;;  %v3188_v9 = vadd.f32 %v3187_v55, %v10437_v36  ;;  %v3231_v12 = vadd.f32 %v3230_v4, %v10438_v25 }
 0x6c3   :  { %v3238_v32 = vmul.f32 0.5, %v3229_v27 }
 0x6c4   :  { %5807 = vtanh.f32 %v3236_v0  ;;  %v3237_v54 = vmul.f32 0.5, %v3188_v9 }
 0x6c5   :  { %5809 = vtanh.f32 %v3227_v52 }
 0x6c6   :  { %5811 = vtanh.f32 %v3237_v54 }
 0x6c7   :  { %5813 = vtanh.f32 %v3231_v12 }
 0x6c8   :  { %5815 = vtanh.f32 %v3235_v18 }
 0x6c9   :  { %5817 = vtanh.f32 %v3238_v32  ;;  %v10523_v32 = vld [vmem:[#allocation60_spill] sm:$0xff] }
 0x6cd   :  { %v5804_v21 = vpop.eup %5803 }
 0x6ce   :  { %v3245_v19 = vadd.f32 1.0, %v5804_v21 }
 0x6cf   :  { %v5806_v22 = vpop.eup %5805 }
 0x6d0   :  { %v3251_v53 = vmul.f32 0.5, %v3245_v19  ;;  %v3246_v51 = vadd.f32 1.0, %v5806_v22 }
 0x6d1   :  { %v5808_v55 = vpop.eup %5807 }
 0x6d2   :  { %v5810_v36 = vpop.eup %5809  ;;  %v3252_v9 = vmul.f32 0.5, %v3246_v51  ;;  %v3248_v0 = vadd.f32 1.0, %v5808_v55 }
 0x6d3   :  { %v5812_v52 = vpop.eup %5811  ;;  %v3261_v50 = vmul.f32 %v5810_v36, %v3251_v53 }
 0x6d4   :  { %v3259_v4 = vmul.f32 %v3252_v9, %v8821_v3  ;;  %v3254_v54 = vmul.f32 0.5, %v3248_v0  ;;  %v3249_v12 = vadd.f32 1.0, %v5812_v52  ;;  %v5814_v34 = vpop.eup %5813  ;;  %v10524_v9 = vld [vmem:[#allocation61_spill] sm:$0xff] }
 0x6d5   :  { %v5816_v52 = vpop.eup %5815 }
 0x6d6   :  { %v9213_v23 = vadd.f32 %v3261_v50, %v3259_v4  ;;  %v3255_v21 = vmul.f32 0.5, %v3249_v12  ;;  %v3262_v19 = vmul.f32 %v5814_v34, %v3254_v54  ;;  %v10525_v4 = vld [vmem:[#allocation89_spill] sm:$0xff]  ;;  %v5818_v12 = vpop.eup %5817  ;;  %v10526_v34 = vld [vmem:[#allocation63_spill] sm:$0xff]  ;;  %v3247_v25 = vadd.f32 1.0, %v5816_v52 }
 0x6d8   :  { %10521 = vst [vmem:[#allocation122_spill] sm:$0xff] %v9213_v23  ;;  %v3260_v27 = vmul.f32 %v3255_v21, %v8825_v42  ;;  %5819 = vtanh.f32 %v9213_v23  ;;  %v10528_v23 = vld [vmem:[#allocation16_spill] sm:$0xff] }
 0x6da   :  { %v9217_v22 = vadd.f32 %v3262_v19, %v3260_v27  ;;  %v10527_v19 = vld [vmem:[#allocation62_spill] sm:$0xff] }
 0x6db   :  { %v3323_v51 = vpop.f32.mrf.mxu1  ;;  %v3366_v18 = vpop.f32.mrf.mxu0 }
 0x6dc   :  { %10522 = vst [vmem:[#allocation123_spill] sm:$0xff] %v9217_v22  ;;  %5821 = vtanh.f32 %v9217_v22  ;;  %v3375_v3 = vadd.f32 %v3323_v51, %v10523_v32  ;;  %v1007_v22 = vadd.f32 %v10528_v23, %v10527_v19  ;;  %v10530_v19 = vld [vmem:[#allocation88_spill] sm:$0xff] }
 0x6dd   :  { %v3325_v36 = vpop.f32.mrf.mxu1  ;;  %v3368_v53 = vpop.f32.mrf.mxu0  ;;  %v3377_v29 = vadd.f32 %v3366_v18, %v10530_v19 }
 0x6de   :  { %v3383_v55 = vmul.f32 0.5, %v3375_v3  ;;  %v3376_v0 = vadd.f32 %v3325_v36, %v10524_v9  ;;  %v3378_v50 = vadd.f32 %v3368_v53, %v10525_v4  ;;  %v3250_v36 = vadd.f32 1.0, %v5818_v12  ;;  %v10529_v9 = vld [vmem:[#allocation91_spill] sm:$0xff] }
 0x6df   :  { %v3327_v42 = vpop.f32.mrf.mxu1  ;;  %v3370_v54 = vpop.f32.mrf.mxu0  ;;  %v3385_v12 = vmul.f32 0.5, %v3377_v29 }
 0x6e0   :  { %5823 = vtanh.f32 %v3383_v55  ;;  %v3384_v21 = vmul.f32 0.5, %v3376_v0  ;;  %v3379_v27 = vadd.f32 %v3327_v42, %v10526_v34  ;;  %v3253_v0 = vmul.f32 0.5, %v3247_v25 }
 0x6e1   :  { %v3329_v59 = vpop.f32.mrf.mxu1  ;;  %v3372_v51 = vpop.f32.mrf.mxu0  ;;  %v3256_v63 = vmul.f32 0.5, %v3250_v36 }
 0x6e2   :  { %5825 = vtanh.f32 %v3384_v21  ;;  %v3386_v32 = vmul.f32 0.5, %v3379_v27  ;;  %v3380_v3 = vadd.f32 %v3329_v59, %v1007_v22  ;;  %v3382_v4 = vadd.f32 %v3372_v51, %v10529_v9  ;;  %v10531_v21 = vld [vmem:[#allocation90_spill] sm:$0xff] }
 0x6e3   :  { %5827 = vtanh.f32 %v3378_v50  ;;  %v3381_v27 = vadd.f32 %v3370_v54, %v10531_v21 }
 0x6e4   :  { %5829 = vtanh.f32 %v3386_v32  ;;  %v3387_v53 = vmul.f32 0.5, %v3380_v3 }
 0x6e5   :  { %v5820_v55 = vpop.eup %5819  ;;  %v3388_v3 = vmul.f32 0.5, %v3381_v27 }
 0x6e6   :  { %5831 = vtanh.f32 %v3387_v53  ;;  %v3267_v34 = vmul.f32 %v5820_v55, %v3253_v0 }
 0x6e7   :  { %5833 = vtanh.f32 %v3382_v4 }
 0x6e8   :  { %5835 = vtanh.f32 %v3385_v12 }
 0x6e9   :  { %v5822_v42 = vpop.eup %5821  ;;  %5837 = vtanh.f32 %v3388_v3  ;;  %v10569_v3 = vld [vmem:[#allocation37_spill] sm:$0xff] }
 0x6ea   :  { %v3268_v23 = vmul.f32 %v5822_v42, %v3256_v63 }
 0x6ec   :  { %v3269_v59 = vpack.c.bf16 %v3268_v23, %v3267_v34 }
 0x6ed   :  { %v5824_v22 = vpop.eup %5823 }
 0x6ee   :  { %v3395_v52 = vadd.f32 1.0, %v5824_v22  ;;  %5107 = vst [vmem:[#allocation3 + $0x20] sm:$0xff] %v3269_v59   ;;  %3452 = vmatprep.mubr.bf16.mxu1 %v3269_v59  ;;  %3495 = vmatprep.mubr.bf16.mxu0 %v3269_v59 }
 0x6ef   :  { %v5826_v50 = vpop.eup %5825 }
 0x6f0   :  { %v5828_v51 = vpop.eup %5827  ;;  %v3401_v32 = vmul.f32 0.5, %v3395_v52  ;;  %v3396_v25 = vadd.f32 1.0, %v5826_v50 }
 0x6f1   :  { %v5830_v36 = vpop.eup %5829 }
 0x6f2   :  { %v3402_v53 = vmul.f32 0.5, %v3396_v25  ;;  %v3411_v9 = vmul.f32 %v5828_v51, %v3401_v32  ;;  %v3398_v63 = vadd.f32 1.0, %v5830_v36  ;;  %v10570_v36 = vld [vmem:[#allocation42_spill] sm:$0xff] }
 0x6f3   :  { %v5832_v4 = vpop.eup %5831 }
 0x6f4   :  { %v3409_v18 = vmul.f32 %v3402_v53, %v8839_v2  ;;  %v3404_v54 = vmul.f32 0.5, %v3398_v63  ;;  %v3399_v55 = vadd.f32 1.0, %v5832_v4  ;;  %v5834_v0 = vpop.eup %5833  ;;  %v10571_v53 = vld [vmem:[#allocation81_spill] sm:$0xff]  ;;  %v10573_v63 = vld [vmem:[#allocation7_spill] sm:$0xff] }
 0x6f5   :  { %v5836_v21 = vpop.eup %5835  ;;  %v10574_v4 = vld [vmem:[#allocation83_spill] sm:$0xff] }
 0x6f6   :  { %v9230_v42 = vadd.f32 %v3411_v9, %v3409_v18  ;;  %v3405_v34 = vmul.f32 0.5, %v3399_v55  ;;  %v3412_v29 = vmul.f32 %v5834_v0, %v3404_v54  ;;  %v5838_v27 = vpop.eup %5837  ;;  %v3397_v59 = vadd.f32 1.0, %v5836_v21  ;;  %v10572_v9 = vld [vmem:[#allocation49_spill] sm:$0xff]  ;;  %v10575_v18 = vld [vmem:[#allocation80_spill] sm:$0xff]  ;;  %v10576_v54 = vld [vmem:[#allocation82_spill] sm:$0xff] }
 0x6f7   :  { %v3400_v2 = vadd.f32 1.0, %v5838_v27  ;;  %v10577_v55 = vld [vmem:[#allocation109_spill] sm:$0xff]  ;;  %v10578_v0 = vld [vmem:[#allocation110_spill] sm:$0xff]  ;;  %v10583_v27 = vld [vmem:[#allocation115_spill] sm:$0xff] }
 0x6f8   :  { %v3410_v23 = vmul.f32 %v3405_v34, %v8843_v11  ;;  %5839 = vtanh.f32 %v9230_v42  ;;  %v3403_v52 = vmul.f32 0.5, %v3397_v59  ;;  %v10553_v11 = vld [vmem:[#allocation11_spill] sm:$0xff]  ;;  %v10582_v21 = vld [vmem:[#allocation114_spill] sm:$0xff]  ;;  %v10584_v59 = vld [vmem:[#allocation116_spill] sm:$0xff] }
 0x6f9   :  { %v3406_v50 = vmul.f32 0.5, %v3400_v2  ;;  %v10579_v34 = vld [vmem:[#allocation111_spill] sm:$0xff]  ;;  %v10585_v2 = vld [vmem:[#allocation117_spill] sm:$0xff] }
 0x6fa   :  { %v9234_v19 = vadd.f32 %v3412_v29, %v3410_v23  ;;  %v10580_v29 = vld [vmem:[#allocation112_spill] sm:$0xff]  ;;  %v10581_v23 = vld [vmem:[#allocation113_spill] sm:$0xff] }
 0x6fc   :  { %5841 = vtanh.f32 %v9234_v19 }
 0x705   :  { %v5840_v22 = vpop.eup %5839 }
 0x706   :  { %v3417_v51 = vmul.f32 %v5840_v22, %v3403_v52  ;;  %v10586_v22 = vld [vmem:[#allocation118_spill] sm:$0xff]  ;;  %v10587_v52 = vld [vmem:[#allocation119_spill] sm:$0xff] }
 0x709   :  { %v5842_v12 = vpop.eup %5841 }
 0x70a   :  { %v3418_v32 = vmul.f32 %v5842_v12, %v3406_v50  ;;  %v10588_v50 = vld [vmem:[#allocation120_spill] sm:$0xff]  ;;  %v10589_v12 = vld [vmem:[#allocation121_spill] sm:$0xff] }
 0x70c   :  { %v3419_v25 = vpack.c.bf16 %v3418_v32, %v3417_v51  ;;  %v10590_v51 = vld [vmem:[#allocation36_spill] sm:$0xff]  ;;  %v10591_v32 = vld [vmem:[#allocation38_spill] sm:$0xff] }
 0x70e   :  { %3453 = vmatmul.mubr.bf16.vlgmr.msra.gmra.mxu1 %v3419_v25  ;;  %3496 = vmatmul.mubr.bf16.vlgmr.msra.gmra.mxu0 %v3419_v25 }
 0x70f   :  { %3563 = vmatpush1.bf16.msra.mxu1 %v8495_v58  ;;  %3606 = vmatpush1.bf16.msra.mxu0 %v8501_v13  ;;  %v10532_v58 = vld [vmem:[#allocation26_spill] sm:$0xff] }
 0x710   :  { %3564 = vmatprep.subr.bf16.mxu1 %v8507_v44  ;;  %3607 = vmatprep.subr.bf16.mxu0 %v8513_v49  ;;  %v10533_v13 = vld [vmem:[#allocation30_spill] sm:$0xff]  ;;  %v10534_v44 = vld [vmem:[#allocation31_spill] sm:$0xff]  ;;  %v10535_v49 = vld [vmem:[#allocation33_spill] sm:$0xff] }
 0x711   :  { %3594 = vmatprep.mubr.bf16.mxu1 %v10180_v62  ;;  %3637 = vmatprep.mubr.bf16.mxu0 %v10180_v62 }
 0x713   :  { %3565 = vmatpush1.bf16.msra.mxu1 %v8521_v60  ;;  %3608 = vmatpush1.bf16.msra.mxu0 %v8527_v7  ;;  %v10536_v60 = vld [vmem:[#allocation34_spill] sm:$0xff]  ;;  %v10537_v7 = vld [vmem:[#allocation35_spill] sm:$0xff] }
 0x714   :  { %3566 = vmatprep.subr.bf16.mxu1 %v8533_v17  ;;  %3609 = vmatprep.subr.bf16.mxu0 %v8539_v1  ;;  %v10538_v17 = vld [vmem:[#allocation39_spill] sm:$0xff]  ;;  %v10539_v1 = vld [vmem:[#allocation40_spill] sm:$0xff] }
 0x717   :  { %3567 = vmatpush1.bf16.msra.mxu1 %v8545_v8  ;;  %3610 = vmatpush1.bf16.msra.mxu0 %v8551_v39  ;;  %v10540_v8 = vld [vmem:[#allocation41_spill] sm:$0xff] }
 0x718   :  { %3568 = vmatprep.subr.bf16.mxu1 %v8557_v38  ;;  %3611 = vmatprep.subr.bf16.mxu0 %v8563_v41  ;;  %v10541_v39 = vld [vmem:[#allocation45_spill] sm:$0xff]  ;;  %v10542_v38 = vld [vmem:[#allocation46_spill] sm:$0xff]  ;;  %v10543_v41 = vld [vmem:[#allocation47_spill] sm:$0xff] }
 0x71b   :  { %3569 = vmatpush1.bf16.msra.mxu1 %v8569_v16  ;;  %3612 = vmatpush1.bf16.msra.mxu0 %v8575_v6  ;;  %v10544_v16 = vld [vmem:[#allocation48_spill] sm:$0xff]  ;;  %v10545_v6 = vld [vmem:[#allocation50_spill] sm:$0xff] }
 0x71c   :  { %3570 = vmatprep.subr.bf16.mxu1 %v8581_v61  ;;  %3613 = vmatprep.subr.bf16.mxu0 %v8587_v5  ;;  %v10546_v61 = vld [vmem:[#allocation51_spill] sm:$0xff]  ;;  %v10547_v5 = vld [vmem:[#allocation52_spill] sm:$0xff] }
 0x71f   :  { %3571 = vmatpush1.bf16.msra.mxu1 %v8593_v35  ;;  %3614 = vmatpush1.bf16.msra.mxu0 %v8599_v15  ;;  %v10548_v35 = vld [vmem:[#allocation53_spill] sm:$0xff] }
 0x720   :  { %3572 = vmatprep.subr.bf16.mxu1 %v8605_v28  ;;  %3615 = vmatprep.subr.bf16.mxu0 %v8611_v47  ;;  %v10549_v15 = vld [vmem:[#allocation57_spill] sm:$0xff]  ;;  %v10550_v28 = vld [vmem:[#allocation58_spill] sm:$0xff] }
 0x721   :  { %v10551_v47 = vld [vmem:[#allocation5_spill] sm:$0xff] }
 0x723   :  { %3573 = vmatpush1.bf16.msra.mxu1 %v10452_v31  ;;  %3616 = vmatpush1.bf16.msra.mxu0 %v10453_v26  ;;  %v10554_v31 = vld [vmem:[#allocation14_spill] sm:$0xff]  ;;  %v10555_v26 = vld [vmem:[#allocation73_spill] sm:$0xff] }
 0x724   :  { %3574 = vmatprep.subr.bf16.mxu1 %v10454_v48  ;;  %3617 = vmatprep.subr.bf16.mxu0 %v10455_v46  ;;  %v10556_v48 = vld [vmem:[#allocation19_spill] sm:$0xff]  ;;  %v10557_v46 = vld [vmem:[#allocation4_spill] sm:$0xff] }
 0x727   :  { %3575 = vmatpush1.bf16.msra.mxu1 %v10456_v10  ;;  %3618 = vmatpush1.bf16.msra.mxu0 %v10457_v43  ;;  %v10558_v10 = vld [vmem:[#allocation75_spill] sm:$0xff]  ;;  %v10559_v43 = vld [vmem:[#allocation72_spill] sm:$0xff] }
 0x728   :  { %3576 = vmatprep.subr.bf16.mxu1 %v10458_v14  ;;  %3619 = vmatprep.subr.bf16.mxu0 %v10459_v30  ;;  %v10560_v14 = vld [vmem:[#allocation74_spill] sm:$0xff]  ;;  %v10561_v30 = vld [vmem:[#allocation100_spill] sm:$0xff] }
 0x72b   :  { %3577 = vmatpush1.bf16.msra.mxu1 %v8665_v33  ;;  %3620 = vmatpush1.bf16.msra.mxu0 %v10460_v57  ;;  %v10552_v33 = vld [vmem:[#allocation15_spill] sm:$0xff] }
 0x72c   :  { %3693 = vmatprep.subr.bf16.mxu1 %v10461_v56  ;;  %3736 = vmatprep.subr.bf16.mxu0 %v10462_v24  ;;  %v10562_v57 = vld [vmem:[#allocation107_spill] sm:$0xff]  ;;  %v10563_v56 = vld [vmem:[#allocation108_spill] sm:$0xff]  ;;  %v10564_v24 = vld [vmem:[#allocation10_spill] sm:$0xff] }
 0x72e   :  { %3595 = vmatmul.mubr.bf16.vlgmr.msra.gmra.mxu1 %v3419_v25  ;;  %3638 = vmatmul.mubr.bf16.vlgmr.msra.gmra.mxu0 %v3419_v25 }
 0x72f   :  { %3694 = vmatpush1.bf16.msra.mxu1 %v10463_v37  ;;  %3737 = vmatpush1.bf16.msra.mxu0 %v10464_v45  ;;  %v10565_v37 = vld [vmem:[#allocation12_spill] sm:$0xff]  ;;  %v10566_v45 = vld [vmem:[#allocation21_spill] sm:$0xff] }
 0x730   :  { %3695 = vmatprep.subr.bf16.mxu1 %v10465_v40  ;;  %3738 = vmatprep.subr.bf16.mxu0 %v10466_v20  ;;  %v10567_v40 = vld [vmem:[#allocation22_spill] sm:$0xff]  ;;  %v10568_v20 = vld [vmem:[#allocation43_spill] sm:$0xff] }
 0x733   :  { %3696 = vmatpush1.bf16.msra.mxu1 %v10532_v58  ;;  %3739 = vmatpush1.bf16.msra.mxu0 %v10533_v13  ;;  %v10592_v13 = vld [vmem:[#allocation13_spill] sm:$0xff] }
 0x734   :  { %3697 = vmatprep.subr.bf16.mxu1 %v10534_v44  ;;  %3740 = vmatprep.subr.bf16.mxu0 %v10535_v49 }
 0x737   :  { %3698 = vmatpush1.bf16.msra.mxu1 %v10536_v60  ;;  %3741 = vmatpush1.bf16.msra.mxu0 %v10537_v7 }
 0x738   :  { %3699 = vmatprep.subr.bf16.mxu1 %v10538_v17  ;;  %3742 = vmatprep.subr.bf16.mxu0 %v10539_v1 }
 0x73b   :  { %3700 = vmatpush1.bf16.msra.mxu1 %v10540_v8  ;;  %3743 = vmatpush1.bf16.msra.mxu0 %v10541_v39 }
 0x73c   :  { %3701 = vmatprep.subr.bf16.mxu1 %v10542_v38  ;;  %3744 = vmatprep.subr.bf16.mxu0 %v10543_v41 }
 0x73f   :  { %3702 = vmatpush1.bf16.msra.mxu1 %v10544_v16  ;;  %3745 = vmatpush1.bf16.msra.mxu0 %v10545_v6 }
 0x740   :  { %3703 = vmatprep.subr.bf16.mxu1 %v10546_v61  ;;  %3746 = vmatprep.subr.bf16.mxu0 %v10547_v5 }
 0x743   :  { %3704 = vmatpush1.bf16.msra.mxu1 %v10548_v35  ;;  %3747 = vmatpush1.bf16.msra.mxu0 %v10549_v15 }
 0x744   :  { %3705 = vmatprep.subr.bf16.mxu1 %v10550_v28  ;;  %3748 = vmatprep.subr.bf16.mxu0 %v10551_v47 }
 0x747   :  { %3706 = vmatpush1.bf16.msra.mxu1 %v10552_v33  ;;  %3749 = vmatpush1.bf16.msra.mxu0 %v10553_v11 }
 0x748   :  { %3707 = vmatprep.subr.bf16.mxu1 %v10554_v31  ;;  %3750 = vmatprep.subr.bf16.mxu0 %v10555_v26 }
 0x74b   :  { %3708 = vmatpush1.bf16.msra.mxu1 %v10556_v48  ;;  %3751 = vmatpush1.bf16.msra.mxu0 %v10557_v46 }
 0x74c   :  { %3709 = vmatprep.subr.bf16.mxu1 %v10558_v10  ;;  %3752 = vmatprep.subr.bf16.mxu0 %v10559_v43 }
 0x74f   :  { %3710 = vmatpush2.bf16.msra.mxu1 %v10560_v14  ;;  %3753 = vmatpush2.bf16.msra.mxu0 %v10561_v30 }
 0x750   :  { %3711 = vmatprep.subr.bf16.mxu1 %v10562_v57  ;;  %3754 = vmatprep.subr.bf16.mxu0 %v10563_v56 }
 0x753   :  { %3712 = vmatpush2.bf16.msra.mxu1 %v10564_v24  ;;  %3755 = vmatpush2.bf16.msra.mxu0 %v10565_v37 }
 0x754   :  { %3713 = vmatprep.subr.bf16.mxu1 %v10566_v45  ;;  %3756 = vmatprep.subr.bf16.mxu0 %v10567_v40 }
 0x757   :  { %3714 = vmatpush2.bf16.msra.mxu1 %v10568_v20  ;;  %3757 = vmatpush2.bf16.msra.mxu0 %v10569_v3 }
 0x758   :  { %3715 = vmatprep.subr.bf16.mxu1 %v10570_v36  ;;  %3758 = vmatprep.subr.bf16.mxu0 %v10571_v53 }
 0x75b   :  { %3716 = vmatpush2.bf16.msra.mxu1 %v10572_v9  ;;  %3759 = vmatpush2.bf16.msra.mxu0 %v10573_v63 }
 0x75c   :  { %3717 = vmatprep.subr.bf16.mxu1 %v10574_v4  ;;  %3760 = vmatprep.subr.bf16.mxu0 %v10575_v18 }
 0x75f   :  { %3718 = vmatpush2.bf16.msra.mxu1 %v10576_v54  ;;  %3761 = vmatpush2.bf16.msra.mxu0 %v10577_v55 }
 0x760   :  { %3719 = vmatprep.subr.bf16.mxu1 %v10578_v0  ;;  %3762 = vmatprep.subr.bf16.mxu0 %v10579_v34 }
 0x763   :  { %3720 = vmatpush2.bf16.msra.mxu1 %v10580_v29  ;;  %3763 = vmatpush2.bf16.msra.mxu0 %v10581_v23 }
 0x764   :  { %3721 = vmatprep.subr.bf16.mxu1 %v10582_v21  ;;  %3764 = vmatprep.subr.bf16.mxu0 %v10583_v27 }
 0x767   :  { %3722 = vmatpush2.bf16.msra.mxu1 %v10584_v59  ;;  %3765 = vmatpush2.bf16.msra.mxu0 %v10585_v2  ;;  %v10593_v2 = vld [vmem:[#allocation17_spill] sm:$0xff] }
 0x768   :  { %3723 = vmatprep.subr.bf16.mxu1 %v10586_v22  ;;  %3766 = vmatprep.subr.bf16.mxu0 %v10587_v52 }
 0x76b   :  { %3724 = vmatpush2.bf16.msra.mxu1 %v10588_v50  ;;  %3767 = vmatpush2.bf16.msra.mxu0 %v10589_v12  ;;  %v10594_v12 = vld [vmem:[#allocation18_spill] sm:$0xff] }
 0x76c   :  { %3835 = vmatprep.subr.bf16.mxu1 %v10590_v51  ;;  %3878 = vmatprep.subr.bf16.mxu0 %v10591_v32 }
 0x7ce   :  { %v3454_v25 = vpop.f32.mrf.mxu1  ;;  %v3497_v58 = vpop.f32.mrf.mxu0 }
 0x7cf   :  { %v3455_v44 = vadd.f32 %v3454_v25, %v10592_v13 }
 0x7d0   :  { %v3456_v49 = vpop.f32.mrf.mxu1  ;;  %v3499_v60 = vpop.f32.mrf.mxu0 }
 0x7d1   :  { %v3506_v7 = vmul.f32 0.5, %v3455_v44  ;;  %v3457_v59 = vadd.f32 %v3456_v49, %v10593_v2  ;;  %v3500_v21 = vadd.f32 %v3499_v60, %v10594_v12  ;;  %v10595_v49 = vld [vmem:[#allocation20_spill] sm:$0xff] }
 0x7d2   :  { %v3458_v22 = vpop.f32.mrf.mxu1  ;;  %v3501_v27 = vpop.f32.mrf.mxu0  ;;  %v3498_v34 = vadd.f32 %v3497_v58, %v10595_v49 }
 0x7d3   :  { %5843 = vtanh.f32 %v3506_v7  ;;  %v3507_v52 = vmul.f32 0.5, %v3457_v59  ;;  %v3459_v50 = vadd.f32 %v3458_v22, %v10592_v13  ;;  %v3502_v59 = vadd.f32 %v3501_v27, %v10595_v49  ;;  %v10598_v49 = vld [vmem:[#allocation123_spill] sm:$0xff] }
 0x7d4   :  { %v3460_v51 = vpop.f32.mrf.mxu1  ;;  %v3503_v29 = vpop.f32.mrf.mxu0  ;;  %v3508_v60 = vmul.f32 0.5, %v3498_v34 }
 0x7d5   :  { %5845 = vtanh.f32 %v3507_v52  ;;  %v3509_v32 = vmul.f32 0.5, %v3459_v50  ;;  %v3461_v23 = vadd.f32 %v3460_v51, %v10593_v2  ;;  %v3504_v44 = vadd.f32 %v3503_v29, %v10594_v12  ;;  %v10596_v29 = vld [vmem:[#allocation122_spill] sm:$0xff] }
 0x7d6   :  { %v3511_v52 = vmul.f32 0.5, %v3502_v59 }
 0x7d7   :  { %5847 = vtanh.f32 %v3509_v32  ;;  %v3510_v25 = vmul.f32 0.5, %v3461_v23 }
 0x7d8   :  { %5849 = vtanh.f32 %v3500_v21 }
 0x7d9   :  { %5851 = vtanh.f32 %v3510_v25 }
 0x7da   :  { %5853 = vtanh.f32 %v3504_v44 }
 0x7db   :  { %5855 = vtanh.f32 %v3508_v60 }
 0x7dc   :  { %5857 = vtanh.f32 %v3511_v52  ;;  %v10600_v52 = vld [vmem:[#allocation64_spill] sm:$0xff] }
 0x7e0   :  { %v5844_v22 = vpop.eup %5843 }
 0x7e1   :  { %v3518_v7 = vadd.f32 1.0, %v5844_v22 }
 0x7e2   :  { %v5846_v13 = vpop.eup %5845 }
 0x7e3   :  { %v3524_v50 = vmul.f32 0.5, %v3518_v7  ;;  %v3519_v0 = vadd.f32 1.0, %v5846_v13 }
 0x7e4   :  { %v5848_v51 = vpop.eup %5847 }
 0x7e5   :  { %v5850_v2 = vpop.eup %5849  ;;  %v3525_v23 = vmul.f32 0.5, %v3519_v0  ;;  %v3521_v21 = vadd.f32 1.0, %v5848_v51 }
 0x7e6   :  { %v5852_v32 = vpop.eup %5851  ;;  %v3534_v58 = vmul.f32 %v5850_v2, %v3524_v50 }
 0x7e7   :  { %v3532_v25 = vmul.f32 %v3525_v23, %v10596_v29  ;;  %v3527_v44 = vmul.f32 0.5, %v3521_v21  ;;  %v3522_v12 = vadd.f32 1.0, %v5852_v32  ;;  %v5854_v34 = vpop.eup %5853  ;;  %v10601_v21 = vld [vmem:[#allocation65_spill] sm:$0xff] }
 0x7e8   :  { %v10602_v29 = vld [vmem:[#allocation93_spill] sm:$0xff] }
 0x7e9   :  { %v9344_v27 = vadd.f32 %v3534_v58, %v3532_v25  ;;  %v3528_v22 = vmul.f32 0.5, %v3522_v12  ;;  %v3535_v7 = vmul.f32 %v5854_v34, %v3527_v44  ;;  %v5856_v12 = vpop.eup %5855  ;;  %v10603_v34 = vld [vmem:[#allocation67_spill] sm:$0xff] }
 0x7ea   :  { %v5858_v44 = vpop.eup %5857  ;;  %v3520_v54 = vadd.f32 1.0, %v5856_v12 }
 0x7eb   :  { %10597 = vst [vmem:[#allocation124_spill] sm:$0xff] %v9344_v27  ;;  %v3533_v59 = vmul.f32 %v3528_v22, %v10598_v49  ;;  %5859 = vtanh.f32 %v9344_v27  ;;  %v10605_v27 = vld [vmem:[#allocation29_spill] sm:$0xff] }
 0x7ed   :  { %v9348_v13 = vadd.f32 %v3535_v7, %v3533_v59  ;;  %v10604_v7 = vld [vmem:[#allocation66_spill] sm:$0xff] }
 0x7ee   :  { %v3596_v0 = vpop.f32.mrf.mxu1  ;;  %v3639_v60 = vpop.f32.mrf.mxu0 }
 0x7ef   :  { %10599 = vst [vmem:[#allocation28_spill] sm:$0xff] %v9348_v13  ;;  %5861 = vtanh.f32 %v9348_v13  ;;  %v3648_v51 = vadd.f32 %v3596_v0, %v10600_v52  ;;  %v1017_v13 = vadd.f32 %v10605_v27, %v10604_v7  ;;  %v10607_v7 = vld [vmem:[#allocation92_spill] sm:$0xff] }
 0x7f0   :  { %v3598_v2 = vpop.f32.mrf.mxu1  ;;  %v3641_v50 = vpop.f32.mrf.mxu0  ;;  %v3650_v4 = vadd.f32 %v3639_v60, %v10607_v7 }
 0x7f1   :  { %v3656_v23 = vmul.f32 0.5, %v3648_v51  ;;  %v3649_v32 = vadd.f32 %v3598_v2, %v10601_v21  ;;  %v3651_v25 = vadd.f32 %v3641_v50, %v10602_v29  ;;  %v3523_v2 = vadd.f32 1.0, %v5858_v44  ;;  %v10606_v21 = vld [vmem:[#allocation95_spill] sm:$0xff] }
 0x7f2   :  { %v3600_v49 = vpop.f32.mrf.mxu1  ;;  %v3643_v58 = vpop.f32.mrf.mxu0  ;;  %v3658_v44 = vmul.f32 0.5, %v3650_v4 }
 0x7f3   :  { %5863 = vtanh.f32 %v3656_v23  ;;  %v3657_v22 = vmul.f32 0.5, %v3649_v32  ;;  %v3652_v59 = vadd.f32 %v3600_v49, %v10603_v34  ;;  %v3526_v32 = vmul.f32 0.5, %v3520_v54 }
 0x7f4   :  { %v3602_v55 = vpop.f32.mrf.mxu1  ;;  %v3645_v0 = vpop.f32.mrf.mxu0  ;;  %v3529_v18 = vmul.f32 0.5, %v3523_v2 }
 0x7f5   :  { %5865 = vtanh.f32 %v3657_v22  ;;  %v3659_v52 = vmul.f32 0.5, %v3652_v59  ;;  %v3653_v51 = vadd.f32 %v3602_v55, %v1017_v13  ;;  %v3655_v29 = vadd.f32 %v3645_v0, %v10606_v21  ;;  %v10608_v22 = vld [vmem:[#allocation94_spill] sm:$0xff] }
 0x7f6   :  { %5867 = vtanh.f32 %v3651_v25  ;;  %v3654_v59 = vadd.f32 %v3643_v58, %v10608_v22 }
 0x7f7   :  { %5869 = vtanh.f32 %v3659_v52  ;;  %v3660_v50 = vmul.f32 0.5, %v3653_v51 }
 0x7f8   :  { %v5860_v23 = vpop.eup %5859  ;;  %v3661_v51 = vmul.f32 0.5, %v3654_v59 }
 0x7f9   :  { %5871 = vtanh.f32 %v3660_v50  ;;  %v3540_v34 = vmul.f32 %v5860_v23, %v3526_v32 }
 0x7fa   :  { %5873 = vtanh.f32 %v3655_v29 }
 0x7fb   :  { %5875 = vtanh.f32 %v3658_v44 }
 0x7fc   :  { %v5862_v49 = vpop.eup %5861  ;;  %5877 = vtanh.f32 %v3661_v51  ;;  %v6184_v51 = vld [vmem:[%s9732_s2 + $0xe8] ss:$16 sps:$4 sm:$0xff]  }
 0x7fd   :  { %v3541_v27 = vmul.f32 %v5862_v49, %v3529_v18 }
 0x7ff   :  { %v3542_v55 = vpack.c.bf16 %v3541_v27, %v3540_v34 }
 0x800   :  { %v5864_v13 = vpop.eup %5863 }
 0x801   :  { %v3668_v12 = vadd.f32 1.0, %v5864_v13  ;;  %5112 = vst [vmem:[#allocation3 + $0x28] sm:$0xff] %v3542_v55   ;;  %3725 = vmatprep.mubr.bf16.mxu1 %v3542_v55  ;;  %3768 = vmatprep.mubr.bf16.mxu0 %v3542_v55 }
 0x802   :  { %v5866_v25 = vpop.eup %5865 }
 0x803   :  { %v5868_v0 = vpop.eup %5867  ;;  %v3674_v52 = vmul.f32 0.5, %v3668_v12  ;;  %v3669_v54 = vadd.f32 1.0, %v5866_v25 }
 0x804   :  { %v5870_v2 = vpop.eup %5869 }
 0x805   :  { %v3675_v50 = vmul.f32 0.5, %v3669_v54  ;;  %v3684_v21 = vmul.f32 %v5868_v0, %v3674_v52  ;;  %v3671_v18 = vadd.f32 1.0, %v5870_v2  ;;  %v6185_v2 = vld [vmem:[%s9732_s2 + $0xc4] ss:$16 sps:$4 sm:$0xff]  }
 0x806   :  { %v5872_v29 = vpop.eup %5871 }
 0x807   :  { %v3682_v60 = vmul.f32 %v3675_v50, %v9230_v42  ;;  %v3677_v58 = vmul.f32 0.5, %v3671_v18  ;;  %v3672_v23 = vadd.f32 1.0, %v5872_v29  ;;  %v5874_v32 = vpop.eup %5873  ;;  %v6186_v50 = vld [vmem:[%s9732_s2 + $0xcc] ss:$16 sps:$4 sm:$0xff]   ;;  %v6188_v18 = vld [vmem:[%s9732_s2 + $0xc8] ss:$16 sps:$4 sm:$0xff]  }
 0x808   :  { %v5876_v22 = vpop.eup %5875  ;;  %v6189_v29 = vld [vmem:[%s9732_s2 + $0xa4] ss:$16 sps:$4 sm:$0xff]  }
 0x809   :  { %v9361_v49 = vadd.f32 %v3684_v21, %v3682_v60  ;;  %v3678_v34 = vmul.f32 0.5, %v3672_v23  ;;  %v3685_v4 = vmul.f32 %v5874_v32, %v3677_v58  ;;  %v5878_v59 = vpop.eup %5877  ;;  %v3670_v55 = vadd.f32 1.0, %v5876_v22  ;;  %v6187_v21 = vld [vmem:[%s9732_s2 + $0xc0] ss:$16 sps:$4 sm:$0xff]   ;;  %v6190_v60 = vld [vmem:[%s9732_s2 + $0xac] ss:$16 sps:$4 sm:$0xff]  }
 0x80a   :  { %v3673_v42 = vadd.f32 1.0, %v5878_v59  ;;  %v6191_v58 = vld [vmem:[%s9732_s2 + $0xa0] ss:$16 sps:$4 sm:$0xff]   ;;  %v6192_v23 = vld [vmem:[%s9732_s2 + $0xa8] ss:$16 sps:$4 sm:$0xff]  }
 0x80b   :  { %v3683_v27 = vmul.f32 %v3678_v34, %v9234_v19  ;;  %5879 = vtanh.f32 %v9361_v49  ;;  %v3676_v12 = vmul.f32 0.5, %v3670_v55  ;;  %v6183_v19 = vld [vmem:[%s9732_s2 + $0xe0] ss:$16 sps:$4 sm:$0xff]   ;;  %v6193_v32 = vld [vmem:[%s9732_s2 + $0x84] ss:$16 sps:$4 sm:$0xff]  }
 0x80c   :  { %v3679_v25 = vmul.f32 0.5, %v3673_v42  ;;  %v6194_v34 = vld [vmem:[%s9732_s2 + $0x8c] ss:$16 sps:$4 sm:$0xff]   ;;  %v6197_v22 = vld [vmem:[%s9732_s2 + $0x64] ss:$16 sps:$4 sm:$0xff]  }
 0x80d   :  { %v9365_v7 = vadd.f32 %v3685_v4, %v3683_v27  ;;  %v6195_v4 = vld [vmem:[%s9732_s2 + $0x80] ss:$16 sps:$4 sm:$0xff]   ;;  %v6196_v27 = vld [vmem:[%s9732_s2 + $0x88] ss:$16 sps:$4 sm:$0xff]   ;;  %v6198_v59 = vld [vmem:[%s9732_s2 + $0x6c] ss:$16 sps:$4 sm:$0xff]  }
 0x80e   :  { %v6199_v55 = vld [vmem:[%s9732_s2 + $0x60] ss:$16 sps:$4 sm:$0xff]   ;;  %v6200_v42 = vld [vmem:[%s9732_s2 + $0x68] ss:$16 sps:$4 sm:$0xff]  }
 0x80f   :  { %5881 = vtanh.f32 %v9365_v7 }
 0x818   :  { %v5880_v13 = vpop.eup %5879 }
 0x819   :  { %v3690_v0 = vmul.f32 %v5880_v13, %v3676_v12  ;;  %v6201_v13 = vld [vmem:[%s9732_s2 + $0x44] ss:$16 sps:$4 sm:$0xff]   ;;  %v6202_v12 = vld [vmem:[%s9732_s2 + $0x4c] ss:$16 sps:$4 sm:$0xff]  }
 0x81c   :  { %v5882_v44 = vpop.eup %5881 }
 0x81d   :  { %v3691_v52 = vmul.f32 %v5882_v44, %v3679_v25  ;;  %v6203_v25 = vld [vmem:[%s9732_s2 + $0x40] ss:$16 sps:$4 sm:$0xff]   ;;  %v6204_v44 = vld [vmem:[%s9732_s2 + $0x48] ss:$16 sps:$4 sm:$0xff]  }
 0x81f   :  { %v9368_v54 = vpack.c.bf16 %v3691_v52, %v3690_v0  ;;  %v6205_v0 = vld [vmem:[%s9732_s2 + $0x24] ss:$16 sps:$4 sm:$0xff]   ;;  %v6206_v52 = vld [vmem:[%s9732_s2 + $0x2c] ss:$16 sps:$4 sm:$0xff]  }
 0x821   :  { %3726 = vmatmul.mubr.bf16.vlgmr.msra.gmra.mxu1 %v9368_v54  ;;  %3769 = vmatmul.mubr.bf16.vlgmr.msra.gmra.mxu0 %v9368_v54 }
 0x822   :  { %3836 = vmatpush1.bf16.msra.mxu1 %v6183_v19  ;;  %3879 = vmatpush1.bf16.msra.mxu0 %v6184_v51  ;;  %v6207_v19 = vld [vmem:[%s9732_s2 + $0x20] ss:$16 sps:$4 sm:$0xff]   ;;  %v6208_v51 = vld [vmem:[%s9732_s2 + $0x28] ss:$16 sps:$4 sm:$0xff]  }
 0x823   :  { %3837 = vmatprep.subr.bf16.mxu1 %v6185_v2  ;;  %3880 = vmatprep.subr.bf16.mxu0 %v6186_v50  ;;  %v6209_v2 = vld [vmem:[%s9732_s2 + $0x4] ss:$16 sps:$4 sm:$0xff]   ;;  %v6210_v50 = vld [vmem:[%s9732_s2 + $0xc] ss:$16 sps:$4 sm:$0xff]  }
 0x824   :  { %3867 = vmatprep.mubr.bf16.mxu1 %v10180_v62  ;;  %3910 = vmatprep.mubr.bf16.mxu0 %v10180_v62 }
 0x826   :  { %3838 = vmatpush1.bf16.msra.mxu1 %v6187_v21  ;;  %3881 = vmatpush1.bf16.msra.mxu0 %v6188_v18  ;;  %v6211_v21 = vld [vmem:[%s9732_s2] ss:$16 sps:$4 sm:$0xff]   ;;  %v6212_v18 = vld [vmem:[%s9732_s2 + $0x8] ss:$16 sps:$4 sm:$0xff]  }
 0x827   :  { %3839 = vmatprep.subr.bf16.mxu1 %v6189_v29  ;;  %3882 = vmatprep.subr.bf16.mxu0 %v6190_v60  ;;  %v6213_v29 = vld [vmem:[%s9733_s4 + $0xe4] ss:$16 sps:$4 sm:$0xff]   ;;  %v6214_v60 = vld [vmem:[%s9733_s4 + $0xec] ss:$16 sps:$4 sm:$0xff]  }
 0x82a   :  { %3840 = vmatpush1.bf16.msra.mxu1 %v6191_v58  ;;  %3883 = vmatpush1.bf16.msra.mxu0 %v6192_v23  ;;  %v6215_v58 = vld [vmem:[%s9733_s4 + $0xe0] ss:$16 sps:$4 sm:$0xff]   ;;  %v6216_v23 = vld [vmem:[%s9733_s4 + $0xe8] ss:$16 sps:$4 sm:$0xff]  }
 0x82b   :  { %3841 = vmatprep.subr.bf16.mxu1 %v6193_v32  ;;  %3884 = vmatprep.subr.bf16.mxu0 %v6194_v34  ;;  %v6217_v32 = vld [vmem:[%s9733_s4 + $0xc4] ss:$16 sps:$4 sm:$0xff]   ;;  %v6218_v34 = vld [vmem:[%s9733_s4 + $0xcc] ss:$16 sps:$4 sm:$0xff]  }
 0x82e   :  { %3842 = vmatpush1.bf16.msra.mxu1 %v6195_v4  ;;  %3885 = vmatpush1.bf16.msra.mxu0 %v6196_v27  ;;  %v6220_v4 = vld [vmem:[%s9733_s4 + $0xc8] ss:$16 sps:$4 sm:$0xff]   ;;  %v6221_v27 = vld [vmem:[%s9733_s4 + $0xa4] ss:$16 sps:$4 sm:$0xff]  }
 0x82f   :  { %3843 = vmatprep.subr.bf16.mxu1 %v6197_v22  ;;  %3886 = vmatprep.subr.bf16.mxu0 %v6198_v59  ;;  %v6222_v22 = vld [vmem:[%s9733_s4 + $0xac] ss:$16 sps:$4 sm:$0xff]   ;;  %v6223_v59 = vld [vmem:[%s9733_s4 + $0xa0] ss:$16 sps:$4 sm:$0xff]  }
 0x832   :  { %3844 = vmatpush1.bf16.msra.mxu1 %v6199_v55  ;;  %3887 = vmatpush1.bf16.msra.mxu0 %v6200_v42  ;;  %v6224_v55 = vld [vmem:[%s9733_s4 + $0xa8] ss:$16 sps:$4 sm:$0xff]  }
 0x833   :  { %3845 = vmatprep.subr.bf16.mxu1 %v6201_v13  ;;  %3888 = vmatprep.subr.bf16.mxu0 %v6202_v12  ;;  %v10628_v12 = vld [vmem:[#allocation20_spill] sm:$0xff] }
 0x836   :  { %3846 = vmatpush1.bf16.msra.mxu1 %v6203_v25  ;;  %3889 = vmatpush1.bf16.msra.mxu0 %v6204_v44 }
 0x837   :  { %3847 = vmatprep.subr.bf16.mxu1 %v6205_v0  ;;  %3890 = vmatprep.subr.bf16.mxu0 %v6206_v52 }
 0x83a   :  { %3848 = vmatpush1.bf16.msra.mxu1 %v6207_v19  ;;  %3891 = vmatpush1.bf16.msra.mxu0 %v6208_v51 }
 0x83b   :  { %3849 = vmatprep.subr.bf16.mxu1 %v6209_v2  ;;  %3892 = vmatprep.subr.bf16.mxu0 %v6210_v50 }
 0x83e   :  { %3850 = vmatpush1.bf16.msra.mxu1 %v6211_v21  ;;  %3893 = vmatpush1.bf16.msra.mxu0 %v6212_v18 }
 0x83f   :  { %3966 = vmatprep.subr.bf16.mxu1 %v6213_v29  ;;  %4009 = vmatprep.subr.bf16.mxu0 %v6214_v60 }
 0x841   :  { %3868 = vmatmul.mubr.bf16.vlgmr.msra.gmra.mxu1 %v9368_v54  ;;  %3911 = vmatmul.mubr.bf16.vlgmr.msra.gmra.mxu0 %v9368_v54  ;;  %v6219_v54 = vld [vmem:[%s9733_s4 + $0xc0] ss:$16 sps:$4 sm:$0xff]  }
 0x842   :  { %3967 = vmatpush1.bf16.msra.mxu1 %v6215_v58  ;;  %4010 = vmatpush1.bf16.msra.mxu0 %v6216_v23 }
 0x843   :  { %3968 = vmatprep.subr.bf16.mxu1 %v6217_v32  ;;  %4011 = vmatprep.subr.bf16.mxu0 %v6218_v34  ;;  %v10629_v32 = vld [vmem:[#allocation124_spill] sm:$0xff] }
 0x846   :  { %3969 = vmatpush1.bf16.msra.mxu1 %v6219_v54  ;;  %4012 = vmatpush1.bf16.msra.mxu0 %v6220_v4 }
 0x847   :  { %3970 = vmatprep.subr.bf16.mxu1 %v6221_v27  ;;  %4013 = vmatprep.subr.bf16.mxu0 %v6222_v22 }
 0x84a   :  { %3971 = vmatpush1.bf16.msra.mxu1 %v6223_v59  ;;  %4014 = vmatpush1.bf16.msra.mxu0 %v6224_v55 }
 0x84b   :  { %3972 = vmatprep.subr.bf16.mxu1 %v10538_v17  ;;  %4015 = vmatprep.subr.bf16.mxu0 %v10539_v1  ;;  %v10609_v17 = vld [vmem:[#allocation83_spill] sm:$0xff]  ;;  %v10610_v1 = vld [vmem:[#allocation80_spill] sm:$0xff] }
 0x84e   :  { %3973 = vmatpush1.bf16.msra.mxu1 %v10540_v8  ;;  %4016 = vmatpush1.bf16.msra.mxu0 %v10541_v39  ;;  %v10611_v8 = vld [vmem:[#allocation82_spill] sm:$0xff]  ;;  %v10612_v39 = vld [vmem:[#allocation109_spill] sm:$0xff] }
 0x84f   :  { %3974 = vmatprep.subr.bf16.mxu1 %v10542_v38  ;;  %4017 = vmatprep.subr.bf16.mxu0 %v10543_v41  ;;  %v10613_v38 = vld [vmem:[#allocation110_spill] sm:$0xff]  ;;  %v10614_v41 = vld [vmem:[#allocation111_spill] sm:$0xff] }
 0x852   :  { %3975 = vmatpush1.bf16.msra.mxu1 %v10544_v16  ;;  %4018 = vmatpush1.bf16.msra.mxu0 %v10545_v6  ;;  %v10615_v16 = vld [vmem:[#allocation112_spill] sm:$0xff]  ;;  %v10616_v6 = vld [vmem:[#allocation113_spill] sm:$0xff] }
 0x853   :  { %3976 = vmatprep.subr.bf16.mxu1 %v10546_v61  ;;  %4019 = vmatprep.subr.bf16.mxu0 %v10547_v5  ;;  %v10617_v61 = vld [vmem:[#allocation114_spill] sm:$0xff]  ;;  %v10618_v5 = vld [vmem:[#allocation115_spill] sm:$0xff] }
 0x856   :  { %3977 = vmatpush1.bf16.msra.mxu1 %v10548_v35  ;;  %4020 = vmatpush1.bf16.msra.mxu0 %v10549_v15  ;;  %v10619_v35 = vld [vmem:[#allocation116_spill] sm:$0xff]  ;;  %v10620_v15 = vld [vmem:[#allocation117_spill] sm:$0xff] }
 0x857   :  { %3978 = vmatprep.subr.bf16.mxu1 %v10550_v28  ;;  %4021 = vmatprep.subr.bf16.mxu0 %v10551_v47  ;;  %v10621_v28 = vld [vmem:[#allocation118_spill] sm:$0xff]  ;;  %v10622_v47 = vld [vmem:[#allocation119_spill] sm:$0xff] }
 0x85a   :  { %3979 = vmatpush1.bf16.msra.mxu1 %v10552_v33  ;;  %4022 = vmatpush1.bf16.msra.mxu0 %v10553_v11  ;;  %v10623_v33 = vld [vmem:[#allocation120_spill] sm:$0xff]  ;;  %v10624_v11 = vld [vmem:[#allocation121_spill] sm:$0xff] }
 0x85b   :  { %3980 = vmatprep.subr.bf16.mxu1 %v10554_v31  ;;  %4023 = vmatprep.subr.bf16.mxu0 %v10555_v26  ;;  %v9557_v31 = vld [vmem:[%s9736_s6 + $0x38] sm:$0xff]  }
 0x85e   :  { %3981 = vmatpush1.bf16.msra.mxu1 %v10556_v48  ;;  %4024 = vmatpush1.bf16.msra.mxu0 %v10557_v46  ;;  %v10625_v46 = vld [vmem:[#allocation13_spill] sm:$0xff] }
 0x85f   :  { %3982 = vmatprep.subr.bf16.mxu1 %v10558_v10  ;;  %4025 = vmatprep.subr.bf16.mxu0 %v10559_v43 }
 0x862   :  { %3983 = vmatpush2.bf16.msra.mxu1 %v10560_v14  ;;  %4026 = vmatpush2.bf16.msra.mxu0 %v10561_v30 }
 0x863   :  { %3984 = vmatprep.subr.bf16.mxu1 %v10562_v57  ;;  %4027 = vmatprep.subr.bf16.mxu0 %v10563_v56  ;;  %v10626_v57 = vld [vmem:[#allocation17_spill] sm:$0xff] }
 0x866   :  { %3985 = vmatpush2.bf16.msra.mxu1 %v10564_v24  ;;  %4028 = vmatpush2.bf16.msra.mxu0 %v10565_v37 }
 0x867   :  { %3986 = vmatprep.subr.bf16.mxu1 %v10566_v45  ;;  %4029 = vmatprep.subr.bf16.mxu0 %v10567_v40 }
 0x86a   :  { %3987 = vmatpush2.bf16.msra.mxu1 %v10568_v20  ;;  %4030 = vmatpush2.bf16.msra.mxu0 %v10569_v3  ;;  %v10627_v20 = vld [vmem:[#allocation18_spill] sm:$0xff] }
 0x86b   :  { %3988 = vmatprep.subr.bf16.mxu1 %v10570_v36  ;;  %4031 = vmatprep.subr.bf16.mxu0 %v10571_v53 }
 0x86e   :  { %3989 = vmatpush2.bf16.msra.mxu1 %v10572_v9  ;;  %4032 = vmatpush2.bf16.msra.mxu0 %v10573_v63 }
 0x86f   :  { %3990 = vmatprep.subr.bf16.mxu1 %v10609_v17  ;;  %4033 = vmatprep.subr.bf16.mxu0 %v10610_v1  ;;  %v10630_v17 = vld [vmem:[#allocation28_spill] sm:$0xff] }
 0x872   :  { %3991 = vmatpush2.bf16.msra.mxu1 %v10611_v8  ;;  %4034 = vmatpush2.bf16.msra.mxu0 %v10612_v39 }
 0x873   :  { %3992 = vmatprep.subr.bf16.mxu1 %v10613_v38  ;;  %4035 = vmatprep.subr.bf16.mxu0 %v10614_v41 }
 0x876   :  { %3993 = vmatpush2.bf16.msra.mxu1 %v10615_v16  ;;  %4036 = vmatpush2.bf16.msra.mxu0 %v10616_v6  ;;  %v10631_v16 = vld [vmem:[#allocation68_spill] sm:$0xff] }
 0x877   :  { %3994 = vmatprep.subr.bf16.mxu1 %v10617_v61  ;;  %4037 = vmatprep.subr.bf16.mxu0 %v10618_v5 }
 0x87a   :  { %3995 = vmatpush2.bf16.msra.mxu1 %v10619_v35  ;;  %4038 = vmatpush2.bf16.msra.mxu0 %v10620_v15  ;;  %v10632_v15 = vld [vmem:[#allocation69_spill] sm:$0xff] }
 0x87b   :  { %3996 = vmatprep.subr.bf16.mxu1 %v10621_v28  ;;  %4039 = vmatprep.subr.bf16.mxu0 %v10622_v47 }
 0x87e   :  { %3997 = vmatpush2.bf16.msra.mxu1 %v10623_v33  ;;  %4040 = vmatpush2.bf16.msra.mxu0 %v10624_v11  ;;  %v10633_v33 = vld [vmem:[#allocation97_spill] sm:$0xff] }
 0x87f   :  { %5185 = vmatprep.subr.bf16.mxu1 %v9557_v31 }
 0x8e1   :  { %v3727_v26 = vpop.f32.mrf.mxu1  ;;  %v3770_v48 = vpop.f32.mrf.mxu0 }
 0x8e2   :  { %v3728_v10 = vadd.f32 %v3727_v26, %v10625_v46  ;;  %v3771_v25 = vadd.f32 %v3770_v48, %v10628_v12 }
 0x8e3   :  { %v3729_v43 = vpop.f32.mrf.mxu1  ;;  %v3772_v14 = vpop.f32.mrf.mxu0 }
 0x8e4   :  { %v3779_v30 = vmul.f32 0.5, %v3728_v10  ;;  %v3730_v56 = vadd.f32 %v3729_v43, %v10626_v57  ;;  %v3773_v3 = vadd.f32 %v3772_v14, %v10627_v20  ;;  %v3781_v19 = vmul.f32 0.5, %v3771_v25  ;;  %v10634_v14 = vld [vmem:[#allocation71_spill] sm:$0xff] }
 0x8e5   :  { %v3731_v24 = vpop.f32.mrf.mxu1  ;;  %v3774_v37 = vpop.f32.mrf.mxu0 }
 0x8e6   :  { %5883 = vtanh.f32 %v3779_v30  ;;  %v3780_v45 = vmul.f32 0.5, %v3730_v56  ;;  %v3732_v40 = vadd.f32 %v3731_v24, %v10625_v46  ;;  %v3775_v44 = vadd.f32 %v3774_v37, %v10628_v12  ;;  %v10635_v56 = vld [vmem:[#allocation70_spill] sm:$0xff]  ;;  %v10636_v24 = vld [vmem:[#allocation44_spill] sm:$0xff] }
 0x8e7   :  { %v3733_v36 = vpop.f32.mrf.mxu1  ;;  %v3776_v63 = vpop.f32.mrf.mxu0  ;;  %v1027_v37 = vadd.f32 %v10636_v24, %v10635_v56  ;;  %v5597_v24 = vld [vmem:[%s9736_s6 + $0x30] sm:$0xff]  }
 0x8e8   :  { %5885 = vtanh.f32 %v3780_v45  ;;  %v3782_v53 = vmul.f32 0.5, %v3732_v40  ;;  %v3734_v9 = vadd.f32 %v3733_v36, %v10626_v57  ;;  %v3777_v13 = vadd.f32 %v3776_v63, %v10627_v20 }
 0x8e9   :  { %v3784_v2 = vmul.f32 0.5, %v3775_v44 }
 0x8ea   :  { %5887 = vtanh.f32 %v3782_v53  ;;  %v3783_v42 = vmul.f32 0.5, %v3734_v9 }
 0x8eb   :  { %5889 = vtanh.f32 %v3773_v3 }
 0x8ec   :  { %5891 = vtanh.f32 %v3783_v42  ;;  %v10637_v42 = vld [vmem:[#allocation99_spill] sm:$0xff] }
 0x8ed   :  { %5893 = vtanh.f32 %v3777_v13 }
 0x8ee   :  { %5895 = vtanh.f32 %v3781_v19 }
 0x8ef   :  { %5897 = vtanh.f32 %v3784_v2 }
 0x8f3   :  { %v5884_v0 = vpop.eup %5883 }
 0x8f4   :  { %v3791_v52 = vadd.f32 1.0, %v5884_v0 }
 0x8f5   :  { %v5886_v51 = vpop.eup %5885 }
 0x8f6   :  { %v3797_v50 = vmul.f32 0.5, %v3791_v52  ;;  %v3792_v21 = vadd.f32 1.0, %v5886_v51  ;;  %v10638_v52 = vld [vmem:[#allocation96_spill] sm:$0xff] }
 0x8f7   :  { %v5888_v18 = vpop.eup %5887 }
 0x8f8   :  { %v5890_v29 = vpop.eup %5889  ;;  %v3798_v60 = vmul.f32 0.5, %v3792_v21  ;;  %v3794_v58 = vadd.f32 1.0, %v5888_v18  ;;  %v10639_v18 = vld [vmem:[#allocation98_spill] sm:$0xff] }
 0x8f9   :  { %v5892_v23 = vpop.eup %5891  ;;  %v3807_v54 = vmul.f32 %v5890_v29, %v3797_v50 }
 0x8fa   :  { %v3805_v34 = vmul.f32 %v3798_v60, %v10629_v32  ;;  %v3800_v4 = vmul.f32 0.5, %v3794_v58  ;;  %v3795_v27 = vadd.f32 1.0, %v5892_v23  ;;  %v5894_v55 = vpop.eup %5893 }
 0x8fb   :  { %v5896_v47 = vpop.eup %5895 }
 0x8fc   :  { %v9569_v22 = vadd.f32 %v3807_v54, %v3805_v34  ;;  %v3801_v59 = vmul.f32 0.5, %v3795_v27  ;;  %v3808_v8 = vmul.f32 %v5894_v55, %v3800_v4  ;;  %v5898_v10 = vpop.eup %5897  ;;  %v3793_v53 = vadd.f32 1.0, %v5896_v47 }
 0x8fd   :  { %v3796_v9 = vadd.f32 1.0, %v5898_v10 }
 0x8fe   :  { %v3806_v1 = vmul.f32 %v3801_v59, %v10630_v17  ;;  %5899 = vtanh.f32 %v9569_v22  ;;  %v3799_v44 = vmul.f32 0.5, %v3793_v53  ;;  %v5604_v53 = vld [vmem:[#allocation3 + $0x8] sm:$0xff]  }
 0x8ff   :  { %v3802_v0 = vmul.f32 0.5, %v3796_v9  ;;  %v5605_v9 = vld [vmem:[#allocation3 + $0x10] sm:$0xff]  }
 0x900   :  { %v9573_v39 = vadd.f32 %v3808_v8, %v3806_v1 }
 0x901   :  { %v3869_v38 = vpop.f32.mrf.mxu1  ;;  %v3912_v41 = vpop.f32.mrf.mxu0 }
 0x902   :  { %5901 = vtanh.f32 %v9573_v39  ;;  %v3921_v6 = vadd.f32 %v3869_v38, %v10631_v16  ;;  %v3923_v19 = vadd.f32 %v3912_v41, %v10638_v52 }
 0x903   :  { %v3871_v61 = vpop.f32.mrf.mxu1  ;;  %v3914_v5 = vpop.f32.mrf.mxu0 }
 0x904   :  { %v3929_v35 = vmul.f32 0.5, %v3921_v6  ;;  %v3922_v28 = vadd.f32 %v3871_v61, %v10632_v15  ;;  %v3924_v11 = vadd.f32 %v3914_v5, %v10633_v33  ;;  %v3931_v21 = vmul.f32 0.5, %v3923_v19 }
 0x905   :  { %v3873_v26 = vpop.f32.mrf.mxu1  ;;  %v3916_v48 = vpop.f32.mrf.mxu0 }
 0x906   :  { %5903 = vtanh.f32 %v3929_v35  ;;  %v3930_v43 = vmul.f32 0.5, %v3922_v28  ;;  %v3925_v30 = vadd.f32 %v3873_v26, %v10634_v14  ;;  %v3927_v29 = vadd.f32 %v3916_v48, %v10639_v18 }
 0x907   :  { %v3875_v45 = vpop.f32.mrf.mxu1  ;;  %v3918_v40 = vpop.f32.mrf.mxu0 }
 0x908   :  { %5905 = vtanh.f32 %v3930_v43  ;;  %v3932_v3 = vmul.f32 0.5, %v3925_v30  ;;  %v3926_v36 = vadd.f32 %v3875_v45, %v1027_v37  ;;  %v3928_v13 = vadd.f32 %v3918_v40, %v10637_v42  ;;  %v5596_v37 = vld [vmem:[#allocation3] sm:$0xff]   ;;  %v5600_v40 = vld [vmem:[%s9736_s6 + $0x18] sm:$0xff]  }
 0x909   :  { %5907 = vtanh.f32 %v3924_v11  ;;  %v3934_v27 = vmul.f32 0.5, %v3927_v29  ;;  %v5599_v45 = vld [vmem:[%s9736_s6 + $0x20] sm:$0xff]  }
 0x90a   :  { %5909 = vtanh.f32 %v3932_v3  ;;  %v3933_v63 = vmul.f32 0.5, %v3926_v36  ;;  %v5602_v3 = vld [vmem:[%s9736_s6 + $0x8] sm:$0xff]   ;;  %v5603_v36 = vld [vmem:[%s9736_s6] sm:$0xff]  }
 0x90b   :  { %v5900_v25 = vpop.eup %5899  ;;  %v5607_v42 = vld [vmem:[#allocation3 + $0x20] sm:$0xff]  }
 0x90c   :  { %5911 = vtanh.f32 %v3933_v63  ;;  %v3813_v2 = vmul.f32 %v5900_v25, %v3799_v44  ;;  %v5606_v63 = vld [vmem:[#allocation3 + $0x18] sm:$0xff]  }
 0x90d   :  { %5913 = vtanh.f32 %v3928_v13  ;;  %v5608_v13 = vld [vmem:[#allocation3 + $0x28] sm:$0xff]  }
 0x90e   :  { %5915 = vtanh.f32 %v3931_v21 }
 0x90f   :  { %v5902_v51 = vpop.eup %5901  ;;  %5917 = vtanh.f32 %v3934_v27 }
 0x910   :  { %v3814_v50 = vmul.f32 %v5902_v51, %v3802_v0 }
 0x912   :  { %v9585_v60 = vpack.c.bf16 %v3814_v50, %v3813_v2 }
 0x913   :  { %v5904_v58 = vpop.eup %5903 }
 0x914   :  { %v3941_v23 = vadd.f32 1.0, %v5904_v58  ;;  %5117 = vst [vmem:[#allocation3 + $0x30] sm:$0xff] %v9585_v60   ;;  %3998 = vmatprep.mubr.bf16.mxu1 %v9585_v60  ;;  %4041 = vmatprep.mubr.bf16.mxu0 %v9585_v60 }
 0x915   :  { %v5906_v32 = vpop.eup %5905 }
 0x916   :  { %v5908_v34 = vpop.eup %5907  ;;  %v3947_v54 = vmul.f32 0.5, %v3941_v23  ;;  %v3942_v4 = vadd.f32 1.0, %v5906_v32 }
 0x917   :  { %v5910_v59 = vpop.eup %5909 }
 0x918   :  { %v3948_v55 = vmul.f32 0.5, %v3942_v4  ;;  %v3957_v17 = vmul.f32 %v5908_v34, %v3947_v54  ;;  %v3944_v1 = vadd.f32 1.0, %v5910_v59 }
 0x919   :  { %v5912_v8 = vpop.eup %5911 }
 0x91a   :  { %v3955_v38 = vmul.f32 %v3948_v55, %v9361_v49  ;;  %v3950_v41 = vmul.f32 0.5, %v3944_v1  ;;  %v3945_v16 = vadd.f32 1.0, %v5912_v8  ;;  %v5914_v6 = vpop.eup %5913 }
 0x91b   :  { %v5916_v47 = vpop.eup %5915  ;;  %v5609_v25 = vld [vmem:[#allocation3 + $0x30] sm:$0xff]  }
 0x91c   :  { %v3959_v61 = vadd.f32 %v3957_v17, %v3955_v38  ;;  %v3951_v5 = vmul.f32 0.5, %v3945_v16  ;;  %v3958_v35 = vmul.f32 %v5914_v6, %v3950_v41  ;;  %v3943_v33 = vadd.f32 1.0, %v5916_v47  ;;  %v5918_v11 = vpop.eup %5917 }
 0x91d   :  { %v3946_v48 = vadd.f32 1.0, %v5918_v11 }
 0x91e   :  { %5919 = vtanh.f32 %v3959_v61  ;;  %v3956_v15 = vmul.f32 %v3951_v5, %v9365_v7  ;;  %v3949_v26 = vmul.f32 0.5, %v3943_v33  ;;  %v5598_v7 = vld [vmem:[%s9736_s6 + $0x28] sm:$0xff]  }
 0x91f   :  { %v3952_v49 = vmul.f32 0.5, %v3946_v48 }
 0x920   :  { %v3960_v28 = vadd.f32 %v3958_v35, %v3956_v15 }
 0x922   :  { %5921 = vtanh.f32 %v3960_v28 }
 0x92b   :  { %v5920_v10 = vpop.eup %5919 }
 0x92c   :  { %v3963_v43 = vmul.f32 %v5920_v10, %v3949_v26 }
 0x92f   :  { %v5922_v14 = vpop.eup %5921 }
 0x930   :  { %v3964_v30 = vmul.f32 %v5922_v14, %v3952_v49 }
 0x932   :  { %v3965_v56 = vpack.c.bf16 %v3964_v30, %v3963_v43  ;;  %v9627_v43 = vld [vmem:[%s9737_s7] ss:$0 sm:$0xff] }
 0x934   :  { %3999 = vmatmul.mubr.bf16.vlgmr.msra.gmra.mxu1 %v3965_v56  ;;  %4042 = vmatmul.mubr.bf16.vlgmr.msra.gmra.mxu0 %v3965_v56 }
 0x935   :  { %5186 = vmatpush3.bf16.msra.mxu1 %v9557_v31  ;;  %5201 = vmatprep.mubr.bf16.mxu1 %v5596_v37  ;;  %v5601_v31 = vld [vmem:[%s9736_s6 + $0x10] sm:$0xff]  }
 0x936   :  { %5187 = vmatprep.subr.bf16.mxu1 %v5597_v24 }
 0x939   :  { %5188 = vmatpush3.bf16.msra.mxu1 %v5597_v24 }
 0x93a   :  { %5189 = vmatprep.subr.bf16.mxu1 %v5598_v7 }
 0x93d   :  { %5190 = vmatpush3.bf16.msra.mxu1 %v5598_v7 }
 0x93e   :  { %5191 = vmatprep.subr.bf16.mxu1 %v5599_v45 }
 0x941   :  { %5192 = vmatpush3.bf16.msra.mxu1 %v5599_v45 }
 0x942   :  { %5193 = vmatprep.subr.bf16.mxu1 %v5600_v40 }
 0x945   :  { %5194 = vmatpush3.bf16.msra.mxu1 %v5600_v40 }
 0x946   :  { %5195 = vmatprep.subr.bf16.mxu1 %v5601_v31 }
 0x949   :  { %5196 = vmatpush3.bf16.msra.mxu1 %v5601_v31 }
 0x94a   :  { %5197 = vmatprep.subr.bf16.mxu1 %v5602_v3 }
 0x94d   :  { %5198 = vmatpush3.bf16.msra.mxu1 %v5602_v3 }
 0x94e   :  { %5199 = vmatprep.subr.bf16.mxu1 %v5603_v36 }
 0x951   :  { %5200 = vmatpush3.bf16.msra.mxu1 %v5603_v36 }
 0x954   :  { %5202 = vmatmul.mubr.bf16.vlgmr.msra.gmra.mxu1 %v5604_v53 }
 0x955   :  { %5205 = vmatprep.mubr.bf16.mxu1 %v5605_v9 }
 0x95c   :  { %5206 = vmatmul.mubr.bf16.gmra.mxu1 %v5606_v63 }
 0x95d   :  { %5209 = vmatprep.mubr.bf16.mxu1 %v5607_v42 }
 0x964   :  { %5210 = vmatmul.mubr.bf16.gmra.mxu1 %v5608_v13 }
 0x965   :  { %5213 = vmatprep.mubr.bf16.mxu1 %v5609_v25 }
 0x9f4   :  { %v4000_v44 = vpop.f32.mrf.mxu1  ;;  %v4043_v0 = vpop.f32.mrf.mxu0 }
 0x9f5   :  { %v4001_v52 = vadd.f32 %v4000_v44, %v10625_v46  ;;  %v4044_v55 = vadd.f32 %v4043_v0, %v10628_v12 }
 0x9f6   :  { %v4002_v19 = vpop.f32.mrf.mxu1  ;;  %v4045_v51 = vpop.f32.mrf.mxu0 }
 0x9f7   :  { %v4052_v2 = vmul.f32 0.5, %v4001_v52  ;;  %v4003_v50 = vadd.f32 %v4002_v19, %v10626_v57  ;;  %v4046_v23 = vadd.f32 %v4045_v51, %v10627_v20  ;;  %v4054_v8 = vmul.f32 0.5, %v4044_v55  ;;  %v9639_v51 = vld [vmem:[%s9738_s8] ss:$0 sm:$0xff] }
 0x9f8   :  { %v4004_v21 = vpop.f32.mrf.mxu1  ;;  %v4047_v18 = vpop.f32.mrf.mxu0 }
 0x9f9   :  { %5923 = vtanh.f32 %v4052_v2  ;;  %v4053_v29 = vmul.f32 0.5, %v4003_v50  ;;  %v4005_v58 = vadd.f32 %v4004_v21, %v10625_v46  ;;  %v4048_v17 = vadd.f32 %v4047_v18, %v10628_v12 }
 0x9fa   :  { %v4006_v32 = vpop.f32.mrf.mxu1  ;;  %v4049_v4 = vpop.f32.mrf.mxu0 }
 0x9fb   :  { %5925 = vtanh.f32 %v4053_v29  ;;  %v4055_v34 = vmul.f32 0.5, %v4005_v58  ;;  %v4007_v54 = vadd.f32 %v4006_v32, %v10626_v57  ;;  %v4050_v59 = vadd.f32 %v4049_v4, %v10627_v20 }
 0x9fc   :  { %v4057_v41 = vmul.f32 0.5, %v4048_v17 }
 0x9fd   :  { %5927 = vtanh.f32 %v4055_v34  ;;  %v4056_v27 = vmul.f32 0.5, %v4007_v54 }
 0x9fe   :  { %5929 = vtanh.f32 %v4046_v23 }
 0x9ff   :  { %5931 = vtanh.f32 %v4056_v27 }
 0xa00   :  { %5933 = vtanh.f32 %v4050_v59 }
 0xa01   :  { %5935 = vtanh.f32 %v4054_v8 }
 0xa02   :  { %5937 = vtanh.f32 %v4057_v41 }
 0xa06   :  { %v5924_v46 = vpop.eup %5923 }
 0xa07   :  { %v4064_v1 = vadd.f32 1.0, %v5924_v46 }
 0xa08   :  { %v5926_v38 = vpop.eup %5925 }
 0xa09   :  { %v4070_v16 = vmul.f32 0.5, %v4064_v1  ;;  %v4065_v6 = vadd.f32 1.0, %v5926_v38 }
 0xa0a   :  { %v5928_v57 = vpop.eup %5927 }
 0xa0b   :  { %v5930_v61 = vpop.eup %5929  ;;  %v4071_v5 = vmul.f32 0.5, %v4065_v6  ;;  %v4067_v35 = vadd.f32 1.0, %v5928_v57 }
 0xa0c   :  { %v5932_v15 = vpop.eup %5931  ;;  %v4080_v28 = vmul.f32 %v5930_v61, %v4070_v16 }
 0xa0d   :  { %v4078_v20 = vmul.f32 %v4071_v5, %v9569_v22  ;;  %v4073_v47 = vmul.f32 0.5, %v4067_v35  ;;  %v4068_v33 = vadd.f32 1.0, %v5932_v15  ;;  %v5934_v26 = vpop.eup %5933 }
 0xa0e   :  { %v5936_v24 = vpop.eup %5935 }
 0xa0f   :  { %v4082_v12 = vadd.f32 %v4080_v28, %v4078_v20  ;;  %v4074_v11 = vmul.f32 0.5, %v4068_v33  ;;  %v4081_v10 = vmul.f32 %v5934_v26, %v4073_v47  ;;  %v5938_v7 = vpop.eup %5937  ;;  %v4066_v3 = vadd.f32 1.0, %v5936_v24 }
 0xa10   :  { %v4069_v36 = vadd.f32 1.0, %v5938_v7 }
 0xa11   :  { %v4079_v48 = vmul.f32 %v4074_v11, %v9573_v39  ;;  %5939 = vtanh.f32 %v4082_v12  ;;  %v4072_v25 = vmul.f32 0.5, %v4066_v3 }
 0xa12   :  { %v4075_v44 = vmul.f32 0.5, %v4069_v36 }
 0xa13   :  { %v4083_v49 = vadd.f32 %v4081_v10, %v4079_v48 }
 0xa14   :  { %v5203_v14 = vpop.f32.mrf.mxu1 }
 0xa15   :  { %5941 = vtanh.f32 %v4083_v49  ;;  %v4277_v22 = vadd.f32 %v5203_v14, %v9627_v43 }
 0xa16   :  { %v4268_v30 = vpop.f32.mrf.mxu1 }
 0xa17   :  { %5943 = vtanh.f32 %v4277_v22  ;;  %v4269_v56 = vadd.f32 %v9627_v43, %v4268_v30 }
 0xa18   :  { %v5204_v37 = vpop.f32.mrf.mxu1 }
 0xa19   :  { %5945 = vtanh.f32 %v4269_v56  ;;  %v4280_v39 = vadd.f32 %v5204_v37, %v9627_v43 }
 0xa1a   :  { %v4271_v45 = vpop.f32.mrf.mxu1 }
 0xa1b   :  { %5947 = vtanh.f32 %v4280_v39  ;;  %v4272_v40 = vadd.f32 %v9627_v43, %v4271_v45 }
 0xa1c   :  { %v5207_v31 = vpop.f32.mrf.mxu1 }
 0xa1d   :  { %5949 = vtanh.f32 %v4272_v40  ;;  %v4293_v53 = vadd.f32 %v5207_v31, %v9627_v43 }
 0xa1e   :  { %v4284_v9 = vpop.f32.mrf.mxu1  ;;  %v5940_v42 = vpop.eup %5939 }
 0xa1f   :  { %5951 = vtanh.f32 %v4293_v53  ;;  %v4285_v63 = vadd.f32 %v9627_v43, %v4284_v9  ;;  %v4086_v2 = vmul.f32 %v5940_v42, %v4072_v25 }
 0xa20   :  { %v5208_v13 = vpop.f32.mrf.mxu1 }
 0xa21   :  { %v4296_v0 = vadd.f32 %v5208_v13, %v9627_v43  ;;  %5953 = vtanh.f32 %v4285_v63 }
 0xa22   :  { %v5942_v52 = vpop.eup %5941  ;;  %v4287_v19 = vpop.f32.mrf.mxu1 }
 0xa23   :  { %v4087_v50 = vmul.f32 %v5942_v52, %v4075_v44  ;;  %5955 = vtanh.f32 %v4296_v0  ;;  %v4288_v21 = vadd.f32 %v9627_v43, %v4287_v19 }
 0xa24   :  { %v5944_v18 = vpop.eup %5943  ;;  %v5211_v29 = vpop.f32.mrf.mxu1 }
 0xa25   :  { %v9642_v58 = vpack.c.bf16 %v4087_v50, %v4086_v2  ;;  %5957 = vtanh.f32 %v4288_v21  ;;  %v4309_v23 = vadd.f32 %v5211_v29, %v9627_v43  ;;  %v4360_v32 = vmul.f32 %v5944_v18, %v9639_v51 }
 0xa26   :  { %v5946_v34 = vpop.eup %5945  ;;  %v4300_v54 = vpop.f32.mrf.mxu1 }
 0xa27   :  { %5122 = vst [vmem:[#allocation3 + $0x38] sm:$0xff] %v9642_v58   ;;  %5959 = vtanh.f32 %v4309_v23  ;;  %v4301_v4 = vadd.f32 %v9627_v43, %v4300_v54  ;;  %4362 = vadd.xlane.f32.xlu1 %v4360_v32  ;;  %v4354_v27 = vmul.f32 %v5946_v34, %v9639_v51 }
 0xa28   :  { %v5948_v59 = vpop.eup %5947  ;;  %v5212_v55 = vpop.f32.mrf.mxu1 }
 0xa29   :  { %v4312_v17 = vadd.f32 %v5212_v55, %v9627_v43  ;;  %4356 = vadd.xlane.f32.xlu0 %v4354_v27  ;;  %v4361_v46 = vmul.f32 %v5948_v59, %v9639_v51  ;;  %5961 = vtanh.f32 %v4301_v4 }
 0xa2a   :  { %v5950_v1 = vpop.eup %5949  ;;  %v4303_v8 = vpop.f32.mrf.mxu1 }
 0xa2b   :  { %5963 = vtanh.f32 %v4312_v17  ;;  %v4304_v38 = vadd.f32 %v9627_v43, %v4303_v8  ;;  %4364 = vadd.xlane.f32.xlu1 %v4361_v46  ;;  %v4355_v41 = vmul.f32 %v5950_v1, %v9639_v51 }
 0xa2c   :  { %v5952_v16 = vpop.eup %5951 }
 0xa2d   :  { %5965 = vtanh.f32 %v4304_v38  ;;  %4358 = vadd.xlane.f32.xlu0 %v4355_v41  ;;  %v4372_v61 = vmul.f32 %v5952_v16, %v9639_v51 }
 0xa2e   :  { %v5610_v6 = vld [vmem:[#allocation3 + $0x38] sm:$0xff]   ;;  %v5954_v57 = vpop.eup %5953 }
 0xa2f   :  { %5214 = vmatmul.mubr.bf16.gmra.mxu1 %v5610_v6  ;;  %v4366_v20 = vmul.f32 %v5954_v57, %v9639_v51 }
 0xa30   :  { %v5956_v5 = vpop.eup %5955 }
 0xa31   :  { %4374 = vadd.xlane.f32.xlu0 %v4372_v61  ;;  %v4373_v35 = vmul.f32 %v5956_v5, %v9639_v51 }
 0xa32   :  { %v5958_v15 = vpop.eup %5957 }
 0xa33   :  { %4376 = vadd.xlane.f32.xlu1 %v4373_v35  ;;  %v4367_v47 = vmul.f32 %v5958_v15, %v9639_v51 }
 0xa34   :  { %v5960_v28 = vpop.eup %5959 }
 0xa35   :  { %4368 = vadd.xlane.f32.xlu0 %v4366_v20  ;;  %v4384_v12 = vmul.f32 %v5960_v28, %v9639_v51 }
 0xa36   :  { %v5962_v33 = vpop.eup %5961 }
 0xa37   :  { %4370 = vadd.xlane.f32.xlu1 %v4367_v47  ;;  %v4378_v10 = vmul.f32 %v5962_v33, %v9639_v51 }
 0xa38   :  { %v5964_v11 = vpop.eup %5963 }
 0xa39   :  { %4386 = vadd.xlane.f32.xlu0 %v4384_v12  ;;  %v4385_v26 = vmul.f32 %v5964_v11, %v9639_v51 }
 0xa3a   :  { %v5966_v48 = vpop.eup %5965 }
 0xa3b   :  { %4388 = vadd.xlane.f32.xlu1 %v4385_v26  ;;  %v4379_v49 = vmul.f32 %v5966_v48, %v9639_v51 }
 0xa3d   :  { %4380 = vadd.xlane.f32.xlu0 %v4378_v10 }
 0xa3f   :  { %4382 = vadd.xlane.f32.xlu1 %v4379_v49 }
 0xab2   :  { %v4357_v42 = vpop.xlane.xlu0 %4356 }
 0xab6   :  { %v4359_v13 = vpop.xlane.xlu0 %4358 }
 0xaba   :  { %v4375_v44 = vpop.xlane.xlu0 %4374 }
 0xabe   :  { %v4369_v52 = vpop.xlane.xlu0 %4368 }
 0xac2   :  { %v4387_v2 = vpop.xlane.xlu0 %4386 }
 0xac6   :  { %v4381_v29 = vpop.xlane.xlu0 %4380 }
 0xaef   :  { %v5215_v14 = vpop.f32.mrf.mxu1 }
 0xaf0   :  { %v4325_v30 = vadd.f32 %v5215_v14, %v9627_v43 }
 0xaf1   :  { %v4316_v22 = vpop.f32.mrf.mxu1 }
 0xaf2   :  { %v4317_v56 = vadd.f32 %v9627_v43, %v4316_v22 }
 0xaf3   :  { %v5216_v24 = vpop.f32.mrf.mxu1 }
 0xaf4   :  { %5967 = vtanh.f32 %v4317_v56  ;;  %v4328_v7 = vadd.f32 %v5216_v24, %v9627_v43 }
 0xaf5   :  { %v4319_v37 = vpop.f32.mrf.mxu1  ;;  %5969 = vtanh.f32 %v4325_v30 }
 0xaf6   :  { %v4320_v39 = vadd.f32 %v9627_v43, %v4319_v37  ;;  %v4363_v43 = vpop.xlane.xlu1 %4362 }
 0xaf7   :  { %v4403_v21 = vsel %vm4402_vm0, %v4357_v42, %v4363_v43 }
 0xaf8   :  { %5971 = vtanh.f32 %v4320_v39  ;;  %v4406_v18 = vsel %vm4405_vm1, %v4403_v21, %v4369_v52  ;;  %v6231_v21 = vmov 7  }
 0xaf9   :  { %5973 = vtanh.f32 %v4328_v7 }
 0xafa   :  { %v4365_v25 = vpop.xlane.xlu1 %4364 }
 0xafb   :  { %v4404_v23 = vsel %vm4402_vm0, %v4359_v13, %v4365_v25 }
 0xafe   :  { %v4377_v0 = vpop.xlane.xlu1 %4376 }
 0xb01   :  { %v5968_v45 = vpop.eup %5967 }
 0xb02   :  { %v4390_v40 = vmul.f32 %v5968_v45, %v9639_v51  ;;  %v5970_v31 = vpop.eup %5969  ;;  %v4371_v19 = vpop.xlane.xlu1 %4370 }
 0xb03   :  { %v4396_v53 = vmul.f32 %v5970_v31, %v9639_v51  ;;  %v4407_v32 = vsel %vm4405_vm1, %v4404_v23, %v4371_v19  ;;  %v5611_v23 = vld [vmem:[%s9739_s9 + $0x38] sm:$0xff]  }
 0xb04   :  { %4392 = vadd.xlane.f32.xlu0 %v4390_v40  ;;  %v4410_v27 = vsel %vm4408_vm2, %v4407_v32, %v4377_v0  ;;  %v6228_v0 = vmov 6   ;;  %v5613_v32 = vld [vmem:[%s9739_s9 + $0x28] sm:$0xff]  }
 0xb05   :  { %v5972_v3 = vpop.eup %5971 }
 0xb06   :  { %v4391_v36 = vmul.f32 %v5972_v3, %v9639_v51  ;;  %v5974_v9 = vpop.eup %5973  ;;  %v4389_v50 = vpop.xlane.xlu1 %4388 }
 0xb07   :  { %v4397_v63 = vmul.f32 %v5974_v9, %v9639_v51  ;;  %v4409_v51 = vsel %vm4408_vm2, %v4406_v18, %v4375_v44  ;;  %v6227_v44 = vmov 2   ;;  %v6232_v18 = vmov 5  }
 0xb08   :  { %4394 = vadd.xlane.f32.xlu1 %v4391_v36  ;;  %4398 = vadd.xlane.f32.xlu0 %v4396_v53  ;;  %v4412_v34 = vsel %vm4411_vm3, %v4409_v51, %v4381_v29  ;;  %v6233_v29 = vmov 0.0   ;;  %v5612_v51 = vld [vmem:[%s9739_s9 + $0x30] sm:$0xff]  }
 0xb09   :  { %v4415_v59 = vsel %vm4414_vm4, %v4412_v34, %v4387_v2  ;;  %v6229_v2 = vmov 3   ;;  %5217 = vmatprep.subr.bf16.mxu0 %v6233_v29  ;;  %5237 = vmatprep.subr.bf16.mxu1 %v6233_v29  ;;  %v5615_v34 = vld [vmem:[%s9739_s9 + $0x18] sm:$0xff]  }
 0xb0a   :  { %v4383_v54 = vpop.xlane.xlu1 %4382  ;;  %5218 = vmatpush3.bf16.msra.mxu0 %v5611_v23  ;;  %5233 = vmatprep.mubr.msk.bf16.mxu0 %vm6234_vm8, %v6233_v29 }
 0xb0b   :  { %v4413_v55 = vsel %vm4411_vm3, %v4410_v27, %v4383_v54  ;;  %5219 = vmatprep.subr.bf16.mxu0 %v6233_v29  ;;  %v5616_v54 = vld [vmem:[%s9739_s9 + $0x10] sm:$0xff]   ;;  %v5618_v27 = vld [vmem:[%s9739_s9] sm:$0xff]   ;;  %5245 = vmatprep.mubr.msk.bf16.mxu1 %vm6234_vm8, %v6233_v29 }
 0xb0c   :  { %4400 = vadd.xlane.f32.xlu1 %v4397_v63  ;;  %v4416_v41 = vsel %vm4414_vm4, %v4413_v55, %v4389_v50  ;;  %v6226_v63 = vmov 1   ;;  %v6230_v50 = vmov 4   ;;  %v5620_v55 = vld [vmem:[%s9740_s11 + $0x10] sm:$0xff]  }
 0xb0d   :  { %5260 = vset.pattern.permute.xlu1 %v6226_v63 }
 0xb0e   :  { %5220 = vmatpush3.bf16.msra.mxu0 %v5612_v51 }
 0xb0f   :  { %5221 = vmatprep.subr.bf16.mxu0 %v6233_v29 }
 0xb12   :  { %5222 = vmatpush3.bf16.msra.mxu0 %v5613_v32 }
 0xb13   :  { %5223 = vmatprep.subr.bf16.mxu0 %v6233_v29 }
 0xb8d   :  { %v4393_v4 = vpop.xlane.xlu0 %4392 }
 0xb8e   :  { %v4418_v17 = vsel %vm4417_vm5, %v4415_v59, %v4393_v4  ;;  %v5617_v4 = vld [vmem:[%s9739_s9 + $0x8] sm:$0xff]   ;;  %v5619_v59 = vld [vmem:[%s9740_s11 + $0x18] sm:$0xff]  }
 0xb8f   :  { %5238 = vmatpush3.bf16.msra.mxu1 %v5619_v59 }
 0xb90   :  { %5239 = vmatprep.subr.bf16.mxu1 %v6233_v29 }
 0xb91   :  { %v4395_v46 = vpop.xlane.xlu1 %4394  ;;  %v4399_v1 = vpop.xlane.xlu0 %4398 }
 0xb92   :  { %v4421_v8 = vsel %vm4420_vm6, %v4418_v17, %v4399_v1  ;;  %v4419_v16 = vsel %vm4417_vm5, %v4416_v41, %v4395_v46  ;;  %v5621_v17 = vld [vmem:[%s9740_s11 + $0x8] sm:$0xff]  }
 0xb93   :  { %v4424_v38 = vsel %vm4423_vm7, %v4421_v8, -inf  ;;  %5240 = vmatpush3.bf16.msra.mxu1 %v5620_v55 }
 0xb94   :  { %4425 = vmax.xlane.f32.xlu0 %v4424_v38  ;;  %5241 = vmatprep.subr.bf16.mxu1 %v6233_v29 }
 0xb95   :  { %v4401_v6 = vpop.xlane.xlu1 %4400 }
 0xb96   :  { %v4422_v57 = vsel %vm4420_vm6, %v4419_v16, %v4401_v6  ;;  %v5128_v6 = vld [vmem:[#allocation3 + $0x8] sm:$0xff]  }
 0xb97   :  { %v4427_v61 = vsel %vm4423_vm7, %v4422_v57, -inf  ;;  %5242 = vmatpush3.bf16.msra.mxu1 %v5621_v17 }
 0xb98   :  { %4428 = vmax.xlane.f32.xlu1 %v4427_v61  ;;  %5243 = vmatprep.subr.bf16.mxu1 %v6233_v29 }
 0xc1d   :  { %v4426_v5 = vpop.xlane.xlu0 %4425 }
 0xc1e   :  { %v4430_v35 = vsub.f32 %v4421_v8, %v4426_v5  ;;  %v5124_v5 = vld [vmem:[#allocation3] sm:$0xff]  }
 0xc20   :  { %v4432_v15 = vmul.f32 1.442695, %v4430_v35  ;;  %v5132_v35 = vld [vmem:[#allocation3 + $0x10] sm:$0xff]  }
 0xc21   :  { %v4429_v20 = vpop.xlane.xlu1 %4428 }
 0xc22   :  { %5975 = vpow2.f32 %v4432_v15  ;;  %v4431_v28 = vsub.f32 %v4422_v57, %v4429_v20  ;;  %v5130_v15 = vunpack.c.h.bf16 %v5128_v6  ;;  %v5126_v20 = vunpack.c.h.bf16 %v5124_v5 }
 0xc24   :  { %v4434_v47 = vmul.f32 1.442695, %v4431_v28 }
 0xc26   :  { %5977 = vpow2.f32 %v4434_v47  ;;  %v5134_v47 = vunpack.c.h.bf16 %v5132_v35 }
 0xc2f   :  { %v5976_v33 = vpop.eup %5975 }
 0xc30   :  { %v4436_v12 = vsel %vm4423_vm7, %v5976_v33, 0.0 }
 0xc31   :  { %4437 = vadd.xlane.f32.xlu0 %v4436_v12 }
 0xc33   :  { %v5978_v11 = vpop.eup %5977 }
 0xc34   :  { %v4439_v26 = vsel %vm4423_vm7, %v5978_v11, 0.0 }
 0xc35   :  { %4440 = vadd.xlane.f32.xlu1 %v4439_v26 }
 0xcba   :  { %v4438_v48 = vpop.xlane.xlu0 %4437 }
 0xcbb   :  { %5979 = vrcp.f32 %v4438_v48 }
 0xcbe   :  { %v4441_v10 = vpop.xlane.xlu1 %4440 }
 0xcbf   :  { %5981 = vrcp.f32 %v4441_v10  ;;  %v5129_v10 = vunpack.c.l.bf16 %v5128_v6 }
 0xcc8   :  { %v5980_v49 = vpop.eup %5979 }
 0xcc9   :  { %v4444_v14 = vmul.f32 %v5980_v49, %v5976_v33  ;;  %v5125_v49 = vunpack.c.l.bf16 %v5124_v5 }
 0xccb   :  { %v4446_v22 = vsel %vm4423_vm7, %v4444_v14, -inf }
 0xccc   :  { %v5982_v30 = vpop.eup %5981  ;;  %4447 = vmax.xlane.f32.xlu0 %v4446_v22 }
 0xccd   :  { %v4445_v56 = vmul.f32 %v5982_v30, %v5978_v11  ;;  %v5136_v11 = vld [vmem:[#allocation3 + $0x18] sm:$0xff]  }
 0xcce   :  { %v5138_v22 = vunpack.c.h.bf16 %v5136_v11 }
 0xccf   :  { %v4449_v24 = vsel %vm4423_vm7, %v4445_v56, -inf }
 0xcd0   :  { %4450 = vmax.xlane.f32.xlu1 %v4449_v24  ;;  %v5133_v24 = vunpack.c.l.bf16 %v5132_v35 }
 0xd55   :  { %v4448_v37 = vpop.xlane.xlu0 %4447 }
 0xd56   :  { %v4452_v7 = vsub.f32 %v4444_v14, %v4448_v37  ;;  %v5140_v37 = vld [vmem:[#allocation3 + $0x20] sm:$0xff]  }
 0xd58   :  { %v4454_v39 = vmul.f32 1.442695, %v4452_v7 }
 0xd59   :  { %v4451_v45 = vpop.xlane.xlu1 %4450 }
 0xd5a   :  { %5983 = vpow2.f32 %v4454_v39  ;;  %v4453_v40 = vsub.f32 %v4445_v56, %v4451_v45 }
 0xd5c   :  { %v4456_v31 = vmul.f32 1.442695, %v4453_v40 }
 0xd5e   :  { %5985 = vpow2.f32 %v4456_v31  ;;  %v5137_v31 = vunpack.c.l.bf16 %v5136_v11 }
 0xd67   :  { %v5984_v3 = vpop.eup %5983 }
 0xd68   :  { %v4458_v36 = vsel %vm4423_vm7, %v5984_v3, 0.0 }
 0xd69   :  { %4459 = vadd.xlane.f32.xlu0 %v4458_v36  ;;  %v5144_v36 = vld [vmem:[#allocation3 + $0x28] sm:$0xff]  }
 0xd6b   :  { %v5986_v53 = vpop.eup %5985 }
 0xd6c   :  { %v4461_v9 = vsel %vm4423_vm7, %v5986_v53, 0.0 }
 0xd6d   :  { %4462 = vadd.xlane.f32.xlu1 %v4461_v9 }
 0xdf2   :  { %v4460_v42 = vpop.xlane.xlu0 %4459 }
 0xdf3   :  { %5987 = vrcp.f32 %v4460_v42 }
 0xdf6   :  { %v4463_v43 = vpop.xlane.xlu1 %4462 }
 0xdf7   :  { %5989 = vrcp.f32 %v4463_v43  ;;  %v5141_v43 = vunpack.c.l.bf16 %v5140_v37 }
 0xe00   :  { %v5988_v13 = vpop.eup %5987 }
 0xe01   :  { %v4466_v25 = vmul.f32 %v5988_v13, %v5984_v3 }
 0xe03   :  { %4489 = vperm.xlu1 %5260, %v4466_v25   ;;  %4474 = vperm.xlu0 %5259, %v4466_v25  }
 0xe04   :  { %v5990_v52 = vpop.eup %5989 }
 0xe05   :  { %v4467_v19 = vmul.f32 %v5990_v52, %v5986_v53  ;;  %v5142_v53 = vunpack.c.h.bf16 %v5140_v37 }
 0xe07   :  { %5261 = vset.pattern.permute.xlu1 %v6227_v44  ;;  %5265 = vset.pattern.permute.xlu0 %v6228_v0 }
 0xe08   :  { %4505 = vperm.xlu1 %5261, %v4466_v25   ;;  %4569 = vperm.xlu0 %5265, %v4466_v25  }
 0xe0c   :  { %5262 = vset.pattern.permute.xlu1 %v6229_v2  ;;  %5270 = vset.pattern.permute.xlu0 %v6230_v50 }
 0xe0d   :  { %4521 = vperm.xlu1 %5262, %v4466_v25   ;;  %4541 = vperm.xlu0 %5270, %v4467_v19  }
 0xe11   :  { %5263 = vset.pattern.permute.xlu1 %v6230_v50  ;;  %5274 = vset.pattern.permute.xlu0 %v6231_v21 }
 0xe12   :  { %4537 = vperm.xlu1 %5263, %v4466_v25   ;;  %4589 = vperm.xlu0 %5274, %v4467_v19  }
 0xe16   :  { %5264 = vset.pattern.permute.xlu1 %v6232_v18 }
 0xe17   :  { %4553 = vperm.xlu1 %5264, %v4466_v25  }
 0xe1b   :  { %5266 = vset.pattern.permute.xlu1 %v10180_v62  ;;  %v5614_v62 = vld [vmem:[%s9739_s9 + $0x20] sm:$0xff]  }
 0xe1c   :  { %4479 = vperm.xlu1 %5266, %v4467_v19   ;;  %5224 = vmatpush3.bf16.msra.mxu0 %v5614_v62  ;;  %v5154_v62 = vunpack.c.h.bf16 %v9642_v58 }
 0xe1d   :  { %5225 = vmatprep.subr.bf16.mxu0 %v6233_v29 }
 0xe20   :  { %5267 = vset.pattern.permute.xlu1 %v6226_v63  ;;  %5226 = vmatpush3.bf16.msra.mxu0 %v5615_v34 }
 0xe21   :  { %4493 = vperm.xlu1 %5267, %v4467_v19   ;;  %5227 = vmatprep.subr.bf16.mxu0 %v6233_v29 }
 0xe24   :  { %5228 = vmatpush3.bf16.msra.mxu0 %v5616_v54 }
 0xe25   :  { %5268 = vset.pattern.permute.xlu1 %v6227_v44  ;;  %5229 = vmatprep.subr.bf16.mxu0 %v6233_v29 }
 0xe26   :  { %4509 = vperm.xlu1 %5268, %v4467_v19  }
 0xe28   :  { %5230 = vmatpush3.bf16.msra.mxu0 %v5617_v4  ;;  %v5149_v4 = vunpack.c.l.bf16 %v9585_v60 }
 0xe29   :  { %5231 = vmatprep.subr.bf16.mxu0 %v6233_v29  ;;  %v5150_v29 = vunpack.c.h.bf16 %v9585_v60  ;;  %v5052_v60 = vld [vmem:[%s9741_s10] ss:$0 sm:$0xff] }
 0xe2a   :  { %5269 = vset.pattern.permute.xlu1 %v6229_v2 }
 0xe2b   :  { %4525 = vperm.xlu1 %5269, %v4467_v19  }
 0xe2c   :  { %5232 = vmatpush3.bf16.msra.mxu0 %v5618_v27 }
 0xe2f   :  { %5271 = vset.pattern.permute.xlu1 %v6232_v18 }
 0xe30   :  { %4557 = vperm.xlu1 %5271, %v4467_v19  }
 0xe34   :  { %5272 = vset.pattern.permute.xlu1 %v6228_v0 }
 0xe35   :  { %4573 = vperm.xlu1 %5272, %v4467_v19   ;;  %v5145_v19 = vunpack.c.l.bf16 %v5144_v36 }
 0xe39   :  { %5273 = vset.pattern.permute.xlu1 %v6231_v21 }
 0xe3a   :  { %4585 = vperm.xlu1 %5273, %v4466_v25   ;;  %v5146_v25 = vunpack.c.h.bf16 %v5144_v36 }
 0xe7e   :  { %v4490_v46 = vpop.permute.xlu1 %4489  ;;  %v4475_v57 = vpop.permute.xlu0 %4474 }
 0xe7f   :  { %v4496_v30 = vmul.f32 %v5129_v10, %v4490_v46  ;;  %v4482_v56 = vmul.f32 %v5125_v49, %v4475_v57  ;;  %v5153_v46 = vunpack.c.l.bf16 %v9642_v58  ;;  %v5622_v57 = vld [vmem:[%s9740_s11] sm:$0xff]  }
 0xe80   :  { %5244 = vmatpush3.bf16.msra.mxu1 %v5622_v57 }
 0xe81   :  { %v4498_v63 = vadd.f32 %v4496_v30, %v4482_v56 }
 0xe83   :  { %v4506_v1 = vpop.permute.xlu1 %4505  ;;  %v4570_v12 = vpop.permute.xlu0 %4569 }
 0xe84   :  { %v4512_v40 = vmul.f32 %v5133_v24, %v4506_v1  ;;  %v4576_v17 = vmul.f32 %v5149_v4, %v4570_v12  ;;  %v5061_v12 = vld [vmem:[%s9742_s12] ss:$0 sm:$0xff] }
 0xe86   :  { %v4514_v0 = vadd.f32 %v4512_v40, %v4498_v63 }
 0xe88   :  { %v4522_v8 = vpop.permute.xlu1 %4521  ;;  %v4542_v3 = vpop.permute.xlu0 %4541 }
 0xe89   :  { %v4528_v42 = vmul.f32 %v5137_v31, %v4522_v8  ;;  %v4545_v13 = vmul.f32 %v5142_v53, %v4542_v3 }
 0xe8b   :  { %v4530_v21 = vadd.f32 %v4528_v42, %v4514_v0 }
 0xe8d   :  { %v4538_v38 = vpop.permute.xlu1 %4537  ;;  %v4590_v51 = vpop.permute.xlu0 %4589 }
 0xe8e   :  { %v4544_v52 = vmul.f32 %v5141_v43, %v4538_v38  ;;  %v4593_v59 = vmul.f32 %v5154_v62, %v4590_v51 }
 0xe90   :  { %v4546_v23 = vadd.f32 %v4544_v52, %v4530_v21 }
 0xe92   :  { %v4554_v41 = vpop.permute.xlu1 %4553 }
 0xe93   :  { %v4560_v18 = vmul.f32 %v5145_v19, %v4554_v41 }
 0xe95   :  { %v4562_v27 = vadd.f32 %v4560_v18, %v4546_v23 }
 0xe97   :  { %v4480_v16 = vpop.permute.xlu1 %4479  ;;  %v4578_v38 = vadd.f32 %v4576_v17, %v4562_v27 }
 0xe98   :  { %v4483_v26 = vmul.f32 %v5126_v20, %v4480_v16 }
 0xe9c   :  { %v4494_v61 = vpop.permute.xlu1 %4493 }
 0xe9d   :  { %v4497_v28 = vmul.f32 %v5130_v15, %v4494_v61 }
 0xe9f   :  { %v4499_v14 = vadd.f32 %v4497_v28, %v4483_v26 }
 0xea1   :  { %v4510_v33 = vpop.permute.xlu1 %4509 }
 0xea2   :  { %v4513_v48 = vmul.f32 %v5134_v47, %v4510_v33 }
 0xea4   :  { %v4515_v39 = vadd.f32 %v4513_v48, %v4499_v14 }
 0xea6   :  { %v4526_v7 = vpop.permute.xlu1 %4525 }
 0xea7   :  { %v4529_v45 = vmul.f32 %v5138_v22, %v4526_v7 }
 0xea9   :  { %v4531_v9 = vadd.f32 %v4529_v45, %v4515_v39 }
 0xeab   :  { %v4558_v44 = vpop.permute.xlu1 %4557  ;;  %v4547_v2 = vadd.f32 %v4545_v13, %v4531_v9 }
 0xeac   :  { %v4561_v50 = vmul.f32 %v5146_v25, %v4558_v44 }
 0xeae   :  { %v4563_v34 = vadd.f32 %v4561_v50, %v4547_v2 }
 0xeb0   :  { %v4574_v32 = vpop.permute.xlu1 %4573 }
 0xeb1   :  { %v4577_v54 = vmul.f32 %v5150_v29, %v4574_v32 }
 0xeb3   :  { %v4579_v55 = vadd.f32 %v4577_v54, %v4563_v34 }
 0xeb5   :  { %v4595_v1 = vadd.f32 %v4593_v59, %v4579_v55  ;;  %v4586_v8 = vpop.permute.xlu1 %4585 }
 0xeb6   :  { %v4592_v41 = vmul.f32 %v5153_v46, %v4586_v8 }
 0xeb8   :  { %v4594_v16 = vadd.f32 %v4592_v41, %v4578_v38 }
 0xeba   :  { %v4596_v6 = vpack.c.bf16 %v4595_v1, %v4594_v16 }
 0xebc   :  { %5234 = vmatmul.mubr.bf16.vlgmr.msra.gmra.mxu0 %v4596_v6 }
 0xf7c   :  { %v4702_v61 = vpop.f32.mrf.mxu0 }
 0xf7d   :  { %v4703_v35 = vadd.f32 %v5052_v60, %v4702_v61 }
 0xf7e   :  { %v5235_v5 = vpop.f32.mrf.mxu0 }
 0xf7f   :  { %v4709_v28 = vmax.f32 %v4703_v35, 0.0 }
 0xf80   :  { %v4705_v58 = vpop.f32.mrf.mxu0 }
 0xf81   :  { %v4706_v15 = vadd.f32 %v5052_v60, %v4705_v58 }
 0xf82   :  { %v5236_v20 = vpop.f32.mrf.mxu0 }
 0xf83   :  { %v4710_v47 = vmax.f32 %v4706_v15, 0.0 }
 0xf85   :  { %v4711_v33 = vpack.c.bf16 %v4710_v47, %v4709_v28 }
 0xf87   :  { %5246 = vmatmul.mubr.msk.bf16.vlgmr.msra.gmra.mxu1 %vm4751_vm9, %v4711_v33 }
0x1047   :  { %v4789_v11 = vpop.f32.mrf.mxu1 }
0x1048   :  { %v4790_v26 = vadd.f32 %v5061_v12, %v4789_v11 }
0x1049   :  { %v5247_v48 = vpop.f32.mrf.mxu1 }
0x104a   :  { %4796 = vst [vmem:[%s9743_s13] sm:$0xff] %v4790_v26 }
0x104b   :  { %v4792_v10 = vpop.f32.mrf.mxu1 }
0x104c   :  { %v4793_v49 = vadd.f32 %v5061_v12, %v4792_v10 }
0x104d   :  { %v5248_v14 = vpop.f32.mrf.mxu1 }
0x104e   :  { %4797 = vst [vmem:[%s9743_s13 + $0x8] sm:$0xff] %v4793_v49 }

</bundles_post_ra>
